<compile_context>
chip_gen: v5e
topology: v5e:2x2
jax: 0.10.0
libtpu: 0.0.40
codegen_flags: <defaults>
</compile_context>

<pallas_src>
import jax
import jax.numpy as jnp
from jax.experimental import pallas as pl
from jax.experimental.pallas import tpu as pltpu

# ---------------- model hyper-params (small, consistent with the module) ----
INPUT_DIM = 100    # vocab size (stand-in for len(sp_model))
EMB_DIM = 32       # emb_dim
HID_DIM = 32       # hid_dim
N_LAYERS = 2       # n_layers
SEQ_LEN = 8
BATCH = 2

_HI = jax.lax.Precision.HIGHEST


def _mm(a, b):
    """f32 matmul on the MXU, exact (multi-pass) precision."""
    return jnp.dot(a, b, preferred_element_type=jnp.float32, precision=_HI)


# ---------------- Pallas kernel: fused embedding + wavefronted 2-layer GRU ---
def _make_encoder_kernel(T, B, H):
    TB = T * B

    def encoder_kernel(ids_ref, emb_ref,
                       w_ih0_ref, w_hh0_ref, b0_ref, bhn0_ref,
                       w_ih1_ref, w_hh1_ref, b1_ref, bhn1_ref,
                       hidden_ref):
        V = emb_ref.shape[0]

        # ---- fused embedding lookup: one-hot @ table (exact row selection) ---
        lane = jax.lax.broadcasted_iota(jnp.int32, (TB, V), 1)
        onehot = (lane == ids_ref[...]).astype(jnp.float32)           # (TB, V)
        x0 = _mm(onehot, emb_ref[...])                                # (TB, E)
        # nn.Dropout(0.5) on embeddings: identity at inference.

        # ---- hoisted layer-0 input projection, one matmul per gate ----------
        # (off the serial path; per-gate so nothing needs lane slicing later)
        gi_r = _mm(x0, w_ih0_ref[0]) + b0_ref[0]                      # (TB, H)
        gi_z = _mm(x0, w_ih0_ref[1]) + b0_ref[1]
        gi_n = _mm(x0, w_ih0_ref[2]) + b0_ref[2]

        bhn0 = bhn0_ref[...]                                          # (1, H)
        bhn1 = bhn1_ref[...]
        b1_r, b1_z, b1_in = b1_ref[0], b1_ref[1], b1_ref[2]

        def layer0_step(t, h):
            lo = t * B
            gh_r = _mm(h, w_hh0_ref[0])                               # (B, H)
            gh_z = _mm(h, w_hh0_ref[1])
            gh_n = _mm(h, w_hh0_ref[2])
            r = jax.nn.sigmoid(gi_r[lo:lo + B, :] + gh_r)
            z = jax.nn.sigmoid(gi_z[lo:lo + B, :] + gh_z)
            n = jnp.tanh(gi_n[lo:lo + B, :] + r * (gh_n + bhn0))
            return (1.0 - z) * n + z * h

        def layer1_step(x, h):
            # input + hidden projections fused per step; all six matmuls are
            # mutually independent, so they pipeline back-to-back in the MXU.
            r = jax.nn.sigmoid(_mm(x, w_ih1_ref[0]) + _mm(h, w_hh1_ref[0]) + b1_r)
            z = jax.nn.sigmoid(_mm(x, w_ih1_ref[1]) + _mm(h, w_hh1_ref[1]) + b1_z)
            gin = _mm(x, w_ih1_ref[2]) + b1_in
            ghn = _mm(h, w_hh1_ref[2])
            n = jnp.tanh(gin + r * (ghn + bhn1))
            return (1.0 - z) * n + z * h

        h0 = jnp.zeros((B, H), jnp.float32)   # PyTorch default h0 = 0
        h1 = jnp.zeros((B, H), jnp.float32)

        # ---- wavefront over the two layers --------------------------------
        # iteration s: layer-1 consumes the h0 produced at iteration s-1
        # (i.e. layer-0 step s-1) while layer-0 advances to step s.
        # Dependent chain: T + 1 stages instead of 2*T.
        for s in range(T + 1):                 # T=8, unrolled at trace time
            h1_new = layer1_step(h0, h1) if s >= 1 else h1
            # inter-layer GRU dropout(0.5): identity at inference.
            h0_new = layer0_step(s, h0) if s < T else h0
            h0, h1 = h0_new, h1_new

        # single store of the final hidden state.
        hidden_ref[...] = jnp.stack([h0, h1], axis=0)

    return encoder_kernel


# ---------------- wrapper-side weight prep -----------------------------------
def _gate(w, g, H):
    """(3H, D) PyTorch gate-stacked weight -> transposed (D, H) slice for gate g."""
    return w[g * H:(g + 1) * H, :].T


def _prep_layer(params, layer, H):
    w_ih = params[f"w_ih_l{layer}"]            # (3H, D_in)
    w_hh = params[f"w_hh_l{layer}"]            # (3H, H)
    b_ih = params[f"b_ih_l{layer}"][0]         # (3H,)
    b_hh = params[f"b_hh_l{layer}"][0]         # (3H,)
    w_ih_g = jnp.stack([_gate(w_ih, g, H) for g in range(3)], axis=0)   # (3, D_in, H)
    w_hh_g = jnp.stack([_gate(w_hh, g, H) for g in range(3)], axis=0)   # (3, H, H)
    # r/z gates: b_ih + b_hh folded; n gate: b_ih only (b_hh_n applied in-loop).
    b = jnp.stack([(b_ih[0:H] + b_hh[0:H])[None, :],
                   (b_ih[H:2 * H] + b_hh[H:2 * H])[None, :],
                   b_ih[2 * H:3 * H][None, :]], axis=0)                 # (3, 1, H)
    bhn = b_hh[2 * H:3 * H][None, :]                                    # (1, H)
    return w_ih_g, w_hh_g, b, bhn


# ---------------- Encoder forward (single pallas_call) -----------------------
def encoder_forward(src, params):
    """src: (T, B) int32 token ids (time-major, batch_first=False).
    Returns hidden: (n_layers, B, hid_dim) float32, like PyTorch nn.GRU."""
    T, B = src.shape
    H = HID_DIM

    # ---- batch blocking: one block per grid step; weights stay resident ----
    if B <= 256:
        Bb = B
    else:
        assert B % 256 == 0, "large batches must be a multiple of 256"
        Bb = 256
    nb = B // Bb
    TB = T * Bb

    # per-block, time-major flat ids (row order inside a block = t*Bb + b)
    ids_blocked = (src.astype(jnp.int32)
                   .reshape(T, nb, Bb).transpose(1, 0, 2).reshape(nb * TB, 1))

    emb = params["embedding"]
    V, E = emb.shape
    w_ih0, w_hh0, b0, bhn0 = _prep_layer(params, 0, H)
    w_ih1, w_hh1, b1, bhn1 = _prep_layer(params, 1, H)

    def const_spec(shape):
        return pl.BlockSpec(shape, lambda i, _s=shape: (0,) * len(_s))

    grid_spec = pltpu.PrefetchScalarGridSpec(
        num_scalar_prefetch=0,
        grid=(nb,),
        in_specs=[
            pl.BlockSpec((TB, 1), lambda i: (i, 0)),        # ids: one batch block / step
            const_spec((V, E)),                             # embedding table (resident)
            const_spec((3, E, H)), const_spec((3, H, H)),   # layer-0 per-gate weights
            const_spec((3, 1, H)), const_spec((1, H)),      # layer-0 biases
            const_spec((3, H, H)), const_spec((3, H, H)),   # layer-1 per-gate weights
            const_spec((3, 1, H)), const_spec((1, H)),      # layer-1 biases
        ],
        out_specs=pl.BlockSpec((N_LAYERS, Bb, H), lambda i: (0, i, 0)),
    )

    return pl.pallas_call(
        _make_encoder_kernel(T, Bb, H),
        out_shape=jax.ShapeDtypeStruct((N_LAYERS, B, H), jnp.float32),
        grid_spec=grid_spec,
        compiler_params=pltpu.CompilerParams(
            dimension_semantics=("parallel",)),   # batch blocks across cores (v7x)
    )(ids_blocked, emb,
      w_ih0, w_hh0, b0, bhn0,
      w_ih1, w_hh1, b1, bhn1)


encoder_forward_jit = jax.jit(encoder_forward)


# ---------------- pure-JAX reference (for correctness check) ----------------
def encoder_ref(src, params):
    x = params["embedding"][src]               # exact gather, (T, B, E)
    H = HID_DIM
    hiddens = []
    for l in range(N_LAYERS):
        w_ih = params[f"w_ih_l{l}"]
        w_hh = params[f"w_hh_l{l}"]
        b_ih = params[f"b_ih_l{l}"][0]
        b_hh = params[f"b_hh_l{l}"][0]
        h = jnp.zeros((x.shape[1], H), jnp.float32)
        outs = []
        for t in range(x.shape[0]):
            gi = jnp.dot(x[t], w_ih.T, precision=_HI) + b_ih
            gh = jnp.dot(h, w_hh.T, precision=_HI) + b_hh
            r = jax.nn.sigmoid(gi[:, :H] + gh[:, :H])
            z = jax.nn.sigmoid(gi[:, H:2 * H] + gh[:, H:2 * H])
            n = jnp.tanh(gi[:, 2 * H:] + r * gh[:, 2 * H:])
            h = (1.0 - z) * n + z * h
            outs.append(h)
        hiddens.append(h)
        x = jnp.stack(outs, axis=0)
    return jnp.stack(hiddens, axis=0)


# ---------------- deterministic parameter init -------------------------------
def init_params(key):
    params = {}
    k_emb, key = jax.random.split(key)
    params["embedding"] = jax.random.normal(k_emb, (INPUT_DIM, EMB_DIM), jnp.float32)
    scale = 1.0 / jnp.sqrt(HID_DIM)
    for l in range(N_LAYERS):
        d_in = EMB_DIM if l == 0 else HID_DIM
        ks = jax.random.split(key, 5)
        key = ks[0]
        params[f"w_ih_l{l}"] = jax.random.uniform(
            ks[1], (3 * HID_DIM, d_in), jnp.float32, -scale, scale)
        params[f"w_hh_l{l}"] = jax.random.uniform(
            ks[2], (3 * HID_DIM, HID_DIM), jnp.float32, -scale, scale)
        params[f"b_ih_l{l}"] = jax.random.uniform(
            ks[3], (1, 3 * HID_DIM), jnp.float32, -scale, scale)
        params[f"b_hh_l{l}"] = jax.random.uniform(
            ks[4], (1, 3 * HID_DIM), jnp.float32, -scale, scale)
    return params


if __name__ == "__main__":
    key = jax.random.PRNGKey(0)
    k_tok, k_par = jax.random.split(key)
    src = jax.random.randint(k_tok, (SEQ_LEN, BATCH), 0, INPUT_DIM, dtype=jnp.int32)
    params = init_params(k_par)

    hidden = encoder_forward_jit(src, params)
    hidden = jax.block_until_ready(hidden)

    ref = encoder_ref(src, params)
    assert hidden.shape == (N_LAYERS, BATCH, HID_DIM)
    assert jnp.allclose(hidden, ref, atol=1e-5, rtol=1e-5), "mismatch vs JAX reference"

    print("KERNEL_OK")
</pallas_src>

<mosaic_0001>
module attributes {stable_mosaic.version = 11 : i64} {
  func.func @encoder_kernel(%arg0: i32, %arg1: memref<16x1xi32, #tpu.memory_space<vmem>>, %arg2: memref<100x32xf32, #tpu.memory_space<vmem>>, %arg3: memref<3x32x32xf32, #tpu.memory_space<vmem>>, %arg4: memref<3x32x32xf32, #tpu.memory_space<vmem>>, %arg5: memref<3x1x32xf32, #tpu.memory_space<vmem>>, %arg6: memref<1x32xf32, #tpu.memory_space<vmem>>, %arg7: memref<3x32x32xf32, #tpu.memory_space<vmem>>, %arg8: memref<3x32x32xf32, #tpu.memory_space<vmem>>, %arg9: memref<3x1x32xf32, #tpu.memory_space<vmem>>, %arg10: memref<1x32xf32, #tpu.memory_space<vmem>>, %arg11: memref<2x2x32xf32, #tpu.memory_space<vmem>>) attributes {dimension_semantics = [#tpu.dimension_semantics<parallel>], iteration_bounds = array<i64: 1>, scalar_prefetch = 0 : i64, scratch_operands = 0 : i64, tpu.core_type = #tpu.core_type<tc>, window_params = [{transform_indices = @transform_0, window_bounds = array<i64: 16, 1>}, {pipeline_mode = #tpu.pipeline_mode<synchronous>, transform_indices = @transform_1, window_bounds = array<i64: 100, 32>}, {pipeline_mode = #tpu.pipeline_mode<synchronous>, transform_indices = @transform_2, window_bounds = array<i64: 3, 32, 32>}, {pipeline_mode = #tpu.pipeline_mode<synchronous>, transform_indices = @transform_3, window_bounds = array<i64: 3, 32, 32>}, {pipeline_mode = #tpu.pipeline_mode<synchronous>, transform_indices = @transform_4, window_bounds = array<i64: 3, 1, 32>}, {pipeline_mode = #tpu.pipeline_mode<synchronous>, transform_indices = @transform_5, window_bounds = array<i64: 1, 32>}, {pipeline_mode = #tpu.pipeline_mode<synchronous>, transform_indices = @transform_6, window_bounds = array<i64: 3, 32, 32>}, {pipeline_mode = #tpu.pipeline_mode<synchronous>, transform_indices = @transform_7, window_bounds = array<i64: 3, 32, 32>}, {pipeline_mode = #tpu.pipeline_mode<synchronous>, transform_indices = @transform_8, window_bounds = array<i64: 3, 1, 32>}, {pipeline_mode = #tpu.pipeline_mode<synchronous>, transform_indices = @transform_9, window_bounds = array<i64: 1, 32>}, {transform_indices = @transform_10, window_bounds = array<i64: 2, 2, 32>}]} {
    %0 = tpu.iota {dimensions = array<i32: 1>} : vector<16x100xi32>
    %c0 = arith.constant 0 : index
    %c0_0 = arith.constant 0 : index
    %1 = vector.load %arg1[%c0, %c0_0] : memref<16x1xi32, #tpu.memory_space<vmem>>, vector<16x1xi32>
    %2 = vector.broadcast %1 : vector<16x1xi32> to vector<16x100xi32>
    %3 = arith.cmpi eq, %0, %2 : vector<16x100xi32>
    %4 = arith.extui %3 : vector<16x100xi1> to vector<16x100xi32>
    %5 = arith.sitofp %4 : vector<16x100xi32> to vector<16x100xf32>
    %c0_1 = arith.constant 0 : index
    %c0_2 = arith.constant 0 : index
    %6 = vector.load %arg2[%c0_1, %c0_2] : memref<100x32xf32, #tpu.memory_space<vmem>>, vector<100x32xf32>
    %cst = arith.constant dense<0.000000e+00> : vector<16x32xf32>
    %7 = tpu.matmul %5, %6, %cst {dimension_numbers = #tpu.dot_dimension_numbers<[1], [0], [0], [1], [0, 0, 1, 1], [], []>, precision = #tpu.contract_precision<fp32>} : vector<16x100xf32>, vector<100x32xf32>, vector<16x32xf32> -> vector<16x32xf32>
    %c0_3 = arith.constant 0 : index
    %c0_4 = arith.constant 0 : index
    %c0_5 = arith.constant 0 : index
    %8 = vector.load %arg3[%c0_3, %c0_4, %c0_5] : memref<3x32x32xf32, #tpu.memory_space<vmem>>, vector<1x32x32xf32>
    %9 = vector.shape_cast %8 : vector<1x32x32xf32> to vector<32x32xf32>
    %cst_6 = arith.constant dense<0.000000e+00> : vector<16x32xf32>
    %10 = tpu.matmul %7, %9, %cst_6 {dimension_numbers = #tpu.dot_dimension_numbers<[1], [0], [0], [1], [0, 0, 1, 1], [], []>, precision = #tpu.contract_precision<fp32>} : vector<16x32xf32>, vector<32x32xf32>, vector<16x32xf32> -> vector<16x32xf32>
    %c0_7 = arith.constant 0 : index
    %c0_8 = arith.constant 0 : index
    %c0_9 = arith.constant 0 : index
    %11 = vector.load %arg5[%c0_7, %c0_8, %c0_9] : memref<3x1x32xf32, #tpu.memory_space<vmem>>, vector<1x1x32xf32>
    %12 = vector.shape_cast %11 : vector<1x1x32xf32> to vector<1x32xf32>
    %13 = vector.broadcast %12 : vector<1x32xf32> to vector<16x32xf32>
    %14 = arith.addf %10, %13 : vector<16x32xf32>
    %c1 = arith.constant 1 : index
    %c0_10 = arith.constant 0 : index
    %c0_11 = arith.constant 0 : index
    %15 = vector.load %arg3[%c1, %c0_10, %c0_11] : memref<3x32x32xf32, #tpu.memory_space<vmem>>, vector<1x32x32xf32>
    %16 = vector.shape_cast %15 : vector<1x32x32xf32> to vector<32x32xf32>
    %cst_12 = arith.constant dense<0.000000e+00> : vector<16x32xf32>
    %17 = tpu.matmul %7, %16, %cst_12 {dimension_numbers = #tpu.dot_dimension_numbers<[1], [0], [0], [1], [0, 0, 1, 1], [], []>, precision = #tpu.contract_precision<fp32>} : vector<16x32xf32>, vector<32x32xf32>, vector<16x32xf32> -> vector<16x32xf32>
    %c1_13 = arith.constant 1 : index
    %c0_14 = arith.constant 0 : index
    %c0_15 = arith.constant 0 : index
    %18 = vector.load %arg5[%c1_13, %c0_14, %c0_15] : memref<3x1x32xf32, #tpu.memory_space<vmem>>, vector<1x1x32xf32>
    %19 = vector.shape_cast %18 : vector<1x1x32xf32> to vector<1x32xf32>
    %20 = vector.broadcast %19 : vector<1x32xf32> to vector<16x32xf32>
    %21 = arith.addf %17, %20 : vector<16x32xf32>
    %c2 = arith.constant 2 : index
    %c0_16 = arith.constant 0 : index
    %c0_17 = arith.constant 0 : index
    %22 = vector.load %arg3[%c2, %c0_16, %c0_17] : memref<3x32x32xf32, #tpu.memory_space<vmem>>, vector<1x32x32xf32>
    %23 = vector.shape_cast %22 : vector<1x32x32xf32> to vector<32x32xf32>
    %cst_18 = arith.constant dense<0.000000e+00> : vector<16x32xf32>
    %24 = tpu.matmul %7, %23, %cst_18 {dimension_numbers = #tpu.dot_dimension_numbers<[1], [0], [0], [1], [0, 0, 1, 1], [], []>, precision = #tpu.contract_precision<fp32>} : vector<16x32xf32>, vector<32x32xf32>, vector<16x32xf32> -> vector<16x32xf32>
    %c2_19 = arith.constant 2 : index
    %c0_20 = arith.constant 0 : index
    %c0_21 = arith.constant 0 : index
    %25 = vector.load %arg5[%c2_19, %c0_20, %c0_21] : memref<3x1x32xf32, #tpu.memory_space<vmem>>, vector<1x1x32xf32>
    %26 = vector.shape_cast %25 : vector<1x1x32xf32> to vector<1x32xf32>
    %27 = vector.broadcast %26 : vector<1x32xf32> to vector<16x32xf32>
    %28 = arith.addf %24, %27 : vector<16x32xf32>
    %c0_22 = arith.constant 0 : index
    %c0_23 = arith.constant 0 : index
    %29 = vector.load %arg6[%c0_22, %c0_23] : memref<1x32xf32, #tpu.memory_space<vmem>>, vector<1x32xf32>
    %c0_24 = arith.constant 0 : index
    %c0_25 = arith.constant 0 : index
    %30 = vector.load %arg10[%c0_24, %c0_25] : memref<1x32xf32, #tpu.memory_space<vmem>>, vector<1x32xf32>
    %c0_26 = arith.constant 0 : index
    %c0_27 = arith.constant 0 : index
    %c0_28 = arith.constant 0 : index
    %31 = vector.load %arg9[%c0_26, %c0_27, %c0_28] : memref<3x1x32xf32, #tpu.memory_space<vmem>>, vector<1x1x32xf32>
    %32 = vector.shape_cast %31 : vector<1x1x32xf32> to vector<1x32xf32>
    %c1_29 = arith.constant 1 : index
    %c0_30 = arith.constant 0 : index
    %c0_31 = arith.constant 0 : index
    %33 = vector.load %arg9[%c1_29, %c0_30, %c0_31] : memref<3x1x32xf32, #tpu.memory_space<vmem>>, vector<1x1x32xf32>
    %34 = vector.shape_cast %33 : vector<1x1x32xf32> to vector<1x32xf32>
    %c2_32 = arith.constant 2 : index
    %c0_33 = arith.constant 0 : index
    %c0_34 = arith.constant 0 : index
    %35 = vector.load %arg9[%c2_32, %c0_33, %c0_34] : memref<3x1x32xf32, #tpu.memory_space<vmem>>, vector<1x1x32xf32>
    %36 = vector.shape_cast %35 : vector<1x1x32xf32> to vector<1x32xf32>
    %cst_35 = arith.constant 0.000000e+00 : f32
    %37 = vector.broadcast %cst_35 : f32 to vector<2x32xf32>
    %cst_36 = arith.constant 0.000000e+00 : f32
    %38 = vector.broadcast %cst_36 : f32 to vector<2x32xf32>
    %c0_37 = arith.constant 0 : index
    %c0_38 = arith.constant 0 : index
    %c0_39 = arith.constant 0 : index
    %39 = vector.load %arg4[%c0_37, %c0_38, %c0_39] : memref<3x32x32xf32, #tpu.memory_space<vmem>>, vector<1x32x32xf32>
    %40 = vector.shape_cast %39 : vector<1x32x32xf32> to vector<32x32xf32>
    %cst_40 = arith.constant dense<0.000000e+00> : vector<2x32xf32>
    %41 = tpu.matmul %37, %40, %cst_40 {dimension_numbers = #tpu.dot_dimension_numbers<[1], [0], [0], [1], [0, 0, 1, 1], [], []>, precision = #tpu.contract_precision<fp32>} : vector<2x32xf32>, vector<32x32xf32>, vector<2x32xf32> -> vector<2x32xf32>
    %c1_41 = arith.constant 1 : index
    %c0_42 = arith.constant 0 : index
    %c0_43 = arith.constant 0 : index
    %42 = vector.load %arg4[%c1_41, %c0_42, %c0_43] : memref<3x32x32xf32, #tpu.memory_space<vmem>>, vector<1x32x32xf32>
    %43 = vector.shape_cast %42 : vector<1x32x32xf32> to vector<32x32xf32>
    %cst_44 = arith.constant dense<0.000000e+00> : vector<2x32xf32>
    %44 = tpu.matmul %37, %43, %cst_44 {dimension_numbers = #tpu.dot_dimension_numbers<[1], [0], [0], [1], [0, 0, 1, 1], [], []>, precision = #tpu.contract_precision<fp32>} : vector<2x32xf32>, vector<32x32xf32>, vector<2x32xf32> -> vector<2x32xf32>
    %c2_45 = arith.constant 2 : index
    %c0_46 = arith.constant 0 : index
    %c0_47 = arith.constant 0 : index
    %45 = vector.load %arg4[%c2_45, %c0_46, %c0_47] : memref<3x32x32xf32, #tpu.memory_space<vmem>>, vector<1x32x32xf32>
    %46 = vector.shape_cast %45 : vector<1x32x32xf32> to vector<32x32xf32>
    %cst_48 = arith.constant dense<0.000000e+00> : vector<2x32xf32>
    %47 = tpu.matmul %37, %46, %cst_48 {dimension_numbers = #tpu.dot_dimension_numbers<[1], [0], [0], [1], [0, 0, 1, 1], [], []>, precision = #tpu.contract_precision<fp32>} : vector<2x32xf32>, vector<32x32xf32>, vector<2x32xf32> -> vector<2x32xf32>
    %48 = vector.extract_strided_slice %14 {offsets = [0, 0], sizes = [2, 32], strides = [1, 1]} : vector<16x32xf32> to vector<2x32xf32>
    %49 = arith.addf %48, %41 : vector<2x32xf32>
    %50 = arith.negf %49 : vector<2x32xf32>
    %51 = math.exp %50 : vector<2x32xf32>
    %cst_49 = arith.constant 1.000000e+00 : f32
    %52 = vector.broadcast %cst_49 : f32 to vector<2x32xf32>
    %53 = arith.addf %52, %51 : vector<2x32xf32>
    %54 = arith.divf %52, %53 : vector<2x32xf32>
    %55 = vector.extract_strided_slice %21 {offsets = [0, 0], sizes = [2, 32], strides = [1, 1]} : vector<16x32xf32> to vector<2x32xf32>
    %56 = arith.addf %55, %44 : vector<2x32xf32>
    %57 = arith.negf %56 : vector<2x32xf32>
    %58 = math.exp %57 : vector<2x32xf32>
    %cst_50 = arith.constant 1.000000e+00 : f32
    %59 = vector.broadcast %cst_50 : f32 to vector<2x32xf32>
    %60 = arith.addf %59, %58 : vector<2x32xf32>
    %61 = arith.divf %59, %60 : vector<2x32xf32>
    %62 = vector.extract_strided_slice %28 {offsets = [0, 0], sizes = [2, 32], strides = [1, 1]} : vector<16x32xf32> to vector<2x32xf32>
    %63 = vector.broadcast %29 : vector<1x32xf32> to vector<2x32xf32>
    %64 = arith.addf %47, %63 : vector<2x32xf32>
    %65 = arith.mulf %54, %64 : vector<2x32xf32>
    %66 = arith.addf %62, %65 : vector<2x32xf32>
    %67 = math.tanh %66 : vector<2x32xf32>
    %cst_51 = arith.constant 1.000000e+00 : f32
    %68 = vector.broadcast %cst_51 : f32 to vector<2x32xf32>
    %69 = arith.subf %68, %61 : vector<2x32xf32>
    %70 = arith.mulf %69, %67 : vector<2x32xf32>
    %71 = arith.mulf %61, %37 : vector<2x32xf32>
    %72 = arith.addf %70, %71 : vector<2x32xf32>
    %c0_52 = arith.constant 0 : index
    %c0_53 = arith.constant 0 : index
    %c0_54 = arith.constant 0 : index
    %73 = vector.load %arg7[%c0_52, %c0_53, %c0_54] : memref<3x32x32xf32, #tpu.memory_space<vmem>>, vector<1x32x32xf32>
    %74 = vector.shape_cast %73 : vector<1x32x32xf32> to vector<32x32xf32>
    %cst_55 = arith.constant dense<0.000000e+00> : vector<2x32xf32>
    %75 = tpu.matmul %72, %74, %cst_55 {dimension_numbers = #tpu.dot_dimension_numbers<[1], [0], [0], [1], [0, 0, 1, 1], [], []>, precision = #tpu.contract_precision<fp32>} : vector<2x32xf32>, vector<32x32xf32>, vector<2x32xf32> -> vector<2x32xf32>
    %c0_56 = arith.constant 0 : index
    %c0_57 = arith.constant 0 : index
    %c0_58 = arith.constant 0 : index
    %76 = vector.load %arg8[%c0_56, %c0_57, %c0_58] : memref<3x32x32xf32, #tpu.memory_space<vmem>>, vector<1x32x32xf32>
    %77 = vector.shape_cast %76 : vector<1x32x32xf32> to vector<32x32xf32>
    %cst_59 = arith.constant dense<0.000000e+00> : vector<2x32xf32>
    %78 = tpu.matmul %38, %77, %cst_59 {dimension_numbers = #tpu.dot_dimension_numbers<[1], [0], [0], [1], [0, 0, 1, 1], [], []>, precision = #tpu.contract_precision<fp32>} : vector<2x32xf32>, vector<32x32xf32>, vector<2x32xf32> -> vector<2x32xf32>
    %79 = arith.addf %75, %78 : vector<2x32xf32>
    %80 = vector.broadcast %32 : vector<1x32xf32> to vector<2x32xf32>
    %81 = arith.addf %79, %80 : vector<2x32xf32>
    %82 = arith.negf %81 : vector<2x32xf32>
    %83 = math.exp %82 : vector<2x32xf32>
    %cst_60 = arith.constant 1.000000e+00 : f32
    %84 = vector.broadcast %cst_60 : f32 to vector<2x32xf32>
    %85 = arith.addf %84, %83 : vector<2x32xf32>
    %86 = arith.divf %84, %85 : vector<2x32xf32>
    %c1_61 = arith.constant 1 : index
    %c0_62 = arith.constant 0 : index
    %c0_63 = arith.constant 0 : index
    %87 = vector.load %arg7[%c1_61, %c0_62, %c0_63] : memref<3x32x32xf32, #tpu.memory_space<vmem>>, vector<1x32x32xf32>
    %88 = vector.shape_cast %87 : vector<1x32x32xf32> to vector<32x32xf32>
    %cst_64 = arith.constant dense<0.000000e+00> : vector<2x32xf32>
    %89 = tpu.matmul %72, %88, %cst_64 {dimension_numbers = #tpu.dot_dimension_numbers<[1], [0], [0], [1], [0, 0, 1, 1], [], []>, precision = #tpu.contract_precision<fp32>} : vector<2x32xf32>, vector<32x32xf32>, vector<2x32xf32> -> vector<2x32xf32>
    %c1_65 = arith.constant 1 : index
    %c0_66 = arith.constant 0 : index
    %c0_67 = arith.constant 0 : index
    %90 = vector.load %arg8[%c1_65, %c0_66, %c0_67] : memref<3x32x32xf32, #tpu.memory_space<vmem>>, vector<1x32x32xf32>
    %91 = vector.shape_cast %90 : vector<1x32x32xf32> to vector<32x32xf32>
    %cst_68 = arith.constant dense<0.000000e+00> : vector<2x32xf32>
    %92 = tpu.matmul %38, %91, %cst_68 {dimension_numbers = #tpu.dot_dimension_numbers<[1], [0], [0], [1], [0, 0, 1, 1], [], []>, precision = #tpu.contract_precision<fp32>} : vector<2x32xf32>, vector<32x32xf32>, vector<2x32xf32> -> vector<2x32xf32>
    %93 = arith.addf %89, %92 : vector<2x32xf32>
    %94 = vector.broadcast %34 : vector<1x32xf32> to vector<2x32xf32>
    %95 = arith.addf %93, %94 : vector<2x32xf32>
    %96 = arith.negf %95 : vector<2x32xf32>
    %97 = math.exp %96 : vector<2x32xf32>
    %cst_69 = arith.constant 1.000000e+00 : f32
    %98 = vector.broadcast %cst_69 : f32 to vector<2x32xf32>
    %99 = arith.addf %98, %97 : vector<2x32xf32>
    %100 = arith.divf %98, %99 : vector<2x32xf32>
    %c2_70 = arith.constant 2 : index
    %c0_71 = arith.constant 0 : index
    %c0_72 = arith.constant 0 : index
    %101 = vector.load %arg7[%c2_70, %c0_71, %c0_72] : memref<3x32x32xf32, #tpu.memory_space<vmem>>, vector<1x32x32xf32>
    %102 = vector.shape_cast %101 : vector<1x32x32xf32> to vector<32x32xf32>
    %cst_73 = arith.constant dense<0.000000e+00> : vector<2x32xf32>
    %103 = tpu.matmul %72, %102, %cst_73 {dimension_numbers = #tpu.dot_dimension_numbers<[1], [0], [0], [1], [0, 0, 1, 1], [], []>, precision = #tpu.contract_precision<fp32>} : vector<2x32xf32>, vector<32x32xf32>, vector<2x32xf32> -> vector<2x32xf32>
    %104 = vector.broadcast %36 : vector<1x32xf32> to vector<2x32xf32>
    %105 = arith.addf %103, %104 : vector<2x32xf32>
    %c2_74 = arith.constant 2 : index
    %c0_75 = arith.constant 0 : index
    %c0_76 = arith.constant 0 : index
    %106 = vector.load %arg8[%c2_74, %c0_75, %c0_76] : memref<3x32x32xf32, #tpu.memory_space<vmem>>, vector<1x32x32xf32>
    %107 = vector.shape_cast %106 : vector<1x32x32xf32> to vector<32x32xf32>
    %cst_77 = arith.constant dense<0.000000e+00> : vector<2x32xf32>
    %108 = tpu.matmul %38, %107, %cst_77 {dimension_numbers = #tpu.dot_dimension_numbers<[1], [0], [0], [1], [0, 0, 1, 1], [], []>, precision = #tpu.contract_precision<fp32>} : vector<2x32xf32>, vector<32x32xf32>, vector<2x32xf32> -> vector<2x32xf32>
    %109 = vector.broadcast %30 : vector<1x32xf32> to vector<2x32xf32>
    %110 = arith.addf %108, %109 : vector<2x32xf32>
    %111 = arith.mulf %86, %110 : vector<2x32xf32>
    %112 = arith.addf %105, %111 : vector<2x32xf32>
    %113 = math.tanh %112 : vector<2x32xf32>
    %cst_78 = arith.constant 1.000000e+00 : f32
    %114 = vector.broadcast %cst_78 : f32 to vector<2x32xf32>
    %115 = arith.subf %114, %100 : vector<2x32xf32>
    %116 = arith.mulf %115, %113 : vector<2x32xf32>
    %117 = arith.mulf %100, %38 : vector<2x32xf32>
    %118 = arith.addf %116, %117 : vector<2x32xf32>
    %c0_79 = arith.constant 0 : index
    %c0_80 = arith.constant 0 : index
    %c0_81 = arith.constant 0 : index
    %119 = vector.load %arg4[%c0_79, %c0_80, %c0_81] : memref<3x32x32xf32, #tpu.memory_space<vmem>>, vector<1x32x32xf32>
    %120 = vector.shape_cast %119 : vector<1x32x32xf32> to vector<32x32xf32>
    %cst_82 = arith.constant dense<0.000000e+00> : vector<2x32xf32>
    %121 = tpu.matmul %72, %120, %cst_82 {dimension_numbers = #tpu.dot_dimension_numbers<[1], [0], [0], [1], [0, 0, 1, 1], [], []>, precision = #tpu.contract_precision<fp32>} : vector<2x32xf32>, vector<32x32xf32>, vector<2x32xf32> -> vector<2x32xf32>
    %c1_83 = arith.constant 1 : index
    %c0_84 = arith.constant 0 : index
    %c0_85 = arith.constant 0 : index
    %122 = vector.load %arg4[%c1_83, %c0_84, %c0_85] : memref<3x32x32xf32, #tpu.memory_space<vmem>>, vector<1x32x32xf32>
    %123 = vector.shape_cast %122 : vector<1x32x32xf32> to vector<32x32xf32>
    %cst_86 = arith.constant dense<0.000000e+00> : vector<2x32xf32>
    %124 = tpu.matmul %72, %123, %cst_86 {dimension_numbers = #tpu.dot_dimension_numbers<[1], [0], [0], [1], [0, 0, 1, 1], [], []>, precision = #tpu.contract_precision<fp32>} : vector<2x32xf32>, vector<32x32xf32>, vector<2x32xf32> -> vector<2x32xf32>
    %c2_87 = arith.constant 2 : index
    %c0_88 = arith.constant 0 : index
    %c0_89 = arith.constant 0 : index
    %125 = vector.load %arg4[%c2_87, %c0_88, %c0_89] : memref<3x32x32xf32, #tpu.memory_space<vmem>>, vector<1x32x32xf32>
    %126 = vector.shape_cast %125 : vector<1x32x32xf32> to vector<32x32xf32>
    %cst_90 = arith.constant dense<0.000000e+00> : vector<2x32xf32>
    %127 = tpu.matmul %72, %126, %cst_90 {dimension_numbers = #tpu.dot_dimension_numbers<[1], [0], [0], [1], [0, 0, 1, 1], [], []>, precision = #tpu.contract_precision<fp32>} : vector<2x32xf32>, vector<32x32xf32>, vector<2x32xf32> -> vector<2x32xf32>
    %128 = vector.extract_strided_slice %14 {offsets = [2, 0], sizes = [2, 32], strides = [1, 1]} : vector<16x32xf32> to vector<2x32xf32>
    %129 = arith.addf %128, %121 : vector<2x32xf32>
    %130 = arith.negf %129 : vector<2x32xf32>
    %131 = math.exp %130 : vector<2x32xf32>
    %cst_91 = arith.constant 1.000000e+00 : f32
    %132 = vector.broadcast %cst_91 : f32 to vector<2x32xf32>
    %133 = arith.addf %132, %131 : vector<2x32xf32>
    %134 = arith.divf %132, %133 : vector<2x32xf32>
    %135 = vector.extract_strided_slice %21 {offsets = [2, 0], sizes = [2, 32], strides = [1, 1]} : vector<16x32xf32> to vector<2x32xf32>
    %136 = arith.addf %135, %124 : vector<2x32xf32>
    %137 = arith.negf %136 : vector<2x32xf32>
    %138 = math.exp %137 : vector<2x32xf32>
    %cst_92 = arith.constant 1.000000e+00 : f32
    %139 = vector.broadcast %cst_92 : f32 to vector<2x32xf32>
    %140 = arith.addf %139, %138 : vector<2x32xf32>
    %141 = arith.divf %139, %140 : vector<2x32xf32>
    %142 = vector.extract_strided_slice %28 {offsets = [2, 0], sizes = [2, 32], strides = [1, 1]} : vector<16x32xf32> to vector<2x32xf32>
    %143 = vector.broadcast %29 : vector<1x32xf32> to vector<2x32xf32>
    %144 = arith.addf %127, %143 : vector<2x32xf32>
    %145 = arith.mulf %134, %144 : vector<2x32xf32>
    %146 = arith.addf %142, %145 : vector<2x32xf32>
    %147 = math.tanh %146 : vector<2x32xf32>
    %cst_93 = arith.constant 1.000000e+00 : f32
    %148 = vector.broadcast %cst_93 : f32 to vector<2x32xf32>
    %149 = arith.subf %148, %141 : vector<2x32xf32>
    %150 = arith.mulf %149, %147 : vector<2x32xf32>
    %151 = arith.mulf %141, %72 : vector<2x32xf32>
    %152 = arith.addf %150, %151 : vector<2x32xf32>
    %c0_94 = arith.constant 0 : index
    %c0_95 = arith.constant 0 : index
    %c0_96 = arith.constant 0 : index
    %153 = vector.load %arg7[%c0_94, %c0_95, %c0_96] : memref<3x32x32xf32, #tpu.memory_space<vmem>>, vector<1x32x32xf32>
    %154 = vector.shape_cast %153 : vector<1x32x32xf32> to vector<32x32xf32>
    %cst_97 = arith.constant dense<0.000000e+00> : vector<2x32xf32>
    %155 = tpu.matmul %152, %154, %cst_97 {dimension_numbers = #tpu.dot_dimension_numbers<[1], [0], [0], [1], [0, 0, 1, 1], [], []>, precision = #tpu.contract_precision<fp32>} : vector<2x32xf32>, vector<32x32xf32>, vector<2x32xf32> -> vector<2x32xf32>
    %c0_98 = arith.constant 0 : index
    %c0_99 = arith.constant 0 : index
    %c0_100 = arith.constant 0 : index
    %156 = vector.load %arg8[%c0_98, %c0_99, %c0_100] : memref<3x32x32xf32, #tpu.memory_space<vmem>>, vector<1x32x32xf32>
    %157 = vector.shape_cast %156 : vector<1x32x32xf32> to vector<32x32xf32>
    %cst_101 = arith.constant dense<0.000000e+00> : vector<2x32xf32>
    %158 = tpu.matmul %118, %157, %cst_101 {dimension_numbers = #tpu.dot_dimension_numbers<[1], [0], [0], [1], [0, 0, 1, 1], [], []>, precision = #tpu.contract_precision<fp32>} : vector<2x32xf32>, vector<32x32xf32>, vector<2x32xf32> -> vector<2x32xf32>
    %159 = arith.addf %155, %158 : vector<2x32xf32>
    %160 = vector.broadcast %32 : vector<1x32xf32> to vector<2x32xf32>
    %161 = arith.addf %159, %160 : vector<2x32xf32>
    %162 = arith.negf %161 : vector<2x32xf32>
    %163 = math.exp %162 : vector<2x32xf32>
    %cst_102 = arith.constant 1.000000e+00 : f32
    %164 = vector.broadcast %cst_102 : f32 to vector<2x32xf32>
    %165 = arith.addf %164, %163 : vector<2x32xf32>
    %166 = arith.divf %164, %165 : vector<2x32xf32>
    %c1_103 = arith.constant 1 : index
    %c0_104 = arith.constant 0 : index
    %c0_105 = arith.constant 0 : index
    %167 = vector.load %arg7[%c1_103, %c0_104, %c0_105] : memref<3x32x32xf32, #tpu.memory_space<vmem>>, vector<1x32x32xf32>
    %168 = vector.shape_cast %167 : vector<1x32x32xf32> to vector<32x32xf32>
    %cst_106 = arith.constant dense<0.000000e+00> : vector<2x32xf32>
    %169 = tpu.matmul %152, %168, %cst_106 {dimension_numbers = #tpu.dot_dimension_numbers<[1], [0], [0], [1], [0, 0, 1, 1], [], []>, precision = #tpu.contract_precision<fp32>} : vector<2x32xf32>, vector<32x32xf32>, vector<2x32xf32> -> vector<2x32xf32>
    %c1_107 = arith.constant 1 : index
    %c0_108 = arith.constant 0 : index
    %c0_109 = arith.constant 0 : index
    %170 = vector.load %arg8[%c1_107, %c0_108, %c0_109] : memref<3x32x32xf32, #tpu.memory_space<vmem>>, vector<1x32x32xf32>
    %171 = vector.shape_cast %170 : vector<1x32x32xf32> to vector<32x32xf32>
    %cst_110 = arith.constant dense<0.000000e+00> : vector<2x32xf32>
    %172 = tpu.matmul %118, %171, %cst_110 {dimension_numbers = #tpu.dot_dimension_numbers<[1], [0], [0], [1], [0, 0, 1, 1], [], []>, precision = #tpu.contract_precision<fp32>} : vector<2x32xf32>, vector<32x32xf32>, vector<2x32xf32> -> vector<2x32xf32>
    %173 = arith.addf %169, %172 : vector<2x32xf32>
    %174 = vector.broadcast %34 : vector<1x32xf32> to vector<2x32xf32>
    %175 = arith.addf %173, %174 : vector<2x32xf32>
    %176 = arith.negf %175 : vector<2x32xf32>
    %177 = math.exp %176 : vector<2x32xf32>
    %cst_111 = arith.constant 1.000000e+00 : f32
    %178 = vector.broadcast %cst_111 : f32 to vector<2x32xf32>
    %179 = arith.addf %178, %177 : vector<2x32xf32>
    %180 = arith.divf %178, %179 : vector<2x32xf32>
    %c2_112 = arith.constant 2 : index
    %c0_113 = arith.constant 0 : index
    %c0_114 = arith.constant 0 : index
    %181 = vector.load %arg7[%c2_112, %c0_113, %c0_114] : memref<3x32x32xf32, #tpu.memory_space<vmem>>, vector<1x32x32xf32>
    %182 = vector.shape_cast %181 : vector<1x32x32xf32> to vector<32x32xf32>
    %cst_115 = arith.constant dense<0.000000e+00> : vector<2x32xf32>
    %183 = tpu.matmul %152, %182, %cst_115 {dimension_numbers = #tpu.dot_dimension_numbers<[1], [0], [0], [1], [0, 0, 1, 1], [], []>, precision = #tpu.contract_precision<fp32>} : vector<2x32xf32>, vector<32x32xf32>, vector<2x32xf32> -> vector<2x32xf32>
    %184 = vector.broadcast %36 : vector<1x32xf32> to vector<2x32xf32>
    %185 = arith.addf %183, %184 : vector<2x32xf32>
    %c2_116 = arith.constant 2 : index
    %c0_117 = arith.constant 0 : index
    %c0_118 = arith.constant 0 : index
    %186 = vector.load %arg8[%c2_116, %c0_117, %c0_118] : memref<3x32x32xf32, #tpu.memory_space<vmem>>, vector<1x32x32xf32>
    %187 = vector.shape_cast %186 : vector<1x32x32xf32> to vector<32x32xf32>
    %cst_119 = arith.constant dense<0.000000e+00> : vector<2x32xf32>
    %188 = tpu.matmul %118, %187, %cst_119 {dimension_numbers = #tpu.dot_dimension_numbers<[1], [0], [0], [1], [0, 0, 1, 1], [], []>, precision = #tpu.contract_precision<fp32>} : vector<2x32xf32>, vector<32x32xf32>, vector<2x32xf32> -> vector<2x32xf32>
    %189 = vector.broadcast %30 : vector<1x32xf32> to vector<2x32xf32>
    %190 = arith.addf %188, %189 : vector<2x32xf32>
    %191 = arith.mulf %166, %190 : vector<2x32xf32>
    %192 = arith.addf %185, %191 : vector<2x32xf32>
    %193 = math.tanh %192 : vector<2x32xf32>
    %cst_120 = arith.constant 1.000000e+00 : f32
    %194 = vector.broadcast %cst_120 : f32 to vector<2x32xf32>
    %195 = arith.subf %194, %180 : vector<2x32xf32>
    %196 = arith.mulf %195, %193 : vector<2x32xf32>
    %197 = arith.mulf %180, %118 : vector<2x32xf32>
    %198 = arith.addf %196, %197 : vector<2x32xf32>
    %c0_121 = arith.constant 0 : index
    %c0_122 = arith.constant 0 : index
    %c0_123 = arith.constant 0 : index
    %199 = vector.load %arg4[%c0_121, %c0_122, %c0_123] : memref<3x32x32xf32, #tpu.memory_space<vmem>>, vector<1x32x32xf32>
    %200 = vector.shape_cast %199 : vector<1x32x32xf32> to vector<32x32xf32>
    %cst_124 = arith.constant dense<0.000000e+00> : vector<2x32xf32>
    %201 = tpu.matmul %152, %200, %cst_124 {dimension_numbers = #tpu.dot_dimension_numbers<[1], [0], [0], [1], [0, 0, 1, 1], [], []>, precision = #tpu.contract_precision<fp32>} : vector<2x32xf32>, vector<32x32xf32>, vector<2x32xf32> -> vector<2x32xf32>
    %c1_125 = arith.constant 1 : index
    %c0_126 = arith.constant 0 : index
    %c0_127 = arith.constant 0 : index
    %202 = vector.load %arg4[%c1_125, %c0_126, %c0_127] : memref<3x32x32xf32, #tpu.memory_space<vmem>>, vector<1x32x32xf32>
    %203 = vector.shape_cast %202 : vector<1x32x32xf32> to vector<32x32xf32>
    %cst_128 = arith.constant dense<0.000000e+00> : vector<2x32xf32>
    %204 = tpu.matmul %152, %203, %cst_128 {dimension_numbers = #tpu.dot_dimension_numbers<[1], [0], [0], [1], [0, 0, 1, 1], [], []>, precision = #tpu.contract_precision<fp32>} : vector<2x32xf32>, vector<32x32xf32>, vector<2x32xf32> -> vector<2x32xf32>
    %c2_129 = arith.constant 2 : index
    %c0_130 = arith.constant 0 : index
    %c0_131 = arith.constant 0 : index
    %205 = vector.load %arg4[%c2_129, %c0_130, %c0_131] : memref<3x32x32xf32, #tpu.memory_space<vmem>>, vector<1x32x32xf32>
    %206 = vector.shape_cast %205 : vector<1x32x32xf32> to vector<32x32xf32>
    %cst_132 = arith.constant dense<0.000000e+00> : vector<2x32xf32>
    %207 = tpu.matmul %152, %206, %cst_132 {dimension_numbers = #tpu.dot_dimension_numbers<[1], [0], [0], [1], [0, 0, 1, 1], [], []>, precision = #tpu.contract_precision<fp32>} : vector<2x32xf32>, vector<32x32xf32>, vector<2x32xf32> -> vector<2x32xf32>
    %208 = vector.extract_strided_slice %14 {offsets = [4, 0], sizes = [2, 32], strides = [1, 1]} : vector<16x32xf32> to vector<2x32xf32>
    %209 = arith.addf %208, %201 : vector<2x32xf32>
    %210 = arith.negf %209 : vector<2x32xf32>
    %211 = math.exp %210 : vector<2x32xf32>
    %cst_133 = arith.constant 1.000000e+00 : f32
    %212 = vector.broadcast %cst_133 : f32 to vector<2x32xf32>
    %213 = arith.addf %212, %211 : vector<2x32xf32>
    %214 = arith.divf %212, %213 : vector<2x32xf32>
    %215 = vector.extract_strided_slice %21 {offsets = [4, 0], sizes = [2, 32], strides = [1, 1]} : vector<16x32xf32> to vector<2x32xf32>
    %216 = arith.addf %215, %204 : vector<2x32xf32>
    %217 = arith.negf %216 : vector<2x32xf32>
    %218 = math.exp %217 : vector<2x32xf32>
    %cst_134 = arith.constant 1.000000e+00 : f32
    %219 = vector.broadcast %cst_134 : f32 to vector<2x32xf32>
    %220 = arith.addf %219, %218 : vector<2x32xf32>
    %221 = arith.divf %219, %220 : vector<2x32xf32>
    %222 = vector.extract_strided_slice %28 {offsets = [4, 0], sizes = [2, 32], strides = [1, 1]} : vector<16x32xf32> to vector<2x32xf32>
    %223 = vector.broadcast %29 : vector<1x32xf32> to vector<2x32xf32>
    %224 = arith.addf %207, %223 : vector<2x32xf32>
    %225 = arith.mulf %214, %224 : vector<2x32xf32>
    %226 = arith.addf %222, %225 : vector<2x32xf32>
    %227 = math.tanh %226 : vector<2x32xf32>
    %cst_135 = arith.constant 1.000000e+00 : f32
    %228 = vector.broadcast %cst_135 : f32 to vector<2x32xf32>
    %229 = arith.subf %228, %221 : vector<2x32xf32>
    %230 = arith.mulf %229, %227 : vector<2x32xf32>
    %231 = arith.mulf %221, %152 : vector<2x32xf32>
    %232 = arith.addf %230, %231 : vector<2x32xf32>
    %c0_136 = arith.constant 0 : index
    %c0_137 = arith.constant 0 : index
    %c0_138 = arith.constant 0 : index
    %233 = vector.load %arg7[%c0_136, %c0_137, %c0_138] : memref<3x32x32xf32, #tpu.memory_space<vmem>>, vector<1x32x32xf32>
    %234 = vector.shape_cast %233 : vector<1x32x32xf32> to vector<32x32xf32>
    %cst_139 = arith.constant dense<0.000000e+00> : vector<2x32xf32>
    %235 = tpu.matmul %232, %234, %cst_139 {dimension_numbers = #tpu.dot_dimension_numbers<[1], [0], [0], [1], [0, 0, 1, 1], [], []>, precision = #tpu.contract_precision<fp32>} : vector<2x32xf32>, vector<32x32xf32>, vector<2x32xf32> -> vector<2x32xf32>
    %c0_140 = arith.constant 0 : index
    %c0_141 = arith.constant 0 : index
    %c0_142 = arith.constant 0 : index
    %236 = vector.load %arg8[%c0_140, %c0_141, %c0_142] : memref<3x32x32xf32, #tpu.memory_space<vmem>>, vector<1x32x32xf32>
    %237 = vector.shape_cast %236 : vector<1x32x32xf32> to vector<32x32xf32>
    %cst_143 = arith.constant dense<0.000000e+00> : vector<2x32xf32>
    %238 = tpu.matmul %198, %237, %cst_143 {dimension_numbers = #tpu.dot_dimension_numbers<[1], [0], [0], [1], [0, 0, 1, 1], [], []>, precision = #tpu.contract_precision<fp32>} : vector<2x32xf32>, vector<32x32xf32>, vector<2x32xf32> -> vector<2x32xf32>
    %239 = arith.addf %235, %238 : vector<2x32xf32>
    %240 = vector.broadcast %32 : vector<1x32xf32> to vector<2x32xf32>
    %241 = arith.addf %239, %240 : vector<2x32xf32>
    %242 = arith.negf %241 : vector<2x32xf32>
    %243 = math.exp %242 : vector<2x32xf32>
    %cst_144 = arith.constant 1.000000e+00 : f32
    %244 = vector.broadcast %cst_144 : f32 to vector<2x32xf32>
    %245 = arith.addf %244, %243 : vector<2x32xf32>
    %246 = arith.divf %244, %245 : vector<2x32xf32>
    %c1_145 = arith.constant 1 : index
    %c0_146 = arith.constant 0 : index
    %c0_147 = arith.constant 0 : index
    %247 = vector.load %arg7[%c1_145, %c0_146, %c0_147] : memref<3x32x32xf32, #tpu.memory_space<vmem>>, vector<1x32x32xf32>
    %248 = vector.shape_cast %247 : vector<1x32x32xf32> to vector<32x32xf32>
    %cst_148 = arith.constant dense<0.000000e+00> : vector<2x32xf32>
    %249 = tpu.matmul %232, %248, %cst_148 {dimension_numbers = #tpu.dot_dimension_numbers<[1], [0], [0], [1], [0, 0, 1, 1], [], []>, precision = #tpu.contract_precision<fp32>} : vector<2x32xf32>, vector<32x32xf32>, vector<2x32xf32> -> vector<2x32xf32>
    %c1_149 = arith.constant 1 : index
    %c0_150 = arith.constant 0 : index
    %c0_151 = arith.constant 0 : index
    %250 = vector.load %arg8[%c1_149, %c0_150, %c0_151] : memref<3x32x32xf32, #tpu.memory_space<vmem>>, vector<1x32x32xf32>
    %251 = vector.shape_cast %250 : vector<1x32x32xf32> to vector<32x32xf32>
    %cst_152 = arith.constant dense<0.000000e+00> : vector<2x32xf32>
    %252 = tpu.matmul %198, %251, %cst_152 {dimension_numbers = #tpu.dot_dimension_numbers<[1], [0], [0], [1], [0, 0, 1, 1], [], []>, precision = #tpu.contract_precision<fp32>} : vector<2x32xf32>, vector<32x32xf32>, vector<2x32xf32> -> vector<2x32xf32>
    %253 = arith.addf %249, %252 : vector<2x32xf32>
    %254 = vector.broadcast %34 : vector<1x32xf32> to vector<2x32xf32>
    %255 = arith.addf %253, %254 : vector<2x32xf32>
    %256 = arith.negf %255 : vector<2x32xf32>
    %257 = math.exp %256 : vector<2x32xf32>
    %cst_153 = arith.constant 1.000000e+00 : f32
    %258 = vector.broadcast %cst_153 : f32 to vector<2x32xf32>
    %259 = arith.addf %258, %257 : vector<2x32xf32>
    %260 = arith.divf %258, %259 : vector<2x32xf32>
    %c2_154 = arith.constant 2 : index
    %c0_155 = arith.constant 0 : index
    %c0_156 = arith.constant 0 : index
    %261 = vector.load %arg7[%c2_154, %c0_155, %c0_156] : memref<3x32x32xf32, #tpu.memory_space<vmem>>, vector<1x32x32xf32>
    %262 = vector.shape_cast %261 : vector<1x32x32xf32> to vector<32x32xf32>
    %cst_157 = arith.constant dense<0.000000e+00> : vector<2x32xf32>
    %263 = tpu.matmul %232, %262, %cst_157 {dimension_numbers = #tpu.dot_dimension_numbers<[1], [0], [0], [1], [0, 0, 1, 1], [], []>, precision = #tpu.contract_precision<fp32>} : vector<2x32xf32>, vector<32x32xf32>, vector<2x32xf32> -> vector<2x32xf32>
    %264 = vector.broadcast %36 : vector<1x32xf32> to vector<2x32xf32>
    %265 = arith.addf %263, %264 : vector<2x32xf32>
    %c2_158 = arith.constant 2 : index
    %c0_159 = arith.constant 0 : index
    %c0_160 = arith.constant 0 : index
    %266 = vector.load %arg8[%c2_158, %c0_159, %c0_160] : memref<3x32x32xf32, #tpu.memory_space<vmem>>, vector<1x32x32xf32>
    %267 = vector.shape_cast %266 : vector<1x32x32xf32> to vector<32x32xf32>
    %cst_161 = arith.constant dense<0.000000e+00> : vector<2x32xf32>
    %268 = tpu.matmul %198, %267, %cst_161 {dimension_numbers = #tpu.dot_dimension_numbers<[1], [0], [0], [1], [0, 0, 1, 1], [], []>, precision = #tpu.contract_precision<fp32>} : vector<2x32xf32>, vector<32x32xf32>, vector<2x32xf32> -> vector<2x32xf32>
    %269 = vector.broadcast %30 : vector<1x32xf32> to vector<2x32xf32>
    %270 = arith.addf %268, %269 : vector<2x32xf32>
    %271 = arith.mulf %246, %270 : vector<2x32xf32>
    %272 = arith.addf %265, %271 : vector<2x32xf32>
    %273 = math.tanh %272 : vector<2x32xf32>
    %cst_162 = arith.constant 1.000000e+00 : f32
    %274 = vector.broadcast %cst_162 : f32 to vector<2x32xf32>
    %275 = arith.subf %274, %260 : vector<2x32xf32>
    %276 = arith.mulf %275, %273 : vector<2x32xf32>
    %277 = arith.mulf %260, %198 : vector<2x32xf32>
    %278 = arith.addf %276, %277 : vector<2x32xf32>
    %c0_163 = arith.constant 0 : index
    %c0_164 = arith.constant 0 : index
    %c0_165 = arith.constant 0 : index
    %279 = vector.load %arg4[%c0_163, %c0_164, %c0_165] : memref<3x32x32xf32, #tpu.memory_space<vmem>>, vector<1x32x32xf32>
    %280 = vector.shape_cast %279 : vector<1x32x32xf32> to vector<32x32xf32>
    %cst_166 = arith.constant dense<0.000000e+00> : vector<2x32xf32>
    %281 = tpu.matmul %232, %280, %cst_166 {dimension_numbers = #tpu.dot_dimension_numbers<[1], [0], [0], [1], [0, 0, 1, 1], [], []>, precision = #tpu.contract_precision<fp32>} : vector<2x32xf32>, vector<32x32xf32>, vector<2x32xf32> -> vector<2x32xf32>
    %c1_167 = arith.constant 1 : index
    %c0_168 = arith.constant 0 : index
    %c0_169 = arith.constant 0 : index
    %282 = vector.load %arg4[%c1_167, %c0_168, %c0_169] : memref<3x32x32xf32, #tpu.memory_space<vmem>>, vector<1x32x32xf32>
    %283 = vector.shape_cast %282 : vector<1x32x32xf32> to vector<32x32xf32>
    %cst_170 = arith.constant dense<0.000000e+00> : vector<2x32xf32>
    %284 = tpu.matmul %232, %283, %cst_170 {dimension_numbers = #tpu.dot_dimension_numbers<[1], [0], [0], [1], [0, 0, 1, 1], [], []>, precision = #tpu.contract_precision<fp32>} : vector<2x32xf32>, vector<32x32xf32>, vector<2x32xf32> -> vector<2x32xf32>
    %c2_171 = arith.constant 2 : index
    %c0_172 = arith.constant 0 : index
    %c0_173 = arith.constant 0 : index
    %285 = vector.load %arg4[%c2_171, %c0_172, %c0_173] : memref<3x32x32xf32, #tpu.memory_space<vmem>>, vector<1x32x32xf32>
    %286 = vector.shape_cast %285 : vector<1x32x32xf32> to vector<32x32xf32>
    %cst_174 = arith.constant dense<0.000000e+00> : vector<2x32xf32>
    %287 = tpu.matmul %232, %286, %cst_174 {dimension_numbers = #tpu.dot_dimension_numbers<[1], [0], [0], [1], [0, 0, 1, 1], [], []>, precision = #tpu.contract_precision<fp32>} : vector<2x32xf32>, vector<32x32xf32>, vector<2x32xf32> -> vector<2x32xf32>
    %288 = vector.extract_strided_slice %14 {offsets = [6, 0], sizes = [2, 32], strides = [1, 1]} : vector<16x32xf32> to vector<2x32xf32>
    %289 = arith.addf %288, %281 : vector<2x32xf32>
    %290 = arith.negf %289 : vector<2x32xf32>
    %291 = math.exp %290 : vector<2x32xf32>
    %cst_175 = arith.constant 1.000000e+00 : f32
    %292 = vector.broadcast %cst_175 : f32 to vector<2x32xf32>
    %293 = arith.addf %292, %291 : vector<2x32xf32>
    %294 = arith.divf %292, %293 : vector<2x32xf32>
    %295 = vector.extract_strided_slice %21 {offsets = [6, 0], sizes = [2, 32], strides = [1, 1]} : vector<16x32xf32> to vector<2x32xf32>
    %296 = arith.addf %295, %284 : vector<2x32xf32>
    %297 = arith.negf %296 : vector<2x32xf32>
    %298 = math.exp %297 : vector<2x32xf32>
    %cst_176 = arith.constant 1.000000e+00 : f32
    %299 = vector.broadcast %cst_176 : f32 to vector<2x32xf32>
    %300 = arith.addf %299, %298 : vector<2x32xf32>
    %301 = arith.divf %299, %300 : vector<2x32xf32>
    %302 = vector.extract_strided_slice %28 {offsets = [6, 0], sizes = [2, 32], strides = [1, 1]} : vector<16x32xf32> to vector<2x32xf32>
    %303 = vector.broadcast %29 : vector<1x32xf32> to vector<2x32xf32>
    %304 = arith.addf %287, %303 : vector<2x32xf32>
    %305 = arith.mulf %294, %304 : vector<2x32xf32>
    %306 = arith.addf %302, %305 : vector<2x32xf32>
    %307 = math.tanh %306 : vector<2x32xf32>
    %cst_177 = arith.constant 1.000000e+00 : f32
    %308 = vector.broadcast %cst_177 : f32 to vector<2x32xf32>
    %309 = arith.subf %308, %301 : vector<2x32xf32>
    %310 = arith.mulf %309, %307 : vector<2x32xf32>
    %311 = arith.mulf %301, %232 : vector<2x32xf32>
    %312 = arith.addf %310, %311 : vector<2x32xf32>
    %c0_178 = arith.constant 0 : index
    %c0_179 = arith.constant 0 : index
    %c0_180 = arith.constant 0 : index
    %313 = vector.load %arg7[%c0_178, %c0_179, %c0_180] : memref<3x32x32xf32, #tpu.memory_space<vmem>>, vector<1x32x32xf32>
    %314 = vector.shape_cast %313 : vector<1x32x32xf32> to vector<32x32xf32>
    %cst_181 = arith.constant dense<0.000000e+00> : vector<2x32xf32>
    %315 = tpu.matmul %312, %314, %cst_181 {dimension_numbers = #tpu.dot_dimension_numbers<[1], [0], [0], [1], [0, 0, 1, 1], [], []>, precision = #tpu.contract_precision<fp32>} : vector<2x32xf32>, vector<32x32xf32>, vector<2x32xf32> -> vector<2x32xf32>
    %c0_182 = arith.constant 0 : index
    %c0_183 = arith.constant 0 : index
    %c0_184 = arith.constant 0 : index
    %316 = vector.load %arg8[%c0_182, %c0_183, %c0_184] : memref<3x32x32xf32, #tpu.memory_space<vmem>>, vector<1x32x32xf32>
    %317 = vector.shape_cast %316 : vector<1x32x32xf32> to vector<32x32xf32>
    %cst_185 = arith.constant dense<0.000000e+00> : vector<2x32xf32>
    %318 = tpu.matmul %278, %317, %cst_185 {dimension_numbers = #tpu.dot_dimension_numbers<[1], [0], [0], [1], [0, 0, 1, 1], [], []>, precision = #tpu.contract_precision<fp32>} : vector<2x32xf32>, vector<32x32xf32>, vector<2x32xf32> -> vector<2x32xf32>
    %319 = arith.addf %315, %318 : vector<2x32xf32>
    %320 = vector.broadcast %32 : vector<1x32xf32> to vector<2x32xf32>
    %321 = arith.addf %319, %320 : vector<2x32xf32>
    %322 = arith.negf %321 : vector<2x32xf32>
    %323 = math.exp %322 : vector<2x32xf32>
    %cst_186 = arith.constant 1.000000e+00 : f32
    %324 = vector.broadcast %cst_186 : f32 to vector<2x32xf32>
    %325 = arith.addf %324, %323 : vector<2x32xf32>
    %326 = arith.divf %324, %325 : vector<2x32xf32>
    %c1_187 = arith.constant 1 : index
    %c0_188 = arith.constant 0 : index
    %c0_189 = arith.constant 0 : index
    %327 = vector.load %arg7[%c1_187, %c0_188, %c0_189] : memref<3x32x32xf32, #tpu.memory_space<vmem>>, vector<1x32x32xf32>
    %328 = vector.shape_cast %327 : vector<1x32x32xf32> to vector<32x32xf32>
    %cst_190 = arith.constant dense<0.000000e+00> : vector<2x32xf32>
    %329 = tpu.matmul %312, %328, %cst_190 {dimension_numbers = #tpu.dot_dimension_numbers<[1], [0], [0], [1], [0, 0, 1, 1], [], []>, precision = #tpu.contract_precision<fp32>} : vector<2x32xf32>, vector<32x32xf32>, vector<2x32xf32> -> vector<2x32xf32>
    %c1_191 = arith.constant 1 : index
    %c0_192 = arith.constant 0 : index
    %c0_193 = arith.constant 0 : index
    %330 = vector.load %arg8[%c1_191, %c0_192, %c0_193] : memref<3x32x32xf32, #tpu.memory_space<vmem>>, vector<1x32x32xf32>
    %331 = vector.shape_cast %330 : vector<1x32x32xf32> to vector<32x32xf32>
    %cst_194 = arith.constant dense<0.000000e+00> : vector<2x32xf32>
    %332 = tpu.matmul %278, %331, %cst_194 {dimension_numbers = #tpu.dot_dimension_numbers<[1], [0], [0], [1], [0, 0, 1, 1], [], []>, precision = #tpu.contract_precision<fp32>} : vector<2x32xf32>, vector<32x32xf32>, vector<2x32xf32> -> vector<2x32xf32>
    %333 = arith.addf %329, %332 : vector<2x32xf32>
    %334 = vector.broadcast %34 : vector<1x32xf32> to vector<2x32xf32>
    %335 = arith.addf %333, %334 : vector<2x32xf32>
    %336 = arith.negf %335 : vector<2x32xf32>
    %337 = math.exp %336 : vector<2x32xf32>
    %cst_195 = arith.constant 1.000000e+00 : f32
    %338 = vector.broadcast %cst_195 : f32 to vector<2x32xf32>
    %339 = arith.addf %338, %337 : vector<2x32xf32>
    %340 = arith.divf %338, %339 : vector<2x32xf32>
    %c2_196 = arith.constant 2 : index
    %c0_197 = arith.constant 0 : index
    %c0_198 = arith.constant 0 : index
    %341 = vector.load %arg7[%c2_196, %c0_197, %c0_198] : memref<3x32x32xf32, #tpu.memory_space<vmem>>, vector<1x32x32xf32>
    %342 = vector.shape_cast %341 : vector<1x32x32xf32> to vector<32x32xf32>
    %cst_199 = arith.constant dense<0.000000e+00> : vector<2x32xf32>
    %343 = tpu.matmul %312, %342, %cst_199 {dimension_numbers = #tpu.dot_dimension_numbers<[1], [0], [0], [1], [0, 0, 1, 1], [], []>, precision = #tpu.contract_precision<fp32>} : vector<2x32xf32>, vector<32x32xf32>, vector<2x32xf32> -> vector<2x32xf32>
    %344 = vector.broadcast %36 : vector<1x32xf32> to vector<2x32xf32>
    %345 = arith.addf %343, %344 : vector<2x32xf32>
    %c2_200 = arith.constant 2 : index
    %c0_201 = arith.constant 0 : index
    %c0_202 = arith.constant 0 : index
    %346 = vector.load %arg8[%c2_200, %c0_201, %c0_202] : memref<3x32x32xf32, #tpu.memory_space<vmem>>, vector<1x32x32xf32>
    %347 = vector.shape_cast %346 : vector<1x32x32xf32> to vector<32x32xf32>
    %cst_203 = arith.constant dense<0.000000e+00> : vector<2x32xf32>
    %348 = tpu.matmul %278, %347, %cst_203 {dimension_numbers = #tpu.dot_dimension_numbers<[1], [0], [0], [1], [0, 0, 1, 1], [], []>, precision = #tpu.contract_precision<fp32>} : vector<2x32xf32>, vector<32x32xf32>, vector<2x32xf32> -> vector<2x32xf32>
    %349 = vector.broadcast %30 : vector<1x32xf32> to vector<2x32xf32>
    %350 = arith.addf %348, %349 : vector<2x32xf32>
    %351 = arith.mulf %326, %350 : vector<2x32xf32>
    %352 = arith.addf %345, %351 : vector<2x32xf32>
    %353 = math.tanh %352 : vector<2x32xf32>
    %cst_204 = arith.constant 1.000000e+00 : f32
    %354 = vector.broadcast %cst_204 : f32 to vector<2x32xf32>
    %355 = arith.subf %354, %340 : vector<2x32xf32>
    %356 = arith.mulf %355, %353 : vector<2x32xf32>
    %357 = arith.mulf %340, %278 : vector<2x32xf32>
    %358 = arith.addf %356, %357 : vector<2x32xf32>
    %c0_205 = arith.constant 0 : index
    %c0_206 = arith.constant 0 : index
    %c0_207 = arith.constant 0 : index
    %359 = vector.load %arg4[%c0_205, %c0_206, %c0_207] : memref<3x32x32xf32, #tpu.memory_space<vmem>>, vector<1x32x32xf32>
    %360 = vector.shape_cast %359 : vector<1x32x32xf32> to vector<32x32xf32>
    %cst_208 = arith.constant dense<0.000000e+00> : vector<2x32xf32>
    %361 = tpu.matmul %312, %360, %cst_208 {dimension_numbers = #tpu.dot_dimension_numbers<[1], [0], [0], [1], [0, 0, 1, 1], [], []>, precision = #tpu.contract_precision<fp32>} : vector<2x32xf32>, vector<32x32xf32>, vector<2x32xf32> -> vector<2x32xf32>
    %c1_209 = arith.constant 1 : index
    %c0_210 = arith.constant 0 : index
    %c0_211 = arith.constant 0 : index
    %362 = vector.load %arg4[%c1_209, %c0_210, %c0_211] : memref<3x32x32xf32, #tpu.memory_space<vmem>>, vector<1x32x32xf32>
    %363 = vector.shape_cast %362 : vector<1x32x32xf32> to vector<32x32xf32>
    %cst_212 = arith.constant dense<0.000000e+00> : vector<2x32xf32>
    %364 = tpu.matmul %312, %363, %cst_212 {dimension_numbers = #tpu.dot_dimension_numbers<[1], [0], [0], [1], [0, 0, 1, 1], [], []>, precision = #tpu.contract_precision<fp32>} : vector<2x32xf32>, vector<32x32xf32>, vector<2x32xf32> -> vector<2x32xf32>
    %c2_213 = arith.constant 2 : index
    %c0_214 = arith.constant 0 : index
    %c0_215 = arith.constant 0 : index
    %365 = vector.load %arg4[%c2_213, %c0_214, %c0_215] : memref<3x32x32xf32, #tpu.memory_space<vmem>>, vector<1x32x32xf32>
    %366 = vector.shape_cast %365 : vector<1x32x32xf32> to vector<32x32xf32>
    %cst_216 = arith.constant dense<0.000000e+00> : vector<2x32xf32>
    %367 = tpu.matmul %312, %366, %cst_216 {dimension_numbers = #tpu.dot_dimension_numbers<[1], [0], [0], [1], [0, 0, 1, 1], [], []>, precision = #tpu.contract_precision<fp32>} : vector<2x32xf32>, vector<32x32xf32>, vector<2x32xf32> -> vector<2x32xf32>
    %368 = vector.extract_strided_slice %14 {offsets = [8, 0], sizes = [2, 32], strides = [1, 1]} : vector<16x32xf32> to vector<2x32xf32>
    %369 = arith.addf %368, %361 : vector<2x32xf32>
    %370 = arith.negf %369 : vector<2x32xf32>
    %371 = math.exp %370 : vector<2x32xf32>
    %cst_217 = arith.constant 1.000000e+00 : f32
    %372 = vector.broadcast %cst_217 : f32 to vector<2x32xf32>
    %373 = arith.addf %372, %371 : vector<2x32xf32>
    %374 = arith.divf %372, %373 : vector<2x32xf32>
    %375 = vector.extract_strided_slice %21 {offsets = [8, 0], sizes = [2, 32], strides = [1, 1]} : vector<16x32xf32> to vector<2x32xf32>
    %376 = arith.addf %375, %364 : vector<2x32xf32>
    %377 = arith.negf %376 : vector<2x32xf32>
    %378 = math.exp %377 : vector<2x32xf32>
    %cst_218 = arith.constant 1.000000e+00 : f32
    %379 = vector.broadcast %cst_218 : f32 to vector<2x32xf32>
    %380 = arith.addf %379, %378 : vector<2x32xf32>
    %381 = arith.divf %379, %380 : vector<2x32xf32>
    %382 = vector.extract_strided_slice %28 {offsets = [8, 0], sizes = [2, 32], strides = [1, 1]} : vector<16x32xf32> to vector<2x32xf32>
    %383 = vector.broadcast %29 : vector<1x32xf32> to vector<2x32xf32>
    %384 = arith.addf %367, %383 : vector<2x32xf32>
    %385 = arith.mulf %374, %384 : vector<2x32xf32>
    %386 = arith.addf %382, %385 : vector<2x32xf32>
    %387 = math.tanh %386 : vector<2x32xf32>
    %cst_219 = arith.constant 1.000000e+00 : f32
    %388 = vector.broadcast %cst_219 : f32 to vector<2x32xf32>
    %389 = arith.subf %388, %381 : vector<2x32xf32>
    %390 = arith.mulf %389, %387 : vector<2x32xf32>
    %391 = arith.mulf %381, %312 : vector<2x32xf32>
    %392 = arith.addf %390, %391 : vector<2x32xf32>
    %c0_220 = arith.constant 0 : index
    %c0_221 = arith.constant 0 : index
    %c0_222 = arith.constant 0 : index
    %393 = vector.load %arg7[%c0_220, %c0_221, %c0_222] : memref<3x32x32xf32, #tpu.memory_space<vmem>>, vector<1x32x32xf32>
    %394 = vector.shape_cast %393 : vector<1x32x32xf32> to vector<32x32xf32>
    %cst_223 = arith.constant dense<0.000000e+00> : vector<2x32xf32>
    %395 = tpu.matmul %392, %394, %cst_223 {dimension_numbers = #tpu.dot_dimension_numbers<[1], [0], [0], [1], [0, 0, 1, 1], [], []>, precision = #tpu.contract_precision<fp32>} : vector<2x32xf32>, vector<32x32xf32>, vector<2x32xf32> -> vector<2x32xf32>
    %c0_224 = arith.constant 0 : index
    %c0_225 = arith.constant 0 : index
    %c0_226 = arith.constant 0 : index
    %396 = vector.load %arg8[%c0_224, %c0_225, %c0_226] : memref<3x32x32xf32, #tpu.memory_space<vmem>>, vector<1x32x32xf32>
    %397 = vector.shape_cast %396 : vector<1x32x32xf32> to vector<32x32xf32>
    %cst_227 = arith.constant dense<0.000000e+00> : vector<2x32xf32>
    %398 = tpu.matmul %358, %397, %cst_227 {dimension_numbers = #tpu.dot_dimension_numbers<[1], [0], [0], [1], [0, 0, 1, 1], [], []>, precision = #tpu.contract_precision<fp32>} : vector<2x32xf32>, vector<32x32xf32>, vector<2x32xf32> -> vector<2x32xf32>
    %399 = arith.addf %395, %398 : vector<2x32xf32>
    %400 = vector.broadcast %32 : vector<1x32xf32> to vector<2x32xf32>
    %401 = arith.addf %399, %400 : vector<2x32xf32>
    %402 = arith.negf %401 : vector<2x32xf32>
    %403 = math.exp %402 : vector<2x32xf32>
    %cst_228 = arith.constant 1.000000e+00 : f32
    %404 = vector.broadcast %cst_228 : f32 to vector<2x32xf32>
    %405 = arith.addf %404, %403 : vector<2x32xf32>
    %406 = arith.divf %404, %405 : vector<2x32xf32>
    %c1_229 = arith.constant 1 : index
    %c0_230 = arith.constant 0 : index
    %c0_231 = arith.constant 0 : index
    %407 = vector.load %arg7[%c1_229, %c0_230, %c0_231] : memref<3x32x32xf32, #tpu.memory_space<vmem>>, vector<1x32x32xf32>
    %408 = vector.shape_cast %407 : vector<1x32x32xf32> to vector<32x32xf32>
    %cst_232 = arith.constant dense<0.000000e+00> : vector<2x32xf32>
    %409 = tpu.matmul %392, %408, %cst_232 {dimension_numbers = #tpu.dot_dimension_numbers<[1], [0], [0], [1], [0, 0, 1, 1], [], []>, precision = #tpu.contract_precision<fp32>} : vector<2x32xf32>, vector<32x32xf32>, vector<2x32xf32> -> vector<2x32xf32>
    %c1_233 = arith.constant 1 : index
    %c0_234 = arith.constant 0 : index
    %c0_235 = arith.constant 0 : index
    %410 = vector.load %arg8[%c1_233, %c0_234, %c0_235] : memref<3x32x32xf32, #tpu.memory_space<vmem>>, vector<1x32x32xf32>
    %411 = vector.shape_cast %410 : vector<1x32x32xf32> to vector<32x32xf32>
    %cst_236 = arith.constant dense<0.000000e+00> : vector<2x32xf32>
    %412 = tpu.matmul %358, %411, %cst_236 {dimension_numbers = #tpu.dot_dimension_numbers<[1], [0], [0], [1], [0, 0, 1, 1], [], []>, precision = #tpu.contract_precision<fp32>} : vector<2x32xf32>, vector<32x32xf32>, vector<2x32xf32> -> vector<2x32xf32>
    %413 = arith.addf %409, %412 : vector<2x32xf32>
    %414 = vector.broadcast %34 : vector<1x32xf32> to vector<2x32xf32>
    %415 = arith.addf %413, %414 : vector<2x32xf32>
    %416 = arith.negf %415 : vector<2x32xf32>
    %417 = math.exp %416 : vector<2x32xf32>
    %cst_237 = arith.constant 1.000000e+00 : f32
    %418 = vector.broadcast %cst_237 : f32 to vector<2x32xf32>
    %419 = arith.addf %418, %417 : vector<2x32xf32>
    %420 = arith.divf %418, %419 : vector<2x32xf32>
    %c2_238 = arith.constant 2 : index
    %c0_239 = arith.constant 0 : index
    %c0_240 = arith.constant 0 : index
    %421 = vector.load %arg7[%c2_238, %c0_239, %c0_240] : memref<3x32x32xf32, #tpu.memory_space<vmem>>, vector<1x32x32xf32>
    %422 = vector.shape_cast %421 : vector<1x32x32xf32> to vector<32x32xf32>
    %cst_241 = arith.constant dense<0.000000e+00> : vector<2x32xf32>
    %423 = tpu.matmul %392, %422, %cst_241 {dimension_numbers = #tpu.dot_dimension_numbers<[1], [0], [0], [1], [0, 0, 1, 1], [], []>, precision = #tpu.contract_precision<fp32>} : vector<2x32xf32>, vector<32x32xf32>, vector<2x32xf32> -> vector<2x32xf32>
    %424 = vector.broadcast %36 : vector<1x32xf32> to vector<2x32xf32>
    %425 = arith.addf %423, %424 : vector<2x32xf32>
    %c2_242 = arith.constant 2 : index
    %c0_243 = arith.constant 0 : index
    %c0_244 = arith.constant 0 : index
    %426 = vector.load %arg8[%c2_242, %c0_243, %c0_244] : memref<3x32x32xf32, #tpu.memory_space<vmem>>, vector<1x32x32xf32>
    %427 = vector.shape_cast %426 : vector<1x32x32xf32> to vector<32x32xf32>
    %cst_245 = arith.constant dense<0.000000e+00> : vector<2x32xf32>
    %428 = tpu.matmul %358, %427, %cst_245 {dimension_numbers = #tpu.dot_dimension_numbers<[1], [0], [0], [1], [0, 0, 1, 1], [], []>, precision = #tpu.contract_precision<fp32>} : vector<2x32xf32>, vector<32x32xf32>, vector<2x32xf32> -> vector<2x32xf32>
    %429 = vector.broadcast %30 : vector<1x32xf32> to vector<2x32xf32>
    %430 = arith.addf %428, %429 : vector<2x32xf32>
    %431 = arith.mulf %406, %430 : vector<2x32xf32>
    %432 = arith.addf %425, %431 : vector<2x32xf32>
    %433 = math.tanh %432 : vector<2x32xf32>
    %cst_246 = arith.constant 1.000000e+00 : f32
    %434 = vector.broadcast %cst_246 : f32 to vector<2x32xf32>
    %435 = arith.subf %434, %420 : vector<2x32xf32>
    %436 = arith.mulf %435, %433 : vector<2x32xf32>
    %437 = arith.mulf %420, %358 : vector<2x32xf32>
    %438 = arith.addf %436, %437 : vector<2x32xf32>
    %c0_247 = arith.constant 0 : index
    %c0_248 = arith.constant 0 : index
    %c0_249 = arith.constant 0 : index
    %439 = vector.load %arg4[%c0_247, %c0_248, %c0_249] : memref<3x32x32xf32, #tpu.memory_space<vmem>>, vector<1x32x32xf32>
    %440 = vector.shape_cast %439 : vector<1x32x32xf32> to vector<32x32xf32>
    %cst_250 = arith.constant dense<0.000000e+00> : vector<2x32xf32>
    %441 = tpu.matmul %392, %440, %cst_250 {dimension_numbers = #tpu.dot_dimension_numbers<[1], [0], [0], [1], [0, 0, 1, 1], [], []>, precision = #tpu.contract_precision<fp32>} : vector<2x32xf32>, vector<32x32xf32>, vector<2x32xf32> -> vector<2x32xf32>
    %c1_251 = arith.constant 1 : index
    %c0_252 = arith.constant 0 : index
    %c0_253 = arith.constant 0 : index
    %442 = vector.load %arg4[%c1_251, %c0_252, %c0_253] : memref<3x32x32xf32, #tpu.memory_space<vmem>>, vector<1x32x32xf32>
    %443 = vector.shape_cast %442 : vector<1x32x32xf32> to vector<32x32xf32>
    %cst_254 = arith.constant dense<0.000000e+00> : vector<2x32xf32>
    %444 = tpu.matmul %392, %443, %cst_254 {dimension_numbers = #tpu.dot_dimension_numbers<[1], [0], [0], [1], [0, 0, 1, 1], [], []>, precision = #tpu.contract_precision<fp32>} : vector<2x32xf32>, vector<32x32xf32>, vector<2x32xf32> -> vector<2x32xf32>
    %c2_255 = arith.constant 2 : index
    %c0_256 = arith.constant 0 : index
    %c0_257 = arith.constant 0 : index
    %445 = vector.load %arg4[%c2_255, %c0_256, %c0_257] : memref<3x32x32xf32, #tpu.memory_space<vmem>>, vector<1x32x32xf32>
    %446 = vector.shape_cast %445 : vector<1x32x32xf32> to vector<32x32xf32>
    %cst_258 = arith.constant dense<0.000000e+00> : vector<2x32xf32>
    %447 = tpu.matmul %392, %446, %cst_258 {dimension_numbers = #tpu.dot_dimension_numbers<[1], [0], [0], [1], [0, 0, 1, 1], [], []>, precision = #tpu.contract_precision<fp32>} : vector<2x32xf32>, vector<32x32xf32>, vector<2x32xf32> -> vector<2x32xf32>
    %448 = vector.extract_strided_slice %14 {offsets = [10, 0], sizes = [2, 32], strides = [1, 1]} : vector<16x32xf32> to vector<2x32xf32>
    %449 = arith.addf %448, %441 : vector<2x32xf32>
    %450 = arith.negf %449 : vector<2x32xf32>
    %451 = math.exp %450 : vector<2x32xf32>
    %cst_259 = arith.constant 1.000000e+00 : f32
    %452 = vector.broadcast %cst_259 : f32 to vector<2x32xf32>
    %453 = arith.addf %452, %451 : vector<2x32xf32>
    %454 = arith.divf %452, %453 : vector<2x32xf32>
    %455 = vector.extract_strided_slice %21 {offsets = [10, 0], sizes = [2, 32], strides = [1, 1]} : vector<16x32xf32> to vector<2x32xf32>
    %456 = arith.addf %455, %444 : vector<2x32xf32>
    %457 = arith.negf %456 : vector<2x32xf32>
    %458 = math.exp %457 : vector<2x32xf32>
    %cst_260 = arith.constant 1.000000e+00 : f32
    %459 = vector.broadcast %cst_260 : f32 to vector<2x32xf32>
    %460 = arith.addf %459, %458 : vector<2x32xf32>
    %461 = arith.divf %459, %460 : vector<2x32xf32>
    %462 = vector.extract_strided_slice %28 {offsets = [10, 0], sizes = [2, 32], strides = [1, 1]} : vector<16x32xf32> to vector<2x32xf32>
    %463 = vector.broadcast %29 : vector<1x32xf32> to vector<2x32xf32>
    %464 = arith.addf %447, %463 : vector<2x32xf32>
    %465 = arith.mulf %454, %464 : vector<2x32xf32>
    %466 = arith.addf %462, %465 : vector<2x32xf32>
    %467 = math.tanh %466 : vector<2x32xf32>
    %cst_261 = arith.constant 1.000000e+00 : f32
    %468 = vector.broadcast %cst_261 : f32 to vector<2x32xf32>
    %469 = arith.subf %468, %461 : vector<2x32xf32>
    %470 = arith.mulf %469, %467 : vector<2x32xf32>
    %471 = arith.mulf %461, %392 : vector<2x32xf32>
    %472 = arith.addf %470, %471 : vector<2x32xf32>
    %c0_262 = arith.constant 0 : index
    %c0_263 = arith.constant 0 : index
    %c0_264 = arith.constant 0 : index
    %473 = vector.load %arg7[%c0_262, %c0_263, %c0_264] : memref<3x32x32xf32, #tpu.memory_space<vmem>>, vector<1x32x32xf32>
    %474 = vector.shape_cast %473 : vector<1x32x32xf32> to vector<32x32xf32>
    %cst_265 = arith.constant dense<0.000000e+00> : vector<2x32xf32>
    %475 = tpu.matmul %472, %474, %cst_265 {dimension_numbers = #tpu.dot_dimension_numbers<[1], [0], [0], [1], [0, 0, 1, 1], [], []>, precision = #tpu.contract_precision<fp32>} : vector<2x32xf32>, vector<32x32xf32>, vector<2x32xf32> -> vector<2x32xf32>
    %c0_266 = arith.constant 0 : index
    %c0_267 = arith.constant 0 : index
    %c0_268 = arith.constant 0 : index
    %476 = vector.load %arg8[%c0_266, %c0_267, %c0_268] : memref<3x32x32xf32, #tpu.memory_space<vmem>>, vector<1x32x32xf32>
    %477 = vector.shape_cast %476 : vector<1x32x32xf32> to vector<32x32xf32>
    %cst_269 = arith.constant dense<0.000000e+00> : vector<2x32xf32>
    %478 = tpu.matmul %438, %477, %cst_269 {dimension_numbers = #tpu.dot_dimension_numbers<[1], [0], [0], [1], [0, 0, 1, 1], [], []>, precision = #tpu.contract_precision<fp32>} : vector<2x32xf32>, vector<32x32xf32>, vector<2x32xf32> -> vector<2x32xf32>
    %479 = arith.addf %475, %478 : vector<2x32xf32>
    %480 = vector.broadcast %32 : vector<1x32xf32> to vector<2x32xf32>
    %481 = arith.addf %479, %480 : vector<2x32xf32>
    %482 = arith.negf %481 : vector<2x32xf32>
    %483 = math.exp %482 : vector<2x32xf32>
    %cst_270 = arith.constant 1.000000e+00 : f32
    %484 = vector.broadcast %cst_270 : f32 to vector<2x32xf32>
    %485 = arith.addf %484, %483 : vector<2x32xf32>
    %486 = arith.divf %484, %485 : vector<2x32xf32>
    %c1_271 = arith.constant 1 : index
    %c0_272 = arith.constant 0 : index
    %c0_273 = arith.constant 0 : index
    %487 = vector.load %arg7[%c1_271, %c0_272, %c0_273] : memref<3x32x32xf32, #tpu.memory_space<vmem>>, vector<1x32x32xf32>
    %488 = vector.shape_cast %487 : vector<1x32x32xf32> to vector<32x32xf32>
    %cst_274 = arith.constant dense<0.000000e+00> : vector<2x32xf32>
    %489 = tpu.matmul %472, %488, %cst_274 {dimension_numbers = #tpu.dot_dimension_numbers<[1], [0], [0], [1], [0, 0, 1, 1], [], []>, precision = #tpu.contract_precision<fp32>} : vector<2x32xf32>, vector<32x32xf32>, vector<2x32xf32> -> vector<2x32xf32>
    %c1_275 = arith.constant 1 : index
    %c0_276 = arith.constant 0 : index
    %c0_277 = arith.constant 0 : index
    %490 = vector.load %arg8[%c1_275, %c0_276, %c0_277] : memref<3x32x32xf32, #tpu.memory_space<vmem>>, vector<1x32x32xf32>
    %491 = vector.shape_cast %490 : vector<1x32x32xf32> to vector<32x32xf32>
    %cst_278 = arith.constant dense<0.000000e+00> : vector<2x32xf32>
    %492 = tpu.matmul %438, %491, %cst_278 {dimension_numbers = #tpu.dot_dimension_numbers<[1], [0], [0], [1], [0, 0, 1, 1], [], []>, precision = #tpu.contract_precision<fp32>} : vector<2x32xf32>, vector<32x32xf32>, vector<2x32xf32> -> vector<2x32xf32>
    %493 = arith.addf %489, %492 : vector<2x32xf32>
    %494 = vector.broadcast %34 : vector<1x32xf32> to vector<2x32xf32>
    %495 = arith.addf %493, %494 : vector<2x32xf32>
    %496 = arith.negf %495 : vector<2x32xf32>
    %497 = math.exp %496 : vector<2x32xf32>
    %cst_279 = arith.constant 1.000000e+00 : f32
    %498 = vector.broadcast %cst_279 : f32 to vector<2x32xf32>
    %499 = arith.addf %498, %497 : vector<2x32xf32>
    %500 = arith.divf %498, %499 : vector<2x32xf32>
    %c2_280 = arith.constant 2 : index
    %c0_281 = arith.constant 0 : index
    %c0_282 = arith.constant 0 : index
    %501 = vector.load %arg7[%c2_280, %c0_281, %c0_282] : memref<3x32x32xf32, #tpu.memory_space<vmem>>, vector<1x32x32xf32>
    %502 = vector.shape_cast %501 : vector<1x32x32xf32> to vector<32x32xf32>
    %cst_283 = arith.constant dense<0.000000e+00> : vector<2x32xf32>
    %503 = tpu.matmul %472, %502, %cst_283 {dimension_numbers = #tpu.dot_dimension_numbers<[1], [0], [0], [1], [0, 0, 1, 1], [], []>, precision = #tpu.contract_precision<fp32>} : vector<2x32xf32>, vector<32x32xf32>, vector<2x32xf32> -> vector<2x32xf32>
    %504 = vector.broadcast %36 : vector<1x32xf32> to vector<2x32xf32>
    %505 = arith.addf %503, %504 : vector<2x32xf32>
    %c2_284 = arith.constant 2 : index
    %c0_285 = arith.constant 0 : index
    %c0_286 = arith.constant 0 : index
    %506 = vector.load %arg8[%c2_284, %c0_285, %c0_286] : memref<3x32x32xf32, #tpu.memory_space<vmem>>, vector<1x32x32xf32>
    %507 = vector.shape_cast %506 : vector<1x32x32xf32> to vector<32x32xf32>
    %cst_287 = arith.constant dense<0.000000e+00> : vector<2x32xf32>
    %508 = tpu.matmul %438, %507, %cst_287 {dimension_numbers = #tpu.dot_dimension_numbers<[1], [0], [0], [1], [0, 0, 1, 1], [], []>, precision = #tpu.contract_precision<fp32>} : vector<2x32xf32>, vector<32x32xf32>, vector<2x32xf32> -> vector<2x32xf32>
    %509 = vector.broadcast %30 : vector<1x32xf32> to vector<2x32xf32>
    %510 = arith.addf %508, %509 : vector<2x32xf32>
    %511 = arith.mulf %486, %510 : vector<2x32xf32>
    %512 = arith.addf %505, %511 : vector<2x32xf32>
    %513 = math.tanh %512 : vector<2x32xf32>
    %cst_288 = arith.constant 1.000000e+00 : f32
    %514 = vector.broadcast %cst_288 : f32 to vector<2x32xf32>
    %515 = arith.subf %514, %500 : vector<2x32xf32>
    %516 = arith.mulf %515, %513 : vector<2x32xf32>
    %517 = arith.mulf %500, %438 : vector<2x32xf32>
    %518 = arith.addf %516, %517 : vector<2x32xf32>
    %c0_289 = arith.constant 0 : index
    %c0_290 = arith.constant 0 : index
    %c0_291 = arith.constant 0 : index
    %519 = vector.load %arg4[%c0_289, %c0_290, %c0_291] : memref<3x32x32xf32, #tpu.memory_space<vmem>>, vector<1x32x32xf32>
    %520 = vector.shape_cast %519 : vector<1x32x32xf32> to vector<32x32xf32>
    %cst_292 = arith.constant dense<0.000000e+00> : vector<2x32xf32>
    %521 = tpu.matmul %472, %520, %cst_292 {dimension_numbers = #tpu.dot_dimension_numbers<[1], [0], [0], [1], [0, 0, 1, 1], [], []>, precision = #tpu.contract_precision<fp32>} : vector<2x32xf32>, vector<32x32xf32>, vector<2x32xf32> -> vector<2x32xf32>
    %c1_293 = arith.constant 1 : index
    %c0_294 = arith.constant 0 : index
    %c0_295 = arith.constant 0 : index
    %522 = vector.load %arg4[%c1_293, %c0_294, %c0_295] : memref<3x32x32xf32, #tpu.memory_space<vmem>>, vector<1x32x32xf32>
    %523 = vector.shape_cast %522 : vector<1x32x32xf32> to vector<32x32xf32>
    %cst_296 = arith.constant dense<0.000000e+00> : vector<2x32xf32>
    %524 = tpu.matmul %472, %523, %cst_296 {dimension_numbers = #tpu.dot_dimension_numbers<[1], [0], [0], [1], [0, 0, 1, 1], [], []>, precision = #tpu.contract_precision<fp32>} : vector<2x32xf32>, vector<32x32xf32>, vector<2x32xf32> -> vector<2x32xf32>
    %c2_297 = arith.constant 2 : index
    %c0_298 = arith.constant 0 : index
    %c0_299 = arith.constant 0 : index
    %525 = vector.load %arg4[%c2_297, %c0_298, %c0_299] : memref<3x32x32xf32, #tpu.memory_space<vmem>>, vector<1x32x32xf32>
    %526 = vector.shape_cast %525 : vector<1x32x32xf32> to vector<32x32xf32>
    %cst_300 = arith.constant dense<0.000000e+00> : vector<2x32xf32>
    %527 = tpu.matmul %472, %526, %cst_300 {dimension_numbers = #tpu.dot_dimension_numbers<[1], [0], [0], [1], [0, 0, 1, 1], [], []>, precision = #tpu.contract_precision<fp32>} : vector<2x32xf32>, vector<32x32xf32>, vector<2x32xf32> -> vector<2x32xf32>
    %528 = vector.extract_strided_slice %14 {offsets = [12, 0], sizes = [2, 32], strides = [1, 1]} : vector<16x32xf32> to vector<2x32xf32>
    %529 = arith.addf %528, %521 : vector<2x32xf32>
    %530 = arith.negf %529 : vector<2x32xf32>
    %531 = math.exp %530 : vector<2x32xf32>
    %cst_301 = arith.constant 1.000000e+00 : f32
    %532 = vector.broadcast %cst_301 : f32 to vector<2x32xf32>
    %533 = arith.addf %532, %531 : vector<2x32xf32>
    %534 = arith.divf %532, %533 : vector<2x32xf32>
    %535 = vector.extract_strided_slice %21 {offsets = [12, 0], sizes = [2, 32], strides = [1, 1]} : vector<16x32xf32> to vector<2x32xf32>
    %536 = arith.addf %535, %524 : vector<2x32xf32>
    %537 = arith.negf %536 : vector<2x32xf32>
    %538 = math.exp %537 : vector<2x32xf32>
    %cst_302 = arith.constant 1.000000e+00 : f32
    %539 = vector.broadcast %cst_302 : f32 to vector<2x32xf32>
    %540 = arith.addf %539, %538 : vector<2x32xf32>
    %541 = arith.divf %539, %540 : vector<2x32xf32>
    %542 = vector.extract_strided_slice %28 {offsets = [12, 0], sizes = [2, 32], strides = [1, 1]} : vector<16x32xf32> to vector<2x32xf32>
    %543 = vector.broadcast %29 : vector<1x32xf32> to vector<2x32xf32>
    %544 = arith.addf %527, %543 : vector<2x32xf32>
    %545 = arith.mulf %534, %544 : vector<2x32xf32>
    %546 = arith.addf %542, %545 : vector<2x32xf32>
    %547 = math.tanh %546 : vector<2x32xf32>
    %cst_303 = arith.constant 1.000000e+00 : f32
    %548 = vector.broadcast %cst_303 : f32 to vector<2x32xf32>
    %549 = arith.subf %548, %541 : vector<2x32xf32>
    %550 = arith.mulf %549, %547 : vector<2x32xf32>
    %551 = arith.mulf %541, %472 : vector<2x32xf32>
    %552 = arith.addf %550, %551 : vector<2x32xf32>
    %c0_304 = arith.constant 0 : index
    %c0_305 = arith.constant 0 : index
    %c0_306 = arith.constant 0 : index
    %553 = vector.load %arg7[%c0_304, %c0_305, %c0_306] : memref<3x32x32xf32, #tpu.memory_space<vmem>>, vector<1x32x32xf32>
    %554 = vector.shape_cast %553 : vector<1x32x32xf32> to vector<32x32xf32>
    %cst_307 = arith.constant dense<0.000000e+00> : vector<2x32xf32>
    %555 = tpu.matmul %552, %554, %cst_307 {dimension_numbers = #tpu.dot_dimension_numbers<[1], [0], [0], [1], [0, 0, 1, 1], [], []>, precision = #tpu.contract_precision<fp32>} : vector<2x32xf32>, vector<32x32xf32>, vector<2x32xf32> -> vector<2x32xf32>
    %c0_308 = arith.constant 0 : index
    %c0_309 = arith.constant 0 : index
    %c0_310 = arith.constant 0 : index
    %556 = vector.load %arg8[%c0_308, %c0_309, %c0_310] : memref<3x32x32xf32, #tpu.memory_space<vmem>>, vector<1x32x32xf32>
    %557 = vector.shape_cast %556 : vector<1x32x32xf32> to vector<32x32xf32>
    %cst_311 = arith.constant dense<0.000000e+00> : vector<2x32xf32>
    %558 = tpu.matmul %518, %557, %cst_311 {dimension_numbers = #tpu.dot_dimension_numbers<[1], [0], [0], [1], [0, 0, 1, 1], [], []>, precision = #tpu.contract_precision<fp32>} : vector<2x32xf32>, vector<32x32xf32>, vector<2x32xf32> -> vector<2x32xf32>
    %559 = arith.addf %555, %558 : vector<2x32xf32>
    %560 = vector.broadcast %32 : vector<1x32xf32> to vector<2x32xf32>
    %561 = arith.addf %559, %560 : vector<2x32xf32>
    %562 = arith.negf %561 : vector<2x32xf32>
    %563 = math.exp %562 : vector<2x32xf32>
    %cst_312 = arith.constant 1.000000e+00 : f32
    %564 = vector.broadcast %cst_312 : f32 to vector<2x32xf32>
    %565 = arith.addf %564, %563 : vector<2x32xf32>
    %566 = arith.divf %564, %565 : vector<2x32xf32>
    %c1_313 = arith.constant 1 : index
    %c0_314 = arith.constant 0 : index
    %c0_315 = arith.constant 0 : index
    %567 = vector.load %arg7[%c1_313, %c0_314, %c0_315] : memref<3x32x32xf32, #tpu.memory_space<vmem>>, vector<1x32x32xf32>
    %568 = vector.shape_cast %567 : vector<1x32x32xf32> to vector<32x32xf32>
    %cst_316 = arith.constant dense<0.000000e+00> : vector<2x32xf32>
    %569 = tpu.matmul %552, %568, %cst_316 {dimension_numbers = #tpu.dot_dimension_numbers<[1], [0], [0], [1], [0, 0, 1, 1], [], []>, precision = #tpu.contract_precision<fp32>} : vector<2x32xf32>, vector<32x32xf32>, vector<2x32xf32> -> vector<2x32xf32>
    %c1_317 = arith.constant 1 : index
    %c0_318 = arith.constant 0 : index
    %c0_319 = arith.constant 0 : index
    %570 = vector.load %arg8[%c1_317, %c0_318, %c0_319] : memref<3x32x32xf32, #tpu.memory_space<vmem>>, vector<1x32x32xf32>
    %571 = vector.shape_cast %570 : vector<1x32x32xf32> to vector<32x32xf32>
    %cst_320 = arith.constant dense<0.000000e+00> : vector<2x32xf32>
    %572 = tpu.matmul %518, %571, %cst_320 {dimension_numbers = #tpu.dot_dimension_numbers<[1], [0], [0], [1], [0, 0, 1, 1], [], []>, precision = #tpu.contract_precision<fp32>} : vector<2x32xf32>, vector<32x32xf32>, vector<2x32xf32> -> vector<2x32xf32>
    %573 = arith.addf %569, %572 : vector<2x32xf32>
    %574 = vector.broadcast %34 : vector<1x32xf32> to vector<2x32xf32>
    %575 = arith.addf %573, %574 : vector<2x32xf32>
    %576 = arith.negf %575 : vector<2x32xf32>
    %577 = math.exp %576 : vector<2x32xf32>
    %cst_321 = arith.constant 1.000000e+00 : f32
    %578 = vector.broadcast %cst_321 : f32 to vector<2x32xf32>
    %579 = arith.addf %578, %577 : vector<2x32xf32>
    %580 = arith.divf %578, %579 : vector<2x32xf32>
    %c2_322 = arith.constant 2 : index
    %c0_323 = arith.constant 0 : index
    %c0_324 = arith.constant 0 : index
    %581 = vector.load %arg7[%c2_322, %c0_323, %c0_324] : memref<3x32x32xf32, #tpu.memory_space<vmem>>, vector<1x32x32xf32>
    %582 = vector.shape_cast %581 : vector<1x32x32xf32> to vector<32x32xf32>
    %cst_325 = arith.constant dense<0.000000e+00> : vector<2x32xf32>
    %583 = tpu.matmul %552, %582, %cst_325 {dimension_numbers = #tpu.dot_dimension_numbers<[1], [0], [0], [1], [0, 0, 1, 1], [], []>, precision = #tpu.contract_precision<fp32>} : vector<2x32xf32>, vector<32x32xf32>, vector<2x32xf32> -> vector<2x32xf32>
    %584 = vector.broadcast %36 : vector<1x32xf32> to vector<2x32xf32>
    %585 = arith.addf %583, %584 : vector<2x32xf32>
    %c2_326 = arith.constant 2 : index
    %c0_327 = arith.constant 0 : index
    %c0_328 = arith.constant 0 : index
    %586 = vector.load %arg8[%c2_326, %c0_327, %c0_328] : memref<3x32x32xf32, #tpu.memory_space<vmem>>, vector<1x32x32xf32>
    %587 = vector.shape_cast %586 : vector<1x32x32xf32> to vector<32x32xf32>
    %cst_329 = arith.constant dense<0.000000e+00> : vector<2x32xf32>
    %588 = tpu.matmul %518, %587, %cst_329 {dimension_numbers = #tpu.dot_dimension_numbers<[1], [0], [0], [1], [0, 0, 1, 1], [], []>, precision = #tpu.contract_precision<fp32>} : vector<2x32xf32>, vector<32x32xf32>, vector<2x32xf32> -> vector<2x32xf32>
    %589 = vector.broadcast %30 : vector<1x32xf32> to vector<2x32xf32>
    %590 = arith.addf %588, %589 : vector<2x32xf32>
    %591 = arith.mulf %566, %590 : vector<2x32xf32>
    %592 = arith.addf %585, %591 : vector<2x32xf32>
    %593 = math.tanh %592 : vector<2x32xf32>
    %cst_330 = arith.constant 1.000000e+00 : f32
    %594 = vector.broadcast %cst_330 : f32 to vector<2x32xf32>
    %595 = arith.subf %594, %580 : vector<2x32xf32>
    %596 = arith.mulf %595, %593 : vector<2x32xf32>
    %597 = arith.mulf %580, %518 : vector<2x32xf32>
    %598 = arith.addf %596, %597 : vector<2x32xf32>
    %c0_331 = arith.constant 0 : index
    %c0_332 = arith.constant 0 : index
    %c0_333 = arith.constant 0 : index
    %599 = vector.load %arg4[%c0_331, %c0_332, %c0_333] : memref<3x32x32xf32, #tpu.memory_space<vmem>>, vector<1x32x32xf32>
    %600 = vector.shape_cast %599 : vector<1x32x32xf32> to vector<32x32xf32>
    %cst_334 = arith.constant dense<0.000000e+00> : vector<2x32xf32>
    %601 = tpu.matmul %552, %600, %cst_334 {dimension_numbers = #tpu.dot_dimension_numbers<[1], [0], [0], [1], [0, 0, 1, 1], [], []>, precision = #tpu.contract_precision<fp32>} : vector<2x32xf32>, vector<32x32xf32>, vector<2x32xf32> -> vector<2x32xf32>
    %c1_335 = arith.constant 1 : index
    %c0_336 = arith.constant 0 : index
    %c0_337 = arith.constant 0 : index
    %602 = vector.load %arg4[%c1_335, %c0_336, %c0_337] : memref<3x32x32xf32, #tpu.memory_space<vmem>>, vector<1x32x32xf32>
    %603 = vector.shape_cast %602 : vector<1x32x32xf32> to vector<32x32xf32>
    %cst_338 = arith.constant dense<0.000000e+00> : vector<2x32xf32>
    %604 = tpu.matmul %552, %603, %cst_338 {dimension_numbers = #tpu.dot_dimension_numbers<[1], [0], [0], [1], [0, 0, 1, 1], [], []>, precision = #tpu.contract_precision<fp32>} : vector<2x32xf32>, vector<32x32xf32>, vector<2x32xf32> -> vector<2x32xf32>
    %c2_339 = arith.constant 2 : index
    %c0_340 = arith.constant 0 : index
    %c0_341 = arith.constant 0 : index
    %605 = vector.load %arg4[%c2_339, %c0_340, %c0_341] : memref<3x32x32xf32, #tpu.memory_space<vmem>>, vector<1x32x32xf32>
    %606 = vector.shape_cast %605 : vector<1x32x32xf32> to vector<32x32xf32>
    %cst_342 = arith.constant dense<0.000000e+00> : vector<2x32xf32>
    %607 = tpu.matmul %552, %606, %cst_342 {dimension_numbers = #tpu.dot_dimension_numbers<[1], [0], [0], [1], [0, 0, 1, 1], [], []>, precision = #tpu.contract_precision<fp32>} : vector<2x32xf32>, vector<32x32xf32>, vector<2x32xf32> -> vector<2x32xf32>
    %608 = vector.extract_strided_slice %14 {offsets = [14, 0], sizes = [2, 32], strides = [1, 1]} : vector<16x32xf32> to vector<2x32xf32>
    %609 = arith.addf %608, %601 : vector<2x32xf32>
    %610 = arith.negf %609 : vector<2x32xf32>
    %611 = math.exp %610 : vector<2x32xf32>
    %cst_343 = arith.constant 1.000000e+00 : f32
    %612 = vector.broadcast %cst_343 : f32 to vector<2x32xf32>
    %613 = arith.addf %612, %611 : vector<2x32xf32>
    %614 = arith.divf %612, %613 : vector<2x32xf32>
    %615 = vector.extract_strided_slice %21 {offsets = [14, 0], sizes = [2, 32], strides = [1, 1]} : vector<16x32xf32> to vector<2x32xf32>
    %616 = arith.addf %615, %604 : vector<2x32xf32>
    %617 = arith.negf %616 : vector<2x32xf32>
    %618 = math.exp %617 : vector<2x32xf32>
    %cst_344 = arith.constant 1.000000e+00 : f32
    %619 = vector.broadcast %cst_344 : f32 to vector<2x32xf32>
    %620 = arith.addf %619, %618 : vector<2x32xf32>
    %621 = arith.divf %619, %620 : vector<2x32xf32>
    %622 = vector.extract_strided_slice %28 {offsets = [14, 0], sizes = [2, 32], strides = [1, 1]} : vector<16x32xf32> to vector<2x32xf32>
    %623 = vector.broadcast %29 : vector<1x32xf32> to vector<2x32xf32>
    %624 = arith.addf %607, %623 : vector<2x32xf32>
    %625 = arith.mulf %614, %624 : vector<2x32xf32>
    %626 = arith.addf %622, %625 : vector<2x32xf32>
    %627 = math.tanh %626 : vector<2x32xf32>
    %cst_345 = arith.constant 1.000000e+00 : f32
    %628 = vector.broadcast %cst_345 : f32 to vector<2x32xf32>
    %629 = arith.subf %628, %621 : vector<2x32xf32>
    %630 = arith.mulf %629, %627 : vector<2x32xf32>
    %631 = arith.mulf %621, %552 : vector<2x32xf32>
    %632 = arith.addf %630, %631 : vector<2x32xf32>
    %c0_346 = arith.constant 0 : index
    %c0_347 = arith.constant 0 : index
    %c0_348 = arith.constant 0 : index
    %633 = vector.load %arg7[%c0_346, %c0_347, %c0_348] : memref<3x32x32xf32, #tpu.memory_space<vmem>>, vector<1x32x32xf32>
    %634 = vector.shape_cast %633 : vector<1x32x32xf32> to vector<32x32xf32>
    %cst_349 = arith.constant dense<0.000000e+00> : vector<2x32xf32>
    %635 = tpu.matmul %632, %634, %cst_349 {dimension_numbers = #tpu.dot_dimension_numbers<[1], [0], [0], [1], [0, 0, 1, 1], [], []>, precision = #tpu.contract_precision<fp32>} : vector<2x32xf32>, vector<32x32xf32>, vector<2x32xf32> -> vector<2x32xf32>
    %c0_350 = arith.constant 0 : index
    %c0_351 = arith.constant 0 : index
    %c0_352 = arith.constant 0 : index
    %636 = vector.load %arg8[%c0_350, %c0_351, %c0_352] : memref<3x32x32xf32, #tpu.memory_space<vmem>>, vector<1x32x32xf32>
    %637 = vector.shape_cast %636 : vector<1x32x32xf32> to vector<32x32xf32>
    %cst_353 = arith.constant dense<0.000000e+00> : vector<2x32xf32>
    %638 = tpu.matmul %598, %637, %cst_353 {dimension_numbers = #tpu.dot_dimension_numbers<[1], [0], [0], [1], [0, 0, 1, 1], [], []>, precision = #tpu.contract_precision<fp32>} : vector<2x32xf32>, vector<32x32xf32>, vector<2x32xf32> -> vector<2x32xf32>
    %639 = arith.addf %635, %638 : vector<2x32xf32>
    %640 = vector.broadcast %32 : vector<1x32xf32> to vector<2x32xf32>
    %641 = arith.addf %639, %640 : vector<2x32xf32>
    %642 = arith.negf %641 : vector<2x32xf32>
    %643 = math.exp %642 : vector<2x32xf32>
    %cst_354 = arith.constant 1.000000e+00 : f32
    %644 = vector.broadcast %cst_354 : f32 to vector<2x32xf32>
    %645 = arith.addf %644, %643 : vector<2x32xf32>
    %646 = arith.divf %644, %645 : vector<2x32xf32>
    %c1_355 = arith.constant 1 : index
    %c0_356 = arith.constant 0 : index
    %c0_357 = arith.constant 0 : index
    %647 = vector.load %arg7[%c1_355, %c0_356, %c0_357] : memref<3x32x32xf32, #tpu.memory_space<vmem>>, vector<1x32x32xf32>
    %648 = vector.shape_cast %647 : vector<1x32x32xf32> to vector<32x32xf32>
    %cst_358 = arith.constant dense<0.000000e+00> : vector<2x32xf32>
    %649 = tpu.matmul %632, %648, %cst_358 {dimension_numbers = #tpu.dot_dimension_numbers<[1], [0], [0], [1], [0, 0, 1, 1], [], []>, precision = #tpu.contract_precision<fp32>} : vector<2x32xf32>, vector<32x32xf32>, vector<2x32xf32> -> vector<2x32xf32>
    %c1_359 = arith.constant 1 : index
    %c0_360 = arith.constant 0 : index
    %c0_361 = arith.constant 0 : index
    %650 = vector.load %arg8[%c1_359, %c0_360, %c0_361] : memref<3x32x32xf32, #tpu.memory_space<vmem>>, vector<1x32x32xf32>
    %651 = vector.shape_cast %650 : vector<1x32x32xf32> to vector<32x32xf32>
    %cst_362 = arith.constant dense<0.000000e+00> : vector<2x32xf32>
    %652 = tpu.matmul %598, %651, %cst_362 {dimension_numbers = #tpu.dot_dimension_numbers<[1], [0], [0], [1], [0, 0, 1, 1], [], []>, precision = #tpu.contract_precision<fp32>} : vector<2x32xf32>, vector<32x32xf32>, vector<2x32xf32> -> vector<2x32xf32>
    %653 = arith.addf %649, %652 : vector<2x32xf32>
    %654 = vector.broadcast %34 : vector<1x32xf32> to vector<2x32xf32>
    %655 = arith.addf %653, %654 : vector<2x32xf32>
    %656 = arith.negf %655 : vector<2x32xf32>
    %657 = math.exp %656 : vector<2x32xf32>
    %cst_363 = arith.constant 1.000000e+00 : f32
    %658 = vector.broadcast %cst_363 : f32 to vector<2x32xf32>
    %659 = arith.addf %658, %657 : vector<2x32xf32>
    %660 = arith.divf %658, %659 : vector<2x32xf32>
    %c2_364 = arith.constant 2 : index
    %c0_365 = arith.constant 0 : index
    %c0_366 = arith.constant 0 : index
    %661 = vector.load %arg7[%c2_364, %c0_365, %c0_366] : memref<3x32x32xf32, #tpu.memory_space<vmem>>, vector<1x32x32xf32>
    %662 = vector.shape_cast %661 : vector<1x32x32xf32> to vector<32x32xf32>
    %cst_367 = arith.constant dense<0.000000e+00> : vector<2x32xf32>
    %663 = tpu.matmul %632, %662, %cst_367 {dimension_numbers = #tpu.dot_dimension_numbers<[1], [0], [0], [1], [0, 0, 1, 1], [], []>, precision = #tpu.contract_precision<fp32>} : vector<2x32xf32>, vector<32x32xf32>, vector<2x32xf32> -> vector<2x32xf32>
    %664 = vector.broadcast %36 : vector<1x32xf32> to vector<2x32xf32>
    %665 = arith.addf %663, %664 : vector<2x32xf32>
    %c2_368 = arith.constant 2 : index
    %c0_369 = arith.constant 0 : index
    %c0_370 = arith.constant 0 : index
    %666 = vector.load %arg8[%c2_368, %c0_369, %c0_370] : memref<3x32x32xf32, #tpu.memory_space<vmem>>, vector<1x32x32xf32>
    %667 = vector.shape_cast %666 : vector<1x32x32xf32> to vector<32x32xf32>
    %cst_371 = arith.constant dense<0.000000e+00> : vector<2x32xf32>
    %668 = tpu.matmul %598, %667, %cst_371 {dimension_numbers = #tpu.dot_dimension_numbers<[1], [0], [0], [1], [0, 0, 1, 1], [], []>, precision = #tpu.contract_precision<fp32>} : vector<2x32xf32>, vector<32x32xf32>, vector<2x32xf32> -> vector<2x32xf32>
    %669 = vector.broadcast %30 : vector<1x32xf32> to vector<2x32xf32>
    %670 = arith.addf %668, %669 : vector<2x32xf32>
    %671 = arith.mulf %646, %670 : vector<2x32xf32>
    %672 = arith.addf %665, %671 : vector<2x32xf32>
    %673 = math.tanh %672 : vector<2x32xf32>
    %cst_372 = arith.constant 1.000000e+00 : f32
    %674 = vector.broadcast %cst_372 : f32 to vector<2x32xf32>
    %675 = arith.subf %674, %660 : vector<2x32xf32>
    %676 = arith.mulf %675, %673 : vector<2x32xf32>
    %677 = arith.mulf %660, %598 : vector<2x32xf32>
    %678 = arith.addf %676, %677 : vector<2x32xf32>
    %679 = vector.shape_cast %632 : vector<2x32xf32> to vector<1x2x32xf32>
    %680 = vector.shape_cast %678 : vector<2x32xf32> to vector<1x2x32xf32>
    %681 = tpu.concatenate %679, %680 in 0 : vector<1x2x32xf32>, vector<1x2x32xf32> -> vector<2x2x32xf32>
    %c0_373 = arith.constant 0 : index
    %c0_374 = arith.constant 0 : index
    %c0_375 = arith.constant 0 : index
    %682 = vector.load %arg11[%c0_373, %c0_374, %c0_375] : memref<2x2x32xf32, #tpu.memory_space<vmem>>, vector<2x2x32xf32>
    tpu.vector_store %arg11[%c0_373, %c0_374, %c0_375], %681 {strides = array<i32>} : memref<2x2x32xf32, #tpu.memory_space<vmem>>, vector<2x2x32xf32>,
    return
  }
  func.func @transform_0(%arg0: i32) -> (i32, i32) {
    %c0_i32 = arith.constant 0 : i32
    %c0_i32_0 = arith.constant 0 : i32
    return %arg0, %c0_i32 : i32, i32
  }
  func.func @transform_1(%arg0: i32) -> (i32, i32) {
    %c0_i32 = arith.constant 0 : i32
    %c0_i32_0 = arith.constant 0 : i32
    %c0_i32_1 = arith.constant 0 : i32
    return %c0_i32, %c0_i32_0 : i32, i32
  }
  func.func @transform_2(%arg0: i32) -> (i32, i32, i32) {
    %c0_i32 = arith.constant 0 : i32
    %c0_i32_0 = arith.constant 0 : i32
    %c0_i32_1 = arith.constant 0 : i32
    %c0_i32_2 = arith.constant 0 : i32
    return %c0_i32, %c0_i32_0, %c0_i32_1 : i32, i32, i32
  }
  func.func @transform_3(%arg0: i32) -> (i32, i32, i32) {
    %c0_i32 = arith.constant 0 : i32
    %c0_i32_0 = arith.constant 0 : i32
    %c0_i32_1 = arith.constant 0 : i32
    %c0_i32_2 = arith.constant 0 : i32
    return %c0_i32, %c0_i32_0, %c0_i32_1 : i32, i32, i32
  }
  func.func @transform_4(%arg0: i32) -> (i32, i32, i32) {
    %c0_i32 = arith.constant 0 : i32
    %c0_i32_0 = arith.constant 0 : i32
    %c0_i32_1 = arith.constant 0 : i32
    %c0_i32_2 = arith.constant 0 : i32
    return %c0_i32, %c0_i32_0, %c0_i32_1 : i32, i32, i32
  }
  func.func @transform_5(%arg0: i32) -> (i32, i32) {
    %c0_i32 = arith.constant 0 : i32
    %c0_i32_0 = arith.constant 0 : i32
    %c0_i32_1 = arith.constant 0 : i32
    return %c0_i32, %c0_i32_0 : i32, i32
  }
  func.func @transform_6(%arg0: i32) -> (i32, i32, i32) {
    %c0_i32 = arith.constant 0 : i32
    %c0_i32_0 = arith.constant 0 : i32
    %c0_i32_1 = arith.constant 0 : i32
    %c0_i32_2 = arith.constant 0 : i32
    return %c0_i32, %c0_i32_0, %c0_i32_1 : i32, i32, i32
  }
  func.func @transform_7(%arg0: i32) -> (i32, i32, i32) {
    %c0_i32 = arith.constant 0 : i32
    %c0_i32_0 = arith.constant 0 : i32
    %c0_i32_1 = arith.constant 0 : i32
    %c0_i32_2 = arith.constant 0 : i32
    return %c0_i32, %c0_i32_0, %c0_i32_1 : i32, i32, i32
  }
  func.func @transform_8(%arg0: i32) -> (i32, i32, i32) {
    %c0_i32 = arith.constant 0 : i32
    %c0_i32_0 = arith.constant 0 : i32
    %c0_i32_1 = arith.constant 0 : i32
    %c0_i32_2 = arith.constant 0 : i32
    return %c0_i32, %c0_i32_0, %c0_i32_1 : i32, i32, i32
  }
  func.func @transform_9(%arg0: i32) -> (i32, i32) {
    %c0_i32 = arith.constant 0 : i32
    %c0_i32_0 = arith.constant 0 : i32
    %c0_i32_1 = arith.constant 0 : i32
    return %c0_i32, %c0_i32_0 : i32, i32
  }
  func.func @transform_10(%arg0: i32) -> (i32, i32, i32) {
    %c0_i32 = arith.constant 0 : i32
    %c0_i32_0 = arith.constant 0 : i32
    %c0_i32_1 = arith.constant 0 : i32
    return %c0_i32, %arg0, %c0_i32_0 : i32, i32, i32
  }
}

</mosaic_0001>

<bundles_post_ra>
// kernel: encoder_forward.1
= control target key start
LH: loop header
LB: loop body
LE: loop exit
PB: predicated region body
PF: predicated region fallthrough
CT: control target
= control target key end

     0   :  { %vm72_vm0 = vcmask 1043456   ;;  %v15668_v2 = vmov 0   ;;  %s19403_s0 = inlined_call_operand.vmem [shape: s32[16,1], index: 0, kind: input, shape index: {}]   ;;  %s19404_s1 = inlined_call_operand.vmem [shape: f32[100,32], index: 1, kind: input, shape index: {}]   ;;  %s19405_s2 = inlined_call_operand.vmem [shape: f32[3,32,32], index: 2, kind: input, shape index: {}]   ;;  %s19406_s3 = inlined_call_operand.vmem [shape: f32[3,32,32], index: 3, kind: input, shape index: {}]   ;;  %s19407_s4 = inlined_call_operand.vmem [shape: f32[3,1,32], index: 4, kind: input, shape index: {}]   ;;  %s19408_s5 = inlined_call_operand.vmem [shape: f32[1,32], index: 5, kind: input, shape index: {}]   ;;  %s19409_s6 = inlined_call_operand.vmem [shape: f32[3,32,32], index: 6, kind: input, shape index: {}]   ;;  %s19410_s7 = inlined_call_operand.vmem [shape: f32[3,32,32], index: 7, kind: input, shape index: {}]   ;;  %s19411_s8 = inlined_call_operand.vmem [shape: f32[3,1,32], index: 8, kind: input, shape index: {}]   ;;  %s19412_s9 = inlined_call_operand.vmem [shape: f32[1,32], index: 9, kind: input, shape index: {}]   ;;  %s19413_s10 = inlined_call_operand.hbm [shape: f32[2,2,32], index: 10, kind: output, shape index: {}]  }
   0x1   :  { %v38_v0 = vld [vmem:[%s19403_s0] sm:$0xff]  ;;  %15454 = vset.pattern.permute.xlu0 %v15668_v2  ;;  %v63_v4 = vld [vmem:[%s19404_s1 + $0x58] sm:$0xff]  ;;  %v62_v5 = vld [vmem:[%s19404_s1 + $0x50] sm:$0xff] }
   0x2   :  { %v64_v1 = vld [vmem:[%s19404_s1 + $0x60] sm:$0xf]  ;;  %v61_v6 = vld [vmem:[%s19404_s1 + $0x48] sm:$0xff]  ;;  %41 = vperm.xlu0 %15454, %v38_v0   ;;  %v15745_v8 = vand.u32 4294901760, %v63_v4  ;;  %v15747_v9 = vand.u32 4294901760, %v62_v5  ;;  %v59_v12 = vld [vmem:[%s19404_s1 + $0x38] sm:$0xff] }
   0x3   :  { %v74_v3 = vsel %vm72_vm0, %v64_v1, 0  ;;  %v15749_v10 = vand.u32 4294901760, %v61_v6  ;;  %v60_v11 = vld [vmem:[%s19404_s1 + $0x40] sm:$0xff]  ;;  %v15759_v14 = vand.u32 4294901760, %v59_v12  ;;  %v58_v15 = vld [vmem:[%s19404_s1 + $0x30] sm:$0xff]  ;;  %v57_v16 = vld [vmem:[%s19404_s1 + $0x28] sm:$0xff] }
   0x4   :  { %v15743_v7 = vand.u32 4294901760, %v74_v3  ;;  %v15757_v13 = vand.u32 4294901760, %v60_v11  ;;  %v15771_v18 = vsub.f32 %v63_v4, %v15745_v8  ;;  %v15774_v19 = vsub.f32 %v62_v5, %v15747_v9  ;;  %v39_v21 = vld [vmem:[%s19403_s0 + $0x8] sm:$0xff]  ;;  %v56_v32 = vld [vmem:[%s19404_s1 + $0x20] sm:$0xff]  ;;  %v55_v33 = vld [vmem:[%s19404_s1 + $0x18] sm:$0xff] }
   0x5   :  { %v15777_v20 = vsub.f32 %v61_v6, %v15749_v10  ;;  %v15787_v23 = vsub.f32 %v59_v12, %v15759_v14  ;;  %v15789_v24 = vand.u32 4294901760, %v58_v15  ;;  %v15791_v25 = vand.u32 4294901760, %v57_v16  ;;  %v54_v39 = vld [vmem:[%s19404_s1 + $0x10] sm:$0xff] }
   0x6   :  { %v15768_v17 = vsub.f32 %v74_v3, %v15743_v7  ;;  %80 = vmatpush.msra.mxu0 %v15743_v7  ;;  %v15784_v22 = vsub.f32 %v60_v11, %v15757_v13  ;;  %269 = vmatpush.msra.mxu3 %v15743_v7  ;;  %v133_v27 = vand.u32 4294901760, %v15771_v18  ;;  %v139_v28 = vand.u32 4294901760, %v15774_v19 }
   0x7   :  { %v145_v29 = vand.u32 4294901760, %v15777_v20  ;;  %v15802_v31 = vsub.f32 %v58_v15, %v15789_v24  ;;  %v157_v37 = vand.u32 4294901760, %v15787_v23  ;;  %v15823_v38 = vsub.f32 %v57_v16, %v15791_v25 }
   0x8   :  { %v127_v26 = vand.u32 4294901760, %v15768_v17  ;;  %82 = vmatpush.msra.mxu0 %v15745_v8  ;;  %217 = vmatpush.msra.mxu2 %v15768_v17  ;;  %v151_v30 = vand.u32 4294901760, %v15784_v22  ;;  %v134_v35 = vsub.f32 %v15771_v18, %v133_v27  ;;  %v140_v36 = vsub.f32 %v15774_v19, %v139_v28 }
   0x9   :  { %271 = vmatpush.msra.mxu3 %v15745_v8 }
   0xa   :  { %v128_v34 = vsub.f32 %v15768_v17, %v127_v26  ;;  %84 = vmatpush.msra.mxu0 %v15747_v9  ;;  %220 = vmatpush.msra.mxu2 %v15771_v18 }
   0xb   :  { %273 = vmatpush.msra.mxu3 %v15747_v9 }
   0xc   :  { %15 = vsyncpa [#allocation3], 0  ;;  %44 = vperm.xlu0 %15454, %v39_v21   ;;  %v129_v40 = vand.u32 4294901760, %v128_v34  ;;  %v135_v41 = vand.u32 4294901760, %v134_v35  ;;  %v146_v42 = vsub.f32 %v15777_v20, %v145_v29  ;;  %86 = vmatpush.msra.mxu0 %v15749_v10  ;;  %v152_v43 = vsub.f32 %v15784_v22, %v151_v30  ;;  %v53_v45 = vld [vmem:[%s19404_s1 + $0x8] sm:$0xff]  ;;  %v52_v52 = vld [vmem:[%s19404_s1] sm:$0xff] }
   0xd   :  { %v163_v44 = vand.u32 4294901760, %v15802_v31  ;;  %223 = vmatpush.msra.mxu2 %v15774_v19  ;;  %275 = vmatpush.msra.mxu3 %v15749_v10  ;;  %v141_v46 = vand.u32 4294901760, %v140_v36  ;;  %v15843_v47 = vand.u32 4294901760, %v56_v32  ;;  %v15846_v48 = vand.u32 4294901760, %v55_v33  ;;  %s15361_s23 = sshll.u32 %s19413_s10, 4  ;;  %s15671_s24 = smov 32   ;;  %s15362_s23 = int_to_ptr.hbm [resolvable:$true] %s15361_s23 }
   0xe   :  { %130 = vmatpush.msra.mxu1 %v129_v40  ;;  %88 = vmatpush.msra.mxu0 %v15757_v13  ;;  %v15848_v49 = vand.u32 4294901760, %v54_v39  ;;  %v158_v50 = vsub.f32 %v15787_v23, %v157_v37  ;;  %v169_v51 = vand.u32 4294901760, %v15823_v38  ;;  %v147_v53 = vand.u32 4294901760, %v146_v42  ;;  %v410_v40 = vld [vmem:[%s19405_s2 + $0x8] sm:$0xff]  ;;  %s15672_s25 = smov 2  }
   0xf   :  { %226 = vmatpush.msra.mxu2 %v15777_v20  ;;  %277 = vmatpush.msra.mxu3 %v15757_v13  ;;  %v15860_v54 = vsub.f32 %v56_v32, %v15843_v47  ;;  %v15863_v55 = vsub.f32 %v55_v33, %v15846_v48  ;;  %v15866_v56 = vand.u32 4294901760, %v53_v45  ;;  %v153_v57 = vand.u32 4294901760, %v152_v43 }
  0x10   :  { %136 = vmatpush.msra.mxu1 %v135_v41  ;;  %90 = vmatpush.msra.mxu0 %v15759_v14  ;;  %v164_v58 = vsub.f32 %v15802_v31, %v163_v44  ;;  %v15875_v60 = vsub.f32 %v54_v39, %v15848_v49  ;;  %v15878_v61 = vand.u32 4294901760, %v52_v52  ;;  %v159_v62 = vand.u32 4294901760, %v158_v50 }
  0x11   :  { %229 = vmatpush.msra.mxu2 %v15784_v22  ;;  %279 = vmatpush.msra.mxu3 %v15759_v14  ;;  %v175_v59 = vand.u32 4294901760, %v15860_v54  ;;  %v170_v63 = vsub.f32 %v15823_v38, %v169_v51  ;;  %v181_v0 = vand.u32 4294901760, %v15863_v55  ;;  %v15887_v1 = vsub.f32 %v53_v45, %v15866_v56 }
  0x12   :  { %142 = vmatpush.msra.mxu1 %v141_v46  ;;  %92 = vmatpush.msra.mxu0 %v15789_v24  ;;  %v165_v2 = vand.u32 4294901760, %v164_v58  ;;  %v187_v4 = vand.u32 4294901760, %v15875_v60  ;;  %v198_v5 = vsub.f32 %v52_v52, %v15878_v61  ;;  %vm65_vm1 = vcmask 818176  }
  0x13   :  { %232 = vmatpush.msra.mxu2 %v15787_v23  ;;  %281 = vmatpush.msra.mxu3 %v15789_v24  ;;  %v176_v3 = vsub.f32 %v15860_v54, %v175_v59  ;;  %v171_v6 = vand.u32 4294901760, %v170_v63  ;;  %v182_v11 = vsub.f32 %v15863_v55, %v181_v0  ;;  %v193_v12 = vand.u32 4294901760, %v15887_v1 }
  0x14   :  { %148 = vmatpush.msra.mxu1 %v147_v53  ;;  %94 = vmatpush.msra.mxu0 %v15791_v25  ;;  %v188_v16 = vsub.f32 %v15875_v60, %v187_v4  ;;  %v199_v21 = vand.u32 4294901760, %v198_v5  ;;  %v440_v43 = vand.u32 4294901760, %v410_v40  ;;  %vm417_vm4 = vcmask 261120  }
  0x15   :  { %235 = vmatpush.msra.mxu2 %v15802_v31  ;;  %283 = vmatpush.msra.mxu3 %v15791_v25  ;;  %v177_v15 = vand.u32 4294901760, %v176_v3  ;;  %v183_v32 = vand.u32 4294901760, %v182_v11  ;;  %v194_v33 = vsub.f32 %v15887_v1, %v193_v12  ;;  %v411_v31 = vld [vmem:[%s19405_s2 + $0x10] sm:$0xff]  ;;  %v15381_v3 = vld [vmem:[%s19405_s2 + $0x20] sm:$0xff] }
  0x16   :  { %154 = vmatpush.msra.mxu1 %v153_v57  ;;  %96 = vmatpush.msra.mxu0 %v15843_v47  ;;  %v189_v34 = vand.u32 4294901760, %v188_v16  ;;  %v200_v35 = vsub.f32 %v198_v5, %v199_v21 }
  0x17   :  { %238 = vmatpush.msra.mxu2 %v15823_v38  ;;  %285 = vmatpush.msra.mxu3 %v15843_v47  ;;  %v195_v36 = vand.u32 4294901760, %v194_v33  ;;  %v438_v38 = vand.u32 4294901760, %v411_v31 }
  0x18   :  { %160 = vmatpush.msra.mxu1 %v159_v62  ;;  %98 = vmatpush.msra.mxu0 %v15846_v48  ;;  %v201_v39 = vand.u32 4294901760, %v200_v35  ;;  %v15383_v62 = vld [vmem:[%s19405_s2 + $0x30] sm:$0xff] }
  0x19   :  { %241 = vmatpush.msra.mxu2 %v15860_v54  ;;  %287 = vmatpush.msra.mxu3 %v15846_v48  ;;  %v480_v42 = vsub.f32 %v411_v31, %v438_v38  ;;  %v15388_v35 = vld [vmem:[%s19405_s2 + $0x50] sm:$0xff] }
  0x1a   :  { %166 = vmatpush.msra.mxu1 %v165_v2  ;;  %100 = vmatpush.msra.mxu0 %v15848_v49  ;;  %v15382_v2 = vld [vmem:[%s19405_s2 + $0x28] sm:$0xff] }
  0x1b   :  { %244 = vmatpush.msra.mxu2 %v15863_v55  ;;  %289 = vmatpush.msra.mxu3 %v15848_v49  ;;  %v481_v46 = vand.u32 4294901760, %v480_v42 }
  0x1c   :  { %172 = vmatpush.msra.mxu1 %v171_v6  ;;  %102 = vmatpush.msra.mxu0 %v15866_v56  ;;  %v15996_v6 = vand.u32 4294901760, %v15381_v3 }
  0x1d   :  { %247 = vmatpush.msra.mxu2 %v15875_v60  ;;  %291 = vmatpush.msra.mxu3 %v15866_v56  ;;  %v482_v50 = vsub.f32 %v480_v42, %v481_v46  ;;  %v15384_v60 = vld [vmem:[%s19405_s2 + $0x38] sm:$0xff] }
  0x1e   :  { %178 = vmatpush.msra.mxu1 %v177_v15  ;;  %104 = vmatpush.msra.mxu0 %v15878_v61 }
  0x1f   :  { %250 = vmatpush.msra.mxu2 %v15887_v1  ;;  %293 = vmatpush.msra.mxu3 %v15878_v61  ;;  %v483_v53 = vand.u32 4294901760, %v482_v50  ;;  %v15981_v1 = vand.u32 4294901760, %v15383_v62 }
  0x20   :  { %313 = vmatpush.msrb.mxu0 %v127_v26  ;;  %184 = vmatpush.msra.mxu1 %v183_v32  ;;  %v15389_v32 = vld [vmem:[%s19405_s2 + $0x58] sm:$0xff] }
  0x21   :  { %253 = vmatpush.msra.mxu2 %v198_v5  ;;  %v15994_v5 = vand.u32 4294901760, %v15382_v2 }
  0x22   :  { %317 = vmatpush.msrb.mxu0 %v133_v27  ;;  %190 = vmatpush.msra.mxu1 %v189_v34  ;;  %v16012_v34 = vand.u32 4294901760, %v15389_v32 }
  0x23   :  { %v16000_v11 = vsub.f32 %v15382_v2, %v15994_v5 }
  0x24   :  { %321 = vmatpush.msrb.mxu0 %v139_v28  ;;  %196 = vmatpush.msra.mxu1 %v195_v36  ;;  %v16018_v36 = vsub.f32 %v15389_v32, %v16012_v34 }
  0x26   :  { %325 = vmatpush.msrb.mxu0 %v145_v29  ;;  %202 = vmatpush.msra.mxu1 %v201_v39  ;;  %v412_v29 = vld [vmem:[%s19405_s2 + $0x18] sm:$0xff]  ;;  %v16020_v39 = vand.u32 4294901760, %v15388_v35 }
  0x28   :  { %375 = vmatpush.msrb.mxu1 %v15743_v7  ;;  %329 = vmatpush.msrb.mxu0 %v151_v30  ;;  %v36_v7 = vlaneseq  ;;  %v436_v30 = vand.u32 4294901760, %v412_v29 }
  0x2a   :  { %377 = vmatpush.msrb.mxu1 %v15745_v8  ;;  %333 = vmatpush.msrb.mxu0 %v157_v37  ;;  %v37_v8 = vand.u32 127, %v36_v7  ;;  %v474_v37 = vsub.f32 %v412_v29, %v436_v30 }
  0x2b   :  { %437 = vmatpush.msrb.mxu2 %v436_v30 }
  0x2c   :  { %379 = vmatpush.msrb.mxu1 %v15747_v9  ;;  %337 = vmatpush.msrb.mxu0 %v163_v44  ;;  %v475_v41 = vand.u32 4294901760, %v474_v37  ;;  %v409_v44 = vld [vmem:[%s19405_s2] sm:$0xff] }
  0x2d   :  { %439 = vmatpush.msrb.mxu2 %v438_v38 }
  0x2e   :  { %381 = vmatpush.msrb.mxu1 %v15749_v10  ;;  %341 = vmatpush.msrb.mxu0 %v169_v51  ;;  %v19414_v10 = vmov 0.0   ;;  %v476_v45 = vsub.f32 %v474_v37, %v475_v41 }
  0x2f   :  { %441 = vmatpush.msrb.mxu2 %v440_v43 }
  0x30   :  { %383 = vmatpush.msrb.mxu1 %v15757_v13  ;;  %345 = vmatpush.msrb.mxu0 %v175_v59 }
  0x32   :  { %385 = vmatpush.msrb.mxu1 %v15759_v14  ;;  %349 = vmatpush.msrb.mxu0 %v181_v0 }
  0x34   :  { %387 = vmatpush.msrb.mxu1 %v15789_v24  ;;  %353 = vmatpush.msrb.mxu0 %v187_v4  ;;  %v15991_v4 = vsub.f32 %v15383_v62, %v15981_v1 }
  0x36   :  { %389 = vmatpush.msrb.mxu1 %v15791_v25  ;;  %357 = vmatpush.msrb.mxu0 %v193_v12  ;;  %v16004_v12 = vsub.f32 %v15381_v3, %v15996_v6 }
  0x38   :  { %391 = vmatpush.msrb.mxu1 %v15843_v47  ;;  %361 = vmatpush.msrb.mxu0 %v199_v21  ;;  %v486_v47 = vsub.f32 %v410_v40, %v440_v43 }
  0x3a   :  { %393 = vmatpush.msrb.mxu1 %v15846_v48  ;;  %v442_v48 = vand.u32 4294901760, %v409_v44  ;;  %v487_v51 = vand.u32 4294901760, %v486_v47 }
  0x3c   :  { %395 = vmatpush.msrb.mxu1 %v15848_v49  ;;  %v477_v49 = vand.u32 4294901760, %v476_v45  ;;  %v492_v52 = vsub.f32 %v409_v44, %v442_v48  ;;  %443 = vmatpush.msrb.mxu2 %v442_v48  ;;  %v488_v54 = vsub.f32 %v486_v47, %v487_v51  ;;  %v719_v44 = vand.u32 4294901760, %v16004_v12 }
  0x3e   :  { %397 = vmatpush.msrb.mxu1 %v15866_v56  ;;  %478 = vmatpush.msrb.mxu3 %v477_v49  ;;  %v493_v55 = vand.u32 4294901760, %v492_v52  ;;  %v489_v56 = vand.u32 4294901760, %v488_v54 }
  0x40   :  { %399 = vmatpush.msrb.mxu1 %v15878_v61  ;;  %484 = vmatpush.msrb.mxu3 %v483_v53  ;;  %v494_v57 = vsub.f32 %v492_v52, %v493_v55  ;;  %v15972_v61 = vand.u32 4294901760, %v15384_v60 }
  0x42   :  { %490 = vmatpush.msrb.mxu3 %v489_v56  ;;  %v495_v58 = vand.u32 4294901760, %v494_v57  ;;  %v15978_v0 = vsub.f32 %v15384_v60, %v15972_v61  ;;  %v720_v56 = vsub.f32 %v16004_v12, %v719_v44 }
  0x44   :  { %496 = vmatpush.msrb.mxu3 %v495_v58 }
  0x74   :  { %v42_v9 = vpop.permute.xlu0 %41 }
  0x75   :  { %vm46_vm2 = vcmp.eq.s32.totalorder %v37_v8, %v42_v9 }
  0x76   :  { %v15373_v13 = vsel %vm46_vm2, 1.0, %v19414_v10 }
  0x77   :  { %15375 = vmatmul.msk.f32.vlgmr.msra.gmra.mxu1 %vm65_vm1, %v15373_v13  ;;  %v67_v14 = vsel %vm65_vm1, %v15373_v13, 0 }
  0x78   :  { %v106_v17 = vsub.f32 %v67_v14, %v67_v14  ;;  %624 = vmatpush.msra.mxu1 %v436_v30 }
  0x7a   :  { %256 = vmatmul.f32.vlgmr.msra.gmra.mxu2 %v106_v17  ;;  %v107_v18 = vand.u32 4294901760, %v106_v17  ;;  %626 = vmatpush.msra.mxu1 %v438_v38 }
  0x7b   :  { %520 = vmatpush.msra.mxu2 %v474_v37  ;;  %v713_v37 = vand.u32 4294901760, %v16000_v11 }
  0x7c   :  { %297 = vmatmul.f32.vlgmr.msra.gmra.mxu3 %v107_v18  ;;  %v108_v20 = vsub.f32 %v106_v17, %v107_v18  ;;  %628 = vmatpush.msra.mxu1 %v440_v43  ;;  %v701_v17 = vand.u32 4294901760, %v15978_v0  ;;  %v15386_v18 = vld [vmem:[%s19405_s2 + $0x40] sm:$0xff] }
  0x7d   :  { %523 = vmatpush.msra.mxu2 %v480_v42  ;;  %554 = vmatpush.msra.mxu3 %v436_v30  ;;  %v714_v49 = vsub.f32 %v16000_v11, %v713_v37 }
  0x7e   :  { %v45_v19 = vpop.permute.xlu0 %44  ;;  %v109_v23 = vand.u32 4294901760, %v108_v20  ;;  %630 = vmatpush.msra.mxu1 %v442_v48  ;;  %v927_v20 = vand.u32 4294901760, %v16018_v36  ;;  %v702_v31 = vsub.f32 %v15978_v0, %v701_v17 }
  0x7f   :  { %vm47_vm3 = vcmp.eq.s32.totalorder %v37_v8, %v45_v19  ;;  %526 = vmatpush.msra.mxu2 %v486_v47  ;;  %556 = vmatpush.msra.mxu3 %v438_v38  ;;  %v15387_v8 = vld [vmem:[%s19405_s2 + $0x48] sm:$0xff] }
  0x80   :  { %v15374_v22 = vsel %vm47_vm3, 1.0, %v19414_v10  ;;  %110 = vmatmul.f32.vlgmr.msra.gmra.mxu0 %v109_v23  ;;  %v16028_v14 = vand.u32 4294901760, %v15387_v8  ;;  %v707_v23 = vand.u32 4294901760, %v15991_v4  ;;  %v928_v40 = vsub.f32 %v16018_v36, %v927_v20 }
  0x81   :  { %15376 = vmatmul.msk.f32.gmra.mxu1 %vm65_vm1, %v15374_v22  ;;  %v70_v24 = vsel %vm65_vm1, %v15374_v22, 0  ;;  %589 = vmatpush.msra.mxu0 %v475_v41 }
  0x82   :  { %v114_v25 = vsub.f32 %v70_v24, %v70_v24  ;;  %529 = vmatpush.msra.mxu2 %v492_v52  ;;  %558 = vmatpush.msra.mxu3 %v440_v43  ;;  %v16037_v24 = vsub.f32 %v15387_v8, %v16028_v14  ;;  %v708_v43 = vsub.f32 %v15991_v4, %v707_v23  ;;  %v929_v52 = vand.u32 4294901760, %v928_v40 }
  0x83   :  { %593 = vmatpush.msra.mxu0 %v481_v46 }
  0x84   :  { %261 = vmatmul.f32.gmra.mxu2 %v114_v25  ;;  %v115_v26 = vand.u32 4294901760, %v114_v25  ;;  %560 = vmatpush.msra.mxu3 %v442_v48  ;;  %v939_v41 = vand.u32 4294901760, %v16037_v24  ;;  %v703_v48 = vand.u32 4294901760, %v702_v31 }
  0x85   :  { %597 = vmatpush.msra.mxu0 %v487_v51 }
  0x86   :  { %303 = vmatmul.f32.gmra.mxu3 %v115_v26  ;;  %v116_v27 = vsub.f32 %v114_v25, %v115_v26  ;;  %v16039_v25 = vand.u32 4294901760, %v15386_v18  ;;  %v940_v53 = vsub.f32 %v16037_v24, %v939_v41 }
  0x87   :  { %601 = vmatpush.msra.mxu0 %v493_v55  ;;  %v709_v55 = vand.u32 4294901760, %v708_v43 }
  0x88   :  { %v117_v28 = vand.u32 4294901760, %v116_v27  ;;  %v16055_v45 = vsub.f32 %v15386_v18, %v16039_v25 }
  0x89   :  { %15379 = vmatmul.msk.f32.vlgmr.msrb.gmra.mxu1 %vm65_vm1, %v15373_v13 }
  0x8a   :  { %118 = vmatmul.f32.gmra.mxu0 %v117_v28  ;;  %780 = vmatpush.msrb.mxu1 %v15972_v61  ;;  %v945_v57 = vand.u32 4294901760, %v16055_v45 }
  0x8c   :  { %782 = vmatpush.msrb.mxu1 %v15981_v1  ;;  %v946_v32 = vsub.f32 %v16055_v45, %v945_v57 }
  0x8e   :  { %784 = vmatpush.msrb.mxu1 %v15994_v5 }
  0x90   :  { %786 = vmatpush.msrb.mxu1 %v15996_v6 }
  0x91   :  { %15380 = vmatmul.msk.f32.gmra.mxu1 %vm65_vm1, %v15374_v22 }
  0x92   :  { %15377 = vmatmul.msk.f32.vlgmr.msrb.gmra.mxu0 %vm65_vm1, %v15373_v13  ;;  %v16026_v13 = vsub.f32 %v15388_v35, %v16020_v39 }
  0x93   :  { %746 = vmatpush.msrb.mxu0 %v15978_v0 }
  0x94   :  { %v933_v28 = vand.u32 4294901760, %v16026_v13 }
  0x95   :  { %749 = vmatpush.msrb.mxu0 %v15991_v4 }
  0x96   :  { %v934_v46 = vsub.f32 %v16026_v13, %v933_v28 }
  0x97   :  { %752 = vmatpush.msrb.mxu0 %v16000_v11  ;;  %v1100_v11 = vld [vmem:[%s19406_s3 + $0x8] sm:$0xff] }
  0x98   :  { %v935_v60 = vand.u32 4294901760, %v934_v46 }
  0x99   :  { %755 = vmatpush.msrb.mxu0 %v16004_v12 }
  0x9a   :  { %15378 = vmatmul.msk.f32.gmra.mxu0 %vm65_vm1, %v15374_v22 }
  0xf4   :  { %v205_v59 = vpop.f32.mrf.mxu1 }
  0xfd   :  { %v111_v63 = vpop.f32.mrf.mxu0  ;;  %v257_v21 = vpop.f32.mrf.mxu2 }
  0xfe   :  { %v209_v15 = vpop.f32.mrf.mxu1  ;;  %v206_v16 = vadd.f32 %v205_v59, %v111_v63  ;;  %v715_v63 = vand.u32 4294901760, %v714_v49 }
  0xff   :  { %v298_v9 = vpop.f32.mrf.mxu3 }
 0x100   :  { %v258_v7 = vadd.f32 %v257_v21, %v206_v16  ;;  %v721_v21 = vand.u32 4294901760, %v720_v56 }
 0x102   :  { %v299_v22 = vadd.f32 %v298_v9, %v258_v7  ;;  %v947_v9 = vand.u32 4294901760, %v946_v32 }
 0x106   :  { %v402_v26 = vpop.f32.mrf.mxu1 }
 0x107   :  { %v119_v33 = vpop.f32.mrf.mxu0  ;;  %v262_v29 = vpop.f32.mrf.mxu2 }
 0x108   :  { %v210_v19 = vadd.f32 %v209_v15, %v119_v33  ;;  %v941_v15 = vand.u32 4294901760, %v940_v53 }
 0x109   :  { %v304_v50 = vpop.f32.mrf.mxu3 }
 0x10a   :  { %v263_v38 = vadd.f32 %v262_v29, %v210_v19 }
 0x10c   :  { %v305_v54 = vadd.f32 %v304_v50, %v263_v38  ;;  %v15396_v38 = vld [vmem:[%s19406_s3 + $0x38] sm:$0xff] }
 0x10d   :  { %v16228_v40 = vand.u32 4294901760, %v15396_v38 }
 0x10e   :  { %v406_v2 = vpop.f32.mrf.mxu1 }
 0x10f   :  { %v364_v27 = vpop.f32.mrf.mxu0  ;;  %19893 = vst [vmem:[#allocation21_spill] sm:$0xff] %v16228_v40 }
 0x110   :  { %v365_v30 = vadd.f32 %v364_v27, %v299_v22 }
 0x112   :  { %v403_v42 = vadd.f32 %v402_v26, %v365_v30 }
 0x114   :  { %v419_v47 = vsel %vm417_vm4, %v403_v42, 0  ;;  %v16238_v42 = vsub.f32 %v15396_v38, %v16228_v40 }
 0x115   :  { %v16064_v51 = vand.u32 4294901760, %v419_v47 }
 0x116   :  { %19894 = vst [vmem:[#allocation22_spill] sm:$0xff] %v16238_v42 }
 0x117   :  { %v16074_v58 = vsub.f32 %v419_v47, %v16064_v51  ;;  %v368_v59 = vpop.f32.mrf.mxu0  ;;  %498 = vmatmul.f32.vlgmr.msrb.gmra.mxu3 %v16064_v51  ;;  %603 = vmatmul.f32.vlgmr.msra.gmra.mxu0 %v16064_v51  ;;  %v15393_v47 = vld [vmem:[%s19406_s3 + $0x20] sm:$0xff] }
 0x118   :  { %v369_v62 = vadd.f32 %v368_v59, %v305_v54  ;;  %632 = vmatmul.f32.vlgmr.msra.gmra.mxu1 %v16064_v51  ;;  %704 = vmatpush.msrb.mxu3 %v703_v48  ;;  %v16259_v48 = vand.u32 4294901760, %v15393_v47 }
 0x119   :  { %v16080_v3 = vand.u32 4294901760, %v16074_v58  ;;  %889 = vmatpush.msra.mxu0 %v16012_v34  ;;  %930 = vmatpush.msra.mxu1 %v929_v52 }
 0x11a   :  { %v407_v16 = vadd.f32 %v406_v2, %v369_v62  ;;  %710 = vmatpush.msrb.mxu3 %v709_v55  ;;  %19898 = vst [vmem:[#allocation26_spill] sm:$0xff] %v16259_v48  ;;  %v16273_v50 = vsub.f32 %v15393_v47, %v16259_v48  ;;  %v15400_v62 = vld [vmem:[%s19406_s3 + $0x58] sm:$0xff]  ;;  %v15398_v2 = vld [vmem:[%s19406_s3 + $0x48] sm:$0xff] }
 0x11b   :  { %v447_v33 = vsub.f32 %v16074_v58, %v16080_v3  ;;  %891 = vmatpush.msra.mxu0 %v16020_v39  ;;  %936 = vmatpush.msra.mxu1 %v935_v60 }
 0x11c   :  { %v422_v35 = vsel %vm417_vm4, %v407_v16, 0  ;;  %716 = vmatpush.msrb.mxu3 %v715_v63  ;;  %19900 = vst [vmem:[#allocation28_spill] sm:$0xff] %v16273_v50  ;;  %v16300_v56 = vand.u32 4294901760, %v16273_v50  ;;  %v15399_v63 = vld [vmem:[%s19406_s3 + $0x50] sm:$0xff] }
 0x11d   :  { %v16088_v7 = vand.u32 4294901760, %v422_v35  ;;  %v448_v8 = vand.u32 4294901760, %v447_v33  ;;  %893 = vmatpush.msra.mxu0 %v16028_v14  ;;  %942 = vmatpush.msra.mxu1 %v941_v15  ;;  %v16326_v15 = vand.u32 4294901760, %v15400_v62  ;;  %v16328_v16 = vand.u32 4294901760, %v15399_v63 }
 0x11e   :  { %722 = vmatpush.msrb.mxu3 %v721_v21  ;;  %19904 = vst [vmem:[#allocation32_spill] sm:$0xff] %v16300_v56  ;;  %v1358_v60 = vsub.f32 %v16273_v50, %v16300_v56  ;;  %v16330_v21 = vand.u32 4294901760, %v15398_v2 }
 0x11f   :  { %v16092_v18 = vsub.f32 %v422_v35, %v16088_v7  ;;  %449 = vmatmul.f32.vlgmr.msrb.gmra.mxu2 %v448_v8  ;;  %502 = vmatmul.f32.gmra.mxu3 %v16088_v7  ;;  %19908 = vst [vmem:[#allocation36_spill] sm:$0xff] %v16326_v15  ;;  %v16336_v33 = vsub.f32 %v15400_v62, %v16326_v15 }
 0x120   :  { %607 = vmatmul.f32.gmra.mxu0 %v16088_v7  ;;  %636 = vmatmul.f32.gmra.mxu1 %v16088_v7  ;;  %19909 = vst [vmem:[#allocation37_spill] sm:$0xff] %v16328_v16  ;;  %v16333_v32 = vand.u32 4294901760, %v1358_v60  ;;  %v16340_v35 = vsub.f32 %v15399_v63, %v16328_v16 }
 0x121   :  { %v16098_v19 = vand.u32 4294901760, %v16092_v18  ;;  %663 = vmatpush.msrb.mxu2 %v15972_v61  ;;  %895 = vmatpush.msra.mxu0 %v16039_v25  ;;  %19910 = vst [vmem:[#allocation38_spill] sm:$0xff] %v16330_v21 }
 0x122   :  { %948 = vmatpush.msra.mxu1 %v947_v9  ;;  %19911 = vst [vmem:[#allocation39_spill] sm:$0xff] %v16333_v32 }
 0x123   :  { %v455_v22 = vsub.f32 %v16092_v18, %v16098_v19  ;;  %665 = vmatpush.msrb.mxu2 %v15981_v1  ;;  %19912 = vst [vmem:[#allocation40_spill] sm:$0xff] %v16336_v33 }
 0x124   :  { %19913 = vst [vmem:[#allocation41_spill] sm:$0xff] %v16340_v35 }
 0x125   :  { %v456_v26 = vand.u32 4294901760, %v455_v22  ;;  %667 = vmatpush.msrb.mxu2 %v15994_v5 }
 0x127   :  { %457 = vmatmul.f32.gmra.mxu2 %v456_v26  ;;  %564 = vmatmul.f32.vlgmr.msra.gmra.mxu3 %v16080_v3 }
 0x128   :  { %758 = vmatmul.f32.vlgmr.msrb.gmra.mxu0 %v16074_v58  ;;  %790 = vmatmul.f32.vlgmr.msrb.gmra.mxu1 %v16080_v3 }
 0x129   :  { %669 = vmatpush.msrb.mxu2 %v15996_v6  ;;  %850 = vmatpush.msra.mxu3 %v15972_v61  ;;  %v1102_v61 = vld [vmem:[%s19406_s3 + $0x18] sm:$0xff] }
 0x12a   :  { %1041 = vmatpush.msrb.mxu0 %v927_v20  ;;  %1076 = vmatpush.msrb.mxu1 %v16012_v34  ;;  %v16146_v0 = vand.u32 4294901760, %v1102_v61 }
 0x12b   :  { %852 = vmatpush.msra.mxu3 %v15981_v1  ;;  %v1101_v1 = vld [vmem:[%s19406_s3 + $0x10] sm:$0xff] }
 0x12c   :  { %1045 = vmatpush.msrb.mxu0 %v933_v28  ;;  %1078 = vmatpush.msrb.mxu1 %v16020_v39  ;;  %19877 = vst [vmem:[#allocation5_spill] sm:$0xff] %v16146_v0  ;;  %v16152_v4 = vand.u32 4294901760, %v1101_v1 }
 0x12d   :  { %854 = vmatpush.msra.mxu3 %v15994_v5  ;;  %v16157_v5 = vsub.f32 %v1102_v61, %v16146_v0 }
 0x12e   :  { %1049 = vmatpush.msrb.mxu0 %v939_v41  ;;  %1080 = vmatpush.msrb.mxu1 %v16028_v14  ;;  %19878 = vst [vmem:[#allocation6_spill] sm:$0xff] %v16152_v4  ;;  %v15395_v41 = vld [vmem:[%s19406_s3 + $0x30] sm:$0xff] }
 0x12f   :  { %532 = vmatmul.f32.vlgmr.msra.gmra.mxu2 %v16074_v58  ;;  %570 = vmatmul.f32.gmra.mxu3 %v16098_v19  ;;  %19879 = vst [vmem:[#allocation7_spill] sm:$0xff] %v16157_v5  ;;  %v16168_v12 = vand.u32 4294901760, %v16157_v5  ;;  %v16240_v43 = vand.u32 4294901760, %v15395_v41 }
 0x130   :  { %763 = vmatmul.f32.gmra.mxu0 %v16092_v18  ;;  %796 = vmatmul.f32.gmra.mxu1 %v16098_v19 }
 0x131   :  { %815 = vmatpush.msra.mxu2 %v701_v17  ;;  %856 = vmatpush.msra.mxu3 %v15996_v6  ;;  %v16160_v6 = vsub.f32 %v1101_v1, %v16152_v4  ;;  %19881 = vst [vmem:[#allocation9_spill] sm:$0xff] %v16168_v12 }
 0x132   :  { %1053 = vmatpush.msrb.mxu0 %v945_v57  ;;  %1082 = vmatpush.msrb.mxu1 %v16039_v25  ;;  %19895 = vst [vmem:[#allocation23_spill] sm:$0xff] %v16240_v43 }
 0x133   :  { %819 = vmatpush.msra.mxu2 %v707_v23  ;;  %19880 = vst [vmem:[#allocation8_spill] sm:$0xff] %v16160_v6 }
 0x135   :  { %823 = vmatpush.msra.mxu2 %v713_v37 }
 0x137   :  { %537 = vmatmul.f32.gmra.mxu2 %v16092_v18  ;;  %724 = vmatmul.f32.vlgmr.msrb.gmra.mxu3 %v16064_v51 }
 0x138   :  { %901 = vmatmul.f32.vlgmr.msra.gmra.mxu0 %v448_v8  ;;  %950 = vmatmul.f32.vlgmr.msra.gmra.mxu1 %v16064_v51 }
 0x139   :  { %827 = vmatpush.msra.mxu2 %v719_v44  ;;  %1006 = vmatpush.msrb.mxu3 %v16012_v34  ;;  %v16170_v34 = vand.u32 4294901760, %v1100_v11  ;;  %v15394_v44 = vld [vmem:[%s19406_s3 + $0x28] sm:$0xff] }
 0x13a   :  { %1279 = vmatpush.msra.mxu1 %v16146_v0  ;;  %1248 = vmatpush.msra.mxu0 %v16168_v12  ;;  %v16251_v46 = vand.u32 4294901760, %v15394_v44 }
 0x13b   :  { %1008 = vmatpush.msrb.mxu3 %v16020_v39  ;;  %19882 = vst [vmem:[#allocation10_spill] sm:$0xff] %v16170_v34  ;;  %v1099_v39 = vld [vmem:[%s19406_s3] sm:$0xff] }
 0x13c   :  { %1281 = vmatpush.msra.mxu1 %v16152_v4  ;;  %v16185_v17 = vand.u32 4294901760, %v1099_v39  ;;  %19897 = vst [vmem:[#allocation25_spill] sm:$0xff] %v16251_v46  ;;  %v16267_v49 = vsub.f32 %v15394_v44, %v16251_v46 }
 0x13d   :  { %1010 = vmatpush.msrb.mxu3 %v16028_v14  ;;  %v1150_v14 = vsub.f32 %v16157_v5, %v16168_v12 }
 0x13e   :  { %19885 = vst [vmem:[#allocation13_spill] sm:$0xff] %v16185_v17  ;;  %1283 = vmatpush.msra.mxu1 %v16170_v34  ;;  %v16292_v54 = vand.u32 4294901760, %v16267_v49 }
 0x13f   :  { %675 = vmatmul.f32.vlgmr.msrb.gmra.mxu2 %v448_v8  ;;  %728 = vmatmul.f32.gmra.mxu3 %v16088_v7  ;;  %v16192_v23 = vand.u32 4294901760, %v1150_v14  ;;  %19899 = vst [vmem:[#allocation27_spill] sm:$0xff] %v16267_v49  ;;  %v16348_v8 = vsub.f32 %v15398_v2, %v16330_v21 }
 0x140   :  { %909 = vmatmul.f32.gmra.mxu0 %v456_v26  ;;  %954 = vmatmul.f32.gmra.mxu1 %v16088_v7  ;;  %19903 = vst [vmem:[#allocation31_spill] sm:$0xff] %v16292_v54 }
 0x141   :  { %972 = vmatpush.msrb.mxu2 %v16018_v36  ;;  %1012 = vmatpush.msrb.mxu3 %v16039_v25  ;;  %v16173_v36 = vand.u32 4294901760, %v16160_v6  ;;  %19886 = vst [vmem:[#allocation14_spill] sm:$0xff] %v16192_v23  ;;  %v16198_v25 = vsub.f32 %v1099_v39, %v16185_v17 }
 0x142   :  { %1285 = vmatpush.msra.mxu1 %v16185_v17  ;;  %19915 = vst [vmem:[#allocation43_spill] sm:$0xff] %v16348_v8 }
 0x143   :  { %975 = vmatpush.msrb.mxu2 %v16026_v13  ;;  %19883 = vst [vmem:[#allocation11_spill] sm:$0xff] %v16173_v36  ;;  %v16183_v13 = vsub.f32 %v1100_v11, %v16170_v34  ;;  %v1156_v20 = vsub.f32 %v16160_v6, %v16173_v36  ;;  %v16209_v29 = vand.u32 4294901760, %v16198_v25  ;;  %1252 = vmatpush.msra.mxu0 %v16173_v36  ;;  %v16375_v11 = vand.u32 4294901760, %v16348_v8 }
 0x144   :  { %19888 = vst [vmem:[#allocation16_spill] sm:$0xff] %v16198_v25 }
 0x145   :  { %978 = vmatpush.msrb.mxu2 %v16037_v24  ;;  %19884 = vst [vmem:[#allocation12_spill] sm:$0xff] %v16183_v13  ;;  %v16195_v24 = vand.u32 4294901760, %v16183_v13  ;;  %v16202_v27 = vand.u32 4294901760, %v1156_v20  ;;  %v1168_v31 = vsub.f32 %v16198_v25, %v16209_v29  ;;  %v1585_v14 = vsub.f32 %v16348_v8, %v16375_v11 }
 0x146   :  { %19890 = vst [vmem:[#allocation18_spill] sm:$0xff] %v16209_v29 }
 0x147   :  { %683 = vmatmul.f32.gmra.mxu2 %v456_v26  ;;  %858 = vmatmul.f32.vlgmr.msra.gmra.mxu3 %v16064_v51  ;;  %19887 = vst [vmem:[#allocation15_spill] sm:$0xff] %v16195_v24  ;;  %v1162_v28 = vsub.f32 %v16183_v13, %v16195_v24  ;;  %v16220_v37 = vand.u32 4294901760, %v1168_v31 }
 0x148   :  { %1055 = vmatmul.f32.vlgmr.msrb.gmra.mxu0 %v16064_v51  ;;  %1084 = vmatmul.f32.vlgmr.msrb.gmra.mxu1 %v16064_v51  ;;  %19889 = vst [vmem:[#allocation17_spill] sm:$0xff] %v16202_v27 }
 0x149   :  { %981 = vmatpush.msrb.mxu2 %v16055_v45  ;;  %1152 = vmatpush.msra.mxu3 %v16192_v23  ;;  %v16214_v30 = vand.u32 4294901760, %v1162_v28  ;;  %19892 = vst [vmem:[#allocation20_spill] sm:$0xff] %v16220_v37  ;;  %v16248_v45 = vsub.f32 %v15395_v41, %v16240_v43  ;;  %v16391_v28 = vand.u32 4294901760, %v1585_v14 }
 0x14a   :  { %1256 = vmatpush.msra.mxu0 %v16195_v24  ;;  %1409 = vmatpush.msrb.mxu1 %v16228_v40  ;;  %19920 = vst [vmem:[#allocation48_spill] sm:$0xff] %v16375_v11 }
 0x14b   :  { %1158 = vmatpush.msra.mxu3 %v16202_v27  ;;  %19891 = vst [vmem:[#allocation19_spill] sm:$0xff] %v16214_v30  ;;  %v16284_v52 = vand.u32 4294901760, %v16248_v45 }
 0x14c   :  { %1260 = vmatpush.msra.mxu0 %v16209_v29  ;;  %19896 = vst [vmem:[#allocation24_spill] sm:$0xff] %v16248_v45  ;;  %1411 = vmatpush.msrb.mxu1 %v16240_v43 }
 0x14d   :  { %1164 = vmatpush.msra.mxu3 %v16214_v30  ;;  %19902 = vst [vmem:[#allocation30_spill] sm:$0xff] %v16284_v52  ;;  %v1346_v55 = vsub.f32 %v16248_v45, %v16284_v52 }
 0x14e   :  { %1380 = vmatpush.msrb.mxu0 %v16238_v42  ;;  %1413 = vmatpush.msrb.mxu1 %v16251_v46  ;;  %19923 = vst [vmem:[#allocation51_spill] sm:$0xff] %v16391_v28 }
 0x14f   :  { %829 = vmatmul.f32.vlgmr.msra.gmra.mxu2 %v16064_v51  ;;  %862 = vmatmul.f32.gmra.mxu3 %v16088_v7  ;;  %v16279_v51 = vand.u32 4294901760, %v16238_v42  ;;  %v16308_v59 = vand.u32 4294901760, %v1346_v55 }
 0x150   :  { %1059 = vmatmul.f32.gmra.mxu0 %v16088_v7  ;;  %1088 = vmatmul.f32.gmra.mxu1 %v16088_v7 }
 0x151   :  { %1119 = vmatpush.msra.mxu2 %v16146_v0  ;;  %1170 = vmatpush.msra.mxu3 %v16220_v37  ;;  %19901 = vst [vmem:[#allocation29_spill] sm:$0xff] %v16279_v51  ;;  %v1340_v53 = vsub.f32 %v16238_v42, %v16279_v51 }
 0x152   :  { %1383 = vmatpush.msrb.mxu0 %v16248_v45  ;;  %1415 = vmatpush.msrb.mxu1 %v16259_v48  ;;  %19906 = vst [vmem:[#allocation34_spill] sm:$0xff] %v16308_v59 }
 0x153   :  { %1121 = vmatpush.msra.mxu2 %v16152_v4  ;;  %v16303_v57 = vand.u32 4294901760, %v1340_v53 }
 0x154   :  { %1386 = vmatpush.msrb.mxu0 %v16267_v49 }
 0x155   :  { %1123 = vmatpush.msra.mxu2 %v16170_v34  ;;  %19905 = vst [vmem:[#allocation33_spill] sm:$0xff] %v16303_v57 }
 0x156   :  { %1389 = vmatpush.msrb.mxu0 %v16273_v50 }
 0x157   :  { %833 = vmatmul.f32.gmra.mxu2 %v16088_v7  ;;  %1016 = vmatmul.f32.vlgmr.msrb.gmra.mxu3 %v16080_v3  ;;  %v16345_v7 = vand.u32 4294901760, %v16336_v33 }
 0x158   :  { %1125 = vmatpush.msra.mxu2 %v16185_v17  ;;  %1219 = vmatpush.msrb.mxu3 %v16146_v0 }
 0x159   :  { %1262 = vmatmul.f32.vlgmr.msra.gmra.mxu0 %v19414_v10  ;;  %1287 = vmatmul.f32.vlgmr.msra.gmra.mxu1 %v19414_v10  ;;  %19914 = vst [vmem:[#allocation42_spill] sm:$0xff] %v16345_v7  ;;  %v1573_v9 = vsub.f32 %v16336_v33, %v16345_v7 }
 0x15a   :  { %1221 = vmatpush.msrb.mxu3 %v16152_v4  ;;  %1542 = vmatpush.msra.mxu0 %v16326_v15 }
 0x15b   :  { %v16366_v26 = vand.u32 4294901760, %v1573_v9 }
 0x15c   :  { %1223 = vmatpush.msrb.mxu3 %v16170_v34  ;;  %1544 = vmatpush.msra.mxu0 %v16328_v16 }
 0x15d   :  { %19918 = vst [vmem:[#allocation46_spill] sm:$0xff] %v16366_v26  ;;  %1575 = vmatpush.msra.mxu1 %v16366_v26 }
 0x15e   :  { %1225 = vmatpush.msrb.mxu3 %v16185_v17  ;;  %1546 = vmatpush.msra.mxu0 %v16330_v21 }
 0x15f   :  { %984 = vmatmul.f32.vlgmr.msrb.gmra.mxu2 %v16074_v58  ;;  %1022 = vmatmul.f32.gmra.mxu3 %v16098_v19  ;;  %v1352_v58 = vsub.f32 %v16267_v49, %v16292_v54  ;;  %v16360_v19 = vand.u32 4294901760, %v16340_v35 }
 0x160   :  { %1190 = vmatpush.msrb.mxu2 %v16157_v5 }
 0x161   :  { %1392 = vmatmul.f32.vlgmr.msrb.gmra.mxu0 %v19414_v10  ;;  %1419 = vmatmul.f32.vlgmr.msrb.gmra.mxu1 %v19414_v10  ;;  %v16324_v3 = vand.u32 4294901760, %v1352_v58  ;;  %19916 = vst [vmem:[#allocation44_spill] sm:$0xff] %v16360_v19  ;;  %v1579_v61 = vsub.f32 %v16340_v35, %v16360_v19 }
 0x162   :  { %1193 = vmatpush.msrb.mxu2 %v16160_v6 }
 0x163   :  { %19907 = vst [vmem:[#allocation35_spill] sm:$0xff] %v16324_v3  ;;  %v16380_v39 = vand.u32 4294901760, %v1579_v61 }
 0x164   :  { %1196 = vmatpush.msrb.mxu2 %v16183_v13 }
 0x165   :  { %19921 = vst [vmem:[#allocation49_spill] sm:$0xff] %v16380_v39  ;;  %1581 = vmatpush.msra.mxu1 %v16380_v39  ;;  %v1728_v39 = vld [vmem:[%s19410_s7 + $0x18] sm:$0xff] }
 0x166   :  { %1199 = vmatpush.msrb.mxu2 %v16198_v25 }
 0x167   :  { %989 = vmatmul.f32.gmra.mxu2 %v16092_v18  ;;  %1172 = vmatmul.f32.vlgmr.msra.gmra.mxu3 %v19414_v10  ;;  %v15397_v18 = vld [vmem:[%s19406_s3 + $0x40] sm:$0xff] }
 0x168   :  { %1342 = vmatpush.msra.mxu3 %v16303_v57  ;;  %v16362_v22 = vand.u32 4294901760, %v15397_v18  ;;  %1587 = vmatpush.msra.mxu1 %v16391_v28 }
 0x16a   :  { %1348 = vmatpush.msra.mxu3 %v16308_v59  ;;  %19917 = vst [vmem:[#allocation45_spill] sm:$0xff] %v16362_v22  ;;  %v16371_v1 = vsub.f32 %v15397_v18, %v16362_v22  ;;  %1548 = vmatpush.msra.mxu0 %v16362_v22 }
 0x16b   :  { %1554 = vmatmul.f32.vlgmr.msra.gmra.mxu0 %v19414_v10 }
 0x16c   :  { %1354 = vmatpush.msra.mxu3 %v16324_v3  ;;  %19919 = vst [vmem:[#allocation47_spill] sm:$0xff] %v16371_v1  ;;  %v16386_v20 = vand.u32 4294901760, %v16371_v1  ;;  %1671 = vmatpush.msrb.mxu0 %v16345_v7 }
 0x16e   :  { %1360 = vmatpush.msra.mxu3 %v16333_v32  ;;  %19922 = vst [vmem:[#allocation50_spill] sm:$0xff] %v16386_v20  ;;  %v1591_v31 = vsub.f32 %v16371_v1, %v16386_v20  ;;  %1675 = vmatpush.msrb.mxu0 %v16360_v19 }
 0x16f   :  { %1131 = vmatmul.f32.vlgmr.msra.gmra.mxu2 %v19414_v10  ;;  %1229 = vmatmul.f32.vlgmr.msrb.gmra.mxu3 %v19414_v10 }
 0x170   :  { %1309 = vmatpush.msra.mxu2 %v16228_v40  ;;  %1469 = vmatpush.msrb.mxu3 %v16228_v40  ;;  %v16400_v38 = vand.u32 4294901760, %v1591_v31 }
 0x171   :  { %1679 = vmatpush.msrb.mxu0 %v16375_v11 }
 0x172   :  { %1311 = vmatpush.msra.mxu2 %v16240_v43  ;;  %1471 = vmatpush.msrb.mxu3 %v16240_v43  ;;  %19924 = vst [vmem:[#allocation52_spill] sm:$0xff] %v16400_v38 }
 0x173   :  { %1593 = vmatpush.msra.mxu1 %v16400_v38  ;;  %1683 = vmatpush.msrb.mxu0 %v16386_v20 }
 0x174   :  { %1313 = vmatpush.msra.mxu2 %v16251_v46  ;;  %1473 = vmatpush.msrb.mxu3 %v16251_v46 }
 0x175   :  { %1595 = vmatmul.f32.vlgmr.msra.gmra.mxu1 %v19414_v10  ;;  %1685 = vmatmul.f32.vlgmr.msrb.gmra.mxu0 %v19414_v10 }
 0x176   :  { %1315 = vmatpush.msra.mxu2 %v16259_v48  ;;  %1475 = vmatpush.msrb.mxu3 %v16259_v48 }
 0x177   :  { %1202 = vmatmul.f32.vlgmr.msrb.gmra.mxu2 %v19414_v10  ;;  %1362 = vmatmul.f32.vlgmr.msra.gmra.mxu3 %v19414_v10 }
 0x178   :  { %1438 = vmatpush.msrb.mxu2 %v16279_v51  ;;  %1642 = vmatpush.msra.mxu3 %v16326_v15 }
 0x179   :  { %1702 = vmatpush.msrb.mxu1 %v16326_v15 }
 0x17a   :  { %1442 = vmatpush.msrb.mxu2 %v16284_v52  ;;  %1644 = vmatpush.msra.mxu3 %v16328_v16 }
 0x17b   :  { %1704 = vmatpush.msrb.mxu1 %v16328_v16 }
 0x17c   :  { %1446 = vmatpush.msrb.mxu2 %v16292_v54  ;;  %1646 = vmatpush.msra.mxu3 %v16330_v21 }
 0x17d   :  { %1706 = vmatpush.msrb.mxu1 %v16330_v21 }
 0x17e   :  { %1450 = vmatpush.msrb.mxu2 %v16300_v56  ;;  %1648 = vmatpush.msra.mxu3 %v16362_v22 }
 0x17f   :  { %1321 = vmatmul.f32.vlgmr.msra.gmra.mxu2 %v19414_v10  ;;  %1477 = vmatmul.f32.vlgmr.msrb.gmra.mxu3 %v19414_v10 }
 0x180   :  { %1613 = vmatpush.msra.mxu2 %v16336_v33  ;;  %1708 = vmatpush.msrb.mxu1 %v16362_v22 }
 0x181   :  { %1710 = vmatmul.f32.vlgmr.msrb.gmra.mxu1 %v19414_v10 }
 0x182   :  { %1616 = vmatpush.msra.mxu2 %v16340_v35 }
 0x184   :  { %1619 = vmatpush.msra.mxu2 %v16348_v8 }
 0x186   :  { %1622 = vmatpush.msra.mxu2 %v16371_v1 }
 0x187   :  { %1452 = vmatmul.f32.vlgmr.msrb.gmra.mxu2 %v19414_v10  ;;  %1652 = vmatmul.f32.vlgmr.msra.gmra.mxu3 %v19414_v10 }
 0x18f   :  { %1625 = vmatmul.f32.vlgmr.msra.gmra.mxu2 %v19414_v10 }
 0x194   :  { %v604_v53 = vpop.f32.mrf.mxu0 }
 0x195   :  { %v16435_v60 = vpop.f32.mrf.mxu1 }
 0x19a   :  { %v499_v41 = vpop.f32.mrf.mxu3 }
 0x19d   :  { %v16437_v62 = vpop.f32.mrf.mxu0  ;;  %v16441_v9 = vpop.f32.mrf.mxu1 }
 0x19e   :  { %19927 = vst [vmem:[#allocation55_spill] sm:$0xff] %v16437_v62 }
 0x19f   :  { %19929 = vst [vmem:[#allocation57_spill] sm:$0xff] %v16441_v9 }
 0x1a2   :  { %v450_v44 = vpop.f32.mrf.mxu2  ;;  %v16431_v47 = vpop.f32.mrf.mxu3 }
 0x1a3   :  { %19925 = vst [vmem:[#allocation53_spill] sm:$0xff] %v16431_v47 }
 0x1a5   :  { %v16445_v14 = vpop.f32.mrf.mxu0  ;;  %v16447_v31 = vpop.f32.mrf.mxu1 }
 0x1aa   :  { %v16433_v55 = vpop.f32.mrf.mxu2  ;;  %v565_v58 = vpop.f32.mrf.mxu3 }
 0x1ab   :  { %19926 = vst [vmem:[#allocation54_spill] sm:$0xff] %v16433_v55 }
 0x1ad   :  { %v16451_v55 = vpop.f32.mrf.mxu0  ;;  %v16453_v1 = vpop.f32.mrf.mxu1 }
 0x1ae   :  { %19932 = vst [vmem:[#allocation60_spill] sm:$0xff] %v16451_v55 }
 0x1af   :  { %19933 = vst [vmem:[#allocation61_spill] sm:$0xff] %v16453_v1 }
 0x1b2   :  { %v533_v63 = vpop.f32.mrf.mxu2  ;;  %v16439_v2 = vpop.f32.mrf.mxu3 }
 0x1b3   :  { %19928 = vst [vmem:[#allocation56_spill] sm:$0xff] %v16439_v2 }
 0x1b5   :  { %v16459_v2 = vpop.f32.mrf.mxu0  ;;  %v16465_v35 = vpop.f32.mrf.mxu1 }
 0x1ba   :  { %v16443_v18 = vpop.f32.mrf.mxu2  ;;  %v725_v61 = vpop.f32.mrf.mxu3 }
 0x1bb   :  { %19930 = vst [vmem:[#allocation58_spill] sm:$0xff] %v16443_v18 }
 0x1bd   :  { %v16467_v20 = vpop.f32.mrf.mxu0  ;;  %v16473_v55 = vpop.f32.mrf.mxu1 }
 0x1be   :  { %19936 = vst [vmem:[#allocation64_spill] sm:$0xff] %v16467_v20  ;;  %v15455_v20 = vld [vmem:[%s19407_s4] ss:$0 sm:$0xff] }
 0x1bf   :  { %19938 = vst [vmem:[#allocation66_spill] sm:$0xff] %v16473_v55  ;;  %v451_v54 = vadd.f32 %v15455_v20, %v450_v44  ;;  %v16498_v20 = vand.u32 4294901760, %v1728_v39 }
 0x1c1   :  { %v500_v38 = vadd.f32 %v499_v41, %v451_v54  ;;  %19943 = vst [vmem:[#allocation71_spill] sm:$0xff] %v16498_v20  ;;  %v1727_v54 = vld [vmem:[%s19410_s7 + $0x10] sm:$0xff]  ;;  %1742 = vmatpush.msrb.mxu2 %v16498_v20  ;;  %1842 = vmatpush.msra.mxu1 %v16498_v20 }
 0x1c2   :  { %v676_v10 = vpop.f32.mrf.mxu2  ;;  %v16449_v47 = vpop.f32.mrf.mxu3 }
 0x1c3   :  { %19931 = vst [vmem:[#allocation59_spill] sm:$0xff] %v16449_v47  ;;  %v534_v52 = vadd.f32 %v533_v63, %v500_v38  ;;  %v16504_v38 = vand.u32 4294901760, %v1727_v54 }
 0x1c5   :  { %v16481_v56 = vpop.f32.mrf.mxu1  ;;  %19944 = vst [vmem:[#allocation72_spill] sm:$0xff] %v16504_v38  ;;  %1744 = vmatpush.msrb.mxu2 %v16504_v38  ;;  %1844 = vmatpush.msra.mxu1 %v16504_v38 }
 0x1ca   :  { %v16455_v62 = vpop.f32.mrf.mxu2  ;;  %v16457_v8 = vpop.f32.mrf.mxu3 }
 0x1cb   :  { %19934 = vst [vmem:[#allocation62_spill] sm:$0xff] %v16455_v62  ;;  %v16477_v62 = vpop.f32.mrf.mxu0 }
 0x1cd   :  { %v16490_v7 = vpop.f32.mrf.mxu1 }
 0x1ce   :  { %19942 = vst [vmem:[#allocation70_spill] sm:$0xff] %v16490_v7 }
 0x1d2   :  { %v16461_v9 = vpop.f32.mrf.mxu2  ;;  %v16463_v18 = vpop.f32.mrf.mxu3 }
 0x1d3   :  { %19935 = vst [vmem:[#allocation63_spill] sm:$0xff] %v16463_v18 }
 0x1da   :  { %v16469_v33 = vpop.f32.mrf.mxu2  ;;  %v16471_v47 = vpop.f32.mrf.mxu3 }
 0x1db   :  { %19937 = vst [vmem:[#allocation65_spill] sm:$0xff] %v16469_v33  ;;  %v16488_v33 = vpop.f32.mrf.mxu0 }
 0x1dc   :  { %19941 = vst [vmem:[#allocation69_spill] sm:$0xff] %v16488_v33  ;;  %v1288_v33 = vpop.f32.mrf.mxu1 }
 0x1e2   :  { %v16475_v1 = vpop.f32.mrf.mxu2  ;;  %v16479_v11 = vpop.f32.mrf.mxu3 }
 0x1e3   :  { %19939 = vst [vmem:[#allocation67_spill] sm:$0xff] %v16479_v11  ;;  %v1263_v22 = vpop.f32.mrf.mxu0  ;;  %v15457_v11 = vld [vmem:[%s19407_s4 + $0x1] ss:$0 sm:$0xff] }
 0x1e4   :  { %v677_v44 = vadd.f32 %v15457_v11, %v676_v10  ;;  %v1726_v10 = vld [vmem:[%s19410_s7 + $0x8] sm:$0xff]  ;;  %v16520_v11 = vsub.f32 %v1727_v54, %v16504_v38 }
 0x1e6   :  { %19948 = vst [vmem:[#allocation76_spill] sm:$0xff] %v16520_v11  ;;  %v16531_v63 = vand.u32 4294901760, %v16520_v11 }
 0x1e8   :  { %19949 = vst [vmem:[#allocation77_spill] sm:$0xff] %v16531_v63 }
 0x1ea   :  { %v16483_v19 = vpop.f32.mrf.mxu2  ;;  %v1173_v18 = vpop.f32.mrf.mxu3 }
 0x1eb   :  { %19940 = vst [vmem:[#allocation68_spill] sm:$0xff] %v16483_v19  ;;  %v566_v19 = vadd.f32 %v565_v58, %v534_v52  ;;  %v16507_v52 = vsub.f32 %v1728_v39, %v16498_v20  ;;  %v726_v39 = vadd.f32 %v725_v61, %v677_v44 }
 0x1ed   :  { %19945 = vst [vmem:[#allocation73_spill] sm:$0xff] %v16507_v52  ;;  %v605_v41 = vadd.f32 %v604_v53, %v566_v19  ;;  %1813 = vmatpush.msra.mxu0 %v16507_v52 }
 0x1ef   :  { %v16540_v61 = vadd.f32 %v16435_v60, %v605_v41  ;;  %1816 = vmatpush.msra.mxu0 %v16520_v11 }
 0x1f1   :  { %19952 = vst [vmem:[#allocation80_spill] sm:$0xff] %v16540_v61 }
 0x1f2   :  { %v1132_v55 = vpop.f32.mrf.mxu2  ;;  %v1230_v28 = vpop.f32.mrf.mxu3 }
 0x1f3   :  { %v1174_v51 = vadd.f32 %v1173_v18, %v1132_v55 }
 0x1fa   :  { %v1203_v21 = vpop.f32.mrf.mxu2  ;;  %v1363_v19 = vpop.f32.mrf.mxu3 }
 0x1fb   :  { %v1204_v7 = vadd.f32 %v1203_v21, %v1174_v51  ;;  %v16515_v51 = vand.u32 4294901760, %v16507_v52  ;;  %v16517_v21 = vand.u32 4294901760, %v1726_v10 }
 0x1fd   :  { %v1231_v55 = vadd.f32 %v1230_v28, %v1204_v7  ;;  %19946 = vst [vmem:[#allocation74_spill] sm:$0xff] %v16515_v51  ;;  %v1725_v7 = vld [vmem:[%s19410_s7] sm:$0xff]  ;;  %v1393_v28 = vpop.f32.mrf.mxu0  ;;  %v1773_v53 = vsub.f32 %v16507_v52, %v16515_v51  ;;  %1746 = vmatpush.msrb.mxu2 %v16517_v21  ;;  %1846 = vmatpush.msra.mxu1 %v16517_v21 }
 0x1fe   :  { %19947 = vst [vmem:[#allocation75_spill] sm:$0xff] %v16517_v21  ;;  %v16533_v18 = vand.u32 4294901760, %v1725_v7  ;;  %v1779_v52 = vsub.f32 %v16520_v11, %v16531_v63 }
 0x1ff   :  { %v1264_v58 = vadd.f32 %v1263_v22, %v1231_v55  ;;  %v16536_v22 = vsub.f32 %v1726_v10, %v16517_v21  ;;  %v16543_v55 = vand.u32 4294901760, %v1773_v53  ;;  %v1420_v53 = vpop.f32.mrf.mxu1 }
 0x200   :  { %19950 = vst [vmem:[#allocation78_spill] sm:$0xff] %v16533_v18  ;;  %1748 = vmatpush.msrb.mxu2 %v16533_v18  ;;  %v16552_v10 = vsub.f32 %v1725_v7, %v16533_v18  ;;  %1848 = vmatpush.msra.mxu1 %v16533_v18  ;;  %v16560_v11 = vand.u32 4294901760, %v1779_v52 }
 0x201   :  { %19951 = vst [vmem:[#allocation79_spill] sm:$0xff] %v16536_v22  ;;  %v1289_v44 = vadd.f32 %v1288_v33, %v1264_v58  ;;  %v16549_v26 = vand.u32 4294901760, %v16536_v22  ;;  %v760_v33 = vadd.f32 %v16445_v14, %v726_v39  ;;  %v19956_v58 = vmov 0.0   ;;  %1775 = vmatpush.msrb.mxu3 %v16543_v55  ;;  %1819 = vmatpush.msra.mxu0 %v16536_v22 }
 0x202   :  { %v1322_v54 = vpop.f32.mrf.mxu2  ;;  %19953 = vst [vmem:[#allocation81_spill] sm:$0xff] %v16543_v55  ;;  %1754 = vmatmul.f32.vlgmr.msrb.gmra.mxu2 %v19956_v58  ;;  %1852 = vmatmul.f32.vlgmr.msra.gmra.mxu1 %v19956_v58  ;;  %v16565_v16 = vand.u32 4294901760, %v16552_v10 }
 0x203   :  { %19954 = vst [vmem:[#allocation82_spill] sm:$0xff] %v16549_v26  ;;  %v1486_v60 = vadd.f32 %v1289_v44, %v16540_v61  ;;  %v1364_v41 = vadd.f32 %v1363_v19, %v1322_v54  ;;  %v1785_v7 = vsub.f32 %v16536_v22, %v16549_v26  ;;  %1871 = vmatpush.msra.mxu2 %v16515_v51  ;;  %v1724_v19 = vld [vmem:[%s19409_s6 + $0x18] sm:$0xff] }
 0x204   :  { %19955 = vst [vmem:[#allocation83_spill] sm:$0xff] %v16552_v10  ;;  %1781 = vmatpush.msrb.mxu3 %v16560_v11  ;;  %v1791_v44 = vsub.f32 %v16552_v10, %v16565_v16  ;;  %v16578_v54 = vand.u32 4294901760, %v1724_v19  ;;  %1822 = vmatpush.msra.mxu0 %v16552_v10  ;;  %v1722_v10 = vld [vmem:[%s19409_s6 + $0x8] sm:$0xff] }
 0x205   :  { %19957 = vst [vmem:[#allocation84_spill] sm:$0xff] %v16560_v11  ;;  %v15401_v14 = vmul.f32 -1.442695, %v1486_v60  ;;  %v1394_v39 = vadd.f32 %v1393_v28, %v1364_v41  ;;  %v16573_v52 = vand.u32 4294901760, %v1785_v7  ;;  %1875 = vmatpush.msra.mxu2 %v16531_v63  ;;  %v792_v60 = vadd.f32 %v16447_v31, %v760_v33  ;;  %v15458_v28 = vld [vmem:[%s19408_s5] ss:$0 sm:$0xff]  ;;  %v1555_v7 = vpop.f32.mrf.mxu0  ;;  %1825 = vmatmul.f32.vlgmr.msra.gmra.mxu0 %v19956_v58 }
 0x206   :  { %19958 = vst [vmem:[#allocation85_spill] sm:$0xff] %v16565_v16  ;;  %v1723_v41 = vld [vmem:[%s19409_s6 + $0x10] sm:$0xff]  ;;  %v16589_v61 = vand.u32 4294901760, %v1791_v44  ;;  %v16593_v31 = vsub.f32 %v1724_v19, %v16578_v54  ;;  %1930 = vmatpush.msrb.mxu0 %v16578_v54 }
 0x207   :  { %19959 = vst [vmem:[#allocation86_spill] sm:$0xff] %v16573_v52  ;;  %15463 = vpow2.f32 %v15401_v14  ;;  %1787 = vmatpush.msrb.mxu3 %v16573_v52  ;;  %1879 = vmatpush.msra.mxu2 %v16549_v26  ;;  %v16595_v33 = vand.u32 4294901760, %v1723_v41  ;;  %v15456_v14 = vld [vmem:[%s19407_s4 + $0x2] ss:$0 sm:$0xff]  ;;  %v831_v63 = vadd.f32 %v16461_v9, %v792_v60  ;;  %v1421_v51 = vadd.f32 %v1420_v53, %v1394_v39  ;;  %v1478_v26 = vpop.f32.mrf.mxu3 }
 0x208   :  { %19960 = vst [vmem:[#allocation87_spill] sm:$0xff] %v16578_v54  ;;  %v16608_v19 = vand.u32 4294901760, %v16593_v31  ;;  %v16613_v9 = vand.u32 4294901760, %v1722_v10  ;;  %v1556_v39 = vadd.f32 %v15458_v28, %v1555_v7  ;;  %v1721_v60 = vld [vmem:[%s19409_s6] sm:$0xff] }
 0x209   :  { %19961 = vst [vmem:[#allocation88_spill] sm:$0xff] %v16589_v61  ;;  %1793 = vmatpush.msrb.mxu3 %v16589_v61  ;;  %1883 = vmatpush.msra.mxu2 %v16565_v16  ;;  %v16611_v22 = vsub.f32 %v1723_v41, %v16595_v33  ;;  %v1596_v61 = vpop.f32.mrf.mxu1  ;;  %v16630_v28 = vand.u32 4294901760, %v1721_v60  ;;  %v16634_v52 = vadd.f32 %v16457_v8, %v831_v63 }
 0x20a   :  { %19962 = vst [vmem:[#allocation89_spill] sm:$0xff] %v16593_v31  ;;  %v1453_v44 = vpop.f32.mrf.mxu2  ;;  %1795 = vmatmul.f32.vlgmr.msrb.gmra.mxu3 %v19956_v58  ;;  %1885 = vmatmul.f32.vlgmr.msra.gmra.mxu2 %v19956_v58  ;;  %v1961_v16 = vsub.f32 %v16593_v31, %v16608_v19 }
 0x20b   :  { %19963 = vst [vmem:[#allocation90_spill] sm:$0xff] %v16595_v33  ;;  %v1454_v53 = vadd.f32 %v1453_v44, %v1421_v51  ;;  %1902 = vmatpush.msra.mxu3 %v16498_v20  ;;  %v16624_v41 = vand.u32 4294901760, %v16611_v22  ;;  %2001 = vmatpush.msrb.mxu2 %v16593_v31  ;;  %v16628_v51 = vsub.f32 %v1722_v10, %v16613_v9 }
 0x20c   :  { %19964 = vst [vmem:[#allocation91_spill] sm:$0xff] %v16608_v19  ;;  %v903_v44 = vadd.f32 %v15456_v14, %v16459_v2  ;;  %v16640_v55 = vand.u32 4294901760, %v1961_v16  ;;  %v1597_v2 = vadd.f32 %v1596_v61, %v1556_v39  ;;  %1932 = vmatpush.msrb.mxu0 %v16595_v33  ;;  %v15411_v61 = vld [vmem:[%s19410_s7 + $0x38] sm:$0xff] }
 0x20d   :  { %19965 = vst [vmem:[#allocation92_spill] sm:$0xff] %v16611_v22  ;;  %v15464_v7 = vpop.eup %15463  ;;  %v1479_v20 = vadd.f32 %v1478_v26, %v1454_v53  ;;  %1904 = vmatpush.msra.mxu3 %v16504_v38  ;;  %v1967_v10 = vsub.f32 %v16611_v22, %v16624_v41  ;;  %v16645_v31 = vand.u32 4294901760, %v16628_v51  ;;  %2004 = vmatpush.msrb.mxu2 %v16611_v22  ;;  %v15409_v22 = vld [vmem:[%s19410_s7 + $0x28] sm:$0xff] }
 0x20e   :  { %19966 = vst [vmem:[#allocation93_spill] sm:$0xff] %v16613_v9  ;;  %v16637_v11 = vadd.f32 1.0, %v15464_v7  ;;  %v16650_v26 = vsub.f32 %v1721_v60, %v16630_v28  ;;  %1963 = vmatpush.msrb.mxu1 %v16640_v55  ;;  %1934 = vmatpush.msrb.mxu0 %v16613_v9  ;;  %v952_v53 = vadd.f32 %v16465_v35, %v903_v44  ;;  %v16670_v7 = vand.u32 4294901760, %v15411_v61  ;;  %v15410_v35 = vld [vmem:[%s19410_s7 + $0x30] sm:$0xff]  ;;  %v1686_v44 = vpop.f32.mrf.mxu0 }
 0x20f   :  { %19967 = vst [vmem:[#allocation94_spill] sm:$0xff] %v16624_v41  ;;  %v1506_v8 = vadd.f32 %v1479_v20, %v16634_v52  ;;  %1906 = vmatpush.msra.mxu3 %v16517_v21  ;;  %v16656_v63 = vand.u32 4294901760, %v1967_v10  ;;  %v1973_v14 = vsub.f32 %v16628_v51, %v16645_v31  ;;  %2007 = vmatpush.msrb.mxu2 %v16628_v51  ;;  %v1653_v60 = vpop.f32.mrf.mxu3 }
 0x210   :  { %19968 = vst [vmem:[#allocation95_spill] sm:$0xff] %v16628_v51  ;;  %15465 = vrcp.f32 %v16637_v11  ;;  %v16661_v20 = vand.u32 4294901760, %v16650_v26  ;;  %1936 = vmatpush.msrb.mxu0 %v16630_v28  ;;  %vm1496_vm6 = vweird.f32 %v16637_v11 }
 0x211   :  { %19969 = vst [vmem:[#allocation96_spill] sm:$0xff] %v16630_v28  ;;  %v15402_v16 = vmul.f32 -1.442695, %v1506_v8  ;;  %1908 = vmatpush.msra.mxu3 %v16533_v18  ;;  %1969 = vmatpush.msrb.mxu1 %v16656_v63  ;;  %v16674_v8 = vand.u32 4294901760, %v1973_v14  ;;  %v986_v14 = vadd.f32 %v16475_v1, %v952_v53  ;;  %v16701_v1 = vand.u32 4294901760, %v15409_v22  ;;  %v1711_v21 = vpop.f32.mrf.mxu1 }
 0x212   :  { %19970 = vst [vmem:[#allocation97_spill] sm:$0xff] %v16634_v52  ;;  %v1626_v39 = vpop.f32.mrf.mxu2  ;;  %1910 = vmatmul.f32.vlgmr.msra.gmra.mxu3 %v19956_v58  ;;  %v1979_v52 = vsub.f32 %v16650_v26, %v16661_v20  ;;  %2010 = vmatpush.msrb.mxu2 %v16650_v26  ;;  %v1502_v18 = vand.u32 2147483648, %v16637_v11 }
 0x213   :  { %19971 = vst [vmem:[#allocation98_spill] sm:$0xff] %v16640_v55  ;;  %15467 = vpow2.f32 %v15402_v16  ;;  %v1627_v10 = vadd.f32 %v1626_v39, %v1597_v2  ;;  %2030 = vmatpush.msrb.mxu3 %v16578_v54  ;;  %v16683_v16 = vand.u32 4294901760, %v15410_v35  ;;  %v16686_v2 = vsub.f32 %v15411_v61, %v16670_v7  ;;  %1975 = vmatpush.msrb.mxu1 %v16674_v8 }
 0x214   :  { %19972 = vst [vmem:[#allocation99_spill] sm:$0xff] %v16645_v31  ;;  %v16690_v51 = vand.u32 4294901760, %v1979_v52  ;;  %2148 = vmatpush.msra.mxu2 %v16670_v7  ;;  %2059 = vmatpush.msra.mxu0 %v16608_v19 }
 0x215   :  { %19973 = vst [vmem:[#allocation100_spill] sm:$0xff] %v16650_v26  ;;  %v1654_v39 = vadd.f32 %v1653_v60, %v1627_v10  ;;  %2032 = vmatpush.msrb.mxu3 %v16595_v33  ;;  %v16698_v26 = vand.u32 4294901760, %v16686_v2  ;;  %v16704_v61 = vsub.f32 %v15410_v35, %v16683_v16  ;;  %v15408_v60 = vld [vmem:[%s19410_s7 + $0x20] sm:$0xff] }
 0x216   :  { %19974 = vst [vmem:[#allocation101_spill] sm:$0xff] %v16656_v63  ;;  %v15466_v63 = vpop.eup %15465  ;;  %1981 = vmatpush.msrb.mxu1 %v16690_v51  ;;  %2150 = vmatpush.msra.mxu2 %v16683_v16 }
 0x217   :  { %19975 = vst [vmem:[#allocation102_spill] sm:$0xff] %v16661_v20  ;;  %v1687_v52 = vadd.f32 %v1686_v44, %v1654_v39  ;;  %v1492_v53 = vmul.f32 %v15466_v63, %v16637_v11  ;;  %2034 = vmatpush.msrb.mxu3 %v16613_v9  ;;  %v2179_v10 = vsub.f32 %v16686_v2, %v16698_v26  ;;  %v16717_v35 = vand.u32 4294901760, %v16704_v61 }
 0x218   :  { %19976 = vst [vmem:[#allocation103_spill] sm:$0xff] %v16670_v7  ;;  %2090 = vmatpush.msra.mxu1 %v16578_v54  ;;  %v16719_v44 = vand.u32 4294901760, %v15408_v60  ;;  %v16722_v39 = vsub.f32 %v15409_v22, %v16701_v1  ;;  %2152 = vmatpush.msra.mxu2 %v16701_v1  ;;  %vm1497_vm5 = vweird.f32 %v15466_v63 }
 0x219   :  { %19977 = vst [vmem:[#allocation104_spill] sm:$0xff] %v16674_v8  ;;  %v1018_v8 = vadd.f32 %v16471_v47, %v986_v14  ;;  %v1493_v55 = vsub.f32 1.0, %v1492_v53  ;;  %2036 = vmatpush.msrb.mxu3 %v16630_v28  ;;  %v16730_v38 = vand.u32 4294901760, %v2179_v10  ;;  %v2185_v22 = vsub.f32 %v16704_v61, %v16717_v35  ;;  %2063 = vmatpush.msra.mxu0 %v16624_v41  ;;  %vm1498_vm7 = vmor %vm1496_vm6, %vm1497_vm5 }
 0x21a   :  { %19978 = vst [vmem:[#allocation105_spill] sm:$0xff] %v16683_v16  ;;  %2092 = vmatpush.msra.mxu1 %v16595_v33  ;;  %v16735_v47 = vand.u32 4294901760, %v16722_v39  ;;  %v1500_v53 = vand.u32 2147483647, %v16637_v11  ;;  %2154 = vmatpush.msra.mxu2 %v16719_v44  ;;  %v1712_v10 = vadd.f32 %v1711_v21, %v1687_v52  ;;  %v1503_v21 = vor.u32 1.1754944e-38, %v1502_v18 }
 0x21b   :  { %19979 = vst [vmem:[#allocation106_spill] sm:$0xff] %v16686_v2  ;;  %v1494_v14 = vmul.f32 %v15466_v63, %v1493_v55  ;;  %2181 = vmatpush.msra.mxu3 %v16730_v38  ;;  %v16746_v55 = vand.u32 4294901760, %v2185_v22  ;;  %2067 = vmatpush.msra.mxu0 %v16645_v31 }
 0x21c   :  { %19980 = vst [vmem:[#allocation107_spill] sm:$0xff] %v16690_v51  ;;  %v15468_v51 = vpop.eup %15467  ;;  %2094 = vmatpush.msra.mxu1 %v16613_v9  ;;  %v2191_v33 = vsub.f32 %v16722_v39, %v16735_v47  ;;  %vm1501_vm8 = vcmp.eq.f32.partialorder %v1500_v53, 8.507059e+37 }
 0x21d   :  { %19981 = vst [vmem:[#allocation108_spill] sm:$0xff] %v16698_v26  ;;  %v1510_v54 = vadd.f32 1.0, %v15468_v51  ;;  %v16741_v51 = vsub.f32 %v15408_v60, %v16719_v44  ;;  %v1495_v19 = vadd.f32 %v15466_v63, %v1494_v14  ;;  %v1057_v60 = vadd.f32 %v16477_v62, %v1018_v8  ;;  %2187 = vmatpush.msra.mxu3 %v16746_v55 }
 0x21e   :  { %19982 = vst [vmem:[#allocation109_spill] sm:$0xff] %v16701_v1  ;;  %2096 = vmatpush.msra.mxu1 %v16630_v28  ;;  %v16758_v52 = vand.u32 4294901760, %v2191_v33  ;;  %2071 = vmatpush.msra.mxu0 %v16661_v20 }
 0x21f   :  { %19983 = vst [vmem:[#allocation110_spill] sm:$0xff] %v16704_v61  ;;  %15469 = vrcp.f32 %v1510_v54  ;;  %v16751_v15 = vand.u32 4294901760, %v16741_v51  ;;  %v1499_v11 = vsel %vm1498_vm7, %v15466_v63, %v1495_v19  ;;  %v16767_v8 = vadd.f32 %v16481_v56, %v1057_v60 }
 0x220   :  { %19984 = vst [vmem:[#allocation111_spill] sm:$0xff] %v16717_v35  ;;  %v1504_v14 = vsel %vm1501_vm8, %v1503_v21, %v1499_v11  ;;  %2193 = vmatpush.msra.mxu3 %v16758_v52  ;;  %v1522_v53 = vand.u32 2147483648, %v1510_v54  ;;  %v1520_v20 = vand.u32 2147483647, %v1510_v54  ;;  %vm1516_vm10 = vweird.f32 %v1510_v54  ;;  %v15407_v21 = vld [vmem:[%s19409_s6 + $0x38] sm:$0xff] }
 0x221   :  { %19985 = vst [vmem:[#allocation112_spill] sm:$0xff] %v16719_v44  ;;  %v2197_v22 = vsub.f32 %v16741_v51, %v16751_v15  ;;  %v1714_v31 = vmul.f32 %v1712_v10, %v1504_v14 }
 0x222   :  { %19986 = vst [vmem:[#allocation113_spill] sm:$0xff] %v16722_v39  ;;  %v1523_v56 = vor.u32 1.1754944e-38, %v1522_v53  ;;  %vm1521_vm12 = vcmp.eq.f32.partialorder %v1520_v20, 8.507059e+37 }
 0x223   :  { %19987 = vst [vmem:[#allocation114_spill] sm:$0xff] %v16730_v38  ;;  %v16764_v62 = vand.u32 4294901760, %v2197_v22  ;;  %v1715_v33 = vadd.f32 %v1714_v31, %v16767_v8  ;;  %v16774_v22 = vand.u32 4294901760, %v15407_v21  ;;  %v15406_v31 = vld [vmem:[%s19409_s6 + $0x30] sm:$0xff] }
 0x224   :  { %19988 = vst [vmem:[#allocation115_spill] sm:$0xff] %v16735_v47 }
 0x225   :  { %19989 = vst [vmem:[#allocation116_spill] sm:$0xff] %v16741_v51  ;;  %v15470_v18 = vpop.eup %15469  ;;  %2199 = vmatpush.msra.mxu3 %v16764_v62  ;;  %15471 = vtanh.f32 %v1715_v33 }
 0x226   :  { %19990 = vst [vmem:[#allocation117_spill] sm:$0xff] %v16746_v55  ;;  %v1512_v19 = vmul.f32 %v15470_v18, %v1510_v54  ;;  %vm1517_vm9 = vweird.f32 %v15470_v18  ;;  %v15405_v54 = vld [vmem:[%s19409_s6 + $0x28] sm:$0xff] }
 0x227   :  { %19991 = vst [vmem:[#allocation118_spill] sm:$0xff] %v16751_v15  ;;  %vm1518_vm11 = vmor %vm1516_vm10, %vm1517_vm9  ;;  %v16789_v53 = vand.u32 4294901760, %v15405_v54 }
 0x228   :  { %19992 = vst [vmem:[#allocation119_spill] sm:$0xff] %v16758_v52  ;;  %v1513_v63 = vsub.f32 1.0, %v1512_v19 }
 0x229   :  { %19993 = vst [vmem:[#allocation120_spill] sm:$0xff] %v16764_v62 }
 0x22a   :  { %19994 = vst [vmem:[#allocation121_spill] sm:$0xff] %v16767_v8  ;;  %v1514_v55 = vmul.f32 %v15470_v18, %v1513_v63  ;;  %v16782_v63 = vand.u32 4294901760, %v15406_v31  ;;  %v15416_v8 = vld [vmem:[%s19409_s6 + $0x58] sm:$0xff] }
 0x22b   :  { %19995 = vst [vmem:[#allocation122_spill] sm:$0xff] %v16774_v22  ;;  %v15472_v19 = vpop.eup %15471  ;;  %v16849_v41 = vand.u32 4294901760, %v15416_v8 }
 0x22c   :  { %v1515_v10 = vadd.f32 %v15470_v18, %v1514_v55  ;;  %19996 = vst [vmem:[#allocation123_spill] sm:$0xff] %v16782_v63 }
 0x22d   :  { %19999 = vst [vmem:[#allocation126_spill] sm:$0xff] %v16789_v53  ;;  %v16871_v28 = vsub.f32 %v15416_v8, %v16849_v41 }
 0x22e   :  { %v1519_v60 = vsel %vm1518_vm11, %v15470_v18, %v1515_v10  ;;  %v16785_v18 = vsub.f32 %v15407_v21, %v16774_v22  ;;  %v15404_v10 = vld [vmem:[%s19409_s6 + $0x20] sm:$0xff]  ;;  %20009 = vst [vmem:[#allocation136_spill] sm:$0xff] %v16849_v41 }
 0x22f   :  { %v1524_v11 = vsel %vm1521_vm12, %v1523_v56, %v1519_v60  ;;  %v16797_v60 = vsub.f32 %v15406_v31, %v16782_v63  ;;  %v16804_v21 = vand.u32 4294901760, %v15404_v10  ;;  %20012 = vst [vmem:[#allocation139_spill] sm:$0xff] %v16871_v28 }
 0x230   :  { %v1717_v14 = vsub.f32 1.0, %v1524_v11  ;;  %v1719_v33 = vmul.f32 0.0, %v1524_v11  ;;  %19997 = vst [vmem:[#allocation124_spill] sm:$0xff] %v16785_v18 }
 0x231   :  { %20000 = vst [vmem:[#allocation127_spill] sm:$0xff] %v16797_v60  ;;  %v16815_v31 = vand.u32 4294901760, %v16797_v60 }
 0x232   :  { %v1718_v55 = vmul.f32 %v15472_v19, %v1717_v14  ;;  %v16802_v14 = vand.u32 4294901760, %v16785_v18  ;;  %20002 = vst [vmem:[#allocation129_spill] sm:$0xff] %v16804_v21  ;;  %v16807_v19 = vsub.f32 %v15405_v54, %v16789_v53  ;;  %v16824_v54 = vsub.f32 %v15404_v10, %v16804_v21 }
 0x233   :  { %20004 = vst [vmem:[#allocation131_spill] sm:$0xff] %v16815_v31  ;;  %v2370_v10 = vsub.f32 %v16797_v60, %v16815_v31 }
 0x234   :  { %v16787_v20 = vadd.f32 %v1719_v33, %v1718_v55  ;;  %20001 = vst [vmem:[#allocation128_spill] sm:$0xff] %v16802_v14  ;;  %v16847_v38 = vand.u32 4294901760, %v16824_v54 }
 0x235   :  { %20003 = vst [vmem:[#allocation130_spill] sm:$0xff] %v16807_v19 }
 0x236   :  { %19998 = vst [vmem:[#allocation125_spill] sm:$0xff] %v16787_v20  ;;  %v1915_v56 = vsel %vm417_vm4, %v16787_v20, 0  ;;  %v2364_v20 = vsub.f32 %v16785_v18, %v16802_v14 }
 0x237   :  { %v16799_v11 = vand.u32 4294901760, %v1915_v56  ;;  %20005 = vst [vmem:[#allocation132_spill] sm:$0xff] %v16824_v54 }
 0x238   :  { %v16844_v52 = vand.u32 4294901760, %v2364_v20  ;;  %20008 = vst [vmem:[#allocation135_spill] sm:$0xff] %v16847_v38  ;;  %v16862_v20 = vand.u32 4294901760, %v2370_v10 }
 0x239   :  { %v16810_v55 = vsub.f32 %v1915_v56, %v16799_v11  ;;  %1983 = vmatmul.f32.vlgmr.msrb.gmra.mxu1 %v16799_v11  ;;  %v16829_v56 = vand.u32 4294901760, %v16807_v19 }
 0x23a   :  { %2248 = vmatpush.msrb.mxu1 %v16670_v7  ;;  %20007 = vst [vmem:[#allocation134_spill] sm:$0xff] %v16844_v52 }
 0x23b   :  { %2013 = vmatmul.f32.vlgmr.msrb.gmra.mxu2 %v16810_v55  ;;  %v16819_v33 = vand.u32 4294901760, %v16810_v55  ;;  %20006 = vst [vmem:[#allocation133_spill] sm:$0xff] %v16829_v56 }
 0x23c   :  { %2250 = vmatpush.msrb.mxu1 %v16683_v16  ;;  %2277 = vmatpush.msrb.mxu2 %v16698_v26  ;;  %20010 = vst [vmem:[#allocation137_spill] sm:$0xff] %v16862_v20 }
 0x23d   :  { %2040 = vmatmul.f32.vlgmr.msrb.gmra.mxu3 %v16819_v33  ;;  %v1940_v62 = vsub.f32 %v16810_v55, %v16819_v33 }
 0x23e   :  { %2252 = vmatpush.msrb.mxu1 %v16701_v1  ;;  %2281 = vmatpush.msrb.mxu2 %v16717_v35  ;;  %v2376_v35 = vsub.f32 %v16807_v19, %v16829_v56 }
 0x23f   :  { %v16841_v26 = vand.u32 4294901760, %v1940_v62  ;;  %2308 = vmatpush.msrb.mxu3 %v16670_v7  ;;  %v15415_v62 = vld [vmem:[%s19409_s6 + $0x50] sm:$0xff] }
 0x240   :  { %2254 = vmatpush.msrb.mxu1 %v16719_v44  ;;  %2285 = vmatpush.msrb.mxu2 %v16735_v47  ;;  %v2382_v47 = vsub.f32 %v16824_v54, %v16847_v38  ;;  %v16868_v7 = vand.u32 4294901760, %v15415_v62  ;;  %v16878_v10 = vand.u32 4294901760, %v2376_v35 }
 0x241   :  { %1942 = vmatmul.f32.vlgmr.msrb.gmra.mxu0 %v16841_v26  ;;  %2098 = vmatmul.f32.vlgmr.msra.gmra.mxu1 %v16799_v11 }
 0x242   :  { %2310 = vmatpush.msrb.mxu3 %v16683_v16  ;;  %2219 = vmatpush.msrb.mxu0 %v16686_v2  ;;  %20011 = vst [vmem:[#allocation138_spill] sm:$0xff] %v16868_v7  ;;  %v15414_v16 = vld [vmem:[%s19409_s6 + $0x48] sm:$0xff]  ;;  %v16891_v35 = vand.u32 4294901760, %v2382_v47 }
 0x243   :  { %2160 = vmatmul.f32.vlgmr.msra.gmra.mxu2 %v19956_v58  ;;  %2366 = vmatpush.msra.mxu1 %v16844_v52  ;;  %20013 = vst [vmem:[#allocation140_spill] sm:$0xff] %v16878_v10  ;;  %v15413_v52 = vld [vmem:[%s19409_s6 + $0x40] sm:$0xff]  ;;  %v16887_v8 = vand.u32 4294901760, %v15414_v16 }
 0x244   :  { %2289 = vmatpush.msrb.mxu2 %v16751_v15  ;;  %2312 = vmatpush.msrb.mxu3 %v16701_v1  ;;  %20015 = vst [vmem:[#allocation142_spill] sm:$0xff] %v16891_v35  ;;  %v16894_v15 = vand.u32 4294901760, %v16871_v28  ;;  %v16901_v2 = vand.u32 4294901760, %v15413_v52 }
 0x245   :  { %2201 = vmatmul.f32.vlgmr.msra.gmra.mxu3 %v19956_v58  ;;  %2222 = vmatpush.msrb.mxu0 %v16704_v61  ;;  %20014 = vst [vmem:[#allocation141_spill] sm:$0xff] %v16887_v8  ;;  %v16897_v61 = vsub.f32 %v15415_v62, %v16868_v7  ;;  %v16908_v47 = vsub.f32 %v15414_v16, %v16887_v8  ;;  %v15420_v16 = vld [vmem:[%s19410_s7 + $0x58] sm:$0xff] }
 0x246   :  { %2314 = vmatpush.msrb.mxu3 %v16719_v44  ;;  %2372 = vmatpush.msra.mxu1 %v16862_v20  ;;  %20016 = vst [vmem:[#allocation143_spill] sm:$0xff] %v16894_v15  ;;  %v2580_v62 = vsub.f32 %v16871_v28, %v16894_v15  ;;  %v15417_v44 = vld [vmem:[%s19410_s7 + $0x40] sm:$0xff] }
 0x247   :  { %2404 = vmatpush.msra.mxu2 %v16785_v18  ;;  %2225 = vmatpush.msrb.mxu0 %v16722_v39  ;;  %20017 = vst [vmem:[#allocation144_spill] sm:$0xff] %v16897_v61  ;;  %v16946_v39 = vand.u32 4294901760, %v15420_v16 }
 0x248   :  { %2378 = vmatpush.msra.mxu1 %v16878_v10  ;;  %2433 = vmatpush.msra.mxu3 %v16774_v22  ;;  %20018 = vst [vmem:[#allocation145_spill] sm:$0xff] %v16901_v2  ;;  %v16915_v10 = vand.u32 4294901760, %v16897_v61 }
 0x249   :  { %2073 = vmatmul.f32.vlgmr.msra.gmra.mxu0 %v16799_v11  ;;  %2258 = vmatmul.f32.vlgmr.msrb.gmra.mxu1 %v19956_v58  ;;  %20019 = vst [vmem:[#allocation146_spill] sm:$0xff] %v16908_v47  ;;  %v16971_v1 = vsub.f32 %v15420_v16, %v16946_v39 }
 0x24a   :  { %2407 = vmatpush.msra.mxu2 %v16797_v60  ;;  %2228 = vmatpush.msrb.mxu0 %v16741_v51  ;;  %20020 = vst [vmem:[#allocation147_spill] sm:$0xff] %v16915_v10  ;;  %v16920_v60 = vsub.f32 %v15413_v52, %v16901_v2  ;;  %v16934_v52 = vand.u32 4294901760, %v2580_v62  ;;  %v15419_v51 = vld [vmem:[%s19410_s7 + $0x50] sm:$0xff]  ;;  %v15418_v62 = vld [vmem:[%s19410_s7 + $0x48] sm:$0xff] }
 0x24b   :  { %2291 = vmatmul.f32.vlgmr.msrb.gmra.mxu2 %v19956_v58  ;;  %2384 = vmatpush.msra.mxu1 %v16891_v35  ;;  %v16930_v35 = vand.u32 4294901760, %v16908_v47  ;;  %20025 = vst [vmem:[#allocation152_spill] sm:$0xff] %v16946_v39  ;;  %v16957_v18 = vand.u32 4294901760, %v15419_v51  ;;  %v16973_v9 = vand.u32 4294901760, %v15418_v62 }
 0x24c   :  { %2410 = vmatpush.msra.mxu2 %v16807_v19  ;;  %2435 = vmatpush.msra.mxu3 %v16782_v63  ;;  %20021 = vst [vmem:[#allocation148_spill] sm:$0xff] %v16920_v60  ;;  %v2586_v19 = vsub.f32 %v16897_v61, %v16915_v10 }
 0x24d   :  { %2316 = vmatmul.f32.vlgmr.msrb.gmra.mxu3 %v19956_v58  ;;  %2333 = vmatpush.msra.mxu0 %v16774_v22  ;;  %20022 = vst [vmem:[#allocation149_spill] sm:$0xff] %v16930_v35 }
 0x24e   :  { %2413 = vmatpush.msra.mxu2 %v16824_v54  ;;  %2437 = vmatpush.msra.mxu3 %v16789_v53  ;;  %20023 = vst [vmem:[#allocation150_spill] sm:$0xff] %v16934_v52  ;;  %v16944_v54 = vand.u32 4294901760, %v16920_v60  ;;  %v16961_v20 = vand.u32 4294901760, %v2586_v19 }
 0x24f   :  { %2493 = vmatpush.msrb.mxu1 %v16774_v22  ;;  %2335 = vmatpush.msra.mxu0 %v16782_v63  ;;  %v2592_v22 = vsub.f32 %v16908_v47, %v16930_v35  ;;  %20026 = vst [vmem:[#allocation153_spill] sm:$0xff] %v16957_v18 }
 0x250   :  { %2439 = vmatpush.msra.mxu3 %v16804_v21  ;;  %2549 = vmatpush.msrb.mxu2 %v16849_v41  ;;  %20024 = vst [vmem:[#allocation151_spill] sm:$0xff] %v16944_v54 }
 0x251   :  { %2231 = vmatmul.f32.vlgmr.msrb.gmra.mxu0 %v19956_v58  ;;  %2386 = vmatmul.f32.vlgmr.msra.gmra.mxu1 %v16799_v11  ;;  %20027 = vst [vmem:[#allocation154_spill] sm:$0xff] %v16961_v20  ;;  %v16979_v19 = vand.u32 4294901760, %v2592_v22  ;;  %v16996_v22 = vsub.f32 %v15418_v62, %v16973_v9 }
 0x252   :  { %2495 = vmatpush.msrb.mxu1 %v16782_v63  ;;  %2337 = vmatpush.msra.mxu0 %v16789_v53  ;;  %v2598_v63 = vsub.f32 %v16920_v60, %v16944_v54  ;;  %20028 = vst [vmem:[#allocation155_spill] sm:$0xff] %v16971_v1 }
 0x253   :  { %2416 = vmatmul.f32.vlgmr.msra.gmra.mxu2 %v16810_v55  ;;  %2582 = vmatpush.msrb.mxu3 %v16934_v52  ;;  %20029 = vst [vmem:[#allocation156_spill] sm:$0xff] %v16973_v9  ;;  %v16982_v52 = vsub.f32 %v15419_v51, %v16957_v18 }
 0x254   :  { %2497 = vmatpush.msrb.mxu1 %v16789_v53  ;;  %2551 = vmatpush.msrb.mxu2 %v16868_v7  ;;  %20030 = vst [vmem:[#allocation157_spill] sm:$0xff] %v16979_v19  ;;  %v16984_v53 = vand.u32 4294901760, %v15417_v44  ;;  %v16990_v16 = vand.u32 4294901760, %v2598_v63 }
 0x255   :  { %2443 = vmatmul.f32.vlgmr.msra.gmra.mxu3 %v16819_v33  ;;  %2339 = vmatpush.msra.mxu0 %v16804_v21  ;;  %20031 = vst [vmem:[#allocation158_spill] sm:$0xff] %v16982_v52  ;;  %v17003_v51 = vand.u32 4294901760, %v16982_v52 }
 0x256   :  { %2499 = vmatpush.msrb.mxu1 %v16804_v21  ;;  %2553 = vmatpush.msrb.mxu2 %v16887_v8  ;;  %20032 = vst [vmem:[#allocation159_spill] sm:$0xff] %v16984_v53  ;;  %v16993_v21 = vand.u32 4294901760, %v16971_v1  ;;  %v17006_v63 = vsub.f32 %v15417_v44, %v16984_v53 }
 0x257   :  { %2588 = vmatpush.msrb.mxu3 %v16961_v20  ;;  %2462 = vmatpush.msrb.mxu0 %v16802_v14  ;;  %20033 = vst [vmem:[#allocation160_spill] sm:$0xff] %v16990_v16  ;;  %v2779_v44 = vsub.f32 %v16982_v52, %v17003_v51 }
 0x258   :  { %2555 = vmatpush.msrb.mxu2 %v16901_v2  ;;  %2649 = vmatpush.msra.mxu1 %v16849_v41  ;;  %20034 = vst [vmem:[#allocation161_spill] sm:$0xff] %v16993_v21  ;;  %v2773_v62 = vsub.f32 %v16971_v1, %v16993_v21 }
 0x259   :  { %20035 = vst [vmem:[#allocation162_spill] sm:$0xff] %v16996_v22  ;;  %2345 = vmatmul.f32.vlgmr.msra.gmra.mxu0 %v16841_v26  ;;  %2501 = vmatmul.f32.vlgmr.msrb.gmra.mxu1 %v16799_v11 }
 0x25a   :  { %2594 = vmatpush.msrb.mxu3 %v16979_v19  ;;  %2466 = vmatpush.msrb.mxu0 %v16815_v31  ;;  %20036 = vst [vmem:[#allocation163_spill] sm:$0xff] %v17003_v51  ;;  %v17015_v19 = vand.u32 4294901760, %v16996_v22 }
 0x25b   :  { %20037 = vst [vmem:[#allocation164_spill] sm:$0xff] %v17006_v63  ;;  %2561 = vmatmul.f32.vlgmr.msrb.gmra.mxu2 %v16841_v26  ;;  %2651 = vmatpush.msra.mxu1 %v16868_v7 }
 0x25c   :  { %2600 = vmatpush.msrb.mxu3 %v16990_v16  ;;  %2678 = vmatpush.msra.mxu2 %v16894_v15  ;;  %20038 = vst [vmem:[#allocation165_spill] sm:$0xff] %v17015_v19  ;;  %v17024_v16 = vand.u32 4294901760, %v17006_v63  ;;  %v2785_v15 = vsub.f32 %v16996_v22, %v17015_v19 }
 0x25d   :  { %2470 = vmatpush.msrb.mxu0 %v16829_v56  ;;  %2602 = vmatmul.f32.vlgmr.msrb.gmra.mxu3 %v16799_v11  ;;  %v17030_v56 = vand.u32 4294901760, %v2773_v62 }
 0x25e   :  { %2653 = vmatpush.msra.mxu1 %v16887_v8  ;;  %2682 = vmatpush.msra.mxu2 %v16915_v10  ;;  %20039 = vst [vmem:[#allocation166_spill] sm:$0xff] %v17024_v16  ;;  %v17038_v10 = vand.u32 4294901760, %v2779_v44  ;;  %v17046_v62 = vand.u32 4294901760, %v2785_v15  ;;  %v20044_v15 = vld [vmem:[#allocation36_spill] sm:$0xff] }
 0x25f   :  { %2709 = vmatpush.msra.mxu3 %v16849_v41  ;;  %2474 = vmatpush.msrb.mxu0 %v16847_v38  ;;  %20040 = vst [vmem:[#allocation167_spill] sm:$0xff] %v17030_v56  ;;  %v2791_v38 = vsub.f32 %v17006_v63, %v17024_v16 }
 0x260   :  { %2655 = vmatpush.msra.mxu1 %v16901_v2  ;;  %2686 = vmatpush.msra.mxu2 %v16930_v35  ;;  %20041 = vst [vmem:[#allocation168_spill] sm:$0xff] %v17038_v10 }
 0x261   :  { %2711 = vmatpush.msra.mxu3 %v16868_v7  ;;  %2476 = vmatmul.f32.vlgmr.msrb.gmra.mxu0 %v16799_v11  ;;  %20042 = vst [vmem:[#allocation169_spill] sm:$0xff] %v17046_v62  ;;  %v17052_v44 = vand.u32 4294901760, %v2791_v38  ;;  %v20045_v38 = vld [vmem:[#allocation37_spill] sm:$0xff] }
 0x262   :  { %2620 = vmatpush.msra.mxu0 %v16871_v28  ;;  %2659 = vmatmul.f32.vlgmr.msra.gmra.mxu1 %v16819_v33 }
 0x263   :  { %2690 = vmatpush.msra.mxu2 %v16944_v54  ;;  %2713 = vmatpush.msra.mxu3 %v16887_v8  ;;  %20043 = vst [vmem:[#allocation170_spill] sm:$0xff] %v17052_v44 }
 0x264   :  { %2775 = vmatpush.msrb.mxu1 %v17030_v56  ;;  %2623 = vmatpush.msra.mxu0 %v16897_v61 }
 0x265   :  { %2692 = vmatmul.f32.vlgmr.msra.gmra.mxu2 %v16799_v11  ;;  %2715 = vmatpush.msra.mxu3 %v16901_v2 }
 0x266   :  { %2781 = vmatpush.msrb.mxu1 %v17038_v10  ;;  %2813 = vmatpush.msrb.mxu2 %v16971_v1 }
 0x267   :  { %2626 = vmatpush.msra.mxu0 %v16908_v47  ;;  %2717 = vmatmul.f32.vlgmr.msra.gmra.mxu3 %v16799_v11 }
 0x268   :  { %2787 = vmatpush.msrb.mxu1 %v17046_v62  ;;  %2816 = vmatpush.msrb.mxu2 %v16982_v52 }
 0x269   :  { %2842 = vmatpush.msrb.mxu3 %v16946_v39  ;;  %2629 = vmatpush.msra.mxu0 %v16920_v60 }
 0x26a   :  { %2793 = vmatpush.msrb.mxu1 %v17052_v44  ;;  %2819 = vmatpush.msrb.mxu2 %v16996_v22 }
 0x26b   :  { %2844 = vmatpush.msrb.mxu3 %v16957_v18  ;;  %2632 = vmatmul.f32.vlgmr.msra.gmra.mxu0 %v16810_v55 }
 0x26c   :  { %2742 = vmatpush.msrb.mxu0 %v16946_v39  ;;  %2795 = vmatmul.f32.vlgmr.msrb.gmra.mxu1 %v19956_v58 }
 0x26d   :  { %2822 = vmatpush.msrb.mxu2 %v17006_v63  ;;  %2846 = vmatpush.msrb.mxu3 %v16973_v9 }
 0x26e   :  { %2902 = vmatpush.msra.mxu1 %v16946_v39  ;;  %2744 = vmatpush.msrb.mxu0 %v16957_v18 }
 0x26f   :  { %2825 = vmatmul.f32.vlgmr.msrb.gmra.mxu2 %v19956_v58  ;;  %2848 = vmatpush.msrb.mxu3 %v16984_v53 }
 0x270   :  { %2904 = vmatpush.msra.mxu1 %v16957_v18  ;;  %2934 = vmatpush.msra.mxu2 %v16146_v0 }
 0x271   :  { %2746 = vmatpush.msrb.mxu0 %v16973_v9  ;;  %2852 = vmatmul.f32.vlgmr.msrb.gmra.mxu3 %v19956_v58 }
 0x272   :  { %2906 = vmatpush.msra.mxu1 %v16973_v9  ;;  %2936 = vmatpush.msra.mxu2 %v16152_v4 }
 0x273   :  { %2967 = vmatpush.msra.mxu3 %v16192_v23  ;;  %2748 = vmatpush.msrb.mxu0 %v16984_v53 }
 0x274   :  { %2908 = vmatpush.msra.mxu1 %v16984_v53  ;;  %2938 = vmatpush.msra.mxu2 %v16170_v34 }
 0x275   :  { %2973 = vmatpush.msra.mxu3 %v16202_v27  ;;  %2754 = vmatmul.f32.vlgmr.msrb.gmra.mxu0 %v19956_v58 }
 0x276   :  { %2871 = vmatpush.msra.mxu0 %v16993_v21  ;;  %2910 = vmatmul.f32.vlgmr.msra.gmra.mxu1 %v19956_v58 }
 0x277   :  { %2940 = vmatpush.msra.mxu2 %v16185_v17  ;;  %2979 = vmatpush.msra.mxu3 %v16214_v30 }
 0x278   :  { %3034 = vmatpush.msrb.mxu1 %v16146_v0  ;;  %2875 = vmatpush.msra.mxu0 %v17003_v51 }
 0x279   :  { %2946 = vmatmul.f32.vlgmr.msra.gmra.mxu2 %v16841_v26  ;;  %2985 = vmatpush.msra.mxu3 %v16220_v37 }
 0x27a   :  { %3036 = vmatpush.msrb.mxu1 %v16152_v4  ;;  %3063 = vmatpush.msrb.mxu2 %v16168_v12 }
 0x27b   :  { %2879 = vmatpush.msra.mxu0 %v17015_v19  ;;  %2987 = vmatmul.f32.vlgmr.msra.gmra.mxu3 %v16799_v11 }
 0x27c   :  { %3038 = vmatpush.msrb.mxu1 %v16170_v34  ;;  %3067 = vmatpush.msrb.mxu2 %v16173_v36 }
 0x27d   :  { %3094 = vmatpush.msrb.mxu3 %v16146_v0  ;;  %2883 = vmatpush.msra.mxu0 %v17024_v16 }
 0x27e   :  { %3040 = vmatpush.msrb.mxu1 %v16185_v17  ;;  %3071 = vmatpush.msrb.mxu2 %v16195_v24 }
 0x27f   :  { %3096 = vmatpush.msrb.mxu3 %v16152_v4  ;;  %2885 = vmatmul.f32.vlgmr.msra.gmra.mxu0 %v19956_v58  ;;  %v20046_v58 = vld [vmem:[#allocation46_spill] sm:$0xff] }
 0x280   :  { %3005 = vmatpush.msrb.mxu0 %v16157_v5  ;;  %3044 = vmatmul.f32.vlgmr.msrb.gmra.mxu1 %v16819_v33 }
 0x281   :  { %3075 = vmatpush.msrb.mxu2 %v16209_v29  ;;  %3098 = vmatpush.msrb.mxu3 %v16170_v34 }
 0x282   :  { %3152 = vmatpush.msra.mxu1 %v16303_v57  ;;  %3008 = vmatpush.msrb.mxu0 %v16160_v6 }
 0x283   :  { %3077 = vmatmul.f32.vlgmr.msrb.gmra.mxu2 %v16799_v11  ;;  %3100 = vmatpush.msrb.mxu3 %v16185_v17 }
 0x284   :  { %3158 = vmatpush.msra.mxu1 %v16308_v59  ;;  %3190 = vmatpush.msra.mxu2 %v16238_v42 }
 0x285   :  { %3011 = vmatpush.msrb.mxu0 %v16183_v13  ;;  %3102 = vmatmul.f32.vlgmr.msrb.gmra.mxu3 %v16799_v11 }
 0x286   :  { %3164 = vmatpush.msra.mxu1 %v16324_v3  ;;  %3193 = vmatpush.msra.mxu2 %v16248_v45  ;;  %v20087_v45 = vld [vmem:[#allocation85_spill] sm:$0xff] }
 0x287   :  { %3219 = vmatpush.msra.mxu3 %v16228_v40  ;;  %3014 = vmatpush.msrb.mxu0 %v16198_v25  ;;  %v20055_v25 = vld [vmem:[#allocation31_spill] sm:$0xff] }
 0x288   :  { %3170 = vmatpush.msra.mxu1 %v16333_v32  ;;  %3196 = vmatpush.msra.mxu2 %v16267_v49  ;;  %v20048_v49 = vld [vmem:[#allocation49_spill] sm:$0xff] }
 0x289   :  { %3221 = vmatpush.msra.mxu3 %v16240_v43  ;;  %3017 = vmatmul.f32.vlgmr.msrb.gmra.mxu0 %v16810_v55  ;;  %v20050_v32 = vld [vmem:[#allocation45_spill] sm:$0xff] }
 0x28a   :  { %3119 = vmatpush.msra.mxu0 %v16228_v40  ;;  %3172 = vmatmul.f32.vlgmr.msra.gmra.mxu1 %v16799_v11 }
 0x28b   :  { %3199 = vmatpush.msra.mxu2 %v16273_v50  ;;  %3223 = vmatpush.msra.mxu3 %v16251_v46  ;;  %v20047_v50 = vld [vmem:[#allocation38_spill] sm:$0xff] }
 0x28c   :  { %3279 = vmatpush.msrb.mxu1 %v16228_v40  ;;  %3121 = vmatpush.msra.mxu0 %v16240_v43  ;;  %v20083_v40 = vld [vmem:[#allocation93_spill] sm:$0xff] }
 0x28d   :  { %3202 = vmatmul.f32.vlgmr.msra.gmra.mxu2 %v16810_v55  ;;  %3225 = vmatpush.msra.mxu3 %v16259_v48 }
 0x28e   :  { %3281 = vmatpush.msrb.mxu1 %v16240_v43  ;;  %3350 = vmatpush.msrb.mxu2 %v20044_v15  ;;  %v20049_v43 = vld [vmem:[#allocation29_spill] sm:$0xff] }
 0x28f   :  { %3123 = vmatpush.msra.mxu0 %v16251_v46  ;;  %3229 = vmatmul.f32.vlgmr.msra.gmra.mxu3 %v16819_v33 }
 0x290   :  { %3283 = vmatpush.msrb.mxu1 %v16251_v46  ;;  %3352 = vmatpush.msrb.mxu2 %v20045_v38  ;;  %v20051_v46 = vld [vmem:[#allocation51_spill] sm:$0xff] }
 0x291   :  { %3383 = vmatpush.msrb.mxu3 %v20046_v58  ;;  %3125 = vmatpush.msra.mxu0 %v16259_v48  ;;  %v20052_v58 = vld [vmem:[#allocation30_spill] sm:$0xff] }
 0x292   :  { %3285 = vmatpush.msrb.mxu1 %v16259_v48  ;;  %3354 = vmatpush.msrb.mxu2 %v20047_v50  ;;  %v20053_v48 = vld [vmem:[#allocation52_spill] sm:$0xff] }
 0x293   :  { %3389 = vmatpush.msrb.mxu3 %v20048_v49  ;;  %3131 = vmatmul.f32.vlgmr.msra.gmra.mxu0 %v16841_v26  ;;  %v20054_v49 = vld [vmem:[#allocation42_spill] sm:$0xff] }
 0x294   :  { %3248 = vmatpush.msrb.mxu0 %v20049_v43  ;;  %3287 = vmatmul.f32.vlgmr.msrb.gmra.mxu1 %v16799_v11  ;;  %v20056_v43 = vld [vmem:[#allocation44_spill] sm:$0xff] }
 0x295   :  { %3356 = vmatpush.msrb.mxu2 %v20050_v32  ;;  %3395 = vmatpush.msrb.mxu3 %v20051_v46  ;;  %v20057_v46 = vld [vmem:[#allocation32_spill] sm:$0xff] }
 0x296   :  { %3450 = vmatpush.msra.mxu1 %v20044_v15  ;;  %3252 = vmatpush.msrb.mxu0 %v20052_v58  ;;  %v20068_v58 = vld [vmem:[#allocation86_spill] sm:$0xff] }
 0x297   :  { %3362 = vmatmul.f32.vlgmr.msrb.gmra.mxu2 %v16841_v26  ;;  %3401 = vmatpush.msrb.mxu3 %v20053_v48  ;;  %v20058_v26 = vld [vmem:[#allocation48_spill] sm:$0xff] }
 0x298   :  { %3452 = vmatpush.msra.mxu1 %v20045_v38  ;;  %3479 = vmatpush.msra.mxu2 %v20054_v49  ;;  %v20060_v49 = vld [vmem:[#allocation50_spill] sm:$0xff]  ;;  %v20064_v48 = vld [vmem:[#allocation84_spill] sm:$0xff] }
 0x299   :  { %3256 = vmatpush.msrb.mxu0 %v20055_v25  ;;  %3403 = vmatmul.f32.vlgmr.msrb.gmra.mxu3 %v16799_v11  ;;  %v20059_v25 = vld [vmem:[#allocation40_spill] sm:$0xff] }
 0x29a   :  { %3454 = vmatpush.msra.mxu1 %v20047_v50  ;;  %3483 = vmatpush.msra.mxu2 %v20056_v43  ;;  %v20061_v43 = vld [vmem:[#allocation41_spill] sm:$0xff] }
 0x29b   :  { %3510 = vmatpush.msra.mxu3 %v20044_v15  ;;  %3260 = vmatpush.msrb.mxu0 %v20057_v46  ;;  %v20062_v46 = vld [vmem:[#allocation81_spill] sm:$0xff]  ;;  %v20082_v15 = vld [vmem:[#allocation104_spill] sm:$0xff] }
 0x29c   :  { %3456 = vmatpush.msra.mxu1 %v20050_v32  ;;  %3487 = vmatpush.msra.mxu2 %v20058_v26  ;;  %v20063_v26 = vld [vmem:[#allocation43_spill] sm:$0xff] }
 0x29d   :  { %3512 = vmatpush.msra.mxu3 %v20045_v38  ;;  %3262 = vmatmul.f32.vlgmr.msrb.gmra.mxu0 %v16799_v11  ;;  %v20081_v38 = vld [vmem:[#allocation77_spill] sm:$0xff] }
 0x29e   :  { %3460 = vmatmul.f32.vlgmr.msra.gmra.mxu1 %v16819_v33  ;;  %3421 = vmatpush.msra.mxu0 %v20059_v25  ;;  %v20065_v33 = vld [vmem:[#allocation73_spill] sm:$0xff]  ;;  %v20066_v25 = vld [vmem:[#allocation47_spill] sm:$0xff] }
 0x29f   :  { %3491 = vmatpush.msra.mxu2 %v20060_v49  ;;  %3514 = vmatpush.msra.mxu3 %v20047_v50  ;;  %v20067_v49 = vld [vmem:[#allocation71_spill] sm:$0xff]  ;;  %v20078_v50 = vld [vmem:[#allocation74_spill] sm:$0xff] }
 0x2a0   :  { %3493 = vmatmul.f32.vlgmr.msra.gmra.mxu2 %v16799_v11  ;;  %3424 = vmatpush.msra.mxu0 %v20061_v43  ;;  %v20069_v43 = vld [vmem:[#allocation76_spill] sm:$0xff] }
 0x2a1   :  { %3516 = vmatpush.msra.mxu3 %v20050_v32  ;;  %3583 = vmatpush.msrb.mxu1 %v20062_v46  ;;  %v20070_v32 = vld [vmem:[#allocation72_spill] sm:$0xff] }
 0x2a2   :  { %3518 = vmatmul.f32.vlgmr.msra.gmra.mxu3 %v16799_v11  ;;  %3427 = vmatpush.msra.mxu0 %v20063_v26  ;;  %v20071_v46 = vld [vmem:[#allocation88_spill] sm:$0xff]  ;;  %v20072_v11 = vld [vmem:[#allocation79_spill] sm:$0xff] }
 0x2a3   :  { %3589 = vmatpush.msrb.mxu1 %v20064_v48  ;;  %3621 = vmatpush.msrb.mxu2 %v20065_v33  ;;  %v20073_v48 = vld [vmem:[#allocation75_spill] sm:$0xff]  ;;  %v20076_v33 = vld [vmem:[#allocation98_spill] sm:$0xff] }
 0x2a4   :  { %3430 = vmatpush.msra.mxu0 %v20066_v25  ;;  %3650 = vmatpush.msrb.mxu3 %v20067_v49  ;;  %v1755_v25 = vpop.f32.mrf.mxu2 }
 0x2a5   :  { %3433 = vmatmul.f32.vlgmr.msra.gmra.mxu0 %v16810_v55  ;;  %3595 = vmatpush.msrb.mxu1 %v20068_v58  ;;  %v20074_v55 = vld [vmem:[#allocation83_spill] sm:$0xff]  ;;  %v20075_v58 = vld [vmem:[#allocation78_spill] sm:$0xff] }
 0x2a6   :  { %3624 = vmatpush.msrb.mxu2 %v20069_v43  ;;  %3652 = vmatpush.msrb.mxu3 %v20070_v32  ;;  %v1796_v43 = vpop.f32.mrf.mxu3 }
 0x2a7   :  { %3601 = vmatpush.msrb.mxu1 %v20071_v46  ;;  %3550 = vmatpush.msrb.mxu0 %v20067_v49  ;;  %v1853_v46 = vpop.f32.mrf.mxu1  ;;  %v1797_v26 = vadd.f32 %v1796_v43, %v1755_v25  ;;  %v20084_v25 = vld [vmem:[#allocation82_spill] sm:$0xff]  ;;  %v20085_v43 = vld [vmem:[#allocation107_spill] sm:$0xff] }
 0x2a8   :  { %3627 = vmatpush.msrb.mxu2 %v20072_v11  ;;  %3654 = vmatpush.msrb.mxu3 %v20073_v48  ;;  %v20077_v11 = vld [vmem:[#allocation87_spill] sm:$0xff] }
 0x2a9   :  { %3710 = vmatpush.msra.mxu1 %v20067_v49  ;;  %3552 = vmatpush.msrb.mxu0 %v20070_v32  ;;  %v1826_v49 = vpop.f32.mrf.mxu0 }
 0x2aa   :  { %3630 = vmatpush.msrb.mxu2 %v20074_v55  ;;  %3656 = vmatpush.msrb.mxu3 %v20075_v58  ;;  %v20079_v55 = vld [vmem:[#allocation101_spill] sm:$0xff] }
 0x2ab   :  { %3712 = vmatpush.msra.mxu1 %v20070_v32  ;;  %3554 = vmatpush.msrb.mxu0 %v20073_v48  ;;  %v20080_v32 = vld [vmem:[#allocation90_spill] sm:$0xff] }
 0x2ac   :  { %3772 = vmatpush.msra.mxu3 %v20076_v33  ;;  %3739 = vmatpush.msra.mxu2 %v20077_v11  ;;  %v1827_v33 = vadd.f32 %v1826_v49, %v1797_v26 }
 0x2ad   :  { %3714 = vmatpush.msra.mxu1 %v20073_v48  ;;  %3556 = vmatpush.msrb.mxu0 %v20075_v58  ;;  %v20086_v48 = vld [vmem:[#allocation96_spill] sm:$0xff] }
 0x2ae   :  { %3778 = vmatpush.msra.mxu3 %v20079_v55  ;;  %3741 = vmatpush.msra.mxu2 %v20080_v32  ;;  %v1854_v55 = vadd.f32 %v1853_v46, %v1827_v33  ;;  %v1911_v3 = vpop.f32.mrf.mxu3  ;;  %v17210_v46 = vld [vmem:[%s19411_s8] ss:$0 sm:$0xff] }
 0x2af   :  { %3679 = vmatpush.msra.mxu0 %v20078_v50  ;;  %3716 = vmatpush.msra.mxu1 %v20075_v58  ;;  %v1886_v50 = vpop.f32.mrf.mxu2  ;;  %20088 = vst [vmem:[#allocation87_spill] sm:$0xff] %v17210_v46 }
 0x2b0   :  { %3784 = vmatpush.msra.mxu3 %v20082_v15  ;;  %3743 = vmatpush.msra.mxu2 %v20083_v40  ;;  %v1887_v13 = vadd.f32 %v1886_v50, %v1854_v55 }
 0x2b1   :  { %3683 = vmatpush.msra.mxu0 %v20081_v38 }
 0x2b2   :  { %3790 = vmatpush.msra.mxu3 %v20085_v43  ;;  %3745 = vmatpush.msra.mxu2 %v20086_v48  ;;  %v1912_v42 = vadd.f32 %v1911_v3, %v1887_v13 }
 0x2b3   :  { %3687 = vmatpush.msra.mxu0 %v20084_v25 }
 0x2b5   :  { %3691 = vmatpush.msra.mxu0 %v20087_v45 }
 0x2b6   :  { %v1984_v58 = vpop.f32.mrf.mxu1 }
 0x2be   :  { %v1943_v38 = vpop.f32.mrf.mxu0  ;;  %v2014_v59 = vpop.f32.mrf.mxu2 }
 0x2bf   :  { %v1944_v15 = vadd.f32 %v1943_v38, %v1912_v42  ;;  %v2099_v49 = vpop.f32.mrf.mxu1 }
 0x2c0   :  { %v2041_v26 = vpop.f32.mrf.mxu3 }
 0x2c1   :  { %v1985_v6 = vadd.f32 %v1984_v58, %v1944_v15 }
 0x2c3   :  { %v2015_v57 = vadd.f32 %v2014_v59, %v1985_v6 }
 0x2c5   :  { %v2042_v25 = vadd.f32 %v2041_v26, %v2015_v57 }
 0x2c6   :  { %v2074_v29 = vpop.f32.mrf.mxu0  ;;  %v2161_v43 = vpop.f32.mrf.mxu2 }
 0x2c7   :  { %v2075_v5 = vadd.f32 %v2074_v29, %v2042_v25  ;;  %v2259_v16 = vpop.f32.mrf.mxu1 }
 0x2c8   :  { %v2202_v24 = vpop.f32.mrf.mxu3 }
 0x2c9   :  { %v2100_v36 = vadd.f32 %v2099_v49, %v2075_v5  ;;  %v2203_v13 = vadd.f32 %v2202_v24, %v2161_v43 }
 0x2cb   :  { %v2105_v42 = vadd.f32 %v17210_v46, %v2100_v36 }
 0x2cd   :  { %v15403_v57 = vmul.f32 -1.442695, %v2105_v42 }
 0x2ce   :  { %v2232_v50 = vpop.f32.mrf.mxu0  ;;  %v2292_v3 = vpop.f32.mrf.mxu2 }
 0x2cf   :  { %v2233_v38 = vadd.f32 %v2232_v50, %v2203_v13  ;;  %v2387_v58 = vpop.f32.mrf.mxu1  ;;  %15473 = vpow2.f32 %v15403_v57 }
 0x2d0   :  { %v2317_v15 = vpop.f32.mrf.mxu3 }
 0x2d1   :  { %v2260_v6 = vadd.f32 %v2259_v16, %v2233_v38  ;;  %v17216_v16 = vld [vmem:[%s19411_s8 + $0x1] ss:$0 sm:$0xff] }
 0x2d2   :  { %20089 = vst [vmem:[#allocation90_spill] sm:$0xff] %v17216_v16 }
 0x2d3   :  { %v2293_v59 = vadd.f32 %v2292_v3, %v2260_v6 }
 0x2d5   :  { %v2318_v29 = vadd.f32 %v2317_v15, %v2293_v59  ;;  %v15474_v45 = vpop.eup %15473 }
 0x2d6   :  { %v2346_v33 = vpop.f32.mrf.mxu0  ;;  %v2417_v55 = vpop.f32.mrf.mxu2  ;;  %v2109_v13 = vadd.f32 1.0, %v15474_v45 }
 0x2d7   :  { %v2347_v5 = vadd.f32 %v2346_v33, %v2318_v29  ;;  %v2502_v24 = vpop.f32.mrf.mxu1 }
 0x2d8   :  { %v2444_v25 = vpop.f32.mrf.mxu3  ;;  %15475 = vrcp.f32 %v2109_v13  ;;  %v2121_v17 = vand.u32 2147483648, %v2109_v13  ;;  %vm2115_vm14 = vweird.f32 %v2109_v13 }
 0x2d9   :  { %v2388_v49 = vadd.f32 %v2387_v58, %v2347_v5  ;;  %v17228_v5 = vld [vmem:[%s19412_s9] ss:$0 sm:$0xff] }
 0x2da   :  { %20091 = vst [vmem:[#allocation96_spill] sm:$0xff] %v17228_v5 }
 0x2db   :  { %v2418_v26 = vadd.f32 %v2417_v55, %v2388_v49 }
 0x2dd   :  { %v2445_v43 = vadd.f32 %v2444_v25, %v2418_v26 }
 0x2de   :  { %v2477_v19 = vpop.f32.mrf.mxu0  ;;  %v2562_v12 = vpop.f32.mrf.mxu2 }
 0x2df   :  { %v2478_v36 = vadd.f32 %v2477_v19, %v2445_v43  ;;  %v2660_v15 = vpop.f32.mrf.mxu1  ;;  %v15476_v59 = vpop.eup %15475  ;;  %v17222_v19 = vld [vmem:[%s19411_s8 + $0x2] ss:$0 sm:$0xff] }
 0x2e0   :  { %v2603_v3 = vpop.f32.mrf.mxu3  ;;  %20090 = vst [vmem:[#allocation93_spill] sm:$0xff] %v17222_v19  ;;  %v2111_v33 = vmul.f32 %v15476_v59, %v2109_v13  ;;  %v2563_v55 = vadd.f32 %v17222_v19, %v2562_v12  ;;  %vm2116_vm13 = vweird.f32 %v15476_v59 }
 0x2e1   :  { %v2503_v50 = vadd.f32 %v2502_v24, %v2478_v36  ;;  %vm2117_vm15 = vmor %vm2115_vm14, %vm2116_vm13 }
 0x2e2   :  { %v2112_v49 = vsub.f32 1.0, %v2111_v33  ;;  %v2604_v43 = vadd.f32 %v2603_v3, %v2563_v55  ;;  %v2119_v33 = vand.u32 2147483647, %v2109_v13 }
 0x2e3   :  { %v2508_v42 = vadd.f32 %v17216_v16, %v2503_v50 }
 0x2e4   :  { %vm2120_vm0 = vcmp.eq.f32.partialorder %v2119_v33, 8.507059e+37 }
 0x2e5   :  { %v15412_v38 = vmul.f32 -1.442695, %v2508_v42 }
 0x2e7   :  { %15477 = vpow2.f32 %v15412_v38  ;;  %v2113_v38 = vmul.f32 %v15476_v59, %v2112_v49 }
 0x2e8   :  { %v2633_v6 = vpop.f32.mrf.mxu0  ;;  %v2693_v57 = vpop.f32.mrf.mxu2 }
 0x2e9   :  { %v2796_v25 = vpop.f32.mrf.mxu1  ;;  %v2634_v50 = vadd.f32 %v2633_v6, %v2604_v43  ;;  %v2114_v30 = vadd.f32 %v15476_v59, %v2113_v38 }
 0x2ea   :  { %v2718_v58 = vpop.f32.mrf.mxu3 }
 0x2eb   :  { %v2661_v37 = vadd.f32 %v2660_v15, %v2634_v50 }
 0x2ed   :  { %v15478_v29 = vpop.eup %15477  ;;  %v2694_v6 = vadd.f32 %v2693_v57, %v2661_v37 }
 0x2ee   :  { %v2512_v45 = vadd.f32 1.0, %v15478_v29 }
 0x2ef   :  { %v2719_v50 = vadd.f32 %v2718_v58, %v2694_v6 }
 0x2f0   :  { %15479 = vrcp.f32 %v2512_v45  ;;  %vm2518_vm2 = vweird.f32 %v2512_v45  ;;  %v2522_v38 = vand.u32 2147483647, %v2512_v45 }
 0x2f2   :  { %v2755_v26 = vpop.f32.mrf.mxu0  ;;  %v2826_v24 = vpop.f32.mrf.mxu2  ;;  %vm2523_vm5 = vcmp.eq.f32.partialorder %v2522_v38, 8.507059e+37 }
 0x2f3   :  { %v2756_v36 = vadd.f32 %v17228_v5, %v2755_v26  ;;  %v2911_v21 = vpop.f32.mrf.mxu1  ;;  %v2122_v26 = vor.u32 1.1754944e-38, %v2121_v17 }
 0x2f4   :  { %v2853_v29 = vpop.f32.mrf.mxu3 }
 0x2f5   :  { %v2797_v42 = vadd.f32 %v2796_v25, %v2756_v36  ;;  %v2118_v25 = vsel %vm2117_vm15, %v15476_v59, %v2114_v30  ;;  %v2524_v36 = vand.u32 2147483648, %v2512_v45 }
 0x2f6   :  { %v15480_v16 = vpop.eup %15479 }
 0x2f7   :  { %v2514_v46 = vmul.f32 %v15480_v16, %v2512_v45  ;;  %v2827_v12 = vadd.f32 %v2826_v24, %v2797_v42  ;;  %vm2519_vm1 = vweird.f32 %v15480_v16  ;;  %v2123_v24 = vsel %vm2120_vm0, %v2122_v26, %v2118_v25 }
 0x2f8   :  { %vm2520_vm3 = vmor %vm2518_vm2, %vm2519_vm1 }
 0x2f9   :  { %v2515_v19 = vsub.f32 1.0, %v2514_v46  ;;  %v2854_v51 = vadd.f32 %v2853_v29, %v2827_v12  ;;  %v2525_v29 = vor.u32 1.1754944e-38, %v2524_v36 }
 0x2fb   :  { %v2516_v27 = vmul.f32 %v15480_v16, %v2515_v19 }
 0x2fc   :  { %v2886_v3 = vpop.f32.mrf.mxu0  ;;  %v2947_v55 = vpop.f32.mrf.mxu2 }
 0x2fd   :  { %v2887_v49 = vadd.f32 %v2886_v3, %v2854_v51  ;;  %v2517_v46 = vadd.f32 %v15480_v16, %v2516_v27  ;;  %v3045_v37 = vpop.f32.mrf.mxu1 }
 0x2fe   :  { %v2988_v15 = vpop.f32.mrf.mxu3 }
 0x2ff   :  { %v2912_v43 = vadd.f32 %v2911_v21, %v2887_v49  ;;  %v2521_v19 = vsel %vm2520_vm3, %v15480_v16, %v2517_v46  ;;  %v2989_v30 = vadd.f32 %v2988_v15, %v2947_v55  ;;  %v20093_v46 = vld [vmem:[#allocation80_spill] sm:$0xff] }
 0x300   :  { %v2526_v21 = vsel %vm2523_vm5, %v2525_v29, %v2521_v19  ;;  %v20094_v29 = vld [vmem:[#allocation91_spill] sm:$0xff] }
 0x301   :  { %v2914_v42 = vmul.f32 %v2912_v43, %v2123_v24  ;;  %v2917_v27 = vsub.f32 1.0, %v2526_v21  ;;  %v2919_v6 = vmul.f32 0.0, %v2526_v21  ;;  %v20095_v21 = vld [vmem:[#allocation94_spill] sm:$0xff] }
 0x303   :  { %v2915_v13 = vadd.f32 %v2914_v42, %v2719_v50 }
 0x305   :  { %15481 = vtanh.f32 %v2915_v13 }
 0x306   :  { %v3018_v17 = vpop.f32.mrf.mxu0  ;;  %v3078_v51 = vpop.f32.mrf.mxu2 }
 0x307   :  { %v3019_v57 = vadd.f32 %v3018_v17, %v2989_v30  ;;  %v3173_v16 = vpop.f32.mrf.mxu1 }
 0x308   :  { %v3103_v12 = vpop.f32.mrf.mxu3 }
 0x309   :  { %v3046_v59 = vadd.f32 %v3045_v37, %v3019_v57 }
 0x30b   :  { %v15482_v33 = vpop.eup %15481  ;;  %v3079_v58 = vadd.f32 %v3078_v51, %v3046_v59 }
 0x30c   :  { %v2918_v3 = vmul.f32 %v15482_v33, %v2917_v27 }
 0x30d   :  { %v3104_v45 = vadd.f32 %v3103_v12, %v3079_v58  ;;  %v20096_v58 = vld [vmem:[#allocation89_spill] sm:$0xff] }
 0x30e   :  { %v17231_v25 = vadd.f32 %v2919_v6, %v2918_v3  ;;  %v17266_v6 = vld [vmem:[%s19408_s5] ss:$0 sm:$0xff] }
 0x30f   :  { %v3292_v49 = vrot.slane %v3104_v45, 6  ;;  %20097 = vst [vmem:[#allocation172_spill] sm:$0xff] %v17266_v6 }
 0x310   :  { %20092 = vst [vmem:[#allocation171_spill] sm:$0xff] %v17231_v25  ;;  %v3535_v55 = vsel %vm417_vm4, %v17231_v25, 0  ;;  %v3132_v26 = vpop.f32.mrf.mxu0  ;;  %v3203_v43 = vpop.f32.mrf.mxu2 }
 0x311   :  { %v17235_v24 = vand.u32 4294901760, %v3535_v55  ;;  %v3294_v15 = vadd.f32 %v3292_v49, %v20093_v46  ;;  %v3174_v36 = vadd.f32 %v3173_v16, %v3132_v26  ;;  %v3288_v30 = vpop.f32.mrf.mxu1  ;;  %v20098_v16 = vld [vmem:[#allocation114_spill] sm:$0xff]  ;;  %v20099_v49 = vld [vmem:[#allocation99_spill] sm:$0xff]  ;;  %v20100_v26 = vld [vmem:[#allocation92_spill] sm:$0xff] }
 0x312   :  { %v3230_v38 = vpop.f32.mrf.mxu3 }
 0x313   :  { %v15421_v50 = vmul.f32 -1.442695, %v3294_v15  ;;  %3603 = vmatmul.f32.vlgmr.msrb.gmra.mxu1 %v17235_v24  ;;  %v17240_v42 = vsub.f32 %v3535_v55, %v17235_v24  ;;  %v3204_v13 = vadd.f32 %v3203_v43, %v3174_v36  ;;  %v20101_v15 = vld [vmem:[#allocation117_spill] sm:$0xff]  ;;  %v20102_v36 = vld [vmem:[#allocation102_spill] sm:$0xff] }
 0x314   :  { %3839 = vmatpush.msrb.mxu1 %v20077_v11 }
 0x315   :  { %15483 = vpow2.f32 %v15421_v50  ;;  %3633 = vmatmul.f32.vlgmr.msrb.gmra.mxu2 %v17240_v42  ;;  %v17245_v19 = vand.u32 4294901760, %v17240_v42  ;;  %v3231_v17 = vadd.f32 %v3230_v38, %v3204_v13  ;;  %v20103_v50 = vld [vmem:[#allocation95_spill] sm:$0xff]  ;;  %v20104_v38 = vld [vmem:[#allocation97_spill] sm:$0xff] }
 0x316   :  { %3841 = vmatpush.msrb.mxu1 %v20080_v32  ;;  %3868 = vmatpush.msrb.mxu2 %v20094_v29 }
 0x317   :  { %3660 = vmatmul.f32.vlgmr.msrb.gmra.mxu3 %v17245_v19  ;;  %v3560_v37 = vsub.f32 %v17240_v42, %v17245_v19 }
 0x318   :  { %3843 = vmatpush.msrb.mxu1 %v20083_v40  ;;  %3899 = vmatpush.msrb.mxu3 %v20077_v11 }
 0x319   :  { %v17254_v51 = vand.u32 4294901760, %v3560_v37  ;;  %3872 = vmatpush.msrb.mxu2 %v20095_v21  ;;  %v20112_v21 = vld [vmem:[#allocation121_spill] sm:$0xff] }
 0x31a   :  { %v3263_v57 = vpop.f32.mrf.mxu0  ;;  %v3363_v59 = vpop.f32.mrf.mxu2  ;;  %3845 = vmatpush.msrb.mxu1 %v20086_v48  ;;  %3901 = vmatpush.msrb.mxu3 %v20080_v32 }
 0x31b   :  { %v15484_v27 = vpop.eup %15483  ;;  %v3264_v12 = vadd.f32 %v3263_v57, %v3231_v17  ;;  %3562 = vmatmul.f32.vlgmr.msrb.gmra.mxu0 %v17254_v51  ;;  %3718 = vmatmul.f32.vlgmr.msra.gmra.mxu1 %v17235_v24  ;;  %v3364_v45 = vadd.f32 %v17266_v6, %v3363_v59  ;;  %v20106_v57 = vld [vmem:[#allocation100_spill] sm:$0xff] }
 0x31c   :  { %v3298_v33 = vadd.f32 1.0, %v15484_v27  ;;  %3810 = vmatpush.msrb.mxu0 %v20096_v58  ;;  %3903 = vmatpush.msrb.mxu3 %v20083_v40  ;;  %v3404_v55 = vpop.f32.mrf.mxu3 }
 0x31d   :  { %v3289_v3 = vadd.f32 %v3288_v30, %v3264_v12  ;;  %3977 = vmatpush.msra.mxu1 %v20098_v16  ;;  %3876 = vmatpush.msrb.mxu2 %v20099_v49  ;;  %v3405_v37 = vadd.f32 %v3404_v55, %v3364_v45  ;;  %v20105_v30 = vld [vmem:[#allocation119_spill] sm:$0xff]  ;;  %v20107_v12 = vld [vmem:[#allocation120_spill] sm:$0xff] }
 0x31e   :  { %15485 = vrcp.f32 %v3298_v33  ;;  %3813 = vmatpush.msrb.mxu0 %v20100_v26  ;;  %3905 = vmatpush.msrb.mxu3 %v20086_v48  ;;  %v20108_v26 = vld [vmem:[#allocation103_spill] sm:$0xff]  ;;  %vm3304_vm7 = vweird.f32 %v3298_v33 }
 0x31f   :  { %v3315_v43 = vrot.slane %v3289_v3, 6  ;;  %3983 = vmatpush.msra.mxu1 %v20101_v15  ;;  %3880 = vmatpush.msrb.mxu2 %v20102_v36  ;;  %v3461_v15 = vpop.f32.mrf.mxu1 }
 0x320   :  { %3816 = vmatpush.msrb.mxu0 %v20103_v50 }
 0x321   :  { %v3317_v13 = vadd.f32 %v3315_v43, %v20104_v38  ;;  %3989 = vmatpush.msra.mxu1 %v20105_v30  ;;  %v20109_v43 = vld [vmem:[#allocation105_spill] sm:$0xff] }
 0x322   :  { %v3434_v17 = vpop.f32.mrf.mxu0  ;;  %3819 = vmatpush.msrb.mxu0 %v20106_v57  ;;  %v20110_v38 = vld [vmem:[#allocation109_spill] sm:$0xff]  ;;  %v20111_v57 = vld [vmem:[#allocation112_spill] sm:$0xff] }
 0x323   :  { %v15422_v59 = vmul.f32 -1.442695, %v3317_v13  ;;  %v3435_v27 = vadd.f32 %v3434_v17, %v3405_v37  ;;  %3693 = vmatmul.f32.vlgmr.msra.gmra.mxu0 %v17235_v24  ;;  %3995 = vmatpush.msra.mxu1 %v20107_v12  ;;  %v3494_v45 = vpop.f32.mrf.mxu2  ;;  %v3310_v37 = vand.u32 2147483648, %v3298_v33  ;;  %v3308_v17 = vand.u32 2147483647, %v3298_v33 }
 0x324   :  { %v15486_v3 = vpop.eup %15485  ;;  %3944 = vmatpush.msra.mxu0 %v20108_v26 }
 0x325   :  { %15487 = vpow2.f32 %v15422_v59  ;;  %v3462_v50 = vadd.f32 %v3461_v15, %v3435_v27  ;;  %v3300_v36 = vmul.f32 %v15486_v3, %v3298_v33  ;;  %vm3305_vm6 = vweird.f32 %v15486_v3  ;;  %v3519_v16 = vpop.f32.mrf.mxu3 }
 0x326   :  { %3946 = vmatpush.msra.mxu0 %v20109_v43  ;;  %vm3306_vm8 = vmor %vm3304_vm7, %vm3305_vm6  ;;  %v3311_v6 = vor.u32 1.1754944e-38, %v3310_v37  ;;  %vm3309_vm9 = vcmp.eq.f32.partialorder %v3308_v17, 8.507059e+37 }
 0x327   :  { %v3301_v55 = vsub.f32 1.0, %v3300_v36  ;;  %v3495_v30 = vadd.f32 %v3494_v45, %v3462_v50 }
 0x328   :  { %3948 = vmatpush.msra.mxu0 %v20110_v38 }
 0x329   :  { %v3302_v13 = vmul.f32 %v15486_v3, %v3301_v55  ;;  %v3520_v15 = vadd.f32 %v3519_v16, %v3495_v30 }
 0x32a   :  { %3950 = vmatpush.msra.mxu0 %v20111_v57 }
 0x32b   :  { %v15488_v12 = vpop.eup %15487  ;;  %v3303_v49 = vadd.f32 %v15486_v3, %v3302_v13  ;;  %v3523_v50 = vrot.slane %v3520_v15, 6 }
 0x32c   :  { %v3321_v59 = vadd.f32 1.0, %v15488_v12 }
 0x32d   :  { %v3307_v27 = vsel %vm3306_vm8, %v15486_v3, %v3303_v49 }
 0x32e   :  { %15489 = vrcp.f32 %v3321_v59  ;;  %v3312_v36 = vsel %vm3309_vm9, %v3311_v6, %v3307_v27  ;;  %v3333_v25 = vand.u32 2147483648, %v3321_v59  ;;  %v3331_v33 = vand.u32 2147483647, %v3321_v59  ;;  %v20113_v6 = vld [vmem:[#allocation125_spill] sm:$0xff] }
 0x32f   :  { %v3525_v45 = vmul.f32 %v3523_v50, %v3312_v36  ;;  %vm3327_vm11 = vweird.f32 %v3321_v59  ;;  %v3530_v3 = vrot.slane %v20113_v6, 6  ;;  %v20115_v50 = vld [vmem:[#allocation111_spill] sm:$0xff]  ;;  %v20122_v6 = vld [vmem:[#allocation124_spill] sm:$0xff] }
 0x330   :  { %v3334_v16 = vor.u32 1.1754944e-38, %v3333_v25  ;;  %vm3332_vm13 = vcmp.eq.f32.partialorder %v3331_v33, 8.507059e+37  ;;  %v20117_v33 = vld [vmem:[#allocation106_spill] sm:$0xff] }
 0x331   :  { %v3526_v29 = vadd.f32 %v3525_v45, %v20112_v21 }
 0x333   :  { %15491 = vtanh.f32 %v3526_v29 }
 0x334   :  { %v15490_v55 = vpop.eup %15489 }
 0x335   :  { %v3323_v58 = vmul.f32 %v15490_v55, %v3321_v59  ;;  %vm3328_vm10 = vweird.f32 %v15490_v55  ;;  %v20114_v59 = vld [vmem:[#allocation108_spill] sm:$0xff] }
 0x336   :  { %vm3329_vm12 = vmor %vm3327_vm11, %vm3328_vm10 }
 0x337   :  { %v3324_v46 = vsub.f32 1.0, %v3323_v58 }
 0x339   :  { %v3325_v5 = vmul.f32 %v15490_v55, %v3324_v46  ;;  %v15492_v37 = vpop.eup %15491 }
 0x33b   :  { %v3326_v12 = vadd.f32 %v15490_v55, %v3325_v5 }
 0x33d   :  { %v3330_v49 = vsel %vm3329_vm12, %v15490_v55, %v3326_v12  ;;  %v20116_v55 = vld [vmem:[#allocation115_spill] sm:$0xff]  ;;  %v20118_v12 = vld [vmem:[#allocation134_spill] sm:$0xff] }
 0x33e   :  { %v3335_v30 = vsel %vm3332_vm13, %v3334_v16, %v3330_v49  ;;  %v20119_v16 = vld [vmem:[#allocation118_spill] sm:$0xff] }
 0x33f   :  { %v3528_v13 = vsub.f32 1.0, %v3335_v30  ;;  %v3532_v15 = vmul.f32 %v3530_v3, %v3335_v30  ;;  %v20120_v49 = vld [vmem:[#allocation110_spill] sm:$0xff]  ;;  %v20121_v30 = vld [vmem:[#allocation137_spill] sm:$0xff] }
 0x340   :  { %v20123_v3 = vld [vmem:[#allocation113_spill] sm:$0xff] }
 0x341   :  { %v3529_v17 = vmul.f32 %v15492_v37, %v3528_v13  ;;  %v20124_v13 = vld [vmem:[#allocation140_spill] sm:$0xff]  ;;  %v20125_v37 = vld [vmem:[#allocation122_spill] sm:$0xff] }
 0x343   :  { %v17287_v27 = vadd.f32 %v3532_v15, %v3529_v17  ;;  %v20126_v17 = vld [vmem:[#allocation127_spill] sm:$0xff]  ;;  %v20127_v15 = vld [vmem:[#allocation116_spill] sm:$0xff] }
 0x345   :  { %v3723_v46 = vrot.slane %v17287_v27, 2 }
 0x347   :  { %v3724_v58 = vsel %vm417_vm4, %v3723_v46, 0  ;;  %v20128_v46 = vld [vmem:[#allocation142_spill] sm:$0xff] }
 0x348   :  { %v17291_v29 = vand.u32 4294901760, %v3724_v58 }
 0x34a   :  { %v17294_v5 = vsub.f32 %v3724_v58, %v17291_v29  ;;  %3792 = vmatmul.f32.vlgmr.msra.gmra.mxu3 %v17291_v29  ;;  %v20129_v58 = vld [vmem:[#allocation130_spill] sm:$0xff] }
 0x34b   :  { %4044 = vmatpush.msra.mxu3 %v20108_v26 }
 0x34c   :  { %3822 = vmatmul.f32.vlgmr.msrb.gmra.mxu0 %v17294_v5  ;;  %v17300_v25 = vand.u32 4294901760, %v17294_v5 }
 0x34d   :  { %4046 = vmatpush.msra.mxu3 %v20109_v43  ;;  %4073 = vmatpush.msrb.mxu0 %v20114_v59 }
 0x34e   :  { %3849 = vmatmul.f32.vlgmr.msrb.gmra.mxu1 %v17300_v25  ;;  %v3749_v36 = vsub.f32 %v17294_v5, %v17300_v25 }
 0x34f   :  { %4048 = vmatpush.msra.mxu3 %v20110_v38  ;;  %4077 = vmatpush.msrb.mxu0 %v20115_v50 }
 0x350   :  { %v17309_v45 = vand.u32 4294901760, %v3749_v36  ;;  %4104 = vmatpush.msrb.mxu1 %v20108_v26  ;;  %v20130_v36 = vld [vmem:[#allocation123_spill] sm:$0xff] }
 0x351   :  { %4050 = vmatpush.msra.mxu3 %v20111_v57  ;;  %4081 = vmatpush.msrb.mxu0 %v20116_v55 }
 0x352   :  { %3751 = vmatmul.f32.vlgmr.msra.gmra.mxu2 %v17309_v45  ;;  %3907 = vmatmul.f32.vlgmr.msrb.gmra.mxu3 %v17291_v29 }
 0x353   :  { %4106 = vmatpush.msrb.mxu1 %v20109_v43  ;;  %4015 = vmatpush.msra.mxu2 %v20117_v33 }
 0x354   :  { %3956 = vmatmul.f32.vlgmr.msra.gmra.mxu0 %v17254_v51  ;;  %4162 = vmatpush.msrb.mxu3 %v20118_v12 }
 0x355   :  { %4085 = vmatpush.msrb.mxu0 %v20119_v16  ;;  %4108 = vmatpush.msrb.mxu1 %v20110_v38 }
 0x356   :  { %3997 = vmatmul.f32.vlgmr.msra.gmra.mxu1 %v17235_v24  ;;  %4018 = vmatpush.msra.mxu2 %v20120_v49 }
 0x357   :  { %4110 = vmatpush.msrb.mxu1 %v20111_v57  ;;  %4168 = vmatpush.msrb.mxu3 %v20121_v30 }
 0x358   :  { %4200 = vmatpush.msra.mxu0 %v20122_v6  ;;  %4021 = vmatpush.msra.mxu2 %v20123_v3  ;;  %v20132_v3 = vld [vmem:[#allocation126_spill] sm:$0xff] }
 0x359   :  { %4174 = vmatpush.msrb.mxu3 %v20124_v13  ;;  %4229 = vmatpush.msra.mxu1 %v20125_v37  ;;  %v20131_v13 = vld [vmem:[#allocation132_spill] sm:$0xff] }
 0x35a   :  { %3882 = vmatmul.f32.vlgmr.msrb.gmra.mxu2 %v17291_v29  ;;  %4054 = vmatmul.f32.vlgmr.msra.gmra.mxu3 %v17245_v19 }
 0x35b   :  { %4203 = vmatpush.msra.mxu0 %v20126_v17  ;;  %4024 = vmatpush.msra.mxu2 %v20127_v15  ;;  %v20133_v15 = vld [vmem:[#allocation129_spill] sm:$0xff] }
 0x35c   :  { %4087 = vmatmul.f32.vlgmr.msrb.gmra.mxu0 %v17235_v24  ;;  %4180 = vmatpush.msrb.mxu3 %v20128_v46 }
 0x35d   :  { %4206 = vmatpush.msra.mxu0 %v20129_v58  ;;  %4231 = vmatpush.msra.mxu1 %v20130_v36 }
 0x35e   :  { %4112 = vmatmul.f32.vlgmr.msrb.gmra.mxu1 %v17235_v24  ;;  %4129 = vmatpush.msrb.mxu2 %v20125_v37 }
 0x35f   :  { %4209 = vmatpush.msra.mxu0 %v20131_v13  ;;  %4233 = vmatpush.msra.mxu1 %v20132_v3  ;;  %v20134_v13 = vld [vmem:[#allocation150_spill] sm:$0xff] }
 0x360   :  { %4289 = vmatpush.msra.mxu3 %v20125_v37  ;;  %4131 = vmatpush.msrb.mxu2 %v20130_v36 }
 0x361   :  { %4235 = vmatpush.msra.mxu1 %v20133_v15  ;;  %4334 = vmatpush.msrb.mxu0 %v16849_v41 }
 0x362   :  { %4027 = vmatmul.f32.vlgmr.msra.gmra.mxu2 %v17240_v42  ;;  %4182 = vmatmul.f32.vlgmr.msrb.gmra.mxu3 %v17291_v29 }
 0x363   :  { %4291 = vmatpush.msra.mxu3 %v20130_v36  ;;  %4133 = vmatpush.msrb.mxu2 %v20132_v3 }
 0x364   :  { %4212 = vmatmul.f32.vlgmr.msra.gmra.mxu0 %v17294_v5  ;;  %4367 = vmatpush.msrb.mxu1 %v20134_v13  ;;  %v20135_v13 = vld [vmem:[#allocation157_spill] sm:$0xff] }
 0x365   :  { %4293 = vmatpush.msra.mxu3 %v20132_v3  ;;  %4336 = vmatpush.msrb.mxu0 %v16868_v7  ;;  %v20139_v3 = vld [vmem:[#allocation147_spill] sm:$0xff] }
 0x366   :  { %4239 = vmatmul.f32.vlgmr.msra.gmra.mxu1 %v17300_v25  ;;  %4135 = vmatpush.msrb.mxu2 %v20133_v15 }
 0x367   :  { %4295 = vmatpush.msra.mxu3 %v20133_v15  ;;  %4338 = vmatpush.msrb.mxu0 %v16887_v8  ;;  %v20136_v15 = vld [vmem:[#allocation160_spill] sm:$0xff] }
 0x368   :  { %4373 = vmatpush.msrb.mxu1 %v16961_v20  ;;  %4258 = vmatpush.msra.mxu2 %v16802_v14  ;;  %v20137_v20 = vld [vmem:[#allocation143_spill] sm:$0xff]  ;;  %v20138_v14 = vld [vmem:[#allocation133_spill] sm:$0xff] }
 0x369   :  { %4340 = vmatpush.msrb.mxu0 %v16901_v2  ;;  %4434 = vmatpush.msrb.mxu3 %v16849_v41 }
 0x36a   :  { %4141 = vmatmul.f32.vlgmr.msrb.gmra.mxu2 %v17309_v45  ;;  %4297 = vmatmul.f32.vlgmr.msra.gmra.mxu3 %v17291_v29 }
 0x36b   :  { %4379 = vmatpush.msrb.mxu1 %v20135_v13  ;;  %4262 = vmatpush.msra.mxu2 %v16815_v31  ;;  %v20140_v13 = vld [vmem:[#allocation135_spill] sm:$0xff] }
 0x36c   :  { %4346 = vmatmul.f32.vlgmr.msrb.gmra.mxu0 %v17309_v45  ;;  %4436 = vmatpush.msrb.mxu3 %v16868_v7 }
 0x36d   :  { %4385 = vmatpush.msrb.mxu1 %v20136_v15  ;;  %4463 = vmatpush.msra.mxu0 %v20137_v20 }
 0x36e   :  { %4266 = vmatpush.msra.mxu2 %v20138_v14  ;;  %4387 = vmatmul.f32.vlgmr.msrb.gmra.mxu1 %v17291_v29 }
 0x36f   :  { %4438 = vmatpush.msrb.mxu3 %v16887_v8  ;;  %4467 = vmatpush.msra.mxu0 %v20139_v3 }
 0x370   :  { %4494 = vmatpush.msra.mxu1 %v16849_v41  ;;  %4270 = vmatpush.msra.mxu2 %v20140_v13 }
 0x371   :  { %4440 = vmatpush.msrb.mxu3 %v16901_v2  ;;  %4471 = vmatpush.msra.mxu0 %v16930_v35 }
 0x372   :  { %4496 = vmatpush.msra.mxu1 %v16868_v7  ;;  %4272 = vmatmul.f32.vlgmr.msra.gmra.mxu2 %v17291_v29 }
 0x373   :  { %4405 = vmatpush.msrb.mxu2 %v16871_v28  ;;  %4444 = vmatmul.f32.vlgmr.msrb.gmra.mxu3 %v17300_v25 }
 0x374   :  { %4475 = vmatpush.msra.mxu0 %v16944_v54  ;;  %4498 = vmatpush.msra.mxu1 %v16887_v8 }
 0x375   :  { %4552 = vmatpush.msra.mxu3 %v17030_v56  ;;  %4408 = vmatpush.msrb.mxu2 %v16897_v61 }
 0x376   :  { %4477 = vmatmul.f32.vlgmr.msra.gmra.mxu0 %v17291_v29  ;;  %4500 = vmatpush.msra.mxu1 %v16901_v2 }
 0x377   :  { %4558 = vmatpush.msra.mxu3 %v17038_v10  ;;  %4590 = vmatpush.msrb.mxu0 %v16971_v1 }
 0x378   :  { %4411 = vmatpush.msrb.mxu2 %v16908_v47  ;;  %4502 = vmatmul.f32.vlgmr.msra.gmra.mxu1 %v17291_v29 }
 0x379   :  { %4564 = vmatpush.msra.mxu3 %v17046_v62  ;;  %4593 = vmatpush.msrb.mxu0 %v16982_v52 }
 0x37a   :  { %4619 = vmatpush.msrb.mxu1 %v16946_v39  ;;  %4414 = vmatpush.msrb.mxu2 %v16920_v60 }
 0x37b   :  { %4570 = vmatpush.msra.mxu3 %v17052_v44  ;;  %4596 = vmatpush.msrb.mxu0 %v16996_v22 }
 0x37c   :  { %4621 = vmatpush.msrb.mxu1 %v16957_v18  ;;  %4417 = vmatmul.f32.vlgmr.msrb.gmra.mxu2 %v17294_v5 }
 0x37d   :  { %4519 = vmatpush.msra.mxu2 %v16946_v39  ;;  %4572 = vmatmul.f32.vlgmr.msra.gmra.mxu3 %v17235_v24 }
 0x37e   :  { %4599 = vmatpush.msrb.mxu0 %v17006_v63  ;;  %4623 = vmatpush.msrb.mxu1 %v16973_v9  ;;  %v20142_v63 = vld [vmem:[#allocation161_spill] sm:$0xff] }
 0x37f   :  { %4679 = vmatpush.msrb.mxu3 %v16946_v39  ;;  %4521 = vmatpush.msra.mxu2 %v16957_v18 }
 0x380   :  { %4602 = vmatmul.f32.vlgmr.msrb.gmra.mxu0 %v17240_v42  ;;  %4625 = vmatpush.msrb.mxu1 %v16984_v53  ;;  %v20141_v42 = vld [vmem:[#allocation17_spill] sm:$0xff] }
 0x381   :  { %4681 = vmatpush.msrb.mxu3 %v16957_v18  ;;  %4711 = vmatpush.msra.mxu0 %v16146_v0 }
 0x382   :  { %4523 = vmatpush.msra.mxu2 %v16973_v9  ;;  %4629 = vmatmul.f32.vlgmr.msrb.gmra.mxu1 %v17245_v19  ;;  %v20143_v19 = vld [vmem:[#allocation13_spill] sm:$0xff] }
 0x383   :  { %4683 = vmatpush.msrb.mxu3 %v16973_v9  ;;  %4713 = vmatpush.msra.mxu0 %v16152_v4  ;;  %v20144_v9 = vld [vmem:[#allocation19_spill] sm:$0xff] }
 0x384   :  { %4744 = vmatpush.msra.mxu1 %v16192_v23  ;;  %4525 = vmatpush.msra.mxu2 %v16984_v53  ;;  %v20145_v23 = vld [vmem:[#allocation163_spill] sm:$0xff] }
 0x385   :  { %4685 = vmatpush.msrb.mxu3 %v16984_v53  ;;  %4715 = vmatpush.msra.mxu0 %v16170_v34  ;;  %v20146_v53 = vld [vmem:[#allocation20_spill] sm:$0xff] }
 0x386   :  { %4750 = vmatpush.msra.mxu1 %v20141_v42  ;;  %4531 = vmatmul.f32.vlgmr.msra.gmra.mxu2 %v17254_v51  ;;  %v20147_v42 = vld [vmem:[#allocation9_spill] sm:$0xff] }
 0x387   :  { %4648 = vmatpush.msrb.mxu2 %v20142_v63  ;;  %4687 = vmatmul.f32.vlgmr.msrb.gmra.mxu3 %v17235_v24  ;;  %v20148_v51 = vld [vmem:[#allocation165_spill] sm:$0xff]  ;;  %v20149_v63 = vld [vmem:[#allocation11_spill] sm:$0xff] }
 0x388   :  { %4717 = vmatpush.msra.mxu0 %v20143_v19  ;;  %4756 = vmatpush.msra.mxu1 %v20144_v9  ;;  %v20150_v9 = vld [vmem:[#allocation166_spill] sm:$0xff] }
 0x389   :  { %4811 = vmatpush.msra.mxu3 %v16146_v0  ;;  %4652 = vmatpush.msrb.mxu2 %v20145_v23  ;;  %v20151_v23 = vld [vmem:[#allocation15_spill] sm:$0xff] }
 0x38a   :  { %4723 = vmatmul.f32.vlgmr.msra.gmra.mxu0 %v17309_v45  ;;  %4762 = vmatpush.msra.mxu1 %v20146_v53  ;;  %v20155_v53 = vld [vmem:[#allocation8_spill] sm:$0xff] }
 0x38b   :  { %4813 = vmatpush.msra.mxu3 %v16152_v4  ;;  %4840 = vmatpush.msrb.mxu0 %v20147_v42  ;;  %v20152_v42 = vld [vmem:[#allocation7_spill] sm:$0xff] }
 0x38c   :  { %4656 = vmatpush.msrb.mxu2 %v20148_v51  ;;  %4764 = vmatmul.f32.vlgmr.msra.gmra.mxu1 %v17291_v29  ;;  %v20153_v51 = vld [vmem:[#allocation18_spill] sm:$0xff] }
 0x38d   :  { %4815 = vmatpush.msra.mxu3 %v16170_v34  ;;  %4844 = vmatpush.msrb.mxu0 %v20149_v63  ;;  %v20154_v63 = vld [vmem:[#allocation33_spill] sm:$0xff] }
 0x38e   :  { %4871 = vmatpush.msrb.mxu1 %v16146_v0  ;;  %4660 = vmatpush.msrb.mxu2 %v20150_v9  ;;  %v20157_v9 = vld [vmem:[#allocation22_spill] sm:$0xff] }
 0x38f   :  { %4817 = vmatpush.msra.mxu3 %v20143_v19  ;;  %4848 = vmatpush.msrb.mxu0 %v20151_v23  ;;  %v20156_v23 = vld [vmem:[#allocation34_spill] sm:$0xff] }
 0x390   :  { %4873 = vmatpush.msrb.mxu1 %v16152_v4  ;;  %4662 = vmatmul.f32.vlgmr.msrb.gmra.mxu2 %v17235_v24  ;;  %v20158_v24 = vld [vmem:[#allocation12_spill] sm:$0xff]  ;;  %v20164_v4 = vld [vmem:[#allocation27_spill] sm:$0xff] }
 0x391   :  { %4782 = vmatpush.msra.mxu2 %v20152_v42  ;;  %4821 = vmatmul.f32.vlgmr.msra.gmra.mxu3 %v17300_v25  ;;  %v20159_v42 = vld [vmem:[#allocation35_spill] sm:$0xff] }
 0x392   :  { %4852 = vmatpush.msrb.mxu0 %v20153_v51  ;;  %4875 = vmatpush.msrb.mxu1 %v16170_v34  ;;  %v20160_v51 = vld [vmem:[#allocation24_spill] sm:$0xff]  ;;  %v20161_v34 = vld [vmem:[#allocation21_spill] sm:$0xff] }
 0x393   :  { %4929 = vmatpush.msrb.mxu3 %v20154_v63  ;;  %4785 = vmatpush.msra.mxu2 %v20155_v53  ;;  %v20162_v63 = vld [vmem:[#allocation16_spill] sm:$0xff]  ;;  %v20163_v53 = vld [vmem:[#allocation39_spill] sm:$0xff] }
 0x394   :  { %4854 = vmatmul.f32.vlgmr.msrb.gmra.mxu0 %v17291_v29  ;;  %4877 = vmatpush.msrb.mxu1 %v20143_v19  ;;  %v20165_v19 = vld [vmem:[#allocation23_spill] sm:$0xff] }
 0x395   :  { %4935 = vmatpush.msrb.mxu3 %v20156_v23  ;;  %4967 = vmatpush.msra.mxu0 %v20157_v9  ;;  %v20175_v9 = vld [vmem:[#allocation45_spill] sm:$0xff]  ;;  %v20180_v23 = vld [vmem:[#allocation31_spill] sm:$0xff] }
 0x396   :  { %4788 = vmatpush.msra.mxu2 %v20158_v24  ;;  %4879 = vmatmul.f32.vlgmr.msrb.gmra.mxu1 %v17291_v29  ;;  %v20166_v24 = vld [vmem:[#allocation28_spill] sm:$0xff] }
 0x397   :  { %4941 = vmatpush.msrb.mxu3 %v20159_v42  ;;  %4970 = vmatpush.msra.mxu0 %v20160_v51  ;;  %v20167_v42 = vld [vmem:[#allocation25_spill] sm:$0xff] }
 0x398   :  { %4996 = vmatpush.msra.mxu1 %v20161_v34  ;;  %4791 = vmatpush.msra.mxu2 %v20162_v63  ;;  %v20171_v63 = vld [vmem:[#allocation46_spill] sm:$0xff]  ;;  %v20173_v51 = vld [vmem:[#allocation49_spill] sm:$0xff] }
 0x399   :  { %4947 = vmatpush.msrb.mxu3 %v20163_v53  ;;  %4973 = vmatpush.msra.mxu0 %v20164_v4  ;;  %v20168_v53 = vld [vmem:[#allocation26_spill] sm:$0xff]  ;;  %v20169_v4 = vld [vmem:[#allocation36_spill] sm:$0xff] }
 0x39a   :  { %4998 = vmatpush.msra.mxu1 %v20165_v19  ;;  %4794 = vmatmul.f32.vlgmr.msra.gmra.mxu2 %v17294_v5 }
 0x39b   :  { %4896 = vmatpush.msrb.mxu2 %v20161_v34  ;;  %4949 = vmatmul.f32.vlgmr.msrb.gmra.mxu3 %v17291_v29 }
 0x39c   :  { %4976 = vmatpush.msra.mxu0 %v20166_v24  ;;  %5000 = vmatpush.msra.mxu1 %v20167_v42  ;;  %v20170_v24 = vld [vmem:[#allocation37_spill] sm:$0xff] }
 0x39d   :  { %5056 = vmatpush.msra.mxu3 %v20161_v34  ;;  %4898 = vmatpush.msrb.mxu2 %v20165_v19  ;;  %v20172_v34 = vld [vmem:[#allocation38_spill] sm:$0xff] }
 0x39e   :  { %4979 = vmatmul.f32.vlgmr.msra.gmra.mxu0 %v17294_v5  ;;  %5002 = vmatpush.msra.mxu1 %v20168_v53 }
 0x39f   :  { %5058 = vmatpush.msra.mxu3 %v20165_v19  ;;  %5127 = vmatpush.msrb.mxu0 %v20169_v4  ;;  %v20174_v19 = vld [vmem:[#allocation29_spill] sm:$0xff] }
 0x3a0   :  { %4900 = vmatpush.msrb.mxu2 %v20167_v42  ;;  %5006 = vmatmul.f32.vlgmr.msra.gmra.mxu1 %v17300_v25 }
 0x3a1   :  { %5060 = vmatpush.msra.mxu3 %v20167_v42  ;;  %5129 = vmatpush.msrb.mxu0 %v20170_v24  ;;  %v20176_v42 = vld [vmem:[#allocation51_spill] sm:$0xff] }
 0x3a2   :  { %5160 = vmatpush.msrb.mxu1 %v20171_v63  ;;  %4902 = vmatpush.msrb.mxu2 %v20168_v53  ;;  %v20177_v63 = vld [vmem:[#allocation30_spill] sm:$0xff] }
 0x3a3   :  { %5062 = vmatpush.msra.mxu3 %v20168_v53  ;;  %5131 = vmatpush.msrb.mxu0 %v20172_v34  ;;  %v20178_v53 = vld [vmem:[#allocation52_spill] sm:$0xff] }
 0x3a4   :  { %5166 = vmatpush.msrb.mxu1 %v20173_v51  ;;  %4908 = vmatmul.f32.vlgmr.msrb.gmra.mxu2 %v17309_v45  ;;  %v20179_v51 = vld [vmem:[#allocation42_spill] sm:$0xff] }
 0x3a5   :  { %5025 = vmatpush.msra.mxu2 %v20174_v19  ;;  %5064 = vmatmul.f32.vlgmr.msra.gmra.mxu3 %v17291_v29  ;;  %v20181_v19 = vld [vmem:[#allocation44_spill] sm:$0xff] }
 0x3a6   :  { %5133 = vmatpush.msrb.mxu0 %v20175_v9  ;;  %5172 = vmatpush.msrb.mxu1 %v20176_v42  ;;  %v20182_v42 = vld [vmem:[#allocation32_spill] sm:$0xff] }
 0x3a7   :  { %5227 = vmatpush.msrb.mxu3 %v20169_v4  ;;  %5029 = vmatpush.msra.mxu2 %v20177_v63  ;;  %v20193_v63 = vld [vmem:[#allocation86_spill] sm:$0xff] }
 0x3a8   :  { %5139 = vmatmul.f32.vlgmr.msrb.gmra.mxu0 %v17309_v45  ;;  %5178 = vmatpush.msrb.mxu1 %v20178_v53  ;;  %v20183_v45 = vld [vmem:[#allocation48_spill] sm:$0xff] }
 0x3a9   :  { %5229 = vmatpush.msrb.mxu3 %v20170_v24  ;;  %5256 = vmatpush.msra.mxu0 %v20179_v51  ;;  %v20185_v51 = vld [vmem:[#allocation50_spill] sm:$0xff]  ;;  %v20189_v53 = vld [vmem:[#allocation84_spill] sm:$0xff] }
 0x3aa   :  { %5033 = vmatpush.msra.mxu2 %v20180_v23  ;;  %5180 = vmatmul.f32.vlgmr.msrb.gmra.mxu1 %v17291_v29  ;;  %v20184_v23 = vld [vmem:[#allocation40_spill] sm:$0xff] }
 0x3ab   :  { %5231 = vmatpush.msrb.mxu3 %v20172_v34  ;;  %5260 = vmatpush.msra.mxu0 %v20181_v19  ;;  %v20186_v19 = vld [vmem:[#allocation41_spill] sm:$0xff] }
 0x3ac   :  { %5287 = vmatpush.msra.mxu1 %v20169_v4  ;;  %5037 = vmatpush.msra.mxu2 %v20182_v42  ;;  %v20187_v42 = vld [vmem:[#allocation81_spill] sm:$0xff] }
 0x3ad   :  { %5233 = vmatpush.msrb.mxu3 %v20175_v9  ;;  %5264 = vmatpush.msra.mxu0 %v20183_v45  ;;  %v20188_v45 = vld [vmem:[#allocation43_spill] sm:$0xff] }
 0x3ae   :  { %5289 = vmatpush.msra.mxu1 %v20170_v24  ;;  %5039 = vmatmul.f32.vlgmr.msra.gmra.mxu2 %v17291_v29 }
 0x3af   :  { %5237 = vmatmul.f32.vlgmr.msrb.gmra.mxu3 %v17300_v25  ;;  %5198 = vmatpush.msrb.mxu2 %v20184_v23  ;;  %v20190_v25 = vld [vmem:[#allocation73_spill] sm:$0xff]  ;;  %v20191_v23 = vld [vmem:[#allocation47_spill] sm:$0xff] }
 0x3b0   :  { %5268 = vmatpush.msra.mxu0 %v20185_v51  ;;  %5291 = vmatpush.msra.mxu1 %v20172_v34  ;;  %v20192_v51 = vld [vmem:[#allocation71_spill] sm:$0xff] }
 0x3b1   :  { %5270 = vmatmul.f32.vlgmr.msra.gmra.mxu0 %v17291_v29  ;;  %5201 = vmatpush.msrb.mxu2 %v20186_v19  ;;  %v20194_v19 = vld [vmem:[#allocation76_spill] sm:$0xff] }
 0x3b2   :  { %5293 = vmatpush.msra.mxu1 %v20175_v9  ;;  %5360 = vmatpush.msra.mxu3 %v20187_v42  ;;  %v20195_v9 = vld [vmem:[#allocation72_spill] sm:$0xff] }
 0x3b3   :  { %5295 = vmatmul.f32.vlgmr.msra.gmra.mxu1 %v17291_v29  ;;  %5204 = vmatpush.msrb.mxu2 %v20188_v45  ;;  %v20196_v42 = vld [vmem:[#allocation88_spill] sm:$0xff]  ;;  %v20197_v29 = vld [vmem:[#allocation79_spill] sm:$0xff]  ;;  %v20208_v45 = vld [vmem:[#allocation85_spill] sm:$0xff] }
 0x3b4   :  { %5366 = vmatpush.msra.mxu3 %v20189_v53  ;;  %5398 = vmatpush.msrb.mxu0 %v20190_v25  ;;  %v20198_v53 = vld [vmem:[#allocation75_spill] sm:$0xff]  ;;  %v3563_v25 = vpop.f32.mrf.mxu0 }
 0x3b5   :  { %5207 = vmatpush.msrb.mxu2 %v20191_v23  ;;  %5427 = vmatpush.msrb.mxu1 %v20192_v51 }
 0x3b6   :  { %5210 = vmatmul.f32.vlgmr.msrb.gmra.mxu2 %v17294_v5  ;;  %5372 = vmatpush.msra.mxu3 %v20193_v63  ;;  %v20199_v5 = vld [vmem:[#allocation83_spill] sm:$0xff]  ;;  %v20200_v63 = vld [vmem:[#allocation78_spill] sm:$0xff] }
 0x3b7   :  { %5401 = vmatpush.msrb.mxu0 %v20194_v19  ;;  %5429 = vmatpush.msrb.mxu1 %v20195_v9  ;;  %v20202_v19 = vld [vmem:[#allocation74_spill] sm:$0xff] }
 0x3b8   :  { %5378 = vmatpush.msra.mxu3 %v20196_v42  ;;  %5327 = vmatpush.msra.mxu2 %v20192_v51  ;;  %v20201_v42 = vld [vmem:[#allocation98_spill] sm:$0xff] }
 0x3b9   :  { %5404 = vmatpush.msrb.mxu0 %v20197_v29  ;;  %5431 = vmatpush.msrb.mxu1 %v20198_v53  ;;  %v3604_v29 = vpop.f32.mrf.mxu1 }
 0x3ba   :  { %5487 = vmatpush.msrb.mxu3 %v20192_v51  ;;  %5329 = vmatpush.msra.mxu2 %v20195_v9  ;;  %v20203_v51 = vld [vmem:[#allocation101_spill] sm:$0xff] }
 0x3bb   :  { %5407 = vmatpush.msrb.mxu0 %v20199_v5  ;;  %5433 = vmatpush.msrb.mxu1 %v20200_v63  ;;  %v20204_v5 = vld [vmem:[#allocation77_spill] sm:$0xff] }
 0x3bc   :  { %5489 = vmatpush.msrb.mxu3 %v20195_v9  ;;  %5331 = vmatpush.msra.mxu2 %v20198_v53  ;;  %v20205_v9 = vld [vmem:[#allocation104_spill] sm:$0xff]  ;;  %v3694_v23 = vpop.f32.mrf.mxu0 }
 0x3bd   :  { %5549 = vmatpush.msra.mxu1 %v20201_v42  ;;  %5516 = vmatpush.msra.mxu0 %v20077_v11  ;;  %v20206_v42 = vld [vmem:[#allocation82_spill] sm:$0xff] }
 0x3be   :  { %5491 = vmatpush.msrb.mxu3 %v20198_v53  ;;  %5333 = vmatpush.msra.mxu2 %v20200_v63  ;;  %v20207_v53 = vld [vmem:[#allocation107_spill] sm:$0xff] }
 0x3bf   :  { %5555 = vmatpush.msra.mxu1 %v20203_v51  ;;  %5518 = vmatpush.msra.mxu0 %v20080_v32  ;;  %v3605_v51 = vadd.f32 %v3604_v29, %v3563_v25 }
 0x3c0   :  { %5456 = vmatpush.msrb.mxu2 %v20202_v19  ;;  %5493 = vmatpush.msrb.mxu3 %v20200_v63  ;;  %v3661_v19 = vpop.f32.mrf.mxu3  ;;  %v3634_v63 = vpop.f32.mrf.mxu2 }
 0x3c1   :  { %5561 = vmatpush.msra.mxu1 %v20205_v9  ;;  %5520 = vmatpush.msra.mxu0 %v20083_v40  ;;  %v3719_v34 = vpop.f32.mrf.mxu1  ;;  %v3635_v24 = vadd.f32 %v3634_v63, %v3605_v51 }
 0x3c2   :  { %5460 = vmatpush.msrb.mxu2 %v20204_v5 }
 0x3c3   :  { %5567 = vmatpush.msra.mxu1 %v20207_v53  ;;  %5522 = vmatpush.msra.mxu0 %v20086_v48  ;;  %v3662_v0 = vadd.f32 %v3661_v19, %v3635_v24  ;;  %v20209_v19 = vld [vmem:[#allocation87_spill] sm:$0xff] }
 0x3c4   :  { %5464 = vmatpush.msrb.mxu2 %v20206_v42 }
 0x3c5   :  { %v3695_v9 = vadd.f32 %v3694_v23, %v3662_v0 }
 0x3c6   :  { %5468 = vmatpush.msrb.mxu2 %v20208_v45 }
 0x3c7   :  { %v3720_v22 = vadd.f32 %v3719_v34, %v3695_v9 }
 0x3c9   :  { %v3823_v4 = vpop.f32.mrf.mxu0 }
 0x3cb   :  { %v3850_v18 = vpop.f32.mrf.mxu1 }
 0x3cd   :  { %v3793_v5 = vpop.f32.mrf.mxu3 }
 0x3d1   :  { %v3957_v42 = vpop.f32.mrf.mxu0 }
 0x3d3   :  { %v3998_v62 = vpop.f32.mrf.mxu1 }
 0x3d4   :  { %v3999_v63 = vadd.f32 %v3998_v62, %v3957_v42 }
 0x3d5   :  { %v3752_v44 = vpop.f32.mrf.mxu2  ;;  %v3908_v53 = vpop.f32.mrf.mxu3 }
 0x3d6   :  { %v3753_v60 = vadd.f32 %v3752_v44, %v3720_v22 }
 0x3d8   :  { %v3794_v39 = vadd.f32 %v3793_v5, %v3753_v60 }
 0x3d9   :  { %v4088_v25 = vpop.f32.mrf.mxu0 }
 0x3da   :  { %v3824_v52 = vadd.f32 %v3823_v4, %v3794_v39 }
 0x3db   :  { %v4113_v51 = vpop.f32.mrf.mxu1 }
 0x3dc   :  { %v3851_v47 = vadd.f32 %v3850_v18, %v3824_v52 }
 0x3dd   :  { %v3883_v1 = vpop.f32.mrf.mxu2  ;;  %v4055_v29 = vpop.f32.mrf.mxu3 }
 0x3de   :  { %v3884_v45 = vadd.f32 %v3883_v1, %v3851_v47 }
 0x3e0   :  { %v3909_v10 = vadd.f32 %v3908_v53, %v3884_v45 }
 0x3e1   :  { %v4213_v24 = vpop.f32.mrf.mxu0 }
 0x3e2   :  { %v3911_v0 = vadd.f32 %v20209_v19, %v3909_v10 }
 0x3e3   :  { %v4240_v18 = vpop.f32.mrf.mxu1 }
 0x3e4   :  { %v15423_v9 = vmul.f32 -1.442695, %v3911_v0 }
 0x3e5   :  { %v4028_v61 = vpop.f32.mrf.mxu2  ;;  %v4183_v44 = vpop.f32.mrf.mxu3 }
 0x3e6   :  { %v4029_v23 = vadd.f32 %v4028_v61, %v3999_v63  ;;  %15493 = vpow2.f32 %v15423_v9  ;;  %v20210_v63 = vld [vmem:[#allocation90_spill] sm:$0xff] }
 0x3e8   :  { %v4056_v34 = vadd.f32 %v4055_v29, %v4029_v23 }
 0x3e9   :  { %v4347_v53 = vpop.f32.mrf.mxu0 }
 0x3ea   :  { %v4089_v22 = vadd.f32 %v4088_v25, %v4056_v34 }
 0x3eb   :  { %v4388_v29 = vpop.f32.mrf.mxu1 }
 0x3ec   :  { %v4114_v60 = vadd.f32 %v4113_v51, %v4089_v22  ;;  %v15494_v52 = vpop.eup %15493 }
 0x3ed   :  { %v4142_v4 = vpop.f32.mrf.mxu2  ;;  %v4298_v42 = vpop.f32.mrf.mxu3  ;;  %v3915_v10 = vadd.f32 1.0, %v15494_v52 }
 0x3ee   :  { %v4143_v39 = vadd.f32 %v4142_v4, %v4114_v60  ;;  %v20211_v60 = vld [vmem:[#allocation93_spill] sm:$0xff] }
 0x3ef   :  { %15495 = vrcp.f32 %v3915_v10  ;;  %v4348_v4 = vadd.f32 %v20211_v60, %v4347_v53  ;;  %v3927_v60 = vand.u32 2147483648, %v3915_v10  ;;  %vm3921_vm15 = vweird.f32 %v3915_v10 }
 0x3f0   :  { %v4184_v1 = vadd.f32 %v4183_v44, %v4143_v39 }
 0x3f1   :  { %v4389_v52 = vadd.f32 %v4388_v29, %v4348_v4 }
 0x3f2   :  { %v4214_v47 = vadd.f32 %v4213_v24, %v4184_v1 }
 0x3f3   :  { %v4478_v51 = vpop.f32.mrf.mxu0 }
 0x3f4   :  { %v4241_v62 = vadd.f32 %v4240_v18, %v4214_v47 }
 0x3f5   :  { %v4273_v45 = vpop.f32.mrf.mxu2  ;;  %v15496_v34 = vpop.eup %15495 }
 0x3f6   :  { %v4274_v5 = vadd.f32 %v4273_v45, %v4241_v62  ;;  %v4445_v0 = vpop.f32.mrf.mxu3  ;;  %v4503_v9 = vpop.f32.mrf.mxu1  ;;  %v3917_v22 = vmul.f32 %v15496_v34, %v3915_v10  ;;  %v20212_v62 = vld [vmem:[#allocation96_spill] sm:$0xff]  ;;  %vm3922_vm14 = vweird.f32 %v15496_v34 }
 0x3f7   :  { %vm3923_vm0 = vmor %vm3921_vm15, %vm3922_vm14 }
 0x3f8   :  { %v4299_v61 = vadd.f32 %v4298_v42, %v4274_v5  ;;  %v3918_v18 = vsub.f32 1.0, %v3917_v22  ;;  %v3925_v22 = vand.u32 2147483647, %v3915_v10 }
 0x3fa   :  { %v4301_v19 = vadd.f32 %v20210_v63, %v4299_v61  ;;  %v3919_v61 = vmul.f32 %v15496_v34, %v3918_v18  ;;  %vm3926_vm1 = vcmp.eq.f32.partialorder %v3925_v22, 8.507059e+37 }
 0x3fc   :  { %v15424_v25 = vmul.f32 -1.442695, %v4301_v19  ;;  %v3920_v28 = vadd.f32 %v15496_v34, %v3919_v61 }
 0x3fd   :  { %v4603_v39 = vpop.f32.mrf.mxu0 }
 0x3fe   :  { %15497 = vpow2.f32 %v15424_v25 }
 0x3ff   :  { %v4418_v23 = vpop.f32.mrf.mxu2  ;;  %v4630_v19 = vpop.f32.mrf.mxu1 }
 0x400   :  { %v4573_v1 = vpop.f32.mrf.mxu3  ;;  %v4419_v45 = vadd.f32 %v4418_v23, %v4389_v52 }
 0x404   :  { %v15498_v24 = vpop.eup %15497 }
 0x405   :  { %v4305_v44 = vadd.f32 1.0, %v15498_v24  ;;  %v4446_v24 = vadd.f32 %v4445_v0, %v4419_v45 }
 0x407   :  { %15499 = vrcp.f32 %v4305_v44  ;;  %v4724_v35 = vpop.f32.mrf.mxu0  ;;  %v4479_v23 = vadd.f32 %v4478_v51, %v4446_v24  ;;  %vm4311_vm3 = vweird.f32 %v4305_v44 }
 0x409   :  { %v4532_v47 = vpop.f32.mrf.mxu2 }
 0x40a   :  { %v4533_v42 = vadd.f32 %v20212_v62, %v4532_v47  ;;  %v4688_v29 = vpop.f32.mrf.mxu3  ;;  %v3928_v47 = vor.u32 1.1754944e-38, %v3927_v60 }
 0x40c   :  { %v4574_v5 = vadd.f32 %v4573_v1, %v4533_v42  ;;  %v3924_v1 = vsel %vm3923_vm0, %v15496_v34, %v3920_v28  ;;  %v4317_v42 = vand.u32 2147483648, %v4305_v44 }
 0x40d   :  { %v15500_v63 = vpop.eup %15499  ;;  %v3929_v62 = vsel %vm3926_vm1, %v3928_v47, %v3924_v1 }
 0x40e   :  { %v4307_v25 = vmul.f32 %v15500_v63, %v4305_v44  ;;  %v4604_v56 = vadd.f32 %v4603_v39, %v4574_v5  ;;  %vm4312_vm2 = vweird.f32 %v15500_v63  ;;  %v4765_v39 = vpop.f32.mrf.mxu1  ;;  %v4315_v5 = vand.u32 2147483647, %v4305_v44 }
 0x40f   :  { %vm4313_vm5 = vmor %vm4311_vm3, %vm4312_vm2  ;;  %v4318_v61 = vor.u32 1.1754944e-38, %v4317_v42 }
 0x410   :  { %v4308_v54 = vsub.f32 1.0, %v4307_v25  ;;  %v4631_v53 = vadd.f32 %v4630_v19, %v4604_v56  ;;  %v4504_v56 = vadd.f32 %v4503_v9, %v4479_v23  ;;  %v4766_v19 = vadd.f32 %v4765_v39, %v4724_v35 }
 0x411   :  { %v4855_v51 = vpop.f32.mrf.mxu0  ;;  %vm4316_vm6 = vcmp.eq.f32.partialorder %v4315_v5, 8.507059e+37 }
 0x412   :  { %v4309_v13 = vmul.f32 %v15500_v63, %v4308_v54 }
 0x413   :  { %v4663_v4 = vpop.f32.mrf.mxu2 }
 0x414   :  { %v4664_v18 = vadd.f32 %v4663_v4, %v4631_v53  ;;  %v4310_v0 = vadd.f32 %v15500_v63, %v4309_v13  ;;  %v4822_v28 = vpop.f32.mrf.mxu3  ;;  %v20213_v4 = vld [vmem:[#allocation171_spill] sm:$0xff] }
 0x416   :  { %v4689_v52 = vadd.f32 %v4688_v29, %v4664_v18  ;;  %v4314_v10 = vsel %vm4313_vm5, %v15500_v63, %v4310_v0  ;;  %v4880_v60 = vpop.f32.mrf.mxu1 }
 0x417   :  { %v4319_v25 = vsel %vm4316_vm6, %v4318_v61, %v4314_v10  ;;  %v20215_v61 = vld [vmem:[#allocation91_spill] sm:$0xff] }
 0x418   :  { %v4691_v45 = vmul.f32 %v4689_v52, %v3929_v62  ;;  %v4694_v13 = vsub.f32 1.0, %v4319_v25  ;;  %v4696_v44 = vmul.f32 %v4319_v25, %v20213_v4  ;;  %v20214_v62 = vld [vmem:[#allocation80_spill] sm:$0xff]  ;;  %v20216_v25 = vld [vmem:[#allocation94_spill] sm:$0xff] }
 0x41a   :  { %v4692_v54 = vadd.f32 %v4691_v45, %v4504_v56 }
 0x41b   :  { %v4980_v63 = vpop.f32.mrf.mxu0 }
 0x41c   :  { %15501 = vtanh.f32 %v4692_v54 }
 0x41d   :  { %v4795_v34 = vpop.f32.mrf.mxu2 }
 0x41e   :  { %v4796_v24 = vadd.f32 %v4795_v34, %v4766_v19  ;;  %v4950_v47 = vpop.f32.mrf.mxu3  ;;  %v5007_v5 = vpop.f32.mrf.mxu1 }
 0x420   :  { %v4823_v53 = vadd.f32 %v4822_v28, %v4796_v24 }
 0x422   :  { %v15502_v22 = vpop.eup %15501  ;;  %v4856_v9 = vadd.f32 %v4855_v51, %v4823_v53 }
 0x423   :  { %v4695_v29 = vmul.f32 %v15502_v22, %v4694_v13 }
 0x424   :  { %v4881_v23 = vadd.f32 %v4880_v60, %v4856_v9  ;;  %v20217_v9 = vld [vmem:[#allocation89_spill] sm:$0xff] }
 0x425   :  { %v17548_v1 = vadd.f32 %v4696_v44, %v4695_v29  ;;  %v5140_v51 = vpop.f32.mrf.mxu0  ;;  %v20218_v29 = vld [vmem:[#allocation172_spill] sm:$0xff] }
 0x426   :  { %v5069_v35 = vrot.slane %v4881_v23, 4  ;;  %v5141_v4 = vadd.f32 %v20218_v29, %v5140_v51  ;;  %v20219_v23 = vld [vmem:[#allocation114_spill] sm:$0xff] }
 0x427   :  { %v5312_v18 = vsel %vm417_vm4, %v17548_v1, 0  ;;  %v4909_v52 = vpop.f32.mrf.mxu2 }
 0x428   :  { %v17552_v39 = vand.u32 4294901760, %v5312_v18  ;;  %v5071_v0 = vadd.f32 %v5069_v35, %v20214_v62  ;;  %v4951_v42 = vadd.f32 %v4950_v47, %v4909_v52  ;;  %v5065_v24 = vpop.f32.mrf.mxu3  ;;  %v5181_v35 = vpop.f32.mrf.mxu1  ;;  %v20222_v52 = vld [vmem:[#allocation117_spill] sm:$0xff] }
 0x42a   :  { %v15425_v56 = vmul.f32 -1.442695, %v5071_v0  ;;  %5380 = vmatmul.f32.vlgmr.msra.gmra.mxu3 %v17552_v39  ;;  %v17557_v45 = vsub.f32 %v5312_v18, %v17552_v39  ;;  %v4981_v54 = vadd.f32 %v4980_v63, %v4951_v42  ;;  %v20220_v63 = vld [vmem:[#allocation99_spill] sm:$0xff]  ;;  %v20221_v18 = vld [vmem:[#allocation92_spill] sm:$0xff]  ;;  %v20223_v0 = vld [vmem:[#allocation102_spill] sm:$0xff] }
 0x42b   :  { %5616 = vmatpush.msra.mxu3 %v20077_v11  ;;  %v20224_v42 = vld [vmem:[#allocation95_spill] sm:$0xff] }
 0x42c   :  { %15503 = vpow2.f32 %v15425_v56  ;;  %5410 = vmatmul.f32.vlgmr.msrb.gmra.mxu0 %v17557_v45  ;;  %v17562_v10 = vand.u32 4294901760, %v17557_v45  ;;  %v5008_v28 = vadd.f32 %v5007_v5, %v4981_v54  ;;  %v5182_v56 = vadd.f32 %v5181_v35, %v5141_v4  ;;  %v20225_v5 = vld [vmem:[#allocation97_spill] sm:$0xff] }
 0x42d   :  { %5618 = vmatpush.msra.mxu3 %v20080_v32  ;;  %5645 = vmatpush.msrb.mxu0 %v20215_v61 }
 0x42e   :  { %5437 = vmatmul.f32.vlgmr.msrb.gmra.mxu1 %v17562_v10  ;;  %v5337_v19 = vsub.f32 %v17557_v45, %v17562_v10  ;;  %v5271_v35 = vpop.f32.mrf.mxu0 }
 0x42f   :  { %5620 = vmatpush.msra.mxu3 %v20083_v40  ;;  %5676 = vmatpush.msrb.mxu1 %v20077_v11 }
 0x430   :  { %v17571_v34 = vand.u32 4294901760, %v5337_v19  ;;  %5649 = vmatpush.msrb.mxu0 %v20216_v25  ;;  %v20226_v19 = vld [vmem:[#allocation119_spill] sm:$0xff] }
 0x431   :  { %v5040_v53 = vpop.f32.mrf.mxu2  ;;  %5622 = vmatpush.msra.mxu3 %v20086_v48  ;;  %5678 = vmatpush.msrb.mxu1 %v20080_v32 }
 0x432   :  { %v15504_v60 = vpop.eup %15503  ;;  %v5041_v13 = vadd.f32 %v5040_v53, %v5008_v28  ;;  %5339 = vmatmul.f32.vlgmr.msra.gmra.mxu2 %v17571_v34  ;;  %5495 = vmatmul.f32.vlgmr.msrb.gmra.mxu3 %v17552_v39  ;;  %v20227_v28 = vld [vmem:[#allocation100_spill] sm:$0xff]  ;;  %v5238_v29 = vpop.f32.mrf.mxu3 }
 0x433   :  { %v5075_v22 = vadd.f32 1.0, %v15504_v60  ;;  %5587 = vmatpush.msra.mxu2 %v20217_v9  ;;  %5680 = vmatpush.msrb.mxu1 %v20083_v40  ;;  %v20228_v60 = vld [vmem:[#allocation120_spill] sm:$0xff] }
 0x434   :  { %v5066_v44 = vadd.f32 %v5065_v24, %v5041_v13  ;;  %5754 = vmatpush.msrb.mxu3 %v20219_v23  ;;  %5653 = vmatpush.msrb.mxu0 %v20220_v63 }
 0x435   :  { %15505 = vrcp.f32 %v5075_v22  ;;  %5590 = vmatpush.msra.mxu2 %v20221_v18  ;;  %5682 = vmatpush.msrb.mxu1 %v20086_v48  ;;  %vm5081_vm8 = vweird.f32 %v5075_v22 }
 0x436   :  { %v5092_v47 = vrot.slane %v5066_v44, 4  ;;  %5760 = vmatpush.msrb.mxu3 %v20222_v52  ;;  %5657 = vmatpush.msrb.mxu0 %v20223_v0 }
 0x437   :  { %5593 = vmatpush.msra.mxu2 %v20224_v42 }
 0x438   :  { %v5094_v54 = vadd.f32 %v5092_v47, %v20225_v5  ;;  %5766 = vmatpush.msrb.mxu3 %v20226_v19 }
 0x439   :  { %v5211_v51 = vpop.f32.mrf.mxu2  ;;  %5596 = vmatpush.msra.mxu2 %v20227_v28  ;;  %v5296_v28 = vpop.f32.mrf.mxu1 }
 0x43a   :  { %v15426_v24 = vmul.f32 -1.442695, %v5094_v54  ;;  %v5212_v53 = vadd.f32 %v5211_v51, %v5182_v56  ;;  %5470 = vmatmul.f32.vlgmr.msrb.gmra.mxu2 %v17552_v39  ;;  %5772 = vmatpush.msrb.mxu3 %v20228_v60  ;;  %v5087_v56 = vand.u32 2147483648, %v5075_v22  ;;  %v5085_v51 = vand.u32 2147483647, %v5075_v22 }
 0x43b   :  { %v15506_v13 = vpop.eup %15505  ;;  %5721 = vmatpush.msrb.mxu2 %v20108_v26 }
 0x43c   :  { %15507 = vpow2.f32 %v15426_v24  ;;  %v5077_v44 = vmul.f32 %v15506_v13, %v5075_v22  ;;  %v5239_v4 = vadd.f32 %v5238_v29, %v5212_v53  ;;  %vm5082_vm7 = vweird.f32 %v15506_v13 }
 0x43d   :  { %5723 = vmatpush.msrb.mxu2 %v20109_v43  ;;  %vm5083_vm9 = vmor %vm5081_vm8, %vm5082_vm7  ;;  %v5088_v42 = vor.u32 1.1754944e-38, %v5087_v56  ;;  %vm5086_vm10 = vcmp.eq.f32.partialorder %v5085_v51, 8.507059e+37 }
 0x43e   :  { %v5078_v47 = vsub.f32 1.0, %v5077_v44  ;;  %v5272_v19 = vadd.f32 %v5271_v35, %v5239_v4 }
 0x43f   :  { %5725 = vmatpush.msrb.mxu2 %v20110_v38 }
 0x440   :  { %v5079_v54 = vmul.f32 %v15506_v13, %v5078_v47  ;;  %v5297_v53 = vadd.f32 %v5296_v28, %v5272_v19 }
 0x441   :  { %5727 = vmatpush.msrb.mxu2 %v20111_v57 }
 0x442   :  { %v15508_v60 = vpop.eup %15507  ;;  %v5080_v5 = vadd.f32 %v15506_v13, %v5079_v54  ;;  %v5300_v4 = vrot.slane %v5297_v53, 4 }
 0x443   :  { %v5098_v24 = vadd.f32 1.0, %v15508_v60 }
 0x444   :  { %v5084_v29 = vsel %vm5083_vm9, %v15506_v13, %v5080_v5 }
 0x445   :  { %15509 = vrcp.f32 %v5098_v24  ;;  %v5089_v44 = vsel %vm5086_vm10, %v5088_v42, %v5084_v29  ;;  %v5110_v63 = vand.u32 2147483648, %v5098_v24  ;;  %v5108_v54 = vand.u32 2147483647, %v5098_v24  ;;  %v20229_v29 = vld [vmem:[#allocation113_spill] sm:$0xff] }
 0x446   :  { %v5302_v35 = vmul.f32 %v5300_v4, %v5089_v44  ;;  %vm5104_vm12 = vweird.f32 %v5098_v24  ;;  %v5307_v42 = vrot.slane %v17287_v27, 6  ;;  %v20230_v44 = vld [vmem:[#allocation140_spill] sm:$0xff] }
 0x447   :  { %v5111_v5 = vor.u32 1.1754944e-38, %v5110_v63  ;;  %vm5109_vm14 = vcmp.eq.f32.partialorder %v5108_v54, 8.507059e+37  ;;  %v20231_v4 = vld [vmem:[#allocation116_spill] sm:$0xff]  ;;  %v20234_v54 = vld [vmem:[#allocation129_spill] sm:$0xff] }
 0x448   :  { %v5303_v52 = vadd.f32 %v5302_v35, %v20112_v21  ;;  %v20232_v35 = vld [vmem:[#allocation132_spill] sm:$0xff] }
 0x44a   :  { %15511 = vtanh.f32 %v5303_v52 }
 0x44b   :  { %v15510_v47 = vpop.eup %15509 }
 0x44c   :  { %v5100_v0 = vmul.f32 %v15510_v47, %v5098_v24  ;;  %vm5105_vm11 = vweird.f32 %v15510_v47 }
 0x44d   :  { %vm5106_vm13 = vmor %vm5104_vm12, %vm5105_vm11 }
 0x44e   :  { %v5101_v18 = vsub.f32 1.0, %v5100_v0 }
 0x450   :  { %v5102_v23 = vmul.f32 %v15510_v47, %v5101_v18  ;;  %v15512_v13 = vpop.eup %15511 }
 0x452   :  { %v5103_v22 = vadd.f32 %v15510_v47, %v5102_v23 }
 0x454   :  { %v5107_v19 = vsel %vm5106_vm13, %v15510_v47, %v5103_v22  ;;  %v20233_v47 = vld [vmem:[#allocation126_spill] sm:$0xff] }
 0x455   :  { %v5112_v28 = vsel %vm5109_vm14, %v5111_v5, %v5107_v19  ;;  %v20235_v22 = vld [vmem:[#allocation150_spill] sm:$0xff]  ;;  %v20237_v19 = vld [vmem:[#allocation128_spill] sm:$0xff] }
 0x456   :  { %v5305_v60 = vsub.f32 1.0, %v5112_v28  ;;  %v5309_v51 = vmul.f32 %v5307_v42, %v5112_v28  ;;  %v20236_v5 = vld [vmem:[#allocation154_spill] sm:$0xff]  ;;  %v20238_v28 = vld [vmem:[#allocation157_spill] sm:$0xff]  ;;  %v20239_v42 = vld [vmem:[#allocation135_spill] sm:$0xff] }
 0x458   :  { %v5306_v56 = vmul.f32 %v15512_v13, %v5305_v60  ;;  %v20240_v60 = vld [vmem:[#allocation149_spill] sm:$0xff]  ;;  %v20241_v13 = vld [vmem:[#allocation139_spill] sm:$0xff] }
 0x45a   :  { %v17599_v53 = vadd.f32 %v5309_v51, %v5306_v56  ;;  %v20242_v56 = vld [vmem:[#allocation151_spill] sm:$0xff] }
 0x45b   :  { %v20243_v51 = vld [vmem:[#allocation167_spill] sm:$0xff] }
 0x45c   :  { %v5500_v18 = vrot.slane %v17599_v53, 4 }
 0x45e   :  { %v5501_v0 = vsel %vm417_vm4, %v5500_v18, 0  ;;  %v20244_v18 = vld [vmem:[#allocation144_spill] sm:$0xff] }
 0x45f   :  { %v17603_v52 = vand.u32 4294901760, %v5501_v0 }
 0x461   :  { %v17606_v23 = vsub.f32 %v5501_v0, %v17603_v52  ;;  %5569 = vmatmul.f32.vlgmr.msra.gmra.mxu1 %v17603_v52  ;;  %v20245_v0 = vld [vmem:[#allocation168_spill] sm:$0xff] }
 0x462   :  { %5821 = vmatpush.msra.mxu1 %v20108_v26 }
 0x463   :  { %5599 = vmatmul.f32.vlgmr.msra.gmra.mxu2 %v17606_v23  ;;  %v17612_v27 = vand.u32 4294901760, %v17606_v23 }
 0x464   :  { %5823 = vmatpush.msra.mxu1 %v20109_v43  ;;  %5850 = vmatpush.msra.mxu2 %v20114_v59 }
 0x465   :  { %5626 = vmatmul.f32.vlgmr.msra.gmra.mxu3 %v17612_v27  ;;  %v5526_v63 = vsub.f32 %v17606_v23, %v17612_v27 }
 0x466   :  { %5825 = vmatpush.msra.mxu1 %v20110_v38  ;;  %5854 = vmatpush.msra.mxu2 %v20115_v50 }
 0x467   :  { %v17621_v24 = vand.u32 4294901760, %v5526_v63  ;;  %5881 = vmatpush.msra.mxu3 %v20108_v26  ;;  %v20246_v63 = vld [vmem:[#allocation155_spill] sm:$0xff] }
 0x468   :  { %5827 = vmatpush.msra.mxu1 %v20111_v57  ;;  %5858 = vmatpush.msra.mxu2 %v20116_v55 }
 0x469   :  { %5528 = vmatmul.f32.vlgmr.msra.gmra.mxu0 %v17621_v24  ;;  %5684 = vmatmul.f32.vlgmr.msrb.gmra.mxu1 %v17603_v52 }
 0x46a   :  { %5883 = vmatpush.msra.mxu3 %v20109_v43  ;;  %5792 = vmatpush.msra.mxu0 %v20117_v33 }
 0x46b   :  { %5733 = vmatmul.f32.vlgmr.msrb.gmra.mxu2 %v17571_v34  ;;  %5939 = vmatpush.msrb.mxu1 %v20118_v12 }
 0x46c   :  { %5862 = vmatpush.msra.mxu2 %v20119_v16  ;;  %5885 = vmatpush.msra.mxu3 %v20110_v38 }
 0x46d   :  { %5774 = vmatmul.f32.vlgmr.msrb.gmra.mxu3 %v17552_v39  ;;  %5795 = vmatpush.msra.mxu0 %v20120_v49 }
 0x46e   :  { %5887 = vmatpush.msra.mxu3 %v20111_v57  ;;  %5945 = vmatpush.msrb.mxu1 %v20121_v30 }
 0x46f   :  { %5977 = vmatpush.msrb.mxu2 %v20122_v6  ;;  %5798 = vmatpush.msra.mxu0 %v20229_v29 }
 0x470   :  { %5951 = vmatpush.msrb.mxu1 %v20230_v44  ;;  %6006 = vmatpush.msrb.mxu3 %v20125_v37 }
 0x471   :  { %5659 = vmatmul.f32.vlgmr.msrb.gmra.mxu0 %v17603_v52  ;;  %5831 = vmatmul.f32.vlgmr.msra.gmra.mxu1 %v17562_v10 }
 0x472   :  { %5980 = vmatpush.msrb.mxu2 %v20126_v17  ;;  %5801 = vmatpush.msra.mxu0 %v20231_v4 }
 0x473   :  { %5864 = vmatmul.f32.vlgmr.msra.gmra.mxu2 %v17552_v39  ;;  %5957 = vmatpush.msrb.mxu1 %v20128_v46 }
 0x474   :  { %5983 = vmatpush.msrb.mxu2 %v20129_v58  ;;  %6008 = vmatpush.msrb.mxu3 %v20130_v36 }
 0x475   :  { %5889 = vmatmul.f32.vlgmr.msra.gmra.mxu3 %v17552_v39  ;;  %5906 = vmatpush.msrb.mxu0 %v20125_v37 }
 0x476   :  { %5986 = vmatpush.msrb.mxu2 %v20232_v35  ;;  %6010 = vmatpush.msrb.mxu3 %v20233_v47 }
 0x477   :  { %6066 = vmatpush.msra.mxu1 %v20125_v37  ;;  %5908 = vmatpush.msrb.mxu0 %v20130_v36 }
 0x478   :  { %6012 = vmatpush.msrb.mxu3 %v20234_v54  ;;  %6111 = vmatpush.msra.mxu2 %v16849_v41 }
 0x479   :  { %5804 = vmatmul.f32.vlgmr.msra.gmra.mxu0 %v17557_v45  ;;  %5959 = vmatmul.f32.vlgmr.msrb.gmra.mxu1 %v17603_v52 }
 0x47a   :  { %6068 = vmatpush.msra.mxu1 %v20130_v36  ;;  %5910 = vmatpush.msrb.mxu0 %v20233_v47 }
 0x47b   :  { %5989 = vmatmul.f32.vlgmr.msrb.gmra.mxu2 %v17606_v23  ;;  %6144 = vmatpush.msra.mxu3 %v20235_v22 }
 0x47c   :  { %6070 = vmatpush.msra.mxu1 %v20233_v47  ;;  %6113 = vmatpush.msra.mxu2 %v16868_v7 }
 0x47d   :  { %6016 = vmatmul.f32.vlgmr.msrb.gmra.mxu3 %v17612_v27  ;;  %5912 = vmatpush.msrb.mxu0 %v20234_v54 }
 0x47e   :  { %6072 = vmatpush.msra.mxu1 %v20234_v54  ;;  %6115 = vmatpush.msra.mxu2 %v16887_v8 }
 0x47f   :  { %6150 = vmatpush.msra.mxu3 %v20236_v5  ;;  %6035 = vmatpush.msra.mxu0 %v20237_v19 }
 0x480   :  { %6117 = vmatpush.msra.mxu2 %v16901_v2  ;;  %6211 = vmatpush.msrb.mxu1 %v16849_v41 }
 0x481   :  { %5918 = vmatmul.f32.vlgmr.msrb.gmra.mxu0 %v17621_v24  ;;  %6074 = vmatmul.f32.vlgmr.msra.gmra.mxu1 %v17603_v52 }
 0x482   :  { %6156 = vmatpush.msra.mxu3 %v20238_v28  ;;  %6039 = vmatpush.msra.mxu0 %v16815_v31 }
 0x483   :  { %6123 = vmatmul.f32.vlgmr.msra.gmra.mxu2 %v17621_v24  ;;  %6213 = vmatpush.msrb.mxu1 %v16868_v7 }
 0x484   :  { %6162 = vmatpush.msra.mxu3 %v20136_v15  ;;  %6240 = vmatpush.msrb.mxu2 %v20137_v20 }
 0x485   :  { %6043 = vmatpush.msra.mxu0 %v20138_v14  ;;  %6164 = vmatmul.f32.vlgmr.msra.gmra.mxu3 %v17603_v52  ;;  %v20254_v14 = vld [vmem:[#allocation153_spill] sm:$0xff] }
 0x486   :  { %6215 = vmatpush.msrb.mxu1 %v16887_v8  ;;  %6244 = vmatpush.msrb.mxu2 %v20139_v3  ;;  %v20253_v3 = vld [vmem:[#allocation162_spill] sm:$0xff] }
 0x487   :  { %6271 = vmatpush.msrb.mxu3 %v16849_v41  ;;  %6047 = vmatpush.msra.mxu0 %v20239_v42  ;;  %v20250_v42 = vld [vmem:[#allocation152_spill] sm:$0xff] }
 0x488   :  { %6217 = vmatpush.msrb.mxu1 %v16901_v2  ;;  %6248 = vmatpush.msrb.mxu2 %v20240_v60  ;;  %v20247_v60 = vld [vmem:[#allocation146_spill] sm:$0xff] }
 0x489   :  { %6273 = vmatpush.msrb.mxu3 %v16868_v7  ;;  %6049 = vmatmul.f32.vlgmr.msra.gmra.mxu0 %v17603_v52 }
 0x48a   :  { %6182 = vmatpush.msrb.mxu0 %v20241_v13  ;;  %6221 = vmatmul.f32.vlgmr.msrb.gmra.mxu1 %v17612_v27  ;;  %v20248_v13 = vld [vmem:[#allocation169_spill] sm:$0xff] }
 0x48b   :  { %6252 = vmatpush.msrb.mxu2 %v20242_v56  ;;  %6275 = vmatpush.msrb.mxu3 %v16887_v8  ;;  %v20249_v56 = vld [vmem:[#allocation158_spill] sm:$0xff] }
 0x48c   :  { %6329 = vmatpush.msra.mxu1 %v20243_v51  ;;  %6185 = vmatpush.msrb.mxu0 %v20244_v18  ;;  %v20251_v51 = vld [vmem:[#allocation148_spill] sm:$0xff]  ;;  %v20252_v18 = vld [vmem:[#allocation170_spill] sm:$0xff] }
 0x48d   :  { %6254 = vmatmul.f32.vlgmr.msrb.gmra.mxu2 %v17603_v52  ;;  %6277 = vmatpush.msrb.mxu3 %v16901_v2 }
 0x48e   :  { %6335 = vmatpush.msra.mxu1 %v20245_v0  ;;  %6367 = vmatpush.msra.mxu2 %v20246_v63 }
 0x48f   :  { %6188 = vmatpush.msrb.mxu0 %v20247_v60  ;;  %6279 = vmatmul.f32.vlgmr.msrb.gmra.mxu3 %v17603_v52  ;;  %v20255_v60 = vld [vmem:[#allocation164_spill] sm:$0xff] }
 0x490   :  { %6341 = vmatpush.msra.mxu1 %v20248_v13  ;;  %6370 = vmatpush.msra.mxu2 %v20249_v56  ;;  %v20256_v13 = vld [vmem:[#allocation156_spill] sm:$0xff] }
 0x491   :  { %6396 = vmatpush.msra.mxu3 %v20250_v42  ;;  %6191 = vmatpush.msrb.mxu0 %v20251_v51  ;;  %v20260_v51 = vld [vmem:[#allocation14_spill] sm:$0xff] }
 0x492   :  { %6347 = vmatpush.msra.mxu1 %v20252_v18  ;;  %6373 = vmatpush.msra.mxu2 %v20253_v3  ;;  %v20257_v18 = vld [vmem:[#allocation159_spill] sm:$0xff]  ;;  %v20258_v3 = vld [vmem:[#allocation5_spill] sm:$0xff] }
 0x493   :  { %6398 = vmatpush.msra.mxu3 %v20254_v14  ;;  %6194 = vmatmul.f32.vlgmr.msrb.gmra.mxu0 %v17606_v23 }
 0x494   :  { %6296 = vmatpush.msra.mxu0 %v20250_v42  ;;  %6349 = vmatmul.f32.vlgmr.msra.gmra.mxu1 %v17552_v39 }
 0x495   :  { %6376 = vmatpush.msra.mxu2 %v20255_v60  ;;  %6400 = vmatpush.msra.mxu3 %v20256_v13  ;;  %v20259_v60 = vld [vmem:[#allocation6_spill] sm:$0xff] }
 0x496   :  { %6456 = vmatpush.msrb.mxu1 %v20250_v42  ;;  %6298 = vmatpush.msra.mxu0 %v20254_v14  ;;  %v20262_v42 = vld [vmem:[#allocation17_spill] sm:$0xff] }
 0x497   :  { %6379 = vmatmul.f32.vlgmr.msra.gmra.mxu2 %v17557_v45  ;;  %6402 = vmatpush.msra.mxu3 %v20257_v18  ;;  %v20261_v45 = vld [vmem:[#allocation10_spill] sm:$0xff] }
 0x498   :  { %6458 = vmatpush.msrb.mxu1 %v20254_v14  ;;  %6488 = vmatpush.msrb.mxu2 %v20258_v3  ;;  %v20263_v14 = vld [vmem:[#allocation161_spill] sm:$0xff] }
 0x499   :  { %6300 = vmatpush.msra.mxu0 %v20256_v13  ;;  %6406 = vmatmul.f32.vlgmr.msra.gmra.mxu3 %v17562_v10  ;;  %v20264_v10 = vld [vmem:[#allocation13_spill] sm:$0xff] }
 0x49a   :  { %6460 = vmatpush.msrb.mxu1 %v20256_v13  ;;  %6490 = vmatpush.msrb.mxu2 %v20259_v60  ;;  %v20265_v13 = vld [vmem:[#allocation19_spill] sm:$0xff] }
 0x49b   :  { %6521 = vmatpush.msrb.mxu3 %v20260_v51  ;;  %6302 = vmatpush.msra.mxu0 %v20257_v18  ;;  %v20266_v51 = vld [vmem:[#allocation163_spill] sm:$0xff] }
 0x49c   :  { %6462 = vmatpush.msrb.mxu1 %v20257_v18  ;;  %6492 = vmatpush.msrb.mxu2 %v20261_v45  ;;  %v20267_v18 = vld [vmem:[#allocation20_spill] sm:$0xff] }
 0x49d   :  { %6527 = vmatpush.msrb.mxu3 %v20262_v42  ;;  %6308 = vmatmul.f32.vlgmr.msra.gmra.mxu0 %v17571_v34  ;;  %v20268_v42 = vld [vmem:[#allocation9_spill] sm:$0xff] }
 0x49e   :  { %6425 = vmatpush.msrb.mxu0 %v20263_v14  ;;  %6464 = vmatmul.f32.vlgmr.msrb.gmra.mxu1 %v17552_v39  ;;  %v20269_v34 = vld [vmem:[#allocation165_spill] sm:$0xff]  ;;  %v20270_v14 = vld [vmem:[#allocation11_spill] sm:$0xff] }
 0x49f   :  { %6494 = vmatpush.msrb.mxu2 %v20264_v10  ;;  %6533 = vmatpush.msrb.mxu3 %v20265_v13  ;;  %v20271_v13 = vld [vmem:[#allocation166_spill] sm:$0xff] }
 0x4a0   :  { %6588 = vmatpush.msra.mxu1 %v20258_v3  ;;  %6429 = vmatpush.msrb.mxu0 %v20266_v51  ;;  %v20272_v51 = vld [vmem:[#allocation15_spill] sm:$0xff] }
 0x4a1   :  { %6500 = vmatmul.f32.vlgmr.msrb.gmra.mxu2 %v17621_v24  ;;  %6539 = vmatpush.msrb.mxu3 %v20267_v18  ;;  %v20276_v18 = vld [vmem:[#allocation8_spill] sm:$0xff] }
 0x4a2   :  { %6590 = vmatpush.msra.mxu1 %v20259_v60  ;;  %6617 = vmatpush.msra.mxu2 %v20268_v42  ;;  %v20273_v42 = vld [vmem:[#allocation7_spill] sm:$0xff] }
 0x4a3   :  { %6433 = vmatpush.msrb.mxu0 %v20269_v34  ;;  %6541 = vmatmul.f32.vlgmr.msrb.gmra.mxu3 %v17603_v52  ;;  %v20274_v34 = vld [vmem:[#allocation18_spill] sm:$0xff] }
 0x4a4   :  { %6592 = vmatpush.msra.mxu1 %v20261_v45  ;;  %6621 = vmatpush.msra.mxu2 %v20270_v14  ;;  %v20275_v14 = vld [vmem:[#allocation33_spill] sm:$0xff] }
 0x4a5   :  { %6648 = vmatpush.msra.mxu3 %v20258_v3  ;;  %6437 = vmatpush.msrb.mxu0 %v20271_v13  ;;  %v20278_v13 = vld [vmem:[#allocation22_spill] sm:$0xff] }
 0x4a6   :  { %6594 = vmatpush.msra.mxu1 %v20264_v10  ;;  %6625 = vmatpush.msra.mxu2 %v20272_v51  ;;  %v20277_v51 = vld [vmem:[#allocation34_spill] sm:$0xff] }
 0x4a7   :  { %6650 = vmatpush.msra.mxu3 %v20259_v60  ;;  %6439 = vmatmul.f32.vlgmr.msrb.gmra.mxu0 %v17552_v39  ;;  %v20279_v39 = vld [vmem:[#allocation12_spill] sm:$0xff]  ;;  %v20285_v60 = vld [vmem:[#allocation27_spill] sm:$0xff] }
 0x4a8   :  { %6559 = vmatpush.msra.mxu0 %v20273_v42  ;;  %6598 = vmatmul.f32.vlgmr.msra.gmra.mxu1 %v17612_v27  ;;  %v20280_v42 = vld [vmem:[#allocation35_spill] sm:$0xff] }
 0x4a9   :  { %6629 = vmatpush.msra.mxu2 %v20274_v34  ;;  %6652 = vmatpush.msra.mxu3 %v20261_v45  ;;  %v20281_v34 = vld [vmem:[#allocation24_spill] sm:$0xff]  ;;  %v20282_v45 = vld [vmem:[#allocation21_spill] sm:$0xff] }
 0x4aa   :  { %6706 = vmatpush.msrb.mxu1 %v20275_v14  ;;  %6562 = vmatpush.msra.mxu0 %v20276_v18  ;;  %v20283_v14 = vld [vmem:[#allocation16_spill] sm:$0xff]  ;;  %v20284_v18 = vld [vmem:[#allocation39_spill] sm:$0xff] }
 0x4ab   :  { %6631 = vmatmul.f32.vlgmr.msra.gmra.mxu2 %v17603_v52  ;;  %6654 = vmatpush.msra.mxu3 %v20264_v10  ;;  %v20286_v10 = vld [vmem:[#allocation23_spill] sm:$0xff] }
 0x4ac   :  { %6712 = vmatpush.msrb.mxu1 %v20277_v51  ;;  %6744 = vmatpush.msrb.mxu2 %v20278_v13  ;;  %v20296_v13 = vld [vmem:[#allocation45_spill] sm:$0xff]  ;;  %v20301_v51 = vld [vmem:[#allocation31_spill] sm:$0xff] }
 0x4ad   :  { %6565 = vmatpush.msra.mxu0 %v20279_v39  ;;  %6656 = vmatmul.f32.vlgmr.msra.gmra.mxu3 %v17603_v52  ;;  %v20287_v39 = vld [vmem:[#allocation28_spill] sm:$0xff] }
 0x4ae   :  { %6718 = vmatpush.msrb.mxu1 %v20280_v42  ;;  %6747 = vmatpush.msrb.mxu2 %v20281_v34  ;;  %v20288_v42 = vld [vmem:[#allocation25_spill] sm:$0xff] }
 0x4af   :  { %6773 = vmatpush.msrb.mxu3 %v20282_v45  ;;  %6568 = vmatpush.msra.mxu0 %v20283_v14  ;;  %v20292_v14 = vld [vmem:[#allocation46_spill] sm:$0xff]  ;;  %v20294_v34 = vld [vmem:[#allocation49_spill] sm:$0xff] }
 0x4b0   :  { %6724 = vmatpush.msrb.mxu1 %v20284_v18  ;;  %6750 = vmatpush.msrb.mxu2 %v20285_v60  ;;  %v20289_v18 = vld [vmem:[#allocation26_spill] sm:$0xff]  ;;  %v20290_v60 = vld [vmem:[#allocation36_spill] sm:$0xff] }
 0x4b1   :  { %6775 = vmatpush.msrb.mxu3 %v20286_v10  ;;  %6571 = vmatmul.f32.vlgmr.msra.gmra.mxu0 %v17606_v23 }
 0x4b2   :  { %6673 = vmatpush.msrb.mxu0 %v20282_v45  ;;  %6726 = vmatmul.f32.vlgmr.msrb.gmra.mxu1 %v17603_v52 }
 0x4b3   :  { %6753 = vmatpush.msrb.mxu2 %v20287_v39  ;;  %6777 = vmatpush.msrb.mxu3 %v20288_v42  ;;  %v20291_v39 = vld [vmem:[#allocation37_spill] sm:$0xff] }
 0x4b4   :  { %6833 = vmatpush.msra.mxu1 %v20282_v45  ;;  %6675 = vmatpush.msrb.mxu0 %v20286_v10  ;;  %v20293_v45 = vld [vmem:[#allocation38_spill] sm:$0xff] }
 0x4b5   :  { %6756 = vmatmul.f32.vlgmr.msrb.gmra.mxu2 %v17606_v23  ;;  %6779 = vmatpush.msrb.mxu3 %v20289_v18 }
 0x4b6   :  { %6835 = vmatpush.msra.mxu1 %v20286_v10  ;;  %6904 = vmatpush.msra.mxu2 %v20290_v60  ;;  %v20295_v10 = vld [vmem:[#allocation29_spill] sm:$0xff] }
 0x4b7   :  { %6677 = vmatpush.msrb.mxu0 %v20288_v42  ;;  %6783 = vmatmul.f32.vlgmr.msrb.gmra.mxu3 %v17612_v27 }
 0x4b8   :  { %6837 = vmatpush.msra.mxu1 %v20288_v42  ;;  %6906 = vmatpush.msra.mxu2 %v20291_v39  ;;  %v20297_v42 = vld [vmem:[#allocation51_spill] sm:$0xff] }
 0x4b9   :  { %6937 = vmatpush.msra.mxu3 %v20292_v14  ;;  %6679 = vmatpush.msrb.mxu0 %v20289_v18  ;;  %v20298_v14 = vld [vmem:[#allocation30_spill] sm:$0xff] }
 0x4ba   :  { %6839 = vmatpush.msra.mxu1 %v20289_v18  ;;  %6908 = vmatpush.msra.mxu2 %v20293_v45  ;;  %v20299_v18 = vld [vmem:[#allocation52_spill] sm:$0xff] }
 0x4bb   :  { %6943 = vmatpush.msra.mxu3 %v20294_v34  ;;  %6685 = vmatmul.f32.vlgmr.msrb.gmra.mxu0 %v17621_v24  ;;  %v20300_v34 = vld [vmem:[#allocation42_spill] sm:$0xff] }
 0x4bc   :  { %6802 = vmatpush.msra.mxu0 %v20295_v10  ;;  %6841 = vmatmul.f32.vlgmr.msra.gmra.mxu1 %v17603_v52  ;;  %v20302_v10 = vld [vmem:[#allocation44_spill] sm:$0xff] }
 0x4bd   :  { %6910 = vmatpush.msra.mxu2 %v20296_v13  ;;  %6949 = vmatpush.msra.mxu3 %v20297_v42  ;;  %v20303_v42 = vld [vmem:[#allocation32_spill] sm:$0xff] }
 0x4be   :  { %7004 = vmatpush.msrb.mxu1 %v20290_v60  ;;  %6806 = vmatpush.msra.mxu0 %v20298_v14  ;;  %v20314_v14 = vld [vmem:[#allocation86_spill] sm:$0xff] }
 0x4bf   :  { %6916 = vmatmul.f32.vlgmr.msra.gmra.mxu2 %v17621_v24  ;;  %6955 = vmatpush.msra.mxu3 %v20299_v18  ;;  %v20304_v24 = vld [vmem:[#allocation48_spill] sm:$0xff] }
 0x4c0   :  { %7006 = vmatpush.msrb.mxu1 %v20291_v39  ;;  %7033 = vmatpush.msrb.mxu2 %v20300_v34  ;;  %v20306_v34 = vld [vmem:[#allocation50_spill] sm:$0xff]  ;;  %v20310_v18 = vld [vmem:[#allocation84_spill] sm:$0xff] }
 0x4c1   :  { %6810 = vmatpush.msra.mxu0 %v20301_v51  ;;  %6957 = vmatmul.f32.vlgmr.msra.gmra.mxu3 %v17603_v52  ;;  %v20305_v51 = vld [vmem:[#allocation40_spill] sm:$0xff] }
 0x4c2   :  { %7008 = vmatpush.msrb.mxu1 %v20293_v45  ;;  %7037 = vmatpush.msrb.mxu2 %v20302_v10  ;;  %v20307_v10 = vld [vmem:[#allocation41_spill] sm:$0xff] }
 0x4c3   :  { %7064 = vmatpush.msrb.mxu3 %v20290_v60  ;;  %6814 = vmatpush.msra.mxu0 %v20303_v42  ;;  %v20308_v42 = vld [vmem:[#allocation81_spill] sm:$0xff] }
 0x4c4   :  { %7010 = vmatpush.msrb.mxu1 %v20296_v13  ;;  %7041 = vmatpush.msrb.mxu2 %v20304_v24  ;;  %v20309_v24 = vld [vmem:[#allocation43_spill] sm:$0xff] }
 0x4c5   :  { %7066 = vmatpush.msrb.mxu3 %v20291_v39  ;;  %6816 = vmatmul.f32.vlgmr.msra.gmra.mxu0 %v17603_v52 }
 0x4c6   :  { %7014 = vmatmul.f32.vlgmr.msrb.gmra.mxu1 %v17612_v27  ;;  %6975 = vmatpush.msrb.mxu0 %v20305_v51  ;;  %v20311_v27 = vld [vmem:[#allocation73_spill] sm:$0xff]  ;;  %v20312_v51 = vld [vmem:[#allocation47_spill] sm:$0xff] }
 0x4c7   :  { %7045 = vmatpush.msrb.mxu2 %v20306_v34  ;;  %7068 = vmatpush.msrb.mxu3 %v20293_v45  ;;  %v20313_v34 = vld [vmem:[#allocation71_spill] sm:$0xff] }
 0x4c8   :  { %7047 = vmatmul.f32.vlgmr.msrb.gmra.mxu2 %v17603_v52  ;;  %6978 = vmatpush.msrb.mxu0 %v20307_v10  ;;  %v20315_v10 = vld [vmem:[#allocation76_spill] sm:$0xff]  ;;  %v20328_v45 = vld [vmem:[#allocation107_spill] sm:$0xff] }
 0x4c9   :  { %7070 = vmatpush.msrb.mxu3 %v20296_v13  ;;  %7137 = vmatpush.msra.mxu1 %v20308_v42  ;;  %v20316_v13 = vld [vmem:[#allocation72_spill] sm:$0xff] }
 0x4ca   :  { %7072 = vmatmul.f32.vlgmr.msrb.gmra.mxu3 %v17603_v52  ;;  %6981 = vmatpush.msrb.mxu0 %v20309_v24  ;;  %v20317_v42 = vld [vmem:[#allocation88_spill] sm:$0xff]  ;;  %v20318_v52 = vld [vmem:[#allocation79_spill] sm:$0xff]  ;;  %v20327_v24 = vld [vmem:[#allocation82_spill] sm:$0xff] }
 0x4cb   :  { %7143 = vmatpush.msra.mxu1 %v20310_v18  ;;  %7175 = vmatpush.msra.mxu2 %v20311_v27  ;;  %v20319_v18 = vld [vmem:[#allocation75_spill] sm:$0xff] }
 0x4cc   :  { %6984 = vmatpush.msrb.mxu0 %v20312_v51  ;;  %7204 = vmatpush.msra.mxu3 %v20313_v34  ;;  %v20320_v51 = vld [vmem:[#allocation83_spill] sm:$0xff] }
 0x4cd   :  { %6987 = vmatmul.f32.vlgmr.msrb.gmra.mxu0 %v17606_v23  ;;  %7149 = vmatpush.msra.mxu1 %v20314_v14  ;;  %v20321_v23 = vld [vmem:[#allocation78_spill] sm:$0xff]  ;;  %v5381_v14 = vpop.f32.mrf.mxu3 }
 0x4ce   :  { %7178 = vmatpush.msra.mxu2 %v20315_v10  ;;  %7206 = vmatpush.msra.mxu3 %v20316_v13  ;;  %v5340_v10 = vpop.f32.mrf.mxu2 }
 0x4cf   :  { %7155 = vmatpush.msra.mxu1 %v20317_v42  ;;  %7104 = vmatpush.msra.mxu0 %v20313_v34  ;;  %v20322_v42 = vld [vmem:[#allocation98_spill] sm:$0xff]  ;;  %v5382_v27 = vadd.f32 %v5381_v14, %v5340_v10 }
 0x4d0   :  { %7181 = vmatpush.msra.mxu2 %v20318_v52  ;;  %7208 = vmatpush.msra.mxu3 %v20319_v18  ;;  %v5438_v52 = vpop.f32.mrf.mxu1 }
 0x4d1   :  { %7264 = vmatpush.msrb.mxu1 %v20313_v34  ;;  %7106 = vmatpush.msra.mxu0 %v20316_v13  ;;  %v20323_v34 = vld [vmem:[#allocation74_spill] sm:$0xff] }
 0x4d2   :  { %7184 = vmatpush.msra.mxu2 %v20320_v51  ;;  %7210 = vmatpush.msra.mxu3 %v20321_v23  ;;  %v20324_v51 = vld [vmem:[#allocation101_spill] sm:$0xff] }
 0x4d3   :  { %7266 = vmatpush.msrb.mxu1 %v20316_v13  ;;  %7108 = vmatpush.msra.mxu0 %v20319_v18  ;;  %v20325_v13 = vld [vmem:[#allocation77_spill] sm:$0xff] }
 0x4d4   :  { %7326 = vmatpush.msrb.mxu3 %v20322_v42  ;;  %7293 = vmatpush.msrb.mxu2 %v20077_v11  ;;  %v20326_v42 = vld [vmem:[#allocation104_spill] sm:$0xff] }
 0x4d5   :  { %7268 = vmatpush.msrb.mxu1 %v20319_v18  ;;  %7110 = vmatpush.msra.mxu0 %v20321_v23  ;;  %v5411_v18 = vpop.f32.mrf.mxu0 }
 0x4d6   :  { %7332 = vmatpush.msrb.mxu3 %v20324_v51  ;;  %7295 = vmatpush.msrb.mxu2 %v20080_v32  ;;  %v5412_v39 = vadd.f32 %v5411_v18, %v5382_v27  ;;  %v20329_v51 = vld [vmem:[#allocation85_spill] sm:$0xff]  ;;  %v5471_v14 = vpop.f32.mrf.mxu2 }
 0x4d7   :  { %7233 = vmatpush.msrb.mxu0 %v20323_v34  ;;  %7270 = vmatpush.msrb.mxu1 %v20321_v23  ;;  %v5496_v23 = vpop.f32.mrf.mxu3 }
 0x4d8   :  { %7338 = vmatpush.msrb.mxu3 %v20326_v42  ;;  %7297 = vmatpush.msrb.mxu2 %v20083_v40  ;;  %v5439_v34 = vadd.f32 %v5438_v52, %v5412_v39 }
 0x4d9   :  { %7237 = vmatpush.msrb.mxu0 %v20325_v13 }
 0x4da   :  { %7344 = vmatpush.msrb.mxu3 %v20328_v45  ;;  %7299 = vmatpush.msrb.mxu2 %v20086_v48  ;;  %v5472_v60 = vadd.f32 %v5471_v14, %v5439_v34 }
 0x4db   :  { %7241 = vmatpush.msrb.mxu0 %v20327_v24 }
 0x4dc   :  { %v5497_v13 = vadd.f32 %v5496_v23, %v5472_v60  ;;  %v17858_v60 = vld [vmem:[%s19411_s8] ss:$0 sm:$0xff] }
 0x4dd   :  { %7245 = vmatpush.msrb.mxu0 %v20329_v51  ;;  %20330 = vst [vmem:[#allocation103_spill] sm:$0xff] %v17858_v60 }
 0x4de   :  { %v5570_v10 = vpop.f32.mrf.mxu1 }
 0x4e6   :  { %v5529_v3 = vpop.f32.mrf.mxu0  ;;  %v5600_v42 = vpop.f32.mrf.mxu2 }
 0x4e7   :  { %v5530_v56 = vadd.f32 %v5529_v3, %v5497_v13  ;;  %v5685_v63 = vpop.f32.mrf.mxu1 }
 0x4e8   :  { %v5627_v0 = vpop.f32.mrf.mxu3 }
 0x4e9   :  { %v5571_v20 = vadd.f32 %v5570_v10, %v5530_v56 }
 0x4eb   :  { %v5601_v24 = vadd.f32 %v5600_v42, %v5571_v20 }
 0x4ed   :  { %v5628_v15 = vadd.f32 %v5627_v0, %v5601_v24 }
 0x4ee   :  { %v5660_v45 = vpop.f32.mrf.mxu0  ;;  %v5734_v18 = vpop.f32.mrf.mxu2 }
 0x4ef   :  { %v5661_v27 = vadd.f32 %v5660_v45, %v5628_v15  ;;  %v5832_v28 = vpop.f32.mrf.mxu1 }
 0x4f0   :  { %v5775_v31 = vpop.f32.mrf.mxu3 }
 0x4f1   :  { %v5686_v51 = vadd.f32 %v5685_v63, %v5661_v27  ;;  %v5776_v2 = vadd.f32 %v5775_v31, %v5734_v18 }
 0x4f3   :  { %v5688_v3 = vadd.f32 %v17858_v60, %v5686_v51 }
 0x4f5   :  { %v15427_v42 = vmul.f32 -1.442695, %v5688_v3 }
 0x4f6   :  { %v5805_v19 = vpop.f32.mrf.mxu0  ;;  %v5865_v39 = vpop.f32.mrf.mxu2 }
 0x4f7   :  { %v5806_v13 = vadd.f32 %v5805_v19, %v5776_v2  ;;  %v5960_v34 = vpop.f32.mrf.mxu1  ;;  %15513 = vpow2.f32 %v15427_v42 }
 0x4f8   :  { %v5890_v56 = vpop.f32.mrf.mxu3 }
 0x4f9   :  { %v5833_v20 = vadd.f32 %v5832_v28, %v5806_v13 }
 0x4fb   :  { %v5866_v0 = vadd.f32 %v5865_v39, %v5833_v20  ;;  %v17864_v39 = vld [vmem:[%s19411_s8 + $0x1] ss:$0 sm:$0xff] }
 0x4fc   :  { %20331 = vst [vmem:[#allocation105_spill] sm:$0xff] %v17864_v39 }
 0x4fd   :  { %v5891_v15 = vadd.f32 %v5890_v56, %v5866_v0  ;;  %v15514_v14 = vpop.eup %15513 }
 0x4fe   :  { %v5919_v45 = vpop.f32.mrf.mxu0  ;;  %v5990_v24 = vpop.f32.mrf.mxu2  ;;  %v5692_v2 = vadd.f32 1.0, %v15514_v14 }
 0x4ff   :  { %v5920_v31 = vadd.f32 %v5919_v45, %v5891_v15  ;;  %v6075_v10 = vpop.f32.mrf.mxu1 }
 0x500   :  { %v6017_v63 = vpop.f32.mrf.mxu3  ;;  %15515 = vrcp.f32 %v5692_v2  ;;  %vm5698_vm0 = vweird.f32 %v5692_v2  ;;  %v5702_v22 = vand.u32 2147483647, %v5692_v2 }
 0x501   :  { %v5961_v52 = vadd.f32 %v5960_v34, %v5920_v31  ;;  %v17870_v31 = vld [vmem:[%s19411_s8 + $0x2] ss:$0 sm:$0xff] }
 0x502   :  { %20332 = vst [vmem:[#allocation109_spill] sm:$0xff] %v17870_v31  ;;  %vm5703_vm2 = vcmp.eq.f32.partialorder %v5702_v22, 8.507059e+37 }
 0x503   :  { %v5991_v23 = vadd.f32 %v5990_v24, %v5961_v52 }
 0x505   :  { %v6018_v18 = vadd.f32 %v6017_v63, %v5991_v23 }
 0x506   :  { %v6050_v27 = vpop.f32.mrf.mxu0  ;;  %v6124_v5 = vpop.f32.mrf.mxu2 }
 0x507   :  { %v6051_v51 = vadd.f32 %v6050_v27, %v6018_v18  ;;  %v6222_v56 = vpop.f32.mrf.mxu1  ;;  %v15516_v0 = vpop.eup %15515  ;;  %v6125_v63 = vadd.f32 %v17870_v31, %v6124_v5  ;;  %v17876_v27 = vld [vmem:[%s19412_s9] ss:$0 sm:$0xff] }
 0x508   :  { %v6165_v28 = vpop.f32.mrf.mxu3  ;;  %v5694_v45 = vmul.f32 %v15516_v0, %v5692_v2  ;;  %vm5699_vm15 = vweird.f32 %v15516_v0 }
 0x509   :  { %v6076_v19 = vadd.f32 %v6075_v10, %v6051_v51  ;;  %v6166_v18 = vadd.f32 %v6165_v28, %v6125_v63  ;;  %v5704_v28 = vand.u32 2147483648, %v5692_v2  ;;  %vm5700_vm1 = vmor %vm5698_vm0, %vm5699_vm15 }
 0x50a   :  { %v5695_v23 = vsub.f32 1.0, %v5694_v45 }
 0x50b   :  { %v6078_v3 = vadd.f32 %v17864_v39, %v6076_v19 }
 0x50d   :  { %v15428_v13 = vmul.f32 -1.442695, %v6078_v3 }
 0x50f   :  { %15517 = vpow2.f32 %v15428_v13  ;;  %v5696_v13 = vmul.f32 %v15516_v0, %v5695_v23 }
 0x510   :  { %v6195_v20 = vpop.f32.mrf.mxu0  ;;  %v6255_v42 = vpop.f32.mrf.mxu2 }
 0x511   :  { %v6350_v52 = vpop.f32.mrf.mxu1  ;;  %v6196_v19 = vadd.f32 %v6195_v20, %v6166_v18  ;;  %v5697_v7 = vadd.f32 %v15516_v0, %v5696_v13  ;;  %v5705_v18 = vor.u32 1.1754944e-38, %v5704_v28 }
 0x512   :  { %v6280_v34 = vpop.f32.mrf.mxu3 }
 0x513   :  { %v6223_v45 = vadd.f32 %v6222_v56, %v6196_v19 }
 0x515   :  { %v15518_v15 = vpop.eup %15517  ;;  %v6256_v20 = vadd.f32 %v6255_v42, %v6223_v45 }
 0x516   :  { %v6082_v24 = vadd.f32 1.0, %v15518_v15 }
 0x517   :  { %v6281_v19 = vadd.f32 %v6280_v34, %v6256_v20 }
 0x518   :  { %15519 = vrcp.f32 %v6082_v24  ;;  %vm6088_vm5 = vweird.f32 %v6082_v24  ;;  %v6092_v13 = vand.u32 2147483647, %v6082_v24 }
 0x51a   :  { %v6309_v14 = vpop.f32.mrf.mxu0  ;;  %v6380_v10 = vpop.f32.mrf.mxu2  ;;  %vm6093_vm7 = vcmp.eq.f32.partialorder %v6092_v13, 8.507059e+37 }
 0x51b   :  { %v6310_v51 = vadd.f32 %v17876_v27, %v6309_v14  ;;  %v6465_v63 = vpop.f32.mrf.mxu1 }
 0x51c   :  { %v6407_v39 = vpop.f32.mrf.mxu3 }
 0x51d   :  { %v6351_v3 = vadd.f32 %v6350_v52, %v6310_v51  ;;  %v5701_v52 = vsel %vm5700_vm1, %v15516_v0, %v5697_v7 }
 0x51e   :  { %v15520_v15 = vpop.eup %15519 }
 0x51f   :  { %v6084_v60 = vmul.f32 %v15520_v15, %v6082_v24  ;;  %v6381_v5 = vadd.f32 %v6380_v10, %v6351_v3  ;;  %vm6089_vm3 = vweird.f32 %v15520_v15  ;;  %v5706_v10 = vsel %vm5703_vm2, %v5705_v18, %v5701_v52 }
 0x520   :  { %vm6090_vm6 = vmor %vm6088_vm5, %vm6089_vm3 }
 0x521   :  { %v6085_v31 = vsub.f32 1.0, %v6084_v60  ;;  %v6408_v8 = vadd.f32 %v6407_v39, %v6381_v5  ;;  %v6094_v39 = vand.u32 2147483648, %v6082_v24 }
 0x523   :  { %v6086_v41 = vmul.f32 %v15520_v15, %v6085_v31  ;;  %v6095_v5 = vor.u32 1.1754944e-38, %v6094_v39 }
 0x524   :  { %v6440_v54 = vpop.f32.mrf.mxu0  ;;  %v6501_v14 = vpop.f32.mrf.mxu2 }
 0x525   :  { %v6441_v23 = vadd.f32 %v6440_v54, %v6408_v8  ;;  %v6087_v60 = vadd.f32 %v15520_v15, %v6086_v41  ;;  %v6599_v42 = vpop.f32.mrf.mxu1 }
 0x526   :  { %v6542_v56 = vpop.f32.mrf.mxu3 }
 0x527   :  { %v6466_v51 = vadd.f32 %v6465_v63, %v6441_v23  ;;  %v6091_v31 = vsel %vm6090_vm6, %v15520_v15, %v6087_v60  ;;  %v6543_v7 = vadd.f32 %v6542_v56, %v6501_v14 }
 0x528   :  { %v6096_v22 = vsel %vm6093_vm7, %v6095_v5, %v6091_v31 }
 0x529   :  { %v6468_v3 = vmul.f32 %v6466_v51, %v5706_v10  ;;  %v6471_v41 = vsub.f32 1.0, %v6096_v22  ;;  %v6473_v24 = vmul.f32 %v6096_v22, %v17548_v1 }
 0x52b   :  { %v6469_v2 = vadd.f32 %v6468_v3, %v6281_v19 }
 0x52d   :  { %15521 = vtanh.f32 %v6469_v2 }
 0x52e   :  { %v6572_v8 = vpop.f32.mrf.mxu0  ;;  %v6632_v54 = vpop.f32.mrf.mxu2 }
 0x52f   :  { %v6573_v0 = vadd.f32 %v6572_v8, %v6543_v7  ;;  %v6727_v15 = vpop.f32.mrf.mxu1 }
 0x530   :  { %v6657_v28 = vpop.f32.mrf.mxu3 }
 0x531   :  { %v6600_v45 = vadd.f32 %v6599_v42, %v6573_v0 }
 0x533   :  { %v15522_v63 = vpop.eup %15521  ;;  %v6633_v34 = vadd.f32 %v6632_v54, %v6600_v45 }
 0x534   :  { %v6472_v20 = vmul.f32 %v15522_v63, %v6471_v41  ;;  %v17915_v41 = vld [vmem:[%s19408_s5] ss:$0 sm:$0xff]  ;;  %v20333_v63 = vld [vmem:[#allocation114_spill] sm:$0xff] }
 0x535   :  { %v6658_v52 = vadd.f32 %v6657_v28, %v6633_v34  ;;  %v20334_v34 = vld [vmem:[#allocation99_spill] sm:$0xff] }
 0x536   :  { %v17880_v23 = vadd.f32 %v6473_v24, %v6472_v20  ;;  %v20335_v24 = vld [vmem:[#allocation92_spill] sm:$0xff] }
 0x537   :  { %v6846_v18 = vrot.slane %v6658_v52, 2 }
 0x538   :  { %v7089_v14 = vsel %vm417_vm4, %v17880_v23, 0  ;;  %v6686_v51 = vpop.f32.mrf.mxu0  ;;  %v6757_v10 = vpop.f32.mrf.mxu2 }
 0x539   :  { %v17884_v60 = vand.u32 4294901760, %v7089_v14  ;;  %v6848_v56 = vadd.f32 %v6846_v18, %v20214_v62  ;;  %v6728_v39 = vadd.f32 %v6727_v15, %v6686_v51  ;;  %v6842_v31 = vpop.f32.mrf.mxu1  ;;  %v20336_v15 = vld [vmem:[#allocation117_spill] sm:$0xff]  ;;  %v20337_v18 = vld [vmem:[#allocation102_spill] sm:$0xff] }
 0x53a   :  { %v6784_v3 = vpop.f32.mrf.mxu3  ;;  %v20339_v51 = vld [vmem:[#allocation97_spill] sm:$0xff] }
 0x53b   :  { %v15429_v19 = vmul.f32 -1.442695, %v6848_v56  ;;  %7157 = vmatmul.f32.vlgmr.msra.gmra.mxu1 %v17884_v60  ;;  %v17889_v1 = vsub.f32 %v7089_v14, %v17884_v60  ;;  %v6758_v13 = vadd.f32 %v6757_v10, %v6728_v39  ;;  %v20338_v14 = vld [vmem:[#allocation95_spill] sm:$0xff] }
 0x53c   :  { %7393 = vmatpush.msra.mxu1 %v20077_v11  ;;  %v20340_v39 = vld [vmem:[#allocation119_spill] sm:$0xff] }
 0x53d   :  { %15523 = vpow2.f32 %v15429_v19  ;;  %7187 = vmatmul.f32.vlgmr.msra.gmra.mxu2 %v17889_v1  ;;  %v17894_v2 = vand.u32 4294901760, %v17889_v1  ;;  %v6785_v5 = vadd.f32 %v6784_v3, %v6758_v13  ;;  %v20341_v3 = vld [vmem:[#allocation100_spill] sm:$0xff] }
 0x53e   :  { %7395 = vmatpush.msra.mxu1 %v20080_v32  ;;  %7422 = vmatpush.msra.mxu2 %v20215_v61 }
 0x53f   :  { %7214 = vmatmul.f32.vlgmr.msra.gmra.mxu3 %v17894_v2  ;;  %v7114_v62 = vsub.f32 %v17889_v1, %v17894_v2 }
 0x540   :  { %7397 = vmatpush.msra.mxu1 %v20083_v40  ;;  %7453 = vmatpush.msra.mxu3 %v20077_v11 }
 0x541   :  { %v17903_v42 = vand.u32 4294901760, %v7114_v62  ;;  %7426 = vmatpush.msra.mxu2 %v20216_v25 }
 0x542   :  { %v6817_v7 = vpop.f32.mrf.mxu0  ;;  %v6917_v8 = vpop.f32.mrf.mxu2  ;;  %7399 = vmatpush.msra.mxu1 %v20086_v48  ;;  %7455 = vmatpush.msra.mxu3 %v20080_v32 }
 0x543   :  { %v15524_v54 = vpop.eup %15523  ;;  %v6818_v22 = vadd.f32 %v6817_v7, %v6785_v5  ;;  %7116 = vmatmul.f32.vlgmr.msra.gmra.mxu0 %v17903_v42  ;;  %7272 = vmatmul.f32.vlgmr.msrb.gmra.mxu1 %v17884_v60  ;;  %v6918_v28 = vadd.f32 %v17915_v41, %v6917_v8  ;;  %v7015_v7 = vpop.f32.mrf.mxu1 }
 0x544   :  { %v6852_v0 = vadd.f32 1.0, %v15524_v54  ;;  %7364 = vmatpush.msra.mxu0 %v20217_v9  ;;  %7457 = vmatpush.msra.mxu3 %v20083_v40  ;;  %v6958_v20 = vpop.f32.mrf.mxu3 }
 0x545   :  { %v6843_v45 = vadd.f32 %v6842_v31, %v6818_v22  ;;  %7531 = vmatpush.msrb.mxu1 %v20333_v63  ;;  %7430 = vmatpush.msra.mxu2 %v20334_v34  ;;  %v6959_v56 = vadd.f32 %v6958_v20, %v6918_v28  ;;  %v20342_v31 = vld [vmem:[#allocation120_spill] sm:$0xff] }
 0x546   :  { %15525 = vrcp.f32 %v6852_v0  ;;  %7367 = vmatpush.msra.mxu0 %v20335_v24  ;;  %7459 = vmatpush.msra.mxu3 %v20086_v48  ;;  %vm6858_vm9 = vweird.f32 %v6852_v0 }
 0x547   :  { %v6869_v52 = vrot.slane %v6843_v45, 2  ;;  %7537 = vmatpush.msrb.mxu1 %v20336_v15  ;;  %7434 = vmatpush.msra.mxu2 %v20337_v18 }
 0x548   :  { %7370 = vmatpush.msra.mxu0 %v20338_v14 }
 0x549   :  { %v6871_v10 = vadd.f32 %v6869_v52, %v20339_v51  ;;  %7543 = vmatpush.msrb.mxu1 %v20340_v39  ;;  %v6864_v52 = vand.u32 2147483648, %v6852_v0  ;;  %v6862_v51 = vand.u32 2147483647, %v6852_v0 }
 0x54a   :  { %v6988_v19 = vpop.f32.mrf.mxu0  ;;  %7373 = vmatpush.msra.mxu0 %v20341_v3 }
 0x54b   :  { %v15430_v13 = vmul.f32 -1.442695, %v6871_v10  ;;  %v6989_v62 = vadd.f32 %v6988_v19, %v6959_v56  ;;  %7247 = vmatmul.f32.vlgmr.msrb.gmra.mxu0 %v17884_v60  ;;  %7549 = vmatpush.msrb.mxu1 %v20342_v31  ;;  %v7048_v22 = vpop.f32.mrf.mxu2  ;;  %v6865_v31 = vor.u32 1.1754944e-38, %v6864_v52  ;;  %vm6863_vm11 = vcmp.eq.f32.partialorder %v6862_v51, 8.507059e+37 }
 0x54c   :  { %v15526_v5 = vpop.eup %15525  ;;  %7498 = vmatpush.msrb.mxu0 %v20108_v26  ;;  %v7084_v51 = vrot.slane %v17599_v53, 6 }
 0x54d   :  { %15527 = vpow2.f32 %v15430_v13  ;;  %v7016_v8 = vadd.f32 %v7015_v7, %v6989_v62  ;;  %v6854_v54 = vmul.f32 %v15526_v5, %v6852_v0  ;;  %vm6859_vm8 = vweird.f32 %v15526_v5  ;;  %v7073_v19 = vpop.f32.mrf.mxu3 }
 0x54e   :  { %7500 = vmatpush.msrb.mxu0 %v20109_v43  ;;  %vm6860_vm10 = vmor %vm6858_vm9, %vm6859_vm8 }
 0x54f   :  { %v6855_v45 = vsub.f32 1.0, %v6854_v54  ;;  %v7049_v28 = vadd.f32 %v7048_v22, %v7016_v8 }
 0x550   :  { %7502 = vmatpush.msrb.mxu0 %v20110_v38 }
 0x551   :  { %v6856_v20 = vmul.f32 %v15526_v5, %v6855_v45  ;;  %v7074_v62 = vadd.f32 %v7073_v19, %v7049_v28 }
 0x552   :  { %7504 = vmatpush.msrb.mxu0 %v20111_v57 }
 0x553   :  { %v15528_v10 = vpop.eup %15527  ;;  %v6857_v56 = vadd.f32 %v15526_v5, %v6856_v20  ;;  %v7077_v54 = vrot.slane %v7074_v62, 2  ;;  %v20343_v62 = vld [vmem:[#allocation129_spill] sm:$0xff] }
 0x554   :  { %v6875_v13 = vadd.f32 1.0, %v15528_v10 }
 0x555   :  { %v6861_v7 = vsel %vm6860_vm10, %v15526_v5, %v6857_v56 }
 0x556   :  { %15529 = vrcp.f32 %v6875_v13  ;;  %v6866_v8 = vsel %vm6863_vm11, %v6865_v31, %v6861_v7  ;;  %v6887_v18 = vand.u32 2147483648, %v6875_v13  ;;  %v6885_v0 = vand.u32 2147483647, %v6875_v13  ;;  %v20344_v7 = vld [vmem:[#allocation136_spill] sm:$0xff] }
 0x557   :  { %v7079_v22 = vmul.f32 %v7077_v54, %v6866_v8  ;;  %vm6881_vm13 = vweird.f32 %v6875_v13  ;;  %v20345_v8 = vld [vmem:[#allocation150_spill] sm:$0xff] }
 0x558   :  { %v6888_v5 = vor.u32 1.1754944e-38, %v6887_v18  ;;  %vm6886_vm15 = vcmp.eq.f32.partialorder %v6885_v0, 8.507059e+37  ;;  %v20346_v54 = vld [vmem:[#allocation138_spill] sm:$0xff]  ;;  %v20349_v0 = vld [vmem:[#allocation128_spill] sm:$0xff] }
 0x559   :  { %v7080_v39 = vadd.f32 %v7079_v22, %v20112_v21  ;;  %v20347_v22 = vld [vmem:[#allocation141_spill] sm:$0xff] }
 0x55b   :  { %15531 = vtanh.f32 %v7080_v39 }
 0x55c   :  { %v15530_v45 = vpop.eup %15529 }
 0x55d   :  { %v6877_v3 = vmul.f32 %v15530_v45, %v6875_v13  ;;  %vm6882_vm12 = vweird.f32 %v15530_v45 }
 0x55e   :  { %vm6883_vm14 = vmor %vm6881_vm13, %vm6882_vm12 }
 0x55f   :  { %v6878_v14 = vsub.f32 1.0, %v6877_v3 }
 0x561   :  { %v6879_v15 = vmul.f32 %v15530_v45, %v6878_v14  ;;  %v15532_v10 = vpop.eup %15531 }
 0x563   :  { %v6880_v20 = vadd.f32 %v15530_v45, %v6879_v15 }
 0x565   :  { %v6884_v28 = vsel %vm6883_vm14, %v15530_v45, %v6880_v20  ;;  %v20348_v45 = vld [vmem:[#allocation154_spill] sm:$0xff]  ;;  %v20350_v20 = vld [vmem:[#allocation145_spill] sm:$0xff] }
 0x566   :  { %v6889_v52 = vsel %vm6886_vm15, %v6888_v5, %v6884_v28  ;;  %v20351_v5 = vld [vmem:[#allocation157_spill] sm:$0xff]  ;;  %v20352_v28 = vld [vmem:[#allocation131_spill] sm:$0xff] }
 0x567   :  { %v7082_v31 = vsub.f32 1.0, %v6889_v52  ;;  %v7086_v19 = vmul.f32 %v7084_v51, %v6889_v52  ;;  %v20353_v52 = vld [vmem:[#allocation160_spill] sm:$0xff]  ;;  %v20355_v51 = vld [vmem:[#allocation133_spill] sm:$0xff] }
 0x569   :  { %v7083_v56 = vmul.f32 %v15532_v10, %v7082_v31  ;;  %v20354_v31 = vld [vmem:[#allocation143_spill] sm:$0xff] }
 0x56a   :  { %v20356_v10 = vld [vmem:[#allocation147_spill] sm:$0xff] }
 0x56b   :  { %v17936_v21 = vadd.f32 %v7086_v19, %v7083_v56  ;;  %v20357_v56 = vld [vmem:[#allocation135_spill] sm:$0xff]  ;;  %v20358_v19 = vld [vmem:[#allocation149_spill] sm:$0xff] }
 0x56d   :  { %v19768_v14 = vrot.slane %v17936_v21, 6 }
 0x56f   :  { %v7278_v39 = vsel %vm417_vm4, %v19768_v14, 0  ;;  %v20361_v14 = vld [vmem:[#allocation167_spill] sm:$0xff] }
 0x570   :  { %v17942_v15 = vand.u32 4294901760, %v7278_v39 }
 0x572   :  { %v17945_v18 = vsub.f32 %v7278_v39, %v17942_v15  ;;  %7346 = vmatmul.f32.vlgmr.msrb.gmra.mxu3 %v17942_v15  ;;  %v20359_v39 = vld [vmem:[#allocation139_spill] sm:$0xff] }
 0x573   :  { %7598 = vmatpush.msrb.mxu3 %v20108_v26 }
 0x574   :  { %7376 = vmatmul.f32.vlgmr.msra.gmra.mxu0 %v17945_v18  ;;  %v17951_v53 = vand.u32 4294901760, %v17945_v18 }
 0x575   :  { %7600 = vmatpush.msrb.mxu3 %v20109_v43  ;;  %7627 = vmatpush.msra.mxu0 %v20114_v59 }
 0x576   :  { %7403 = vmatmul.f32.vlgmr.msra.gmra.mxu1 %v17951_v53  ;;  %v7303_v3 = vsub.f32 %v17945_v18, %v17951_v53 }
 0x577   :  { %7602 = vmatpush.msrb.mxu3 %v20110_v38  ;;  %7631 = vmatpush.msra.mxu0 %v20115_v50 }
 0x578   :  { %v17960_v13 = vand.u32 4294901760, %v7303_v3  ;;  %7658 = vmatpush.msra.mxu1 %v20108_v26  ;;  %v20360_v3 = vld [vmem:[#allocation151_spill] sm:$0xff] }
 0x579   :  { %7604 = vmatpush.msrb.mxu3 %v20111_v57  ;;  %7635 = vmatpush.msra.mxu0 %v20116_v55 }
 0x57a   :  { %7305 = vmatmul.f32.vlgmr.msrb.gmra.mxu2 %v17960_v13  ;;  %7461 = vmatmul.f32.vlgmr.msra.gmra.mxu3 %v17942_v15 }
 0x57b   :  { %7660 = vmatpush.msra.mxu1 %v20109_v43  ;;  %7569 = vmatpush.msrb.mxu2 %v20117_v33 }
 0x57c   :  { %7510 = vmatmul.f32.vlgmr.msrb.gmra.mxu0 %v17903_v42  ;;  %7716 = vmatpush.msra.mxu3 %v20118_v12 }
 0x57d   :  { %7639 = vmatpush.msra.mxu0 %v20119_v16  ;;  %7662 = vmatpush.msra.mxu1 %v20110_v38 }
 0x57e   :  { %7551 = vmatmul.f32.vlgmr.msrb.gmra.mxu1 %v17884_v60  ;;  %7572 = vmatpush.msrb.mxu2 %v20120_v49 }
 0x57f   :  { %7664 = vmatpush.msra.mxu1 %v20111_v57  ;;  %7722 = vmatpush.msra.mxu3 %v20121_v30 }
 0x580   :  { %7754 = vmatpush.msrb.mxu0 %v20122_v6  ;;  %7575 = vmatpush.msrb.mxu2 %v20229_v29 }
 0x581   :  { %7728 = vmatpush.msra.mxu3 %v20230_v44  ;;  %7783 = vmatpush.msrb.mxu1 %v20125_v37 }
 0x582   :  { %7436 = vmatmul.f32.vlgmr.msra.gmra.mxu2 %v17942_v15  ;;  %7608 = vmatmul.f32.vlgmr.msrb.gmra.mxu3 %v17894_v2 }
 0x583   :  { %7757 = vmatpush.msrb.mxu0 %v20126_v17  ;;  %7578 = vmatpush.msrb.mxu2 %v20231_v4 }
 0x584   :  { %7641 = vmatmul.f32.vlgmr.msra.gmra.mxu0 %v17884_v60  ;;  %7734 = vmatpush.msra.mxu3 %v20128_v46 }
 0x585   :  { %7760 = vmatpush.msrb.mxu0 %v20129_v58  ;;  %7785 = vmatpush.msrb.mxu1 %v20130_v36 }
 0x586   :  { %7666 = vmatmul.f32.vlgmr.msra.gmra.mxu1 %v17884_v60  ;;  %7683 = vmatpush.msra.mxu2 %v20125_v37 }
 0x587   :  { %7763 = vmatpush.msrb.mxu0 %v20232_v35  ;;  %7787 = vmatpush.msrb.mxu1 %v20233_v47 }
 0x588   :  { %7843 = vmatpush.msrb.mxu3 %v20125_v37  ;;  %7685 = vmatpush.msra.mxu2 %v20130_v36 }
 0x589   :  { %7789 = vmatpush.msrb.mxu1 %v20343_v62  ;;  %7888 = vmatpush.msra.mxu0 %v20344_v7 }
 0x58a   :  { %7581 = vmatmul.f32.vlgmr.msrb.gmra.mxu2 %v17889_v1  ;;  %7736 = vmatmul.f32.vlgmr.msra.gmra.mxu3 %v17942_v15 }
 0x58b   :  { %7845 = vmatpush.msrb.mxu3 %v20130_v36  ;;  %7687 = vmatpush.msra.mxu2 %v20233_v47 }
 0x58c   :  { %7766 = vmatmul.f32.vlgmr.msrb.gmra.mxu0 %v17945_v18  ;;  %7921 = vmatpush.msra.mxu1 %v20345_v8 }
 0x58d   :  { %7847 = vmatpush.msrb.mxu3 %v20233_v47  ;;  %7890 = vmatpush.msra.mxu0 %v20346_v54 }
 0x58e   :  { %7793 = vmatmul.f32.vlgmr.msrb.gmra.mxu1 %v17951_v53  ;;  %7689 = vmatpush.msra.mxu2 %v20343_v62 }
 0x58f   :  { %7849 = vmatpush.msrb.mxu3 %v20343_v62  ;;  %7892 = vmatpush.msra.mxu0 %v20347_v22 }
 0x590   :  { %7927 = vmatpush.msra.mxu1 %v20348_v45  ;;  %7812 = vmatpush.msrb.mxu2 %v20349_v0 }
 0x591   :  { %7894 = vmatpush.msra.mxu0 %v20350_v20  ;;  %7988 = vmatpush.msra.mxu3 %v20344_v7 }
 0x592   :  { %7695 = vmatmul.f32.vlgmr.msra.gmra.mxu2 %v17960_v13  ;;  %7851 = vmatmul.f32.vlgmr.msrb.gmra.mxu3 %v17942_v15 }
 0x593   :  { %7933 = vmatpush.msra.mxu1 %v20351_v5  ;;  %7816 = vmatpush.msrb.mxu2 %v20352_v28  ;;  %v20372_v28 = vld [vmem:[#allocation153_spill] sm:$0xff] }
 0x594   :  { %7900 = vmatmul.f32.vlgmr.msra.gmra.mxu0 %v17960_v13  ;;  %7990 = vmatpush.msra.mxu3 %v20346_v54 }
 0x595   :  { %7939 = vmatpush.msra.mxu1 %v20353_v52  ;;  %8017 = vmatpush.msrb.mxu0 %v20354_v31  ;;  %v20368_v31 = vld [vmem:[#allocation152_spill] sm:$0xff]  ;;  %v20371_v52 = vld [vmem:[#allocation162_spill] sm:$0xff] }
 0x596   :  { %7820 = vmatpush.msrb.mxu2 %v20355_v51  ;;  %7941 = vmatmul.f32.vlgmr.msra.gmra.mxu1 %v17942_v15  ;;  %v20365_v51 = vld [vmem:[#allocation146_spill] sm:$0xff] }
 0x597   :  { %7992 = vmatpush.msra.mxu3 %v20347_v22  ;;  %8021 = vmatpush.msrb.mxu0 %v20356_v10  ;;  %v20362_v10 = vld [vmem:[#allocation144_spill] sm:$0xff] }
 0x598   :  { %8048 = vmatpush.msrb.mxu1 %v20344_v7  ;;  %7824 = vmatpush.msrb.mxu2 %v20357_v56  ;;  %v20364_v56 = vld [vmem:[#allocation155_spill] sm:$0xff] }
 0x599   :  { %7994 = vmatpush.msra.mxu3 %v20350_v20  ;;  %8025 = vmatpush.msrb.mxu0 %v20358_v19  ;;  %v20363_v19 = vld [vmem:[#allocation168_spill] sm:$0xff] }
 0x59a   :  { %8050 = vmatpush.msrb.mxu1 %v20346_v54  ;;  %7826 = vmatmul.f32.vlgmr.msrb.gmra.mxu2 %v17942_v15 }
 0x59b   :  { %7959 = vmatpush.msra.mxu2 %v20359_v39  ;;  %7998 = vmatmul.f32.vlgmr.msra.gmra.mxu3 %v17951_v53  ;;  %v20366_v39 = vld [vmem:[#allocation169_spill] sm:$0xff] }
 0x59c   :  { %8029 = vmatpush.msrb.mxu0 %v20360_v3  ;;  %8052 = vmatpush.msrb.mxu1 %v20347_v22  ;;  %v20367_v3 = vld [vmem:[#allocation158_spill] sm:$0xff] }
 0x59d   :  { %8106 = vmatpush.msrb.mxu3 %v20361_v14  ;;  %7962 = vmatpush.msra.mxu2 %v20362_v10  ;;  %v20369_v14 = vld [vmem:[#allocation148_spill] sm:$0xff]  ;;  %v20370_v10 = vld [vmem:[#allocation170_spill] sm:$0xff] }
 0x59e   :  { %8031 = vmatmul.f32.vlgmr.msrb.gmra.mxu0 %v17942_v15  ;;  %8054 = vmatpush.msrb.mxu1 %v20350_v20 }
 0x59f   :  { %8112 = vmatpush.msrb.mxu3 %v20363_v19  ;;  %8144 = vmatpush.msra.mxu0 %v20364_v56 }
 0x5a0   :  { %7965 = vmatpush.msra.mxu2 %v20365_v51  ;;  %8056 = vmatmul.f32.vlgmr.msrb.gmra.mxu1 %v17942_v15  ;;  %v20373_v51 = vld [vmem:[#allocation164_spill] sm:$0xff] }
 0x5a1   :  { %8118 = vmatpush.msrb.mxu3 %v20366_v39  ;;  %8147 = vmatpush.msra.mxu0 %v20367_v3  ;;  %v20374_v39 = vld [vmem:[#allocation156_spill] sm:$0xff] }
 0x5a2   :  { %8173 = vmatpush.msra.mxu1 %v20368_v31  ;;  %7968 = vmatpush.msra.mxu2 %v20369_v14  ;;  %v20378_v14 = vld [vmem:[#allocation14_spill] sm:$0xff] }
 0x5a3   :  { %8124 = vmatpush.msrb.mxu3 %v20370_v10  ;;  %8150 = vmatpush.msra.mxu0 %v20371_v52  ;;  %v20375_v10 = vld [vmem:[#allocation159_spill] sm:$0xff]  ;;  %v20376_v52 = vld [vmem:[#allocation5_spill] sm:$0xff] }
 0x5a4   :  { %8175 = vmatpush.msra.mxu1 %v20372_v28  ;;  %7971 = vmatmul.f32.vlgmr.msra.gmra.mxu2 %v17945_v18 }
 0x5a5   :  { %8073 = vmatpush.msrb.mxu2 %v20368_v31  ;;  %8126 = vmatmul.f32.vlgmr.msrb.gmra.mxu3 %v17884_v60 }
 0x5a6   :  { %8153 = vmatpush.msra.mxu0 %v20373_v51  ;;  %8177 = vmatpush.msra.mxu1 %v20374_v39  ;;  %v20377_v51 = vld [vmem:[#allocation6_spill] sm:$0xff] }
 0x5a7   :  { %8233 = vmatpush.msra.mxu3 %v20368_v31  ;;  %8075 = vmatpush.msrb.mxu2 %v20372_v28  ;;  %v20380_v31 = vld [vmem:[#allocation17_spill] sm:$0xff] }
 0x5a8   :  { %8156 = vmatmul.f32.vlgmr.msra.gmra.mxu0 %v17889_v1  ;;  %8179 = vmatpush.msra.mxu1 %v20375_v10  ;;  %v20379_v1 = vld [vmem:[#allocation10_spill] sm:$0xff] }
 0x5a9   :  { %8235 = vmatpush.msra.mxu3 %v20372_v28  ;;  %8265 = vmatpush.msrb.mxu0 %v20376_v52  ;;  %v20381_v28 = vld [vmem:[#allocation161_spill] sm:$0xff] }
 0x5aa   :  { %8077 = vmatpush.msrb.mxu2 %v20374_v39  ;;  %8183 = vmatmul.f32.vlgmr.msra.gmra.mxu1 %v17894_v2  ;;  %v20382_v2 = vld [vmem:[#allocation13_spill] sm:$0xff] }
 0x5ab   :  { %8237 = vmatpush.msra.mxu3 %v20374_v39  ;;  %8267 = vmatpush.msrb.mxu0 %v20377_v51  ;;  %v20383_v39 = vld [vmem:[#allocation19_spill] sm:$0xff] }
 0x5ac   :  { %8298 = vmatpush.msrb.mxu1 %v20378_v14  ;;  %8079 = vmatpush.msrb.mxu2 %v20375_v10  ;;  %v20384_v14 = vld [vmem:[#allocation163_spill] sm:$0xff] }
 0x5ad   :  { %8239 = vmatpush.msra.mxu3 %v20375_v10  ;;  %8269 = vmatpush.msrb.mxu0 %v20379_v1  ;;  %v20385_v10 = vld [vmem:[#allocation20_spill] sm:$0xff] }
 0x5ae   :  { %8304 = vmatpush.msrb.mxu1 %v20380_v31  ;;  %8085 = vmatmul.f32.vlgmr.msrb.gmra.mxu2 %v17903_v42  ;;  %v20386_v31 = vld [vmem:[#allocation9_spill] sm:$0xff] }
 0x5af   :  { %8202 = vmatpush.msra.mxu2 %v20381_v28  ;;  %8241 = vmatmul.f32.vlgmr.msra.gmra.mxu3 %v17884_v60  ;;  %v20387_v42 = vld [vmem:[#allocation165_spill] sm:$0xff]  ;;  %v20388_v28 = vld [vmem:[#allocation11_spill] sm:$0xff] }
 0x5b0   :  { %8271 = vmatpush.msrb.mxu0 %v20382_v2  ;;  %8310 = vmatpush.msrb.mxu1 %v20383_v39  ;;  %v20389_v39 = vld [vmem:[#allocation166_spill] sm:$0xff] }
 0x5b1   :  { %8365 = vmatpush.msrb.mxu3 %v20376_v52  ;;  %8206 = vmatpush.msra.mxu2 %v20384_v14  ;;  %v20390_v14 = vld [vmem:[#allocation15_spill] sm:$0xff] }
 0x5b2   :  { %8277 = vmatmul.f32.vlgmr.msrb.gmra.mxu0 %v17960_v13  ;;  %8316 = vmatpush.msrb.mxu1 %v20385_v10  ;;  %v20394_v10 = vld [vmem:[#allocation8_spill] sm:$0xff] }
 0x5b3   :  { %8367 = vmatpush.msrb.mxu3 %v20377_v51  ;;  %8394 = vmatpush.msra.mxu0 %v20386_v31  ;;  %v20391_v31 = vld [vmem:[#allocation7_spill] sm:$0xff] }
 0x5b4   :  { %8210 = vmatpush.msra.mxu2 %v20387_v42  ;;  %8318 = vmatmul.f32.vlgmr.msrb.gmra.mxu1 %v17942_v15  ;;  %v20392_v42 = vld [vmem:[#allocation18_spill] sm:$0xff] }
 0x5b5   :  { %8369 = vmatpush.msrb.mxu3 %v20379_v1  ;;  %8398 = vmatpush.msra.mxu0 %v20388_v28  ;;  %v20393_v28 = vld [vmem:[#allocation33_spill] sm:$0xff] }
 0x5b6   :  { %8425 = vmatpush.msra.mxu1 %v20376_v52  ;;  %8214 = vmatpush.msra.mxu2 %v20389_v39  ;;  %v20396_v39 = vld [vmem:[#allocation22_spill] sm:$0xff] }
 0x5b7   :  { %8371 = vmatpush.msrb.mxu3 %v20382_v2  ;;  %8402 = vmatpush.msra.mxu0 %v20390_v14  ;;  %v20395_v14 = vld [vmem:[#allocation34_spill] sm:$0xff] }
 0x5b8   :  { %8427 = vmatpush.msra.mxu1 %v20377_v51  ;;  %8216 = vmatmul.f32.vlgmr.msra.gmra.mxu2 %v17884_v60  ;;  %v20397_v60 = vld [vmem:[#allocation12_spill] sm:$0xff]  ;;  %v20403_v51 = vld [vmem:[#allocation27_spill] sm:$0xff] }
 0x5b9   :  { %8336 = vmatpush.msrb.mxu2 %v20391_v31  ;;  %8375 = vmatmul.f32.vlgmr.msrb.gmra.mxu3 %v17951_v53  ;;  %v20398_v31 = vld [vmem:[#allocation35_spill] sm:$0xff] }
 0x5ba   :  { %8406 = vmatpush.msra.mxu0 %v20392_v42  ;;  %8429 = vmatpush.msra.mxu1 %v20379_v1  ;;  %v20399_v42 = vld [vmem:[#allocation24_spill] sm:$0xff]  ;;  %v20400_v1 = vld [vmem:[#allocation21_spill] sm:$0xff] }
 0x5bb   :  { %8483 = vmatpush.msra.mxu3 %v20393_v28  ;;  %8339 = vmatpush.msrb.mxu2 %v20394_v10  ;;  %v20401_v28 = vld [vmem:[#allocation16_spill] sm:$0xff]  ;;  %v20402_v10 = vld [vmem:[#allocation39_spill] sm:$0xff] }
 0x5bc   :  { %8408 = vmatmul.f32.vlgmr.msra.gmra.mxu0 %v17942_v15  ;;  %8431 = vmatpush.msra.mxu1 %v20382_v2  ;;  %v20404_v2 = vld [vmem:[#allocation23_spill] sm:$0xff] }
 0x5bd   :  { %8489 = vmatpush.msra.mxu3 %v20395_v14  ;;  %8521 = vmatpush.msrb.mxu0 %v20396_v39  ;;  %v20414_v39 = vld [vmem:[#allocation45_spill] sm:$0xff]  ;;  %v20419_v14 = vld [vmem:[#allocation31_spill] sm:$0xff] }
 0x5be   :  { %8342 = vmatpush.msrb.mxu2 %v20397_v60  ;;  %8433 = vmatmul.f32.vlgmr.msra.gmra.mxu1 %v17942_v15  ;;  %v20405_v60 = vld [vmem:[#allocation28_spill] sm:$0xff] }
 0x5bf   :  { %8495 = vmatpush.msra.mxu3 %v20398_v31  ;;  %8524 = vmatpush.msrb.mxu0 %v20399_v42  ;;  %v20406_v31 = vld [vmem:[#allocation25_spill] sm:$0xff] }
 0x5c0   :  { %8550 = vmatpush.msrb.mxu1 %v20400_v1  ;;  %8345 = vmatpush.msrb.mxu2 %v20401_v28  ;;  %v20410_v28 = vld [vmem:[#allocation46_spill] sm:$0xff]  ;;  %v20412_v42 = vld [vmem:[#allocation49_spill] sm:$0xff] }
 0x5c1   :  { %8501 = vmatpush.msra.mxu3 %v20402_v10  ;;  %8527 = vmatpush.msrb.mxu0 %v20403_v51  ;;  %v20407_v10 = vld [vmem:[#allocation26_spill] sm:$0xff]  ;;  %v20408_v51 = vld [vmem:[#allocation36_spill] sm:$0xff] }
 0x5c2   :  { %8552 = vmatpush.msrb.mxu1 %v20404_v2  ;;  %8348 = vmatmul.f32.vlgmr.msrb.gmra.mxu2 %v17945_v18 }
 0x5c3   :  { %8450 = vmatpush.msra.mxu2 %v20400_v1  ;;  %8503 = vmatmul.f32.vlgmr.msra.gmra.mxu3 %v17942_v15 }
 0x5c4   :  { %8530 = vmatpush.msrb.mxu0 %v20405_v60  ;;  %8554 = vmatpush.msrb.mxu1 %v20406_v31  ;;  %v20409_v60 = vld [vmem:[#allocation37_spill] sm:$0xff] }
 0x5c5   :  { %8610 = vmatpush.msrb.mxu3 %v20400_v1  ;;  %8452 = vmatpush.msra.mxu2 %v20404_v2  ;;  %v20411_v1 = vld [vmem:[#allocation38_spill] sm:$0xff] }
 0x5c6   :  { %8533 = vmatmul.f32.vlgmr.msrb.gmra.mxu0 %v17945_v18  ;;  %8556 = vmatpush.msrb.mxu1 %v20407_v10 }
 0x5c7   :  { %8612 = vmatpush.msrb.mxu3 %v20404_v2  ;;  %8675 = vmatpush.msra.mxu0 %v20408_v51  ;;  %v20413_v2 = vld [vmem:[#allocation29_spill] sm:$0xff] }
 0x5c8   :  { %8454 = vmatpush.msra.mxu2 %v20406_v31  ;;  %8560 = vmatmul.f32.vlgmr.msrb.gmra.mxu1 %v17951_v53 }
 0x5c9   :  { %8614 = vmatpush.msrb.mxu3 %v20406_v31  ;;  %8677 = vmatpush.msra.mxu0 %v20409_v60  ;;  %v20415_v31 = vld [vmem:[#allocation51_spill] sm:$0xff] }
 0x5ca   :  { %8708 = vmatpush.msra.mxu1 %v20410_v28  ;;  %8456 = vmatpush.msra.mxu2 %v20407_v10  ;;  %v20416_v28 = vld [vmem:[#allocation30_spill] sm:$0xff] }
 0x5cb   :  { %8616 = vmatpush.msrb.mxu3 %v20407_v10  ;;  %8679 = vmatpush.msra.mxu0 %v20411_v1  ;;  %v20417_v10 = vld [vmem:[#allocation52_spill] sm:$0xff] }
 0x5cc   :  { %8714 = vmatpush.msra.mxu1 %v20412_v42  ;;  %8462 = vmatmul.f32.vlgmr.msra.gmra.mxu2 %v17960_v13  ;;  %v20418_v42 = vld [vmem:[#allocation42_spill] sm:$0xff] }
 0x5cd   :  { %8579 = vmatpush.msrb.mxu2 %v20413_v2  ;;  %8618 = vmatmul.f32.vlgmr.msrb.gmra.mxu3 %v17942_v15  ;;  %v20420_v2 = vld [vmem:[#allocation44_spill] sm:$0xff] }
 0x5ce   :  { %8681 = vmatpush.msra.mxu0 %v20414_v39  ;;  %8720 = vmatpush.msra.mxu1 %v20415_v31  ;;  %v20421_v31 = vld [vmem:[#allocation32_spill] sm:$0xff] }
 0x5cf   :  { %8775 = vmatpush.msra.mxu3 %v20408_v51  ;;  %8583 = vmatpush.msrb.mxu2 %v20416_v28  ;;  %v20432_v28 = vld [vmem:[#allocation86_spill] sm:$0xff] }
 0x5d0   :  { %8687 = vmatmul.f32.vlgmr.msra.gmra.mxu0 %v17960_v13  ;;  %8726 = vmatpush.msra.mxu1 %v20417_v10  ;;  %v20422_v13 = vld [vmem:[#allocation48_spill] sm:$0xff] }
 0x5d1   :  { %8777 = vmatpush.msra.mxu3 %v20409_v60  ;;  %8804 = vmatpush.msrb.mxu0 %v20418_v42  ;;  %v20424_v42 = vld [vmem:[#allocation50_spill] sm:$0xff]  ;;  %v20428_v10 = vld [vmem:[#allocation84_spill] sm:$0xff] }
 0x5d2   :  { %8587 = vmatpush.msrb.mxu2 %v20419_v14  ;;  %8728 = vmatmul.f32.vlgmr.msra.gmra.mxu1 %v17942_v15  ;;  %v20423_v14 = vld [vmem:[#allocation40_spill] sm:$0xff] }
 0x5d3   :  { %8779 = vmatpush.msra.mxu3 %v20411_v1  ;;  %8808 = vmatpush.msrb.mxu0 %v20420_v2  ;;  %v20425_v2 = vld [vmem:[#allocation41_spill] sm:$0xff] }
 0x5d4   :  { %8835 = vmatpush.msrb.mxu1 %v20408_v51  ;;  %8591 = vmatpush.msrb.mxu2 %v20421_v31  ;;  %v20426_v31 = vld [vmem:[#allocation81_spill] sm:$0xff] }
 0x5d5   :  { %8781 = vmatpush.msra.mxu3 %v20414_v39  ;;  %8812 = vmatpush.msrb.mxu0 %v20422_v13  ;;  %v20427_v13 = vld [vmem:[#allocation43_spill] sm:$0xff] }
 0x5d6   :  { %8837 = vmatpush.msrb.mxu1 %v20409_v60  ;;  %8593 = vmatmul.f32.vlgmr.msrb.gmra.mxu2 %v17942_v15 }
 0x5d7   :  { %8785 = vmatmul.f32.vlgmr.msra.gmra.mxu3 %v17951_v53  ;;  %8746 = vmatpush.msra.mxu2 %v20423_v14  ;;  %v20429_v53 = vld [vmem:[#allocation73_spill] sm:$0xff]  ;;  %v20430_v14 = vld [vmem:[#allocation47_spill] sm:$0xff] }
 0x5d8   :  { %8816 = vmatpush.msrb.mxu0 %v20424_v42  ;;  %8839 = vmatpush.msrb.mxu1 %v20411_v1  ;;  %v20431_v42 = vld [vmem:[#allocation71_spill] sm:$0xff] }
 0x5d9   :  { %8818 = vmatmul.f32.vlgmr.msrb.gmra.mxu0 %v17942_v15  ;;  %8749 = vmatpush.msra.mxu2 %v20425_v2  ;;  %v20433_v2 = vld [vmem:[#allocation76_spill] sm:$0xff] }
 0x5da   :  { %8841 = vmatpush.msrb.mxu1 %v20414_v39  ;;  %8904 = vmatpush.msrb.mxu3 %v20426_v31  ;;  %v20434_v39 = vld [vmem:[#allocation72_spill] sm:$0xff] }
 0x5db   :  { %8843 = vmatmul.f32.vlgmr.msrb.gmra.mxu1 %v17942_v15  ;;  %8752 = vmatpush.msra.mxu2 %v20427_v13  ;;  %v20435_v31 = vld [vmem:[#allocation88_spill] sm:$0xff]  ;;  %v20436_v15 = vld [vmem:[#allocation79_spill] sm:$0xff]  ;;  %v20447_v13 = vld [vmem:[#allocation85_spill] sm:$0xff] }
 0x5dc   :  { %8910 = vmatpush.msrb.mxu3 %v20428_v10  ;;  %8942 = vmatpush.msra.mxu0 %v20429_v53  ;;  %v20437_v10 = vld [vmem:[#allocation75_spill] sm:$0xff]  ;;  %v7117_v53 = vpop.f32.mrf.mxu0 }
 0x5dd   :  { %8755 = vmatpush.msra.mxu2 %v20430_v14  ;;  %8971 = vmatpush.msra.mxu1 %v20431_v42 }
 0x5de   :  { %8758 = vmatmul.f32.vlgmr.msra.gmra.mxu2 %v17945_v18  ;;  %8916 = vmatpush.msrb.mxu3 %v20432_v28  ;;  %v20438_v18 = vld [vmem:[#allocation83_spill] sm:$0xff]  ;;  %v20439_v28 = vld [vmem:[#allocation78_spill] sm:$0xff] }
 0x5df   :  { %8945 = vmatpush.msra.mxu0 %v20433_v2  ;;  %8973 = vmatpush.msra.mxu1 %v20434_v39  ;;  %v20441_v2 = vld [vmem:[#allocation74_spill] sm:$0xff] }
 0x5e0   :  { %8922 = vmatpush.msrb.mxu3 %v20435_v31  ;;  %8871 = vmatpush.msrb.mxu2 %v20431_v42  ;;  %v20440_v31 = vld [vmem:[#allocation98_spill] sm:$0xff] }
 0x5e1   :  { %8948 = vmatpush.msra.mxu0 %v20436_v15  ;;  %8975 = vmatpush.msra.mxu1 %v20437_v10  ;;  %v7158_v15 = vpop.f32.mrf.mxu1 }
 0x5e2   :  { %9031 = vmatpush.msra.mxu3 %v20431_v42  ;;  %8873 = vmatpush.msrb.mxu2 %v20434_v39  ;;  %v20442_v42 = vld [vmem:[#allocation101_spill] sm:$0xff] }
 0x5e3   :  { %8951 = vmatpush.msra.mxu0 %v20438_v18  ;;  %8977 = vmatpush.msra.mxu1 %v20439_v28  ;;  %v20443_v18 = vld [vmem:[#allocation77_spill] sm:$0xff] }
 0x5e4   :  { %9033 = vmatpush.msra.mxu3 %v20434_v39  ;;  %8875 = vmatpush.msrb.mxu2 %v20437_v10  ;;  %v20444_v39 = vld [vmem:[#allocation104_spill] sm:$0xff]  ;;  %v7248_v14 = vpop.f32.mrf.mxu0 }
 0x5e5   :  { %9092 = vmatpush.msrb.mxu1 %v20440_v31  ;;  %9059 = vmatpush.msrb.mxu0 %v20077_v11  ;;  %v20445_v31 = vld [vmem:[#allocation82_spill] sm:$0xff] }
 0x5e6   :  { %9035 = vmatpush.msra.mxu3 %v20437_v10  ;;  %8877 = vmatpush.msrb.mxu2 %v20439_v28  ;;  %v20446_v10 = vld [vmem:[#allocation107_spill] sm:$0xff] }
 0x5e7   :  { %9098 = vmatpush.msrb.mxu1 %v20442_v42  ;;  %9061 = vmatpush.msrb.mxu0 %v20080_v32  ;;  %v7159_v42 = vadd.f32 %v7158_v15, %v7117_v53 }
 0x5e8   :  { %9000 = vmatpush.msra.mxu2 %v20441_v2  ;;  %9037 = vmatpush.msra.mxu3 %v20439_v28  ;;  %v7215_v2 = vpop.f32.mrf.mxu3  ;;  %v7188_v28 = vpop.f32.mrf.mxu2 }
 0x5e9   :  { %9104 = vmatpush.msrb.mxu1 %v20444_v39  ;;  %9063 = vmatpush.msrb.mxu0 %v20083_v40  ;;  %v7273_v1 = vpop.f32.mrf.mxu1  ;;  %v7189_v60 = vadd.f32 %v7188_v28, %v7159_v42 }
 0x5ea   :  { %9004 = vmatpush.msra.mxu2 %v20443_v18 }
 0x5eb   :  { %9110 = vmatpush.msrb.mxu1 %v20446_v10  ;;  %9065 = vmatpush.msrb.mxu0 %v20086_v48  ;;  %v7216_v52 = vadd.f32 %v7215_v2, %v7189_v60  ;;  %v20448_v2 = vld [vmem:[#allocation103_spill] sm:$0xff] }
 0x5ec   :  { %9008 = vmatpush.msra.mxu2 %v20445_v31 }
 0x5ed   :  { %v7249_v39 = vadd.f32 %v7248_v14, %v7216_v52 }
 0x5ee   :  { %9012 = vmatpush.msra.mxu2 %v20447_v13 }
 0x5ef   :  { %v7274_v56 = vadd.f32 %v7273_v1, %v7249_v39 }
 0x5f1   :  { %v7377_v51 = vpop.f32.mrf.mxu0 }
 0x5f3   :  { %v7404_v3 = vpop.f32.mrf.mxu1 }
 0x5f5   :  { %v7347_v18 = vpop.f32.mrf.mxu3 }
 0x5f9   :  { %v7511_v31 = vpop.f32.mrf.mxu0 }
 0x5fb   :  { %v7552_v45 = vpop.f32.mrf.mxu1 }
 0x5fc   :  { %v7553_v28 = vadd.f32 %v7552_v45, %v7511_v31 }
 0x5fd   :  { %v7306_v19 = vpop.f32.mrf.mxu2  ;;  %v7462_v10 = vpop.f32.mrf.mxu3 }
 0x5fe   :  { %v7307_v5 = vadd.f32 %v7306_v19, %v7274_v56 }
 0x600   :  { %v7348_v20 = vadd.f32 %v7347_v18, %v7307_v5 }
 0x601   :  { %v7642_v53 = vpop.f32.mrf.mxu0 }
 0x602   :  { %v7378_v0 = vadd.f32 %v7377_v51, %v7348_v20 }
 0x603   :  { %v7667_v42 = vpop.f32.mrf.mxu1 }
 0x604   :  { %v7405_v22 = vadd.f32 %v7404_v3, %v7378_v0 }
 0x605   :  { %v7437_v54 = vpop.f32.mrf.mxu2  ;;  %v7609_v15 = vpop.f32.mrf.mxu3 }
 0x606   :  { %v7438_v13 = vadd.f32 %v7437_v54, %v7405_v22 }
 0x608   :  { %v7463_v8 = vadd.f32 %v7462_v10, %v7438_v13 }
 0x609   :  { %v7767_v60 = vpop.f32.mrf.mxu0 }
 0x60a   :  { %v7465_v14 = vadd.f32 %v20448_v2, %v7463_v8 }
 0x60b   :  { %v7794_v51 = vpop.f32.mrf.mxu1 }
 0x60c   :  { %v15431_v1 = vmul.f32 -1.442695, %v7465_v14 }
 0x60d   :  { %v7582_v7 = vpop.f32.mrf.mxu2  ;;  %v7737_v19 = vpop.f32.mrf.mxu3 }
 0x60e   :  { %v7583_v52 = vadd.f32 %v7582_v7, %v7553_v28  ;;  %15533 = vpow2.f32 %v15431_v1  ;;  %v20449_v28 = vld [vmem:[#allocation105_spill] sm:$0xff] }
 0x610   :  { %v7610_v39 = vadd.f32 %v7609_v15, %v7583_v52 }
 0x611   :  { %v7901_v10 = vpop.f32.mrf.mxu0 }
 0x612   :  { %v7643_v56 = vadd.f32 %v7642_v53, %v7610_v39 }
 0x613   :  { %v7942_v15 = vpop.f32.mrf.mxu1 }
 0x614   :  { %v7668_v5 = vadd.f32 %v7667_v42, %v7643_v56  ;;  %v15534_v3 = vpop.eup %15533 }
 0x615   :  { %v7696_v20 = vpop.f32.mrf.mxu2  ;;  %v7852_v31 = vpop.f32.mrf.mxu3  ;;  %v7469_v8 = vadd.f32 1.0, %v15534_v3 }
 0x616   :  { %v7697_v0 = vadd.f32 %v7696_v20, %v7668_v5  ;;  %v20450_v5 = vld [vmem:[#allocation109_spill] sm:$0xff] }
 0x617   :  { %15535 = vrcp.f32 %v7469_v8  ;;  %v7902_v20 = vadd.f32 %v20450_v5, %v7901_v10  ;;  %v7481_v5 = vand.u32 2147483648, %v7469_v8  ;;  %vm7475_vm1 = vweird.f32 %v7469_v8 }
 0x618   :  { %v7738_v54 = vadd.f32 %v7737_v19, %v7697_v0 }
 0x619   :  { %v7943_v3 = vadd.f32 %v7942_v15, %v7902_v20  ;;  %v20451_v15 = vld [vmem:[#allocation54_spill] sm:$0xff] }
 0x61a   :  { %v7768_v22 = vadd.f32 %v7767_v60, %v7738_v54 }
 0x61b   :  { %v8032_v42 = vpop.f32.mrf.mxu0 }
 0x61c   :  { %v7795_v45 = vadd.f32 %v7794_v51, %v7768_v22 }
 0x61d   :  { %v7827_v13 = vpop.f32.mrf.mxu2  ;;  %v15536_v39 = vpop.eup %15535 }
 0x61e   :  { %v7828_v18 = vadd.f32 %v7827_v13, %v7795_v45  ;;  %v7999_v14 = vpop.f32.mrf.mxu3  ;;  %v8057_v1 = vpop.f32.mrf.mxu1  ;;  %v7471_v56 = vmul.f32 %v15536_v39, %v7469_v8  ;;  %vm7476_vm0 = vweird.f32 %v15536_v39 }
 0x61f   :  { %vm7477_vm2 = vmor %vm7475_vm1, %vm7476_vm0 }
 0x620   :  { %v7853_v7 = vadd.f32 %v7852_v31, %v7828_v18  ;;  %v7472_v51 = vsub.f32 1.0, %v7471_v56  ;;  %v15629_v56 = vld [vmem:[%s19407_s4] ss:$0 sm:$0xff] }
 0x621   :  { %v459_v20 = vadd.f32 %v15629_v56, %v20451_v15  ;;  %v20453_v56 = vld [vmem:[#allocation58_spill] sm:$0xff] }
 0x622   :  { %v7855_v2 = vadd.f32 %v20449_v28, %v7853_v7  ;;  %v7473_v18 = vmul.f32 %v15536_v39, %v7472_v51 }
 0x624   :  { %v15432_v53 = vmul.f32 -1.442695, %v7855_v2  ;;  %v7474_v47 = vadd.f32 %v15536_v39, %v7473_v18 }
 0x625   :  { %v8157_v0 = vpop.f32.mrf.mxu0 }
 0x626   :  { %15537 = vpow2.f32 %v15432_v53 }
 0x627   :  { %v7972_v52 = vpop.f32.mrf.mxu2  ;;  %v8184_v28 = vpop.f32.mrf.mxu1 }
 0x628   :  { %v8127_v54 = vpop.f32.mrf.mxu3  ;;  %v7973_v31 = vadd.f32 %v7972_v52, %v7943_v3  ;;  %v7479_v52 = vand.u32 2147483647, %v7469_v8  ;;  %v7478_v3 = vsel %vm7477_vm2, %v15536_v39, %v7474_v47  ;;  %v20454_v39 = vld [vmem:[#allocation56_spill] sm:$0xff] }
 0x62a   :  { %vm7480_vm3 = vcmp.eq.f32.partialorder %v7479_v52, 8.507059e+37 }
 0x62c   :  { %v15538_v60 = vpop.eup %15537 }
 0x62d   :  { %v7859_v19 = vadd.f32 1.0, %v15538_v60  ;;  %v8000_v60 = vadd.f32 %v7999_v14, %v7973_v31  ;;  %v7482_v14 = vor.u32 1.1754944e-38, %v7481_v5  ;;  %v20452_v31 = vld [vmem:[#allocation53_spill] sm:$0xff] }
 0x62f   :  { %15539 = vrcp.f32 %v7859_v19  ;;  %v7871_v35 = vand.u32 2147483648, %v7859_v19  ;;  %vm7865_vm6 = vweird.f32 %v7859_v19  ;;  %v7869_v36 = vand.u32 2147483647, %v7859_v19 }
 0x631   :  { %v8086_v22 = vpop.f32.mrf.mxu2  ;;  %vm7870_vm8 = vcmp.eq.f32.partialorder %v7869_v36, 8.507059e+37 }
 0x632   :  { %v8087_v45 = vadd.f32 %v17876_v27, %v8086_v22  ;;  %v8278_v27 = vpop.f32.mrf.mxu0 }
 0x634   :  { %v8128_v13 = vadd.f32 %v8127_v54, %v8087_v45  ;;  %v8242_v54 = vpop.f32.mrf.mxu3 }
 0x635   :  { %v15540_v7 = vpop.eup %15539 }
 0x636   :  { %v7861_v2 = vmul.f32 %v15540_v7, %v7859_v19  ;;  %v8158_v53 = vadd.f32 %v8157_v0, %v8128_v13  ;;  %v8033_v0 = vadd.f32 %v8032_v42, %v8000_v60  ;;  %v504_v13 = vadd.f32 %v20452_v31, %v459_v20  ;;  %v20456_v31 = vld [vmem:[#allocation62_spill] sm:$0xff] }
 0x637   :  { %vm7866_vm5 = vweird.f32 %v15540_v7 }
 0x638   :  { %v7862_v62 = vsub.f32 1.0, %v7861_v2  ;;  %v8185_v10 = vadd.f32 %v8184_v28, %v8158_v53  ;;  %v8319_v28 = vpop.f32.mrf.mxu1  ;;  %v7483_v2 = vsel %vm7480_vm3, %v7482_v14, %v7478_v3  ;;  %v539_v15 = vadd.f32 %v20453_v56, %v504_v13  ;;  %vm7867_vm7 = vmor %vm7865_vm6, %vm7866_vm5  ;;  %v20455_v3 = vld [vmem:[#allocation55_spill] sm:$0xff] }
 0x639   :  { %v8058_v8 = vadd.f32 %v8057_v1, %v8033_v0  ;;  %v8320_v5 = vadd.f32 %v8319_v28, %v8278_v27  ;;  %v20458_v56 = vld [vmem:[#allocation59_spill] sm:$0xff] }
 0x63a   :  { %v7863_v51 = vmul.f32 %v15540_v7, %v7862_v62  ;;  %v572_v60 = vadd.f32 %v20454_v39, %v539_v15  ;;  %v8409_v20 = vpop.f32.mrf.mxu0 }
 0x63b   :  { %v8217_v22 = vpop.f32.mrf.mxu2 }
 0x63c   :  { %v8218_v45 = vadd.f32 %v8217_v22, %v8185_v10  ;;  %v7864_v53 = vadd.f32 %v15540_v7, %v7863_v51  ;;  %v7872_v10 = vor.u32 1.1754944e-38, %v7871_v35  ;;  %v8376_v52 = vpop.f32.mrf.mxu3 }
 0x63e   :  { %v8243_v18 = vadd.f32 %v8242_v54, %v8218_v45  ;;  %v7868_v47 = vsel %vm7867_vm7, %v15540_v7, %v7864_v53  ;;  %v609_v45 = vadd.f32 %v20455_v3, %v572_v60  ;;  %v15630_v7 = vld [vmem:[%s19407_s4 + $0x1] ss:$0 sm:$0xff]  ;;  %v20460_v3 = vld [vmem:[#allocation61_spill] sm:$0xff] }
 0x63f   :  { %v7873_v51 = vsel %vm7870_vm8, %v7872_v10, %v7868_v47  ;;  %v685_v35 = vadd.f32 %v15630_v7, %v20456_v31 }
 0x640   :  { %v8245_v62 = vmul.f32 %v8243_v18, %v7483_v2  ;;  %v8434_v0 = vpop.f32.mrf.mxu1  ;;  %v8248_v14 = vsub.f32 1.0, %v7873_v51  ;;  %v8250_v36 = vmul.f32 %v7873_v51, %v17880_v23  ;;  %v20457_v18 = vld [vmem:[#allocation57_spill] sm:$0xff] }
 0x641   :  { %v18212_v28 = vadd.f32 %v20457_v18, %v609_v45  ;;  %v730_v15 = vadd.f32 %v20458_v56, %v685_v35 }
 0x642   :  { %v8246_v42 = vadd.f32 %v8245_v62, %v8058_v8 }
 0x643   :  { %v8534_v8 = vpop.f32.mrf.mxu0 }
 0x644   :  { %15541 = vtanh.f32 %v8246_v42 }
 0x645   :  { %v8349_v54 = vpop.f32.mrf.mxu2 }
 0x646   :  { %v8350_v22 = vadd.f32 %v8349_v54, %v8320_v5  ;;  %v8504_v47 = vpop.f32.mrf.mxu3  ;;  %v20459_v5 = vld [vmem:[#allocation60_spill] sm:$0xff] }
 0x648   :  { %v8377_v1 = vadd.f32 %v8376_v52, %v8350_v22  ;;  %v8561_v54 = vpop.f32.mrf.mxu1 }
 0x64a   :  { %v15542_v19 = vpop.eup %15541  ;;  %v8410_v27 = vadd.f32 %v8409_v20, %v8377_v1  ;;  %v765_v20 = vadd.f32 %v20459_v5, %v730_v15  ;;  %v20466_v5 = vld [vmem:[#allocation95_spill] sm:$0xff] }
 0x64b   :  { %v8249_v13 = vmul.f32 %v15542_v19, %v8248_v14  ;;  %v20461_v14 = vld [vmem:[#allocation65_spill] sm:$0xff] }
 0x64c   :  { %v8435_v2 = vadd.f32 %v8434_v0, %v8410_v27  ;;  %v798_v45 = vadd.f32 %v20460_v3, %v765_v20 }
 0x64d   :  { %v18214_v53 = vadd.f32 %v8250_v36, %v8249_v13  ;;  %v8688_v27 = vpop.f32.mrf.mxu0 }
 0x64e   :  { %v8622_v62 = vadd.f32 %v8435_v2, %v18212_v28  ;;  %v835_v19 = vadd.f32 %v20461_v14, %v798_v45  ;;  %v20462_v2 = vld [vmem:[#allocation63_spill] sm:$0xff]  ;;  %v8689_v15 = vadd.f32 %v17915_v41, %v8688_v27  ;;  %v15631_v41 = vld [vmem:[%s19407_s4 + $0x2] ss:$0 sm:$0xff] }
 0x64f   :  { %v8856_v42 = vsel %vm417_vm4, %v18214_v53, 0  ;;  %v8463_v39 = vpop.f32.mrf.mxu2 }
 0x650   :  { %v18220_v60 = vand.u32 4294901760, %v8856_v42  ;;  %v15433_v10 = vmul.f32 -1.442695, %v8622_v62  ;;  %v8505_v23 = vadd.f32 %v8504_v47, %v8463_v39  ;;  %v8619_v36 = vpop.f32.mrf.mxu3  ;;  %v18251_v56 = vadd.f32 %v20462_v2, %v835_v19  ;;  %v8729_v62 = vpop.f32.mrf.mxu1  ;;  %v20463_v47 = vld [vmem:[#allocation117_spill] sm:$0xff]  ;;  %v20464_v39 = vld [vmem:[#allocation102_spill] sm:$0xff]  ;;  %v20469_v19 = vld [vmem:[#allocation120_spill] sm:$0xff] }
 0x651   :  { %v8730_v20 = vadd.f32 %v8729_v62, %v8689_v15 }
 0x652   :  { %15543 = vpow2.f32 %v15433_v10  ;;  %8924 = vmatmul.f32.vlgmr.msrb.gmra.mxu3 %v18220_v60  ;;  %v18225_v52 = vsub.f32 %v8856_v42, %v18220_v60  ;;  %v8535_v51 = vadd.f32 %v8534_v8, %v8505_v23  ;;  %v20465_v10 = vld [vmem:[#allocation64_spill] sm:$0xff] }
 0x653   :  { %9159 = vmatpush.msrb.mxu3 %v20077_v11  ;;  %v911_v23 = vadd.f32 %v15631_v41, %v20465_v10 }
 0x654   :  { %8954 = vmatmul.f32.vlgmr.msra.gmra.mxu0 %v18225_v52  ;;  %v18230_v22 = vand.u32 4294901760, %v18225_v52  ;;  %v8562_v7 = vadd.f32 %v8561_v54, %v8535_v51  ;;  %v20467_v51 = vld [vmem:[#allocation119_spill] sm:$0xff] }
 0x655   :  { %9161 = vmatpush.msrb.mxu3 %v20080_v32  ;;  %9188 = vmatpush.msra.mxu0 %v20215_v61 }
 0x656   :  { %8981 = vmatmul.f32.vlgmr.msra.gmra.mxu1 %v18230_v22  ;;  %v8881_v1 = vsub.f32 %v18225_v52, %v18230_v22  ;;  %v8819_v10 = vpop.f32.mrf.mxu0 }
 0x657   :  { %9163 = vmatpush.msrb.mxu3 %v20083_v40  ;;  %9219 = vmatpush.msra.mxu1 %v20077_v11 }
 0x658   :  { %v15544_v0 = vpop.eup %15543  ;;  %v18241_v31 = vand.u32 4294901760, %v8881_v1  ;;  %9192 = vmatpush.msra.mxu0 %v20216_v25  ;;  %v20468_v1 = vld [vmem:[#allocation100_spill] sm:$0xff] }
 0x659   :  { %v8626_v35 = vadd.f32 1.0, %v15544_v0  ;;  %v8594_v13 = vpop.f32.mrf.mxu2  ;;  %9165 = vmatpush.msrb.mxu3 %v20086_v48  ;;  %9221 = vmatpush.msra.mxu1 %v20080_v32 }
 0x65a   :  { %v8595_v18 = vadd.f32 %v8594_v13, %v8562_v7  ;;  %8883 = vmatmul.f32.vlgmr.msrb.gmra.mxu2 %v18241_v31  ;;  %9039 = vmatmul.f32.vlgmr.msra.gmra.mxu3 %v18220_v60  ;;  %v20470_v7 = vld [vmem:[#allocation66_spill] sm:$0xff]  ;;  %v8786_v13 = vpop.f32.mrf.mxu3 }
 0x65b   :  { %15545 = vrcp.f32 %v8626_v35  ;;  %9130 = vmatpush.msrb.mxu2 %v20217_v9  ;;  %9223 = vmatpush.msra.mxu1 %v20083_v40  ;;  %v956_v27 = vadd.f32 %v20470_v7, %v911_v23  ;;  %v8638_v62 = vand.u32 2147483648, %v8626_v35  ;;  %vm8632_vm10 = vweird.f32 %v8626_v35  ;;  %v20472_v23 = vld [vmem:[#allocation67_spill] sm:$0xff] }
 0x65c   :  { %v8620_v8 = vadd.f32 %v8619_v36, %v8595_v18  ;;  %9297 = vmatpush.msra.mxu3 %v20333_v63  ;;  %9196 = vmatpush.msra.mxu0 %v20334_v34  ;;  %v20471_v18 = vld [vmem:[#allocation68_spill] sm:$0xff] }
 0x65d   :  { %9133 = vmatpush.msrb.mxu2 %v20335_v24  ;;  %9225 = vmatpush.msra.mxu1 %v20086_v48  ;;  %v991_v2 = vadd.f32 %v20471_v18, %v956_v27  ;;  %v8639_v7 = vor.u32 1.1754944e-38, %v8638_v62  ;;  %v8844_v27 = vpop.f32.mrf.mxu1 }
 0x65e   :  { %v8642_v42 = vadd.f32 %v8620_v8, %v18251_v56  ;;  %9303 = vmatpush.msra.mxu3 %v20463_v47  ;;  %9200 = vmatpush.msra.mxu0 %v20464_v39 }
 0x65f   :  { %9136 = vmatpush.msrb.mxu2 %v20466_v5 }
 0x660   :  { %v15434_v54 = vmul.f32 -1.442695, %v8642_v42  ;;  %9309 = vmatpush.msra.mxu3 %v20467_v51  ;;  %v8636_v42 = vand.u32 2147483647, %v8626_v35 }
 0x661   :  { %v15546_v3 = vpop.eup %15545  ;;  %v8759_v45 = vpop.f32.mrf.mxu2  ;;  %9139 = vmatpush.msrb.mxu2 %v20468_v1 }
 0x662   :  { %15547 = vpow2.f32 %v15434_v54  ;;  %v8628_v0 = vmul.f32 %v15546_v3, %v8626_v35  ;;  %v8760_v14 = vadd.f32 %v8759_v45, %v8730_v20  ;;  %9014 = vmatmul.f32.vlgmr.msra.gmra.mxu2 %v18220_v60  ;;  %9315 = vmatpush.msra.mxu3 %v20469_v19  ;;  %vm8633_vm9 = vweird.f32 %v15546_v3 }
 0x663   :  { %9264 = vmatpush.msra.mxu2 %v20108_v26  ;;  %v1024_v54 = vadd.f32 %v20472_v23, %v991_v2  ;;  %vm8634_vm11 = vmor %vm8632_vm10, %vm8633_vm9  ;;  %vm8637_vm12 = vcmp.eq.f32.partialorder %v8636_v42, 8.507059e+37 }
 0x664   :  { %v8629_v36 = vsub.f32 1.0, %v8628_v0  ;;  %v8787_v15 = vadd.f32 %v8786_v13, %v8760_v14 }
 0x665   :  { %9266 = vmatpush.msra.mxu2 %v20109_v43 }
 0x666   :  { %v8630_v8 = vmul.f32 %v15546_v3, %v8629_v36  ;;  %v8820_v0 = vadd.f32 %v8819_v10, %v8787_v15  ;;  %v20473_v36 = vld [vmem:[#allocation69_spill] sm:$0xff] }
 0x667   :  { %9268 = vmatpush.msra.mxu2 %v20110_v38  ;;  %v1061_v18 = vadd.f32 %v20473_v36, %v1024_v54 }
 0x668   :  { %v15548_v41 = vpop.eup %15547  ;;  %v8631_v20 = vadd.f32 %v15546_v3, %v8630_v8  ;;  %v8845_v19 = vadd.f32 %v8844_v27, %v8820_v0  ;;  %v20474_v8 = vld [vmem:[#allocation70_spill] sm:$0xff] }
 0x669   :  { %v8646_v45 = vadd.f32 1.0, %v15548_v41  ;;  %9270 = vmatpush.msra.mxu2 %v20111_v57  ;;  %v18279_v35 = vadd.f32 %v20474_v8, %v1061_v18  ;;  %v20476_v8 = vld [vmem:[#allocation123_spill] sm:$0xff] }
 0x66a   :  { %v8635_v14 = vsel %vm8634_vm11, %v15546_v3, %v8631_v20 }
 0x66b   :  { %15549 = vrcp.f32 %v8646_v45  ;;  %v8640_v13 = vsel %vm8637_vm12, %v8639_v7, %v8635_v14  ;;  %v8658_v10 = vand.u32 2147483648, %v8646_v45  ;;  %v8656_v3 = vand.u32 2147483647, %v8646_v45 }
 0x66c   :  { %v8847_v1 = vmul.f32 %v8845_v19, %v8640_v13  ;;  %vm8652_vm14 = vweird.f32 %v8646_v45  ;;  %v20475_v7 = vrot.slane %v17936_v21, 6 }
 0x66d   :  { %v8659_v42 = vor.u32 1.1754944e-38, %v8658_v10  ;;  %vm8657_vm0 = vcmp.eq.f32.partialorder %v8656_v3, 8.507059e+37  ;;  %v20480_v10 = vld [vmem:[#allocation136_spill] sm:$0xff]  ;;  %v20482_v3 = vld [vmem:[#allocation138_spill] sm:$0xff] }
 0x66e   :  { %v8848_v41 = vadd.f32 %v8847_v1, %v18279_v35 }
 0x670   :  { %15551 = vtanh.f32 %v8848_v41  ;;  %v20478_v41 = vld [vmem:[#allocation126_spill] sm:$0xff] }
 0x671   :  { %v15550_v51 = vpop.eup %15549 }
 0x672   :  { %v8648_v2 = vmul.f32 %v15550_v51, %v8646_v45  ;;  %vm8653_vm13 = vweird.f32 %v15550_v51 }
 0x673   :  { %vm8654_vm15 = vmor %vm8652_vm14, %vm8653_vm13 }
 0x674   :  { %v8649_v15 = vsub.f32 1.0, %v8648_v2  ;;  %v20477_v2 = vld [vmem:[#allocation132_spill] sm:$0xff] }
 0x676   :  { %v8650_v23 = vmul.f32 %v15550_v51, %v8649_v15  ;;  %v15552_v0 = vpop.eup %15551  ;;  %v20479_v15 = vld [vmem:[#allocation129_spill] sm:$0xff] }
 0x678   :  { %v8651_v62 = vadd.f32 %v15550_v51, %v8650_v23  ;;  %v20481_v23 = vld [vmem:[#allocation150_spill] sm:$0xff] }
 0x67a   :  { %v8655_v20 = vsel %vm8654_vm15, %v15550_v51, %v8651_v62  ;;  %v20483_v62 = vld [vmem:[#allocation141_spill] sm:$0xff] }
 0x67b   :  { %v8660_v19 = vsel %vm8657_vm0, %v8659_v42, %v8655_v20  ;;  %v20484_v42 = vld [vmem:[#allocation154_spill] sm:$0xff]  ;;  %v20485_v20 = vld [vmem:[#allocation128_spill] sm:$0xff] }
 0x67c   :  { %v8850_v54 = vsub.f32 1.0, %v8660_v19  ;;  %v8853_v27 = vmul.f32 %v8660_v19, %v20475_v7  ;;  %v20486_v19 = vld [vmem:[#allocation145_spill] sm:$0xff]  ;;  %v20490_v7 = vld [vmem:[#allocation143_spill] sm:$0xff] }
 0x67e   :  { %v8851_v14 = vmul.f32 %v15552_v0, %v8850_v54  ;;  %v20487_v54 = vld [vmem:[#allocation157_spill] sm:$0xff]  ;;  %v20488_v0 = vld [vmem:[#allocation131_spill] sm:$0xff] }
 0x680   :  { %v18284_v1 = vadd.f32 %v8853_v27, %v8851_v14  ;;  %v20489_v14 = vld [vmem:[#allocation160_spill] sm:$0xff]  ;;  %v20491_v27 = vld [vmem:[#allocation133_spill] sm:$0xff] }
 0x682   :  { %v9044_v13 = vsel %vm417_vm4, %v18284_v1, 0 }
 0x683   :  { %v18288_v36 = vand.u32 4294901760, %v9044_v13 }
 0x685   :  { %v18291_v45 = vsub.f32 %v9044_v13, %v18288_v36  ;;  %9112 = vmatmul.f32.vlgmr.msrb.gmra.mxu1 %v18288_v36  ;;  %v20492_v13 = vld [vmem:[#allocation147_spill] sm:$0xff] }
 0x686   :  { %9364 = vmatpush.msrb.mxu1 %v20108_v26 }
 0x687   :  { %9142 = vmatmul.f32.vlgmr.msrb.gmra.mxu2 %v18291_v45  ;;  %v18297_v51 = vand.u32 4294901760, %v18291_v45 }
 0x688   :  { %9366 = vmatpush.msrb.mxu1 %v20109_v43  ;;  %9393 = vmatpush.msrb.mxu2 %v20114_v59 }
 0x689   :  { %9169 = vmatmul.f32.vlgmr.msrb.gmra.mxu3 %v18297_v51  ;;  %v9069_v21 = vsub.f32 %v18291_v45, %v18297_v51 }
 0x68a   :  { %9368 = vmatpush.msrb.mxu1 %v20110_v38  ;;  %9397 = vmatpush.msrb.mxu2 %v20115_v50 }
 0x68b   :  { %v18306_v18 = vand.u32 4294901760, %v9069_v21  ;;  %9424 = vmatpush.msrb.mxu3 %v20108_v26  ;;  %v20493_v21 = vld [vmem:[#allocation135_spill] sm:$0xff] }
 0x68c   :  { %9370 = vmatpush.msrb.mxu1 %v20111_v57  ;;  %9401 = vmatpush.msrb.mxu2 %v20116_v55 }
 0x68d   :  { %9071 = vmatmul.f32.vlgmr.msrb.gmra.mxu0 %v18306_v18  ;;  %9227 = vmatmul.f32.vlgmr.msra.gmra.mxu1 %v18288_v36 }
 0x68e   :  { %9426 = vmatpush.msrb.mxu3 %v20109_v43  ;;  %9335 = vmatpush.msrb.mxu0 %v20117_v33 }
 0x68f   :  { %9276 = vmatmul.f32.vlgmr.msra.gmra.mxu2 %v18241_v31  ;;  %9482 = vmatpush.msra.mxu1 %v20118_v12 }
 0x690   :  { %9405 = vmatpush.msrb.mxu2 %v20119_v16  ;;  %9428 = vmatpush.msrb.mxu3 %v20110_v38 }
 0x691   :  { %9317 = vmatmul.f32.vlgmr.msra.gmra.mxu3 %v18220_v60  ;;  %9338 = vmatpush.msrb.mxu0 %v20120_v49 }
 0x692   :  { %9430 = vmatpush.msrb.mxu3 %v20111_v57  ;;  %9488 = vmatpush.msra.mxu1 %v20121_v30 }
 0x693   :  { %9520 = vmatpush.msra.mxu2 %v20122_v6  ;;  %9341 = vmatpush.msrb.mxu0 %v20229_v29 }
 0x694   :  { %9494 = vmatpush.msra.mxu1 %v20230_v44  ;;  %9549 = vmatpush.msra.mxu3 %v20125_v37 }
 0x695   :  { %9202 = vmatmul.f32.vlgmr.msra.gmra.mxu0 %v18288_v36  ;;  %9374 = vmatmul.f32.vlgmr.msrb.gmra.mxu1 %v18230_v22 }
 0x696   :  { %9523 = vmatpush.msra.mxu2 %v20126_v17  ;;  %9344 = vmatpush.msrb.mxu0 %v20231_v4 }
 0x697   :  { %9407 = vmatmul.f32.vlgmr.msrb.gmra.mxu2 %v18220_v60  ;;  %9500 = vmatpush.msra.mxu1 %v20128_v46 }
 0x698   :  { %9526 = vmatpush.msra.mxu2 %v20129_v58  ;;  %9551 = vmatpush.msra.mxu3 %v20476_v8 }
 0x699   :  { %9432 = vmatmul.f32.vlgmr.msrb.gmra.mxu3 %v18220_v60  ;;  %9449 = vmatpush.msra.mxu0 %v20125_v37 }
 0x69a   :  { %9529 = vmatpush.msra.mxu2 %v20477_v2  ;;  %9553 = vmatpush.msra.mxu3 %v20478_v41 }
 0x69b   :  { %9609 = vmatpush.msrb.mxu1 %v20125_v37  ;;  %9451 = vmatpush.msra.mxu0 %v20476_v8 }
 0x69c   :  { %9555 = vmatpush.msra.mxu3 %v20479_v15  ;;  %9654 = vmatpush.msrb.mxu2 %v20480_v10 }
 0x69d   :  { %9347 = vmatmul.f32.vlgmr.msrb.gmra.mxu0 %v18225_v52  ;;  %9502 = vmatmul.f32.vlgmr.msra.gmra.mxu1 %v18288_v36 }
 0x69e   :  { %9611 = vmatpush.msrb.mxu1 %v20476_v8  ;;  %9453 = vmatpush.msra.mxu0 %v20478_v41 }
 0x69f   :  { %9532 = vmatmul.f32.vlgmr.msra.gmra.mxu2 %v18291_v45  ;;  %9687 = vmatpush.msrb.mxu3 %v20481_v23 }
 0x6a0   :  { %9613 = vmatpush.msrb.mxu1 %v20478_v41  ;;  %9656 = vmatpush.msrb.mxu2 %v20482_v3 }
 0x6a1   :  { %9559 = vmatmul.f32.vlgmr.msra.gmra.mxu3 %v18297_v51  ;;  %9455 = vmatpush.msra.mxu0 %v20479_v15 }
 0x6a2   :  { %9615 = vmatpush.msrb.mxu1 %v20479_v15  ;;  %9658 = vmatpush.msrb.mxu2 %v20483_v62 }
 0x6a3   :  { %9693 = vmatpush.msrb.mxu3 %v20484_v42  ;;  %9578 = vmatpush.msrb.mxu0 %v20485_v20  ;;  %v20504_v20 = vld [vmem:[#allocation152_spill] sm:$0xff]  ;;  %v20507_v42 = vld [vmem:[#allocation162_spill] sm:$0xff] }
 0x6a4   :  { %9660 = vmatpush.msrb.mxu2 %v20486_v19  ;;  %9754 = vmatpush.msra.mxu1 %v20480_v10 }
 0x6a5   :  { %9461 = vmatmul.f32.vlgmr.msra.gmra.mxu0 %v18306_v18  ;;  %9617 = vmatmul.f32.vlgmr.msrb.gmra.mxu1 %v18288_v36 }
 0x6a6   :  { %9699 = vmatpush.msrb.mxu3 %v20487_v54  ;;  %9582 = vmatpush.msrb.mxu0 %v20488_v0  ;;  %v20494_v0 = vld [vmem:[#allocation149_spill] sm:$0xff]  ;;  %v20501_v54 = vld [vmem:[#allocation146_spill] sm:$0xff] }
 0x6a7   :  { %9666 = vmatmul.f32.vlgmr.msrb.gmra.mxu2 %v18306_v18  ;;  %9756 = vmatpush.msra.mxu1 %v20482_v3 }
 0x6a8   :  { %9705 = vmatpush.msrb.mxu3 %v20489_v14  ;;  %9783 = vmatpush.msra.mxu2 %v20490_v7  ;;  %v20495_v7 = vld [vmem:[#allocation139_spill] sm:$0xff]  ;;  %v20498_v14 = vld [vmem:[#allocation144_spill] sm:$0xff] }
 0x6a9   :  { %9586 = vmatpush.msrb.mxu0 %v20491_v27  ;;  %9707 = vmatmul.f32.vlgmr.msrb.gmra.mxu3 %v18288_v36  ;;  %v20496_v27 = vld [vmem:[#allocation151_spill] sm:$0xff] }
 0x6aa   :  { %9758 = vmatpush.msra.mxu1 %v20483_v62  ;;  %9787 = vmatpush.msra.mxu2 %v20492_v13  ;;  %v20497_v13 = vld [vmem:[#allocation167_spill] sm:$0xff] }
 0x6ab   :  { %9814 = vmatpush.msra.mxu3 %v20480_v10  ;;  %9590 = vmatpush.msrb.mxu0 %v20493_v21  ;;  %v20500_v21 = vld [vmem:[#allocation155_spill] sm:$0xff] }
 0x6ac   :  { %9760 = vmatpush.msra.mxu1 %v20486_v19  ;;  %9791 = vmatpush.msra.mxu2 %v20494_v0  ;;  %v20499_v0 = vld [vmem:[#allocation168_spill] sm:$0xff] }
 0x6ad   :  { %9816 = vmatpush.msra.mxu3 %v20482_v3  ;;  %9592 = vmatmul.f32.vlgmr.msrb.gmra.mxu0 %v18288_v36 }
 0x6ae   :  { %9725 = vmatpush.msra.mxu0 %v20495_v7  ;;  %9764 = vmatmul.f32.vlgmr.msra.gmra.mxu1 %v18297_v51  ;;  %v20502_v7 = vld [vmem:[#allocation169_spill] sm:$0xff] }
 0x6af   :  { %9795 = vmatpush.msra.mxu2 %v20496_v27  ;;  %9818 = vmatpush.msra.mxu3 %v20483_v62  ;;  %v20503_v27 = vld [vmem:[#allocation158_spill] sm:$0xff] }
 0x6b0   :  { %9872 = vmatpush.msrb.mxu1 %v20497_v13  ;;  %9728 = vmatpush.msra.mxu0 %v20498_v14  ;;  %v20505_v13 = vld [vmem:[#allocation148_spill] sm:$0xff]  ;;  %v20506_v14 = vld [vmem:[#allocation170_spill] sm:$0xff] }
 0x6b1   :  { %9797 = vmatmul.f32.vlgmr.msra.gmra.mxu2 %v18288_v36  ;;  %9820 = vmatpush.msra.mxu3 %v20486_v19  ;;  %v20508_v19 = vld [vmem:[#allocation153_spill] sm:$0xff] }
 0x6b2   :  { %9878 = vmatpush.msrb.mxu1 %v20499_v0  ;;  %9910 = vmatpush.msrb.mxu2 %v20500_v21 }
 0x6b3   :  { %9731 = vmatpush.msra.mxu0 %v20501_v54  ;;  %9822 = vmatmul.f32.vlgmr.msra.gmra.mxu3 %v18288_v36  ;;  %v20509_v54 = vld [vmem:[#allocation164_spill] sm:$0xff] }
 0x6b4   :  { %9884 = vmatpush.msrb.mxu1 %v20502_v7  ;;  %9913 = vmatpush.msrb.mxu2 %v20503_v27  ;;  %v20510_v7 = vld [vmem:[#allocation156_spill] sm:$0xff] }
 0x6b5   :  { %9939 = vmatpush.msrb.mxu3 %v20504_v20  ;;  %9734 = vmatpush.msra.mxu0 %v20505_v13  ;;  %v20514_v13 = vld [vmem:[#allocation14_spill] sm:$0xff] }
 0x6b6   :  { %9890 = vmatpush.msrb.mxu1 %v20506_v14  ;;  %9916 = vmatpush.msrb.mxu2 %v20507_v42  ;;  %v20511_v14 = vld [vmem:[#allocation159_spill] sm:$0xff]  ;;  %v20512_v42 = vld [vmem:[#allocation5_spill] sm:$0xff] }
 0x6b7   :  { %9941 = vmatpush.msrb.mxu3 %v20508_v19  ;;  %9737 = vmatmul.f32.vlgmr.msra.gmra.mxu0 %v18291_v45 }
 0x6b8   :  { %9839 = vmatpush.msrb.mxu0 %v20504_v20  ;;  %9892 = vmatmul.f32.vlgmr.msrb.gmra.mxu1 %v18220_v60 }
 0x6b9   :  { %9919 = vmatpush.msrb.mxu2 %v20509_v54  ;;  %9943 = vmatpush.msrb.mxu3 %v20510_v7  ;;  %v20513_v54 = vld [vmem:[#allocation6_spill] sm:$0xff] }
 0x6ba   :  { %9999 = vmatpush.msra.mxu1 %v20504_v20  ;;  %9841 = vmatpush.msrb.mxu0 %v20508_v19  ;;  %v20516_v20 = vld [vmem:[#allocation17_spill] sm:$0xff] }
 0x6bb   :  { %9922 = vmatmul.f32.vlgmr.msrb.gmra.mxu2 %v18225_v52  ;;  %9945 = vmatpush.msrb.mxu3 %v20511_v14  ;;  %v20515_v52 = vld [vmem:[#allocation10_spill] sm:$0xff] }
 0x6bc   :  { %10001 = vmatpush.msra.mxu1 %v20508_v19  ;;  %10031 = vmatpush.msra.mxu2 %v20512_v42  ;;  %v20517_v19 = vld [vmem:[#allocation161_spill] sm:$0xff] }
 0x6bd   :  { %9843 = vmatpush.msrb.mxu0 %v20510_v7  ;;  %9949 = vmatmul.f32.vlgmr.msrb.gmra.mxu3 %v18230_v22  ;;  %v20518_v22 = vld [vmem:[#allocation13_spill] sm:$0xff] }
 0x6be   :  { %10003 = vmatpush.msra.mxu1 %v20510_v7  ;;  %10033 = vmatpush.msra.mxu2 %v20513_v54  ;;  %v20519_v7 = vld [vmem:[#allocation19_spill] sm:$0xff] }
 0x6bf   :  { %10064 = vmatpush.msra.mxu3 %v20514_v13  ;;  %9845 = vmatpush.msrb.mxu0 %v20511_v14  ;;  %v20520_v13 = vld [vmem:[#allocation163_spill] sm:$0xff] }
 0x6c0   :  { %10005 = vmatpush.msra.mxu1 %v20511_v14  ;;  %10035 = vmatpush.msra.mxu2 %v20515_v52  ;;  %v20521_v14 = vld [vmem:[#allocation20_spill] sm:$0xff] }
 0x6c1   :  { %10070 = vmatpush.msra.mxu3 %v20516_v20  ;;  %9851 = vmatmul.f32.vlgmr.msrb.gmra.mxu0 %v18241_v31  ;;  %v20522_v20 = vld [vmem:[#allocation9_spill] sm:$0xff] }
 0x6c2   :  { %9968 = vmatpush.msra.mxu0 %v20517_v19  ;;  %10007 = vmatmul.f32.vlgmr.msra.gmra.mxu1 %v18220_v60  ;;  %v20523_v31 = vld [vmem:[#allocation165_spill] sm:$0xff]  ;;  %v20524_v19 = vld [vmem:[#allocation11_spill] sm:$0xff] }
 0x6c3   :  { %10037 = vmatpush.msra.mxu2 %v20518_v22  ;;  %10076 = vmatpush.msra.mxu3 %v20519_v7  ;;  %v20525_v7 = vld [vmem:[#allocation166_spill] sm:$0xff] }
 0x6c4   :  { %10131 = vmatpush.msrb.mxu1 %v20512_v42  ;;  %9972 = vmatpush.msra.mxu0 %v20520_v13  ;;  %v20526_v13 = vld [vmem:[#allocation15_spill] sm:$0xff] }
 0x6c5   :  { %10043 = vmatmul.f32.vlgmr.msra.gmra.mxu2 %v18306_v18  ;;  %10082 = vmatpush.msra.mxu3 %v20521_v14  ;;  %v20530_v14 = vld [vmem:[#allocation8_spill] sm:$0xff] }
 0x6c6   :  { %10133 = vmatpush.msrb.mxu1 %v20513_v54  ;;  %10160 = vmatpush.msrb.mxu2 %v20522_v20  ;;  %v20527_v20 = vld [vmem:[#allocation7_spill] sm:$0xff] }
 0x6c7   :  { %9976 = vmatpush.msra.mxu0 %v20523_v31  ;;  %10084 = vmatmul.f32.vlgmr.msra.gmra.mxu3 %v18288_v36  ;;  %v20528_v31 = vld [vmem:[#allocation18_spill] sm:$0xff] }
 0x6c8   :  { %10135 = vmatpush.msrb.mxu1 %v20515_v52  ;;  %10164 = vmatpush.msrb.mxu2 %v20524_v19  ;;  %v20529_v19 = vld [vmem:[#allocation33_spill] sm:$0xff] }
 0x6c9   :  { %10191 = vmatpush.msrb.mxu3 %v20512_v42  ;;  %9980 = vmatpush.msra.mxu0 %v20525_v7  ;;  %v20532_v7 = vld [vmem:[#allocation22_spill] sm:$0xff] }
 0x6ca   :  { %10137 = vmatpush.msrb.mxu1 %v20518_v22  ;;  %10168 = vmatpush.msrb.mxu2 %v20526_v13  ;;  %v20531_v13 = vld [vmem:[#allocation34_spill] sm:$0xff] }
 0x6cb   :  { %10193 = vmatpush.msrb.mxu3 %v20513_v54  ;;  %9982 = vmatmul.f32.vlgmr.msra.gmra.mxu0 %v18220_v60  ;;  %v20533_v60 = vld [vmem:[#allocation12_spill] sm:$0xff]  ;;  %v20539_v54 = vld [vmem:[#allocation27_spill] sm:$0xff] }
 0x6cc   :  { %10102 = vmatpush.msrb.mxu0 %v20527_v20  ;;  %10141 = vmatmul.f32.vlgmr.msrb.gmra.mxu1 %v18297_v51  ;;  %v20534_v20 = vld [vmem:[#allocation35_spill] sm:$0xff] }
 0x6cd   :  { %10172 = vmatpush.msrb.mxu2 %v20528_v31  ;;  %10195 = vmatpush.msrb.mxu3 %v20515_v52  ;;  %v20535_v31 = vld [vmem:[#allocation24_spill] sm:$0xff]  ;;  %v20536_v52 = vld [vmem:[#allocation21_spill] sm:$0xff] }
 0x6ce   :  { %10249 = vmatpush.msra.mxu1 %v20529_v19  ;;  %10105 = vmatpush.msrb.mxu0 %v20530_v14  ;;  %v20537_v19 = vld [vmem:[#allocation16_spill] sm:$0xff]  ;;  %v20538_v14 = vld [vmem:[#allocation39_spill] sm:$0xff] }
 0x6cf   :  { %10174 = vmatmul.f32.vlgmr.msrb.gmra.mxu2 %v18288_v36  ;;  %10197 = vmatpush.msrb.mxu3 %v20518_v22  ;;  %v20540_v22 = vld [vmem:[#allocation23_spill] sm:$0xff] }
 0x6d0   :  { %10255 = vmatpush.msra.mxu1 %v20531_v13  ;;  %10287 = vmatpush.msra.mxu2 %v20532_v7  ;;  %v20550_v7 = vld [vmem:[#allocation45_spill] sm:$0xff]  ;;  %v20555_v13 = vld [vmem:[#allocation31_spill] sm:$0xff] }
 0x6d1   :  { %10108 = vmatpush.msrb.mxu0 %v20533_v60  ;;  %10199 = vmatmul.f32.vlgmr.msrb.gmra.mxu3 %v18288_v36  ;;  %v20541_v60 = vld [vmem:[#allocation28_spill] sm:$0xff] }
 0x6d2   :  { %10261 = vmatpush.msra.mxu1 %v20534_v20  ;;  %10290 = vmatpush.msra.mxu2 %v20535_v31  ;;  %v20542_v20 = vld [vmem:[#allocation25_spill] sm:$0xff] }
 0x6d3   :  { %10316 = vmatpush.msra.mxu3 %v20536_v52  ;;  %10111 = vmatpush.msrb.mxu0 %v20537_v19  ;;  %v20546_v19 = vld [vmem:[#allocation46_spill] sm:$0xff]  ;;  %v20548_v31 = vld [vmem:[#allocation49_spill] sm:$0xff] }
 0x6d4   :  { %10267 = vmatpush.msra.mxu1 %v20538_v14  ;;  %10293 = vmatpush.msra.mxu2 %v20539_v54  ;;  %v20543_v14 = vld [vmem:[#allocation26_spill] sm:$0xff]  ;;  %v20544_v54 = vld [vmem:[#allocation36_spill] sm:$0xff] }
 0x6d5   :  { %10318 = vmatpush.msra.mxu3 %v20540_v22  ;;  %10114 = vmatmul.f32.vlgmr.msrb.gmra.mxu0 %v18291_v45 }
 0x6d6   :  { %10216 = vmatpush.msra.mxu0 %v20536_v52  ;;  %10269 = vmatmul.f32.vlgmr.msra.gmra.mxu1 %v18288_v36 }
 0x6d7   :  { %10296 = vmatpush.msra.mxu2 %v20541_v60  ;;  %10320 = vmatpush.msra.mxu3 %v20542_v20  ;;  %v20545_v60 = vld [vmem:[#allocation37_spill] sm:$0xff] }
 0x6d8   :  { %10376 = vmatpush.msrb.mxu1 %v20536_v52  ;;  %10218 = vmatpush.msra.mxu0 %v20540_v22  ;;  %v20547_v52 = vld [vmem:[#allocation38_spill] sm:$0xff] }
 0x6d9   :  { %10299 = vmatmul.f32.vlgmr.msra.gmra.mxu2 %v18291_v45  ;;  %10322 = vmatpush.msra.mxu3 %v20543_v14 }
 0x6da   :  { %10378 = vmatpush.msrb.mxu1 %v20540_v22  ;;  %10447 = vmatpush.msrb.mxu2 %v20544_v54  ;;  %v20549_v22 = vld [vmem:[#allocation29_spill] sm:$0xff] }
 0x6db   :  { %10220 = vmatpush.msra.mxu0 %v20542_v20  ;;  %10326 = vmatmul.f32.vlgmr.msra.gmra.mxu3 %v18297_v51 }
 0x6dc   :  { %10380 = vmatpush.msrb.mxu1 %v20542_v20  ;;  %10449 = vmatpush.msrb.mxu2 %v20545_v60  ;;  %v20551_v20 = vld [vmem:[#allocation51_spill] sm:$0xff] }
 0x6dd   :  { %10480 = vmatpush.msrb.mxu3 %v20546_v19  ;;  %10222 = vmatpush.msra.mxu0 %v20543_v14  ;;  %v20552_v19 = vld [vmem:[#allocation30_spill] sm:$0xff] }
 0x6de   :  { %10382 = vmatpush.msrb.mxu1 %v20543_v14  ;;  %10451 = vmatpush.msrb.mxu2 %v20547_v52  ;;  %v20553_v14 = vld [vmem:[#allocation52_spill] sm:$0xff] }
 0x6df   :  { %10486 = vmatpush.msrb.mxu3 %v20548_v31  ;;  %10228 = vmatmul.f32.vlgmr.msra.gmra.mxu0 %v18306_v18  ;;  %v20554_v31 = vld [vmem:[#allocation42_spill] sm:$0xff] }
 0x6e0   :  { %10345 = vmatpush.msrb.mxu0 %v20549_v22  ;;  %10384 = vmatmul.f32.vlgmr.msrb.gmra.mxu1 %v18288_v36  ;;  %v20556_v22 = vld [vmem:[#allocation44_spill] sm:$0xff] }
 0x6e1   :  { %10453 = vmatpush.msrb.mxu2 %v20550_v7  ;;  %10492 = vmatpush.msrb.mxu3 %v20551_v20  ;;  %v20557_v20 = vld [vmem:[#allocation32_spill] sm:$0xff] }
 0x6e2   :  { %10547 = vmatpush.msra.mxu1 %v20544_v54  ;;  %10349 = vmatpush.msrb.mxu0 %v20552_v19  ;;  %v20568_v19 = vld [vmem:[#allocation86_spill] sm:$0xff] }
 0x6e3   :  { %10459 = vmatmul.f32.vlgmr.msrb.gmra.mxu2 %v18306_v18  ;;  %10498 = vmatpush.msrb.mxu3 %v20553_v14  ;;  %v20558_v18 = vld [vmem:[#allocation48_spill] sm:$0xff] }
 0x6e4   :  { %10549 = vmatpush.msra.mxu1 %v20545_v60  ;;  %10576 = vmatpush.msra.mxu2 %v20554_v31  ;;  %v20560_v31 = vld [vmem:[#allocation50_spill] sm:$0xff]  ;;  %v20564_v14 = vld [vmem:[#allocation84_spill] sm:$0xff] }
 0x6e5   :  { %10353 = vmatpush.msrb.mxu0 %v20555_v13  ;;  %10500 = vmatmul.f32.vlgmr.msrb.gmra.mxu3 %v18288_v36  ;;  %v20559_v13 = vld [vmem:[#allocation40_spill] sm:$0xff] }
 0x6e6   :  { %10551 = vmatpush.msra.mxu1 %v20547_v52  ;;  %10580 = vmatpush.msra.mxu2 %v20556_v22  ;;  %v20561_v22 = vld [vmem:[#allocation41_spill] sm:$0xff] }
 0x6e7   :  { %10607 = vmatpush.msra.mxu3 %v20544_v54  ;;  %10357 = vmatpush.msrb.mxu0 %v20557_v20  ;;  %v20562_v20 = vld [vmem:[#allocation81_spill] sm:$0xff] }
 0x6e8   :  { %10553 = vmatpush.msra.mxu1 %v20550_v7  ;;  %10584 = vmatpush.msra.mxu2 %v20558_v18  ;;  %v20563_v18 = vld [vmem:[#allocation43_spill] sm:$0xff] }
 0x6e9   :  { %10609 = vmatpush.msra.mxu3 %v20545_v60  ;;  %10359 = vmatmul.f32.vlgmr.msrb.gmra.mxu0 %v18288_v36 }
 0x6ea   :  { %10557 = vmatmul.f32.vlgmr.msra.gmra.mxu1 %v18297_v51  ;;  %10518 = vmatpush.msra.mxu0 %v20559_v13  ;;  %v20565_v51 = vld [vmem:[#allocation73_spill] sm:$0xff]  ;;  %v20566_v13 = vld [vmem:[#allocation47_spill] sm:$0xff] }
 0x6eb   :  { %10588 = vmatpush.msra.mxu2 %v20560_v31  ;;  %10611 = vmatpush.msra.mxu3 %v20547_v52  ;;  %v20567_v31 = vld [vmem:[#allocation71_spill] sm:$0xff] }
 0x6ec   :  { %10590 = vmatmul.f32.vlgmr.msra.gmra.mxu2 %v18288_v36  ;;  %10521 = vmatpush.msra.mxu0 %v20561_v22  ;;  %v20569_v22 = vld [vmem:[#allocation76_spill] sm:$0xff]  ;;  %v20582_v52 = vld [vmem:[#allocation107_spill] sm:$0xff] }
 0x6ed   :  { %10613 = vmatpush.msra.mxu3 %v20550_v7  ;;  %10680 = vmatpush.msrb.mxu1 %v20562_v20  ;;  %v20570_v7 = vld [vmem:[#allocation72_spill] sm:$0xff] }
 0x6ee   :  { %10615 = vmatmul.f32.vlgmr.msra.gmra.mxu3 %v18288_v36  ;;  %10524 = vmatpush.msra.mxu0 %v20563_v18  ;;  %v20571_v20 = vld [vmem:[#allocation88_spill] sm:$0xff]  ;;  %v20572_v36 = vld [vmem:[#allocation79_spill] sm:$0xff]  ;;  %v20581_v18 = vld [vmem:[#allocation82_spill] sm:$0xff] }
 0x6ef   :  { %10686 = vmatpush.msrb.mxu1 %v20564_v14  ;;  %10718 = vmatpush.msrb.mxu2 %v20565_v51  ;;  %v20573_v14 = vld [vmem:[#allocation75_spill] sm:$0xff] }
 0x6f0   :  { %10527 = vmatpush.msra.mxu0 %v20566_v13  ;;  %10747 = vmatpush.msrb.mxu3 %v20567_v31  ;;  %v20574_v13 = vld [vmem:[#allocation83_spill] sm:$0xff] }
 0x6f1   :  { %10530 = vmatmul.f32.vlgmr.msra.gmra.mxu0 %v18291_v45  ;;  %10692 = vmatpush.msrb.mxu1 %v20568_v19  ;;  %v20575_v45 = vld [vmem:[#allocation78_spill] sm:$0xff]  ;;  %v8925_v19 = vpop.f32.mrf.mxu3 }
 0x6f2   :  { %10721 = vmatpush.msrb.mxu2 %v20569_v22  ;;  %10749 = vmatpush.msrb.mxu3 %v20570_v7  ;;  %v8884_v22 = vpop.f32.mrf.mxu2 }
 0x6f3   :  { %10698 = vmatpush.msrb.mxu1 %v20571_v20  ;;  %10647 = vmatpush.msrb.mxu0 %v20567_v31  ;;  %v20576_v20 = vld [vmem:[#allocation98_spill] sm:$0xff]  ;;  %v8926_v51 = vadd.f32 %v8925_v19, %v8884_v22 }
 0x6f4   :  { %10724 = vmatpush.msrb.mxu2 %v20572_v36  ;;  %10751 = vmatpush.msrb.mxu3 %v20573_v14  ;;  %v8982_v36 = vpop.f32.mrf.mxu1 }
 0x6f5   :  { %10807 = vmatpush.msra.mxu1 %v20567_v31  ;;  %10649 = vmatpush.msrb.mxu0 %v20570_v7  ;;  %v20577_v31 = vld [vmem:[#allocation74_spill] sm:$0xff] }
 0x6f6   :  { %10727 = vmatpush.msrb.mxu2 %v20574_v13  ;;  %10753 = vmatpush.msrb.mxu3 %v20575_v45  ;;  %v20578_v13 = vld [vmem:[#allocation101_spill] sm:$0xff] }
 0x6f7   :  { %10809 = vmatpush.msra.mxu1 %v20570_v7  ;;  %10651 = vmatpush.msrb.mxu0 %v20573_v14  ;;  %v20579_v7 = vld [vmem:[#allocation77_spill] sm:$0xff] }
 0x6f8   :  { %10869 = vmatpush.msra.mxu3 %v20576_v20  ;;  %10836 = vmatpush.msra.mxu2 %v20077_v11  ;;  %v20580_v20 = vld [vmem:[#allocation104_spill] sm:$0xff] }
 0x6f9   :  { %10811 = vmatpush.msra.mxu1 %v20573_v14  ;;  %10653 = vmatpush.msrb.mxu0 %v20575_v45  ;;  %v8955_v14 = vpop.f32.mrf.mxu0 }
 0x6fa   :  { %10875 = vmatpush.msra.mxu3 %v20578_v13  ;;  %10838 = vmatpush.msra.mxu2 %v20080_v32  ;;  %v8956_v60 = vadd.f32 %v8955_v14, %v8926_v51  ;;  %v20583_v13 = vld [vmem:[#allocation85_spill] sm:$0xff]  ;;  %v9015_v19 = vpop.f32.mrf.mxu2 }
 0x6fb   :  { %10776 = vmatpush.msra.mxu0 %v20577_v31  ;;  %10813 = vmatpush.msra.mxu1 %v20575_v45  ;;  %v9040_v45 = vpop.f32.mrf.mxu3 }
 0x6fc   :  { %10881 = vmatpush.msra.mxu3 %v20580_v20  ;;  %10840 = vmatpush.msra.mxu2 %v20083_v40  ;;  %v8983_v31 = vadd.f32 %v8982_v36, %v8956_v60 }
 0x6fd   :  { %10780 = vmatpush.msra.mxu0 %v20579_v7 }
 0x6fe   :  { %10887 = vmatpush.msra.mxu3 %v20582_v52  ;;  %10842 = vmatpush.msra.mxu2 %v20086_v48  ;;  %v9016_v54 = vadd.f32 %v9015_v19, %v8983_v31 }
 0x6ff   :  { %10784 = vmatpush.msra.mxu0 %v20581_v18 }
 0x700   :  { %v9041_v7 = vadd.f32 %v9040_v45, %v9016_v54  ;;  %v18543_v54 = vld [vmem:[%s19411_s8] ss:$0 sm:$0xff] }
 0x701   :  { %10788 = vmatpush.msra.mxu0 %v20583_v13  ;;  %20584 = vst [vmem:[#allocation112_spill] sm:$0xff] %v18543_v54 }
 0x702   :  { %v9113_v22 = vpop.f32.mrf.mxu1 }
 0x70a   :  { %v9072_v42 = vpop.f32.mrf.mxu0  ;;  %v9143_v20 = vpop.f32.mrf.mxu2 }
 0x70b   :  { %v9073_v27 = vadd.f32 %v9072_v42, %v9041_v7  ;;  %v9228_v21 = vpop.f32.mrf.mxu1 }
 0x70c   :  { %v9170_v0 = vpop.f32.mrf.mxu3 }
 0x70d   :  { %v9114_v62 = vadd.f32 %v9113_v22, %v9073_v27 }
 0x70f   :  { %v9144_v18 = vadd.f32 %v9143_v20, %v9114_v62 }
 0x711   :  { %v9171_v3 = vadd.f32 %v9170_v0, %v9144_v18 }
 0x712   :  { %v9203_v52 = vpop.f32.mrf.mxu0  ;;  %v9277_v14 = vpop.f32.mrf.mxu2 }
 0x713   :  { %v9204_v51 = vadd.f32 %v9203_v52, %v9171_v3  ;;  %v9375_v10 = vpop.f32.mrf.mxu1 }
 0x714   :  { %v9318_v23 = vpop.f32.mrf.mxu3 }
 0x715   :  { %v9229_v13 = vadd.f32 %v9228_v21, %v9204_v51  ;;  %v9319_v15 = vadd.f32 %v9318_v23, %v9277_v14 }
 0x717   :  { %v9231_v42 = vadd.f32 %v18543_v54, %v9229_v13 }
 0x719   :  { %v15435_v20 = vmul.f32 -1.442695, %v9231_v42 }
 0x71a   :  { %v9348_v41 = vpop.f32.mrf.mxu0  ;;  %v9408_v60 = vpop.f32.mrf.mxu2 }
 0x71b   :  { %v9349_v7 = vadd.f32 %v9348_v41, %v9319_v15  ;;  %v9503_v31 = vpop.f32.mrf.mxu1  ;;  %15553 = vpow2.f32 %v15435_v20 }
 0x71c   :  { %v9433_v27 = vpop.f32.mrf.mxu3 }
 0x71d   :  { %v9376_v62 = vadd.f32 %v9375_v10, %v9349_v7 }
 0x71f   :  { %v9409_v0 = vadd.f32 %v9408_v60, %v9376_v62  ;;  %v18549_v60 = vld [vmem:[%s19411_s8 + $0x1] ss:$0 sm:$0xff] }
 0x720   :  { %20585 = vst [vmem:[#allocation121_spill] sm:$0xff] %v18549_v60 }
 0x721   :  { %v9434_v3 = vadd.f32 %v9433_v27, %v9409_v0  ;;  %v15554_v19 = vpop.eup %15553 }
 0x722   :  { %v9462_v52 = vpop.f32.mrf.mxu0  ;;  %v9533_v18 = vpop.f32.mrf.mxu2  ;;  %v9235_v41 = vadd.f32 1.0, %v15554_v19 }
 0x723   :  { %v9463_v23 = vadd.f32 %v9462_v52, %v9434_v3  ;;  %v9618_v22 = vpop.f32.mrf.mxu1 }
 0x724   :  { %v9560_v21 = vpop.f32.mrf.mxu3  ;;  %15555 = vrcp.f32 %v9235_v41  ;;  %vm9241_vm2 = vweird.f32 %v9235_v41  ;;  %v9245_v46 = vand.u32 2147483647, %v9235_v41 }
 0x725   :  { %v9504_v36 = vadd.f32 %v9503_v31, %v9463_v23  ;;  %v18555_v23 = vld [vmem:[%s19411_s8 + $0x2] ss:$0 sm:$0xff] }
 0x726   :  { %20586 = vst [vmem:[#allocation125_spill] sm:$0xff] %v18555_v23  ;;  %vm9246_vm5 = vcmp.eq.f32.partialorder %v9245_v46, 8.507059e+37 }
 0x727   :  { %v9534_v45 = vadd.f32 %v9533_v18, %v9504_v36 }
 0x729   :  { %v9561_v14 = vadd.f32 %v9560_v21, %v9534_v45 }
 0x72a   :  { %v9593_v51 = vpop.f32.mrf.mxu0  ;;  %v9667_v2 = vpop.f32.mrf.mxu2 }
 0x72b   :  { %v9594_v13 = vadd.f32 %v9593_v51, %v9561_v14  ;;  %v9765_v27 = vpop.f32.mrf.mxu1  ;;  %v15556_v0 = vpop.eup %15555  ;;  %v9668_v21 = vadd.f32 %v18555_v23, %v9667_v2  ;;  %v18561_v51 = vld [vmem:[%s19412_s9] ss:$0 sm:$0xff] }
 0x72c   :  { %v9708_v10 = vpop.f32.mrf.mxu3  ;;  %v9237_v52 = vmul.f32 %v15556_v0, %v9235_v41  ;;  %vm9242_vm1 = vweird.f32 %v15556_v0 }
 0x72d   :  { %v9619_v15 = vadd.f32 %v9618_v22, %v9594_v13  ;;  %v9709_v14 = vadd.f32 %v9708_v10, %v9668_v21  ;;  %v9247_v10 = vand.u32 2147483648, %v9235_v41  ;;  %vm9243_vm3 = vmor %vm9241_vm2, %vm9242_vm1 }
 0x72e   :  { %v9238_v45 = vsub.f32 1.0, %v9237_v52 }
 0x72f   :  { %v9621_v42 = vadd.f32 %v18549_v60, %v9619_v15 }
 0x731   :  { %v15436_v7 = vmul.f32 -1.442695, %v9621_v42 }
 0x733   :  { %15557 = vpow2.f32 %v15436_v7  ;;  %v9239_v7 = vmul.f32 %v15556_v0, %v9238_v45 }
 0x734   :  { %v9738_v62 = vpop.f32.mrf.mxu0  ;;  %v9798_v20 = vpop.f32.mrf.mxu2 }
 0x735   :  { %v9893_v36 = vpop.f32.mrf.mxu1  ;;  %v9739_v15 = vadd.f32 %v9738_v62, %v9709_v14  ;;  %v9240_v58 = vadd.f32 %v15556_v0, %v9239_v7  ;;  %v9248_v14 = vor.u32 1.1754944e-38, %v9247_v10 }
 0x736   :  { %v9823_v31 = vpop.f32.mrf.mxu3 }
 0x737   :  { %v9766_v52 = vadd.f32 %v9765_v27, %v9739_v15 }
 0x739   :  { %v15558_v3 = vpop.eup %15557  ;;  %v9799_v62 = vadd.f32 %v9798_v20, %v9766_v52 }
 0x73a   :  { %v9625_v18 = vadd.f32 1.0, %v15558_v3 }
 0x73b   :  { %v9824_v15 = vadd.f32 %v9823_v31, %v9799_v62 }
 0x73c   :  { %15559 = vrcp.f32 %v9625_v18  ;;  %vm9631_vm7 = vweird.f32 %v9625_v18  ;;  %v9635_v7 = vand.u32 2147483647, %v9625_v18 }
 0x73e   :  { %v9852_v19 = vpop.f32.mrf.mxu0  ;;  %v9923_v22 = vpop.f32.mrf.mxu2  ;;  %vm9636_vm9 = vcmp.eq.f32.partialorder %v9635_v7, 8.507059e+37 }
 0x73f   :  { %v9853_v13 = vadd.f32 %v18561_v51, %v9852_v19  ;;  %v10008_v21 = vpop.f32.mrf.mxu1 }
 0x740   :  { %v9950_v60 = vpop.f32.mrf.mxu3 }
 0x741   :  { %v9894_v42 = vadd.f32 %v9893_v36, %v9853_v13  ;;  %v9244_v36 = vsel %vm9243_vm3, %v15556_v0, %v9240_v58 }
 0x742   :  { %v15560_v3 = vpop.eup %15559 }
 0x743   :  { %v9627_v54 = vmul.f32 %v15560_v3, %v9625_v18  ;;  %v9924_v2 = vadd.f32 %v9923_v22, %v9894_v42  ;;  %vm9632_vm6 = vweird.f32 %v15560_v3  ;;  %v9249_v22 = vsel %vm9246_vm5, %v9248_v14, %v9244_v36 }
 0x744   :  { %vm9633_vm8 = vmor %vm9631_vm7, %vm9632_vm6 }
 0x745   :  { %v9628_v23 = vsub.f32 1.0, %v9627_v54  ;;  %v9951_v8 = vadd.f32 %v9950_v60, %v9924_v2  ;;  %v9637_v60 = vand.u32 2147483648, %v9625_v18 }
 0x747   :  { %v9629_v4 = vmul.f32 %v15560_v3, %v9628_v23  ;;  %v9638_v2 = vor.u32 1.1754944e-38, %v9637_v60 }
 0x748   :  { %v9983_v17 = vpop.f32.mrf.mxu0  ;;  %v10044_v19 = vpop.f32.mrf.mxu2 }
 0x749   :  { %v9984_v45 = vadd.f32 %v9983_v17, %v9951_v8  ;;  %v9630_v54 = vadd.f32 %v15560_v3, %v9629_v4  ;;  %v10142_v20 = vpop.f32.mrf.mxu1 }
 0x74a   :  { %v10085_v27 = vpop.f32.mrf.mxu3 }
 0x74b   :  { %v10009_v13 = vadd.f32 %v10008_v21, %v9984_v45  ;;  %v9634_v23 = vsel %vm9633_vm8, %v15560_v3, %v9630_v54  ;;  %v10086_v58 = vadd.f32 %v10085_v27, %v10044_v19 }
 0x74c   :  { %v9639_v8 = vsel %vm9636_vm9, %v9638_v2, %v9634_v23 }
 0x74d   :  { %v10011_v42 = vmul.f32 %v10009_v13, %v9249_v22  ;;  %v10014_v4 = vsub.f32 1.0, %v9639_v8  ;;  %v10016_v18 = vmul.f32 %v9639_v8, %v18214_v53 }
 0x74f   :  { %v10012_v41 = vadd.f32 %v10011_v42, %v9824_v15 }
 0x751   :  { %15561 = vtanh.f32 %v10012_v41 }
 0x752   :  { %v10115_v17 = vpop.f32.mrf.mxu0  ;;  %v10175_v46 = vpop.f32.mrf.mxu2 }
 0x753   :  { %v10116_v0 = vadd.f32 %v10115_v17, %v10086_v58  ;;  %v10270_v3 = vpop.f32.mrf.mxu1 }
 0x754   :  { %v10200_v10 = vpop.f32.mrf.mxu3 }
 0x755   :  { %v10143_v52 = vadd.f32 %v10142_v20, %v10116_v0 }
 0x757   :  { %v15562_v21 = vpop.eup %15561  ;;  %v10176_v31 = vadd.f32 %v10175_v46, %v10143_v52 }
 0x758   :  { %v10015_v62 = vmul.f32 %v15562_v21, %v10014_v4 }
 0x759   :  { %v10201_v36 = vadd.f32 %v10200_v10, %v10176_v31  ;;  %v18600_v10 = vld [vmem:[%s19408_s5] ss:$0 sm:$0xff] }
 0x75a   :  { %v18565_v45 = vadd.f32 %v10016_v18, %v10015_v62 }
 0x75b   :  { %v10389_v14 = vrot.slane %v10201_v36, 6 }
 0x75c   :  { %v10632_v19 = vsel %vm417_vm4, %v18565_v45, 0  ;;  %v10229_v13 = vpop.f32.mrf.mxu0  ;;  %v10300_v22 = vpop.f32.mrf.mxu2 }
 0x75d   :  { %v18569_v54 = vand.u32 4294901760, %v10632_v19  ;;  %v10391_v27 = vadd.f32 %v10389_v14, %v18212_v28  ;;  %v10271_v60 = vadd.f32 %v10270_v3, %v10229_v13  ;;  %v10385_v2 = vpop.f32.mrf.mxu1  ;;  %v20587_v3 = vld [vmem:[#allocation119_spill] sm:$0xff] }
 0x75e   :  { %v10327_v42 = vpop.f32.mrf.mxu3 }
 0x75f   :  { %v15437_v15 = vmul.f32 -1.442695, %v10391_v27  ;;  %10700 = vmatmul.f32.vlgmr.msrb.gmra.mxu1 %v18569_v54  ;;  %v18574_v53 = vsub.f32 %v10632_v19, %v18569_v54  ;;  %v10301_v7 = vadd.f32 %v10300_v22, %v10271_v60  ;;  %v20588_v19 = vld [vmem:[#allocation100_spill] sm:$0xff] }
 0x760   :  { %10936 = vmatpush.msrb.mxu1 %v20077_v11  ;;  %v20589_v27 = vld [vmem:[#allocation120_spill] sm:$0xff] }
 0x761   :  { %15563 = vpow2.f32 %v15437_v15  ;;  %10730 = vmatmul.f32.vlgmr.msrb.gmra.mxu2 %v18574_v53  ;;  %v18579_v41 = vand.u32 4294901760, %v18574_v53  ;;  %v10328_v20 = vadd.f32 %v10327_v42, %v10301_v7 }
 0x762   :  { %10938 = vmatpush.msrb.mxu1 %v20080_v32  ;;  %10965 = vmatpush.msrb.mxu2 %v20215_v61 }
 0x763   :  { %10757 = vmatmul.f32.vlgmr.msrb.gmra.mxu3 %v18579_v41  ;;  %v10657_v23 = vsub.f32 %v18574_v53, %v18579_v41 }
 0x764   :  { %10940 = vmatpush.msrb.mxu1 %v20083_v40  ;;  %10996 = vmatpush.msrb.mxu3 %v20077_v11 }
 0x765   :  { %v18588_v58 = vand.u32 4294901760, %v10657_v23  ;;  %10969 = vmatpush.msrb.mxu2 %v20216_v25 }
 0x766   :  { %v10360_v17 = vpop.f32.mrf.mxu0  ;;  %v10460_v46 = vpop.f32.mrf.mxu2  ;;  %10942 = vmatpush.msrb.mxu1 %v20086_v48  ;;  %10998 = vmatpush.msrb.mxu3 %v20080_v32 }
 0x767   :  { %v15564_v8 = vpop.eup %15563  ;;  %v10361_v0 = vadd.f32 %v10360_v17, %v10328_v20  ;;  %10659 = vmatmul.f32.vlgmr.msrb.gmra.mxu0 %v18588_v58  ;;  %10815 = vmatmul.f32.vlgmr.msra.gmra.mxu1 %v18569_v54  ;;  %v10461_v21 = vadd.f32 %v18600_v10, %v10460_v46  ;;  %v10558_v15 = vpop.f32.mrf.mxu1 }
 0x768   :  { %v10395_v52 = vadd.f32 1.0, %v15564_v8  ;;  %10907 = vmatpush.msrb.mxu0 %v20217_v9  ;;  %11000 = vmatpush.msrb.mxu3 %v20083_v40  ;;  %v10501_v31 = vpop.f32.mrf.mxu3 }
 0x769   :  { %v10386_v4 = vadd.f32 %v10385_v2, %v10361_v0  ;;  %11074 = vmatpush.msra.mxu1 %v20333_v63  ;;  %10973 = vmatpush.msrb.mxu2 %v20334_v34  ;;  %v10502_v36 = vadd.f32 %v10501_v31, %v10461_v21 }
 0x76a   :  { %15565 = vrcp.f32 %v10395_v52  ;;  %10910 = vmatpush.msrb.mxu0 %v20335_v24  ;;  %11002 = vmatpush.msrb.mxu3 %v20086_v48  ;;  %v10407_v46 = vand.u32 2147483648, %v10395_v52  ;;  %v10405_v8 = vand.u32 2147483647, %v10395_v52  ;;  %vm10401_vm11 = vweird.f32 %v10395_v52 }
 0x76b   :  { %v10412_v62 = vrot.slane %v10386_v4, 6  ;;  %11080 = vmatpush.msra.mxu1 %v20463_v47  ;;  %10977 = vmatpush.msrb.mxu2 %v20464_v39 }
 0x76c   :  { %10913 = vmatpush.msrb.mxu0 %v20466_v5  ;;  %vm10406_vm13 = vcmp.eq.f32.partialorder %v10405_v8, 8.507059e+37 }
 0x76d   :  { %v10414_v18 = vadd.f32 %v10412_v62, %v18251_v56  ;;  %11086 = vmatpush.msra.mxu1 %v20587_v3 }
 0x76e   :  { %v10531_v14 = vpop.f32.mrf.mxu0  ;;  %10916 = vmatpush.msrb.mxu0 %v20588_v19 }
 0x76f   :  { %v15438_v13 = vmul.f32 -1.442695, %v10414_v18  ;;  %v10532_v22 = vadd.f32 %v10531_v14, %v10502_v36  ;;  %10790 = vmatmul.f32.vlgmr.msra.gmra.mxu0 %v18569_v54  ;;  %11092 = vmatpush.msra.mxu1 %v20589_v27  ;;  %v10591_v23 = vpop.f32.mrf.mxu2  ;;  %v10408_v36 = vor.u32 1.1754944e-38, %v10407_v46 }
 0x770   :  { %v15566_v60 = vpop.eup %15565  ;;  %11041 = vmatpush.msra.mxu0 %v20108_v26 }
 0x771   :  { %15567 = vpow2.f32 %v15438_v13  ;;  %v10559_v42 = vadd.f32 %v10558_v15, %v10532_v22  ;;  %v10397_v7 = vmul.f32 %v15566_v60, %v10395_v52  ;;  %vm10402_vm10 = vweird.f32 %v15566_v60  ;;  %v10616_v21 = vpop.f32.mrf.mxu3 }
 0x772   :  { %11043 = vmatpush.msra.mxu0 %v20109_v43  ;;  %vm10403_vm12 = vmor %vm10401_vm11, %vm10402_vm10 }
 0x773   :  { %v10398_v2 = vsub.f32 1.0, %v10397_v7  ;;  %v10592_v20 = vadd.f32 %v10591_v23, %v10559_v42 }
 0x774   :  { %11045 = vmatpush.msra.mxu0 %v20110_v38 }
 0x775   :  { %v10399_v17 = vmul.f32 %v15566_v60, %v10398_v2  ;;  %v10617_v62 = vadd.f32 %v10616_v21, %v10592_v20 }
 0x776   :  { %11047 = vmatpush.msra.mxu0 %v20111_v57 }
 0x777   :  { %v15568_v0 = vpop.eup %15567  ;;  %v10400_v4 = vadd.f32 %v15566_v60, %v10399_v17  ;;  %v10620_v13 = vrot.slane %v10617_v62, 6 }
 0x778   :  { %v10418_v31 = vadd.f32 1.0, %v15568_v0  ;;  %v10627_v0 = vrot.slane %v18284_v1, 6 }
 0x779   :  { %v10404_v18 = vsel %vm10403_vm12, %v15566_v60, %v10400_v4 }
 0x77a   :  { %15569 = vrcp.f32 %v10418_v31  ;;  %v10409_v14 = vsel %vm10406_vm13, %v10408_v36, %v10404_v18  ;;  %v10430_v2 = vand.u32 2147483648, %v10418_v31  ;;  %v10428_v52 = vand.u32 2147483647, %v10418_v31 }
 0x77b   :  { %v10622_v22 = vmul.f32 %v10620_v13, %v10409_v14  ;;  %vm10424_vm15 = vweird.f32 %v10418_v31 }
 0x77c   :  { %v10431_v60 = vor.u32 1.1754944e-38, %v10430_v2  ;;  %vm10429_vm1 = vcmp.eq.f32.partialorder %v10428_v52, 8.507059e+37  ;;  %v20594_v2 = vld [vmem:[#allocation123_spill] sm:$0xff]  ;;  %v20595_v52 = vld [vmem:[#allocation132_spill] sm:$0xff] }
 0x77d   :  { %v10623_v7 = vadd.f32 %v10622_v22, %v18279_v35 }
 0x77f   :  { %15571 = vtanh.f32 %v10623_v7  ;;  %v20592_v7 = vld [vmem:[#allocation142_spill] sm:$0xff] }
 0x780   :  { %v15570_v15 = vpop.eup %15569 }
 0x781   :  { %v10420_v42 = vmul.f32 %v15570_v15, %v10418_v31  ;;  %vm10425_vm14 = vweird.f32 %v15570_v15 }
 0x782   :  { %vm10426_vm0 = vmor %vm10424_vm15, %vm10425_vm14 }
 0x783   :  { %v10421_v23 = vsub.f32 1.0, %v10420_v42  ;;  %v20591_v42 = vld [vmem:[#allocation116_spill] sm:$0xff] }
 0x785   :  { %v10422_v27 = vmul.f32 %v15570_v15, %v10421_v23  ;;  %v15572_v4 = vpop.eup %15571  ;;  %v20593_v23 = vld [vmem:[#allocation130_spill] sm:$0xff] }
 0x787   :  { %v10423_v17 = vadd.f32 %v15570_v15, %v10422_v27 }
 0x789   :  { %v10427_v20 = vsel %vm10426_vm0, %v15570_v15, %v10423_v17  ;;  %v20590_v15 = vld [vmem:[#allocation127_spill] sm:$0xff]  ;;  %v20596_v17 = vld [vmem:[#allocation126_spill] sm:$0xff] }
 0x78a   :  { %v10432_v46 = vsel %vm10429_vm1, %v10431_v60, %v10427_v20  ;;  %v20597_v60 = vld [vmem:[#allocation129_spill] sm:$0xff]  ;;  %v20598_v20 = vld [vmem:[#allocation136_spill] sm:$0xff] }
 0x78b   :  { %v10625_v8 = vsub.f32 1.0, %v10432_v46  ;;  %v10629_v62 = vmul.f32 %v10627_v0, %v10432_v46  ;;  %v20599_v46 = vld [vmem:[#allocation150_spill] sm:$0xff]  ;;  %v20601_v0 = vld [vmem:[#allocation141_spill] sm:$0xff] }
 0x78d   :  { %v10626_v21 = vmul.f32 %v15572_v4, %v10625_v8  ;;  %v20600_v8 = vld [vmem:[#allocation138_spill] sm:$0xff] }
 0x78e   :  { %v20602_v4 = vld [vmem:[#allocation154_spill] sm:$0xff] }
 0x78f   :  { %v18621_v18 = vadd.f32 %v10629_v62, %v10626_v21  ;;  %v20603_v21 = vld [vmem:[#allocation128_spill] sm:$0xff]  ;;  %v20604_v62 = vld [vmem:[#allocation145_spill] sm:$0xff] }
 0x791   :  { %v10820_v36 = vrot.slane %v18621_v18, 2 }
 0x793   :  { %v10821_v14 = vsel %vm417_vm4, %v10820_v36, 0  ;;  %v20605_v36 = vld [vmem:[#allocation157_spill] sm:$0xff] }
 0x794   :  { %v18625_v13 = vand.u32 4294901760, %v10821_v14 }
 0x796   :  { %v18628_v27 = vsub.f32 %v10821_v14, %v18625_v13  ;;  %10889 = vmatmul.f32.vlgmr.msra.gmra.mxu3 %v18625_v13  ;;  %v20606_v14 = vld [vmem:[#allocation131_spill] sm:$0xff] }
 0x797   :  { %11141 = vmatpush.msra.mxu3 %v20108_v26 }
 0x798   :  { %10919 = vmatmul.f32.vlgmr.msrb.gmra.mxu0 %v18628_v27  ;;  %v18634_v1 = vand.u32 4294901760, %v18628_v27 }
 0x799   :  { %11143 = vmatpush.msra.mxu3 %v20109_v43  ;;  %11170 = vmatpush.msrb.mxu0 %v20114_v59 }
 0x79a   :  { %10946 = vmatmul.f32.vlgmr.msrb.gmra.mxu1 %v18634_v1  ;;  %v10846_v31 = vsub.f32 %v18628_v27, %v18634_v1 }
 0x79b   :  { %11145 = vmatpush.msra.mxu3 %v20110_v38  ;;  %11174 = vmatpush.msrb.mxu0 %v20115_v50 }
 0x79c   :  { %v18643_v22 = vand.u32 4294901760, %v10846_v31  ;;  %11201 = vmatpush.msrb.mxu1 %v20108_v26  ;;  %v20607_v31 = vld [vmem:[#allocation160_spill] sm:$0xff] }
 0x79d   :  { %11147 = vmatpush.msra.mxu3 %v20111_v57  ;;  %11178 = vmatpush.msrb.mxu0 %v20116_v55 }
 0x79e   :  { %10848 = vmatmul.f32.vlgmr.msra.gmra.mxu2 %v18643_v22  ;;  %11004 = vmatmul.f32.vlgmr.msrb.gmra.mxu3 %v18625_v13 }
 0x79f   :  { %11203 = vmatpush.msrb.mxu1 %v20109_v43  ;;  %11112 = vmatpush.msra.mxu2 %v20117_v33 }
 0x7a0   :  { %11053 = vmatmul.f32.vlgmr.msra.gmra.mxu0 %v18588_v58  ;;  %11259 = vmatpush.msrb.mxu3 %v20118_v12 }
 0x7a1   :  { %11182 = vmatpush.msrb.mxu0 %v20119_v16  ;;  %11205 = vmatpush.msrb.mxu1 %v20110_v38 }
 0x7a2   :  { %11094 = vmatmul.f32.vlgmr.msra.gmra.mxu1 %v18569_v54  ;;  %11115 = vmatpush.msra.mxu2 %v20120_v49 }
 0x7a3   :  { %11207 = vmatpush.msrb.mxu1 %v20111_v57  ;;  %11265 = vmatpush.msrb.mxu3 %v20121_v30 }
 0x7a4   :  { %11297 = vmatpush.msra.mxu0 %v20122_v6  ;;  %11118 = vmatpush.msra.mxu2 %v20229_v29 }
 0x7a5   :  { %11271 = vmatpush.msrb.mxu3 %v20230_v44  ;;  %11326 = vmatpush.msra.mxu1 %v20125_v37 }
 0x7a6   :  { %10979 = vmatmul.f32.vlgmr.msrb.gmra.mxu2 %v18625_v13  ;;  %11151 = vmatmul.f32.vlgmr.msra.gmra.mxu3 %v18579_v41 }
 0x7a7   :  { %11300 = vmatpush.msra.mxu0 %v20590_v15  ;;  %11121 = vmatpush.msra.mxu2 %v20591_v42 }
 0x7a8   :  { %11184 = vmatmul.f32.vlgmr.msrb.gmra.mxu0 %v18569_v54  ;;  %11277 = vmatpush.msrb.mxu3 %v20592_v7 }
 0x7a9   :  { %11303 = vmatpush.msra.mxu0 %v20593_v23  ;;  %11328 = vmatpush.msra.mxu1 %v20594_v2 }
 0x7aa   :  { %11209 = vmatmul.f32.vlgmr.msrb.gmra.mxu1 %v18569_v54  ;;  %11226 = vmatpush.msrb.mxu2 %v20125_v37 }
 0x7ab   :  { %11306 = vmatpush.msra.mxu0 %v20595_v52  ;;  %11330 = vmatpush.msra.mxu1 %v20596_v17 }
 0x7ac   :  { %11386 = vmatpush.msra.mxu3 %v20125_v37  ;;  %11228 = vmatpush.msrb.mxu2 %v20594_v2 }
 0x7ad   :  { %11332 = vmatpush.msra.mxu1 %v20597_v60  ;;  %11431 = vmatpush.msrb.mxu0 %v20598_v20 }
 0x7ae   :  { %11124 = vmatmul.f32.vlgmr.msra.gmra.mxu2 %v18574_v53  ;;  %11279 = vmatmul.f32.vlgmr.msrb.gmra.mxu3 %v18625_v13 }
 0x7af   :  { %11388 = vmatpush.msra.mxu3 %v20594_v2  ;;  %11230 = vmatpush.msrb.mxu2 %v20596_v17 }
 0x7b0   :  { %11309 = vmatmul.f32.vlgmr.msra.gmra.mxu0 %v18628_v27  ;;  %11464 = vmatpush.msrb.mxu1 %v20599_v46  ;;  %v20610_v46 = vld [vmem:[#allocation147_spill] sm:$0xff] }
 0x7b1   :  { %11390 = vmatpush.msra.mxu3 %v20596_v17  ;;  %11433 = vmatpush.msrb.mxu0 %v20600_v8 }
 0x7b2   :  { %11336 = vmatmul.f32.vlgmr.msra.gmra.mxu1 %v18634_v1  ;;  %11232 = vmatpush.msrb.mxu2 %v20597_v60 }
 0x7b3   :  { %11392 = vmatpush.msra.mxu3 %v20597_v60  ;;  %11435 = vmatpush.msrb.mxu0 %v20601_v0 }
 0x7b4   :  { %11470 = vmatpush.msrb.mxu1 %v20602_v4  ;;  %11355 = vmatpush.msra.mxu2 %v20603_v21  ;;  %v20608_v4 = vld [vmem:[#allocation143_spill] sm:$0xff]  ;;  %v20609_v21 = vld [vmem:[#allocation133_spill] sm:$0xff] }
 0x7b5   :  { %11437 = vmatpush.msrb.mxu0 %v20604_v62  ;;  %11531 = vmatpush.msrb.mxu3 %v20598_v20 }
 0x7b6   :  { %11238 = vmatmul.f32.vlgmr.msrb.gmra.mxu2 %v18643_v22  ;;  %11394 = vmatmul.f32.vlgmr.msra.gmra.mxu3 %v18625_v13 }
 0x7b7   :  { %11476 = vmatpush.msrb.mxu1 %v20605_v36  ;;  %11359 = vmatpush.msra.mxu2 %v20606_v14  ;;  %v20611_v36 = vld [vmem:[#allocation135_spill] sm:$0xff]  ;;  %v20612_v14 = vld [vmem:[#allocation149_spill] sm:$0xff] }
 0x7b8   :  { %11443 = vmatmul.f32.vlgmr.msrb.gmra.mxu0 %v18643_v22  ;;  %11533 = vmatpush.msrb.mxu3 %v20600_v8 }
 0x7b9   :  { %11482 = vmatpush.msrb.mxu1 %v20607_v31  ;;  %11560 = vmatpush.msra.mxu0 %v20608_v4  ;;  %v20613_v4 = vld [vmem:[#allocation139_spill] sm:$0xff]  ;;  %v20616_v31 = vld [vmem:[#allocation144_spill] sm:$0xff] }
 0x7ba   :  { %11363 = vmatpush.msra.mxu2 %v20609_v21  ;;  %11484 = vmatmul.f32.vlgmr.msrb.gmra.mxu1 %v18625_v13  ;;  %v20614_v21 = vld [vmem:[#allocation151_spill] sm:$0xff] }
 0x7bb   :  { %11535 = vmatpush.msrb.mxu3 %v20601_v0  ;;  %11564 = vmatpush.msra.mxu0 %v20610_v46  ;;  %v20615_v46 = vld [vmem:[#allocation167_spill] sm:$0xff] }
 0x7bc   :  { %11591 = vmatpush.msra.mxu1 %v20598_v20  ;;  %11367 = vmatpush.msra.mxu2 %v20611_v36  ;;  %v20618_v36 = vld [vmem:[#allocation155_spill] sm:$0xff]  ;;  %v20625_v20 = vld [vmem:[#allocation162_spill] sm:$0xff] }
 0x7bd   :  { %11537 = vmatpush.msrb.mxu3 %v20604_v62  ;;  %11568 = vmatpush.msra.mxu0 %v20612_v14  ;;  %v20617_v14 = vld [vmem:[#allocation168_spill] sm:$0xff] }
 0x7be   :  { %11593 = vmatpush.msra.mxu1 %v20600_v8  ;;  %11369 = vmatmul.f32.vlgmr.msra.gmra.mxu2 %v18625_v13  ;;  %v20619_v8 = vld [vmem:[#allocation146_spill] sm:$0xff] }
 0x7bf   :  { %11502 = vmatpush.msrb.mxu2 %v20613_v4  ;;  %11541 = vmatmul.f32.vlgmr.msrb.gmra.mxu3 %v18634_v1  ;;  %v20620_v4 = vld [vmem:[#allocation169_spill] sm:$0xff] }
 0x7c0   :  { %11572 = vmatpush.msra.mxu0 %v20614_v21  ;;  %11595 = vmatpush.msra.mxu1 %v20601_v0  ;;  %v20621_v21 = vld [vmem:[#allocation158_spill] sm:$0xff]  ;;  %v20622_v0 = vld [vmem:[#allocation152_spill] sm:$0xff] }
 0x7c1   :  { %11649 = vmatpush.msra.mxu3 %v20615_v46  ;;  %11505 = vmatpush.msrb.mxu2 %v20616_v31  ;;  %v20623_v46 = vld [vmem:[#allocation148_spill] sm:$0xff]  ;;  %v20624_v31 = vld [vmem:[#allocation170_spill] sm:$0xff] }
 0x7c2   :  { %11574 = vmatmul.f32.vlgmr.msra.gmra.mxu0 %v18625_v13  ;;  %11597 = vmatpush.msra.mxu1 %v20604_v62  ;;  %v20626_v62 = vld [vmem:[#allocation153_spill] sm:$0xff] }
 0x7c3   :  { %11655 = vmatpush.msra.mxu3 %v20617_v14  ;;  %11687 = vmatpush.msrb.mxu0 %v20618_v36 }
 0x7c4   :  { %11508 = vmatpush.msrb.mxu2 %v20619_v8  ;;  %11599 = vmatmul.f32.vlgmr.msra.gmra.mxu1 %v18625_v13  ;;  %v20627_v8 = vld [vmem:[#allocation164_spill] sm:$0xff] }
 0x7c5   :  { %11661 = vmatpush.msra.mxu3 %v20620_v4  ;;  %11690 = vmatpush.msrb.mxu0 %v20621_v21  ;;  %v20628_v4 = vld [vmem:[#allocation156_spill] sm:$0xff] }
 0x7c6   :  { %11716 = vmatpush.msrb.mxu1 %v20622_v0  ;;  %11511 = vmatpush.msrb.mxu2 %v20623_v46  ;;  %v20632_v46 = vld [vmem:[#allocation14_spill] sm:$0xff] }
 0x7c7   :  { %11667 = vmatpush.msra.mxu3 %v20624_v31  ;;  %11693 = vmatpush.msrb.mxu0 %v20625_v20  ;;  %v20629_v31 = vld [vmem:[#allocation159_spill] sm:$0xff]  ;;  %v20630_v20 = vld [vmem:[#allocation5_spill] sm:$0xff] }
 0x7c8   :  { %11718 = vmatpush.msrb.mxu1 %v20626_v62  ;;  %11514 = vmatmul.f32.vlgmr.msrb.gmra.mxu2 %v18628_v27 }
 0x7c9   :  { %11616 = vmatpush.msra.mxu2 %v20622_v0  ;;  %11669 = vmatmul.f32.vlgmr.msra.gmra.mxu3 %v18569_v54 }
 0x7ca   :  { %11696 = vmatpush.msrb.mxu0 %v20627_v8  ;;  %11720 = vmatpush.msrb.mxu1 %v20628_v4  ;;  %v20631_v8 = vld [vmem:[#allocation6_spill] sm:$0xff] }
 0x7cb   :  { %11776 = vmatpush.msrb.mxu3 %v20622_v0  ;;  %11618 = vmatpush.msra.mxu2 %v20626_v62  ;;  %v20634_v0 = vld [vmem:[#allocation17_spill] sm:$0xff] }
 0x7cc   :  { %11699 = vmatmul.f32.vlgmr.msrb.gmra.mxu0 %v18574_v53  ;;  %11722 = vmatpush.msrb.mxu1 %v20629_v31  ;;  %v20633_v53 = vld [vmem:[#allocation10_spill] sm:$0xff] }
 0x7cd   :  { %11778 = vmatpush.msrb.mxu3 %v20626_v62  ;;  %11808 = vmatpush.msra.mxu0 %v20630_v20  ;;  %v20635_v62 = vld [vmem:[#allocation161_spill] sm:$0xff] }
 0x7ce   :  { %11620 = vmatpush.msra.mxu2 %v20628_v4  ;;  %11726 = vmatmul.f32.vlgmr.msrb.gmra.mxu1 %v18579_v41  ;;  %v20636_v41 = vld [vmem:[#allocation13_spill] sm:$0xff] }
 0x7cf   :  { %11780 = vmatpush.msrb.mxu3 %v20628_v4  ;;  %11810 = vmatpush.msra.mxu0 %v20631_v8  ;;  %v20637_v4 = vld [vmem:[#allocation19_spill] sm:$0xff] }
 0x7d0   :  { %11841 = vmatpush.msra.mxu1 %v20632_v46  ;;  %11622 = vmatpush.msra.mxu2 %v20629_v31  ;;  %v20638_v46 = vld [vmem:[#allocation163_spill] sm:$0xff] }
 0x7d1   :  { %11782 = vmatpush.msrb.mxu3 %v20629_v31  ;;  %11812 = vmatpush.msra.mxu0 %v20633_v53  ;;  %v20639_v31 = vld [vmem:[#allocation20_spill] sm:$0xff] }
 0x7d2   :  { %11847 = vmatpush.msra.mxu1 %v20634_v0  ;;  %11628 = vmatmul.f32.vlgmr.msra.gmra.mxu2 %v18588_v58  ;;  %v20640_v0 = vld [vmem:[#allocation9_spill] sm:$0xff] }
 0x7d3   :  { %11745 = vmatpush.msrb.mxu2 %v20635_v62  ;;  %11784 = vmatmul.f32.vlgmr.msrb.gmra.mxu3 %v18569_v54  ;;  %v20641_v58 = vld [vmem:[#allocation165_spill] sm:$0xff]  ;;  %v20642_v62 = vld [vmem:[#allocation11_spill] sm:$0xff] }
 0x7d4   :  { %11814 = vmatpush.msra.mxu0 %v20636_v41  ;;  %11853 = vmatpush.msra.mxu1 %v20637_v4  ;;  %v20643_v4 = vld [vmem:[#allocation166_spill] sm:$0xff] }
 0x7d5   :  { %11908 = vmatpush.msra.mxu3 %v20630_v20  ;;  %11749 = vmatpush.msrb.mxu2 %v20638_v46  ;;  %v20644_v46 = vld [vmem:[#allocation15_spill] sm:$0xff] }
 0x7d6   :  { %11820 = vmatmul.f32.vlgmr.msra.gmra.mxu0 %v18643_v22  ;;  %11859 = vmatpush.msra.mxu1 %v20639_v31  ;;  %v20648_v31 = vld [vmem:[#allocation8_spill] sm:$0xff] }
 0x7d7   :  { %11910 = vmatpush.msra.mxu3 %v20631_v8  ;;  %11937 = vmatpush.msrb.mxu0 %v20640_v0  ;;  %v20645_v0 = vld [vmem:[#allocation7_spill] sm:$0xff] }
 0x7d8   :  { %11753 = vmatpush.msrb.mxu2 %v20641_v58  ;;  %11861 = vmatmul.f32.vlgmr.msra.gmra.mxu1 %v18625_v13  ;;  %v20646_v58 = vld [vmem:[#allocation18_spill] sm:$0xff] }
 0x7d9   :  { %11912 = vmatpush.msra.mxu3 %v20633_v53  ;;  %11941 = vmatpush.msrb.mxu0 %v20642_v62  ;;  %v20647_v62 = vld [vmem:[#allocation33_spill] sm:$0xff] }
 0x7da   :  { %11968 = vmatpush.msrb.mxu1 %v20630_v20  ;;  %11757 = vmatpush.msrb.mxu2 %v20643_v4  ;;  %v20650_v4 = vld [vmem:[#allocation22_spill] sm:$0xff] }
 0x7db   :  { %11914 = vmatpush.msra.mxu3 %v20636_v41  ;;  %11945 = vmatpush.msrb.mxu0 %v20644_v46  ;;  %v20649_v46 = vld [vmem:[#allocation34_spill] sm:$0xff] }
 0x7dc   :  { %11970 = vmatpush.msrb.mxu1 %v20631_v8  ;;  %11759 = vmatmul.f32.vlgmr.msrb.gmra.mxu2 %v18569_v54  ;;  %v20651_v54 = vld [vmem:[#allocation12_spill] sm:$0xff]  ;;  %v20657_v8 = vld [vmem:[#allocation27_spill] sm:$0xff] }
 0x7dd   :  { %11879 = vmatpush.msra.mxu2 %v20645_v0  ;;  %11918 = vmatmul.f32.vlgmr.msra.gmra.mxu3 %v18634_v1  ;;  %v20652_v0 = vld [vmem:[#allocation35_spill] sm:$0xff] }
 0x7de   :  { %11949 = vmatpush.msrb.mxu0 %v20646_v58  ;;  %11972 = vmatpush.msrb.mxu1 %v20633_v53  ;;  %v20653_v58 = vld [vmem:[#allocation24_spill] sm:$0xff]  ;;  %v20654_v53 = vld [vmem:[#allocation21_spill] sm:$0xff] }
 0x7df   :  { %12026 = vmatpush.msrb.mxu3 %v20647_v62  ;;  %11882 = vmatpush.msra.mxu2 %v20648_v31  ;;  %v20655_v62 = vld [vmem:[#allocation16_spill] sm:$0xff]  ;;  %v20656_v31 = vld [vmem:[#allocation39_spill] sm:$0xff] }
 0x7e0   :  { %11951 = vmatmul.f32.vlgmr.msrb.gmra.mxu0 %v18625_v13  ;;  %11974 = vmatpush.msrb.mxu1 %v20636_v41  ;;  %v20658_v41 = vld [vmem:[#allocation23_spill] sm:$0xff] }
 0x7e1   :  { %12032 = vmatpush.msrb.mxu3 %v20649_v46  ;;  %12064 = vmatpush.msra.mxu0 %v20650_v4  ;;  %v20668_v4 = vld [vmem:[#allocation45_spill] sm:$0xff]  ;;  %v20673_v46 = vld [vmem:[#allocation31_spill] sm:$0xff] }
 0x7e2   :  { %11885 = vmatpush.msra.mxu2 %v20651_v54  ;;  %11976 = vmatmul.f32.vlgmr.msrb.gmra.mxu1 %v18625_v13  ;;  %v20659_v54 = vld [vmem:[#allocation28_spill] sm:$0xff] }
 0x7e3   :  { %12038 = vmatpush.msrb.mxu3 %v20652_v0  ;;  %12067 = vmatpush.msra.mxu0 %v20653_v58  ;;  %v20660_v0 = vld [vmem:[#allocation25_spill] sm:$0xff] }
 0x7e4   :  { %12093 = vmatpush.msra.mxu1 %v20654_v53  ;;  %11888 = vmatpush.msra.mxu2 %v20655_v62  ;;  %v20664_v62 = vld [vmem:[#allocation46_spill] sm:$0xff]  ;;  %v20666_v58 = vld [vmem:[#allocation49_spill] sm:$0xff] }
 0x7e5   :  { %12044 = vmatpush.msrb.mxu3 %v20656_v31  ;;  %12070 = vmatpush.msra.mxu0 %v20657_v8  ;;  %v20661_v31 = vld [vmem:[#allocation26_spill] sm:$0xff]  ;;  %v20662_v8 = vld [vmem:[#allocation36_spill] sm:$0xff] }
 0x7e6   :  { %12095 = vmatpush.msra.mxu1 %v20658_v41  ;;  %11891 = vmatmul.f32.vlgmr.msra.gmra.mxu2 %v18628_v27 }
 0x7e7   :  { %11993 = vmatpush.msrb.mxu2 %v20654_v53  ;;  %12046 = vmatmul.f32.vlgmr.msrb.gmra.mxu3 %v18625_v13 }
 0x7e8   :  { %12073 = vmatpush.msra.mxu0 %v20659_v54  ;;  %12097 = vmatpush.msra.mxu1 %v20660_v0  ;;  %v20663_v54 = vld [vmem:[#allocation37_spill] sm:$0xff] }
 0x7e9   :  { %12153 = vmatpush.msra.mxu3 %v20654_v53  ;;  %11995 = vmatpush.msrb.mxu2 %v20658_v41  ;;  %v20665_v53 = vld [vmem:[#allocation38_spill] sm:$0xff] }
 0x7ea   :  { %12076 = vmatmul.f32.vlgmr.msra.gmra.mxu0 %v18628_v27  ;;  %12099 = vmatpush.msra.mxu1 %v20661_v31 }
 0x7eb   :  { %12155 = vmatpush.msra.mxu3 %v20658_v41  ;;  %12224 = vmatpush.msrb.mxu0 %v20662_v8  ;;  %v20667_v41 = vld [vmem:[#allocation29_spill] sm:$0xff] }
 0x7ec   :  { %11997 = vmatpush.msrb.mxu2 %v20660_v0  ;;  %12103 = vmatmul.f32.vlgmr.msra.gmra.mxu1 %v18634_v1 }
 0x7ed   :  { %12157 = vmatpush.msra.mxu3 %v20660_v0  ;;  %12226 = vmatpush.msrb.mxu0 %v20663_v54  ;;  %v20669_v0 = vld [vmem:[#allocation51_spill] sm:$0xff] }
 0x7ee   :  { %12257 = vmatpush.msrb.mxu1 %v20664_v62  ;;  %11999 = vmatpush.msrb.mxu2 %v20661_v31  ;;  %v20670_v62 = vld [vmem:[#allocation30_spill] sm:$0xff] }
 0x7ef   :  { %12159 = vmatpush.msra.mxu3 %v20661_v31  ;;  %12228 = vmatpush.msrb.mxu0 %v20665_v53  ;;  %v20671_v31 = vld [vmem:[#allocation52_spill] sm:$0xff] }
 0x7f0   :  { %12263 = vmatpush.msrb.mxu1 %v20666_v58  ;;  %12005 = vmatmul.f32.vlgmr.msrb.gmra.mxu2 %v18643_v22  ;;  %v20672_v58 = vld [vmem:[#allocation42_spill] sm:$0xff] }
 0x7f1   :  { %12122 = vmatpush.msra.mxu2 %v20667_v41  ;;  %12161 = vmatmul.f32.vlgmr.msra.gmra.mxu3 %v18625_v13  ;;  %v20674_v41 = vld [vmem:[#allocation44_spill] sm:$0xff] }
 0x7f2   :  { %12230 = vmatpush.msrb.mxu0 %v20668_v4  ;;  %12269 = vmatpush.msrb.mxu1 %v20669_v0  ;;  %v20675_v0 = vld [vmem:[#allocation32_spill] sm:$0xff] }
 0x7f3   :  { %12324 = vmatpush.msrb.mxu3 %v20662_v8  ;;  %12126 = vmatpush.msra.mxu2 %v20670_v62  ;;  %v20686_v62 = vld [vmem:[#allocation86_spill] sm:$0xff] }
 0x7f4   :  { %12236 = vmatmul.f32.vlgmr.msrb.gmra.mxu0 %v18643_v22  ;;  %12275 = vmatpush.msrb.mxu1 %v20671_v31  ;;  %v20676_v22 = vld [vmem:[#allocation48_spill] sm:$0xff] }
 0x7f5   :  { %12326 = vmatpush.msrb.mxu3 %v20663_v54  ;;  %12353 = vmatpush.msra.mxu0 %v20672_v58  ;;  %v20678_v58 = vld [vmem:[#allocation50_spill] sm:$0xff]  ;;  %v20682_v31 = vld [vmem:[#allocation84_spill] sm:$0xff] }
 0x7f6   :  { %12130 = vmatpush.msra.mxu2 %v20673_v46  ;;  %12277 = vmatmul.f32.vlgmr.msrb.gmra.mxu1 %v18625_v13  ;;  %v20677_v46 = vld [vmem:[#allocation40_spill] sm:$0xff] }
 0x7f7   :  { %12328 = vmatpush.msrb.mxu3 %v20665_v53  ;;  %12357 = vmatpush.msra.mxu0 %v20674_v41  ;;  %v20679_v41 = vld [vmem:[#allocation41_spill] sm:$0xff] }
 0x7f8   :  { %12384 = vmatpush.msra.mxu1 %v20662_v8  ;;  %12134 = vmatpush.msra.mxu2 %v20675_v0  ;;  %v20680_v0 = vld [vmem:[#allocation81_spill] sm:$0xff] }
 0x7f9   :  { %12330 = vmatpush.msrb.mxu3 %v20668_v4  ;;  %12361 = vmatpush.msra.mxu0 %v20676_v22  ;;  %v20681_v22 = vld [vmem:[#allocation43_spill] sm:$0xff] }
 0x7fa   :  { %12386 = vmatpush.msra.mxu1 %v20663_v54  ;;  %12136 = vmatmul.f32.vlgmr.msra.gmra.mxu2 %v18625_v13 }
 0x7fb   :  { %12334 = vmatmul.f32.vlgmr.msrb.gmra.mxu3 %v18634_v1  ;;  %12295 = vmatpush.msrb.mxu2 %v20677_v46  ;;  %v20683_v1 = vld [vmem:[#allocation73_spill] sm:$0xff]  ;;  %v20684_v46 = vld [vmem:[#allocation47_spill] sm:$0xff] }
 0x7fc   :  { %12365 = vmatpush.msra.mxu0 %v20678_v58  ;;  %12388 = vmatpush.msra.mxu1 %v20665_v53  ;;  %v20685_v58 = vld [vmem:[#allocation71_spill] sm:$0xff] }
 0x7fd   :  { %12367 = vmatmul.f32.vlgmr.msra.gmra.mxu0 %v18625_v13  ;;  %12298 = vmatpush.msrb.mxu2 %v20679_v41  ;;  %v20687_v41 = vld [vmem:[#allocation76_spill] sm:$0xff] }
 0x7fe   :  { %12390 = vmatpush.msra.mxu1 %v20668_v4  ;;  %12457 = vmatpush.msra.mxu3 %v20680_v0  ;;  %v20688_v4 = vld [vmem:[#allocation72_spill] sm:$0xff] }
 0x7ff   :  { %12392 = vmatmul.f32.vlgmr.msra.gmra.mxu1 %v18625_v13  ;;  %12301 = vmatpush.msrb.mxu2 %v20681_v22  ;;  %v20689_v0 = vld [vmem:[#allocation88_spill] sm:$0xff]  ;;  %v20690_v13 = vld [vmem:[#allocation79_spill] sm:$0xff]  ;;  %v20701_v22 = vld [vmem:[#allocation85_spill] sm:$0xff] }
 0x800   :  { %12463 = vmatpush.msra.mxu3 %v20682_v31  ;;  %12495 = vmatpush.msrb.mxu0 %v20683_v1  ;;  %v20691_v31 = vld [vmem:[#allocation75_spill] sm:$0xff]  ;;  %v10660_v1 = vpop.f32.mrf.mxu0 }
 0x801   :  { %12304 = vmatpush.msrb.mxu2 %v20684_v46  ;;  %12524 = vmatpush.msrb.mxu1 %v20685_v58 }
 0x802   :  { %12307 = vmatmul.f32.vlgmr.msrb.gmra.mxu2 %v18628_v27  ;;  %12469 = vmatpush.msra.mxu3 %v20686_v62  ;;  %v20692_v27 = vld [vmem:[#allocation83_spill] sm:$0xff]  ;;  %v20693_v62 = vld [vmem:[#allocation78_spill] sm:$0xff] }
 0x803   :  { %12498 = vmatpush.msrb.mxu0 %v20687_v41  ;;  %12526 = vmatpush.msrb.mxu1 %v20688_v4  ;;  %v20695_v41 = vld [vmem:[#allocation74_spill] sm:$0xff] }
 0x804   :  { %12475 = vmatpush.msra.mxu3 %v20689_v0  ;;  %12424 = vmatpush.msra.mxu2 %v20685_v58  ;;  %v20694_v0 = vld [vmem:[#allocation98_spill] sm:$0xff] }
 0x805   :  { %12501 = vmatpush.msrb.mxu0 %v20690_v13  ;;  %12528 = vmatpush.msrb.mxu1 %v20691_v31  ;;  %v10701_v13 = vpop.f32.mrf.mxu1 }
 0x806   :  { %12584 = vmatpush.msrb.mxu3 %v20685_v58  ;;  %12426 = vmatpush.msra.mxu2 %v20688_v4  ;;  %v20696_v58 = vld [vmem:[#allocation101_spill] sm:$0xff] }
 0x807   :  { %12504 = vmatpush.msrb.mxu0 %v20692_v27  ;;  %12530 = vmatpush.msrb.mxu1 %v20693_v62  ;;  %v20697_v27 = vld [vmem:[#allocation77_spill] sm:$0xff] }
 0x808   :  { %12586 = vmatpush.msrb.mxu3 %v20688_v4  ;;  %12428 = vmatpush.msra.mxu2 %v20691_v31  ;;  %v20698_v4 = vld [vmem:[#allocation104_spill] sm:$0xff]  ;;  %v10791_v46 = vpop.f32.mrf.mxu0 }
 0x809   :  { %12646 = vmatpush.msra.mxu1 %v20694_v0  ;;  %12613 = vmatpush.msra.mxu0 %v20077_v11  ;;  %v20699_v0 = vld [vmem:[#allocation82_spill] sm:$0xff] }
 0x80a   :  { %12588 = vmatpush.msrb.mxu3 %v20691_v31  ;;  %12430 = vmatpush.msra.mxu2 %v20693_v62  ;;  %v20700_v31 = vld [vmem:[#allocation107_spill] sm:$0xff] }
 0x80b   :  { %12652 = vmatpush.msra.mxu1 %v20696_v58  ;;  %12615 = vmatpush.msra.mxu0 %v20080_v32  ;;  %v10702_v58 = vadd.f32 %v10701_v13, %v10660_v1 }
 0x80c   :  { %12553 = vmatpush.msrb.mxu2 %v20695_v41  ;;  %12590 = vmatpush.msrb.mxu3 %v20693_v62  ;;  %v10758_v41 = vpop.f32.mrf.mxu3  ;;  %v10731_v62 = vpop.f32.mrf.mxu2 }
 0x80d   :  { %12658 = vmatpush.msra.mxu1 %v20698_v4  ;;  %12617 = vmatpush.msra.mxu0 %v20083_v40  ;;  %v10816_v53 = vpop.f32.mrf.mxu1  ;;  %v10732_v54 = vadd.f32 %v10731_v62, %v10702_v58 }
 0x80e   :  { %12557 = vmatpush.msrb.mxu2 %v20697_v27 }
 0x80f   :  { %12664 = vmatpush.msra.mxu1 %v20700_v31  ;;  %12619 = vmatpush.msra.mxu0 %v20086_v48  ;;  %v10759_v20 = vadd.f32 %v10758_v41, %v10732_v54  ;;  %v20702_v41 = vld [vmem:[#allocation112_spill] sm:$0xff] }
 0x810   :  { %12561 = vmatpush.msrb.mxu2 %v20699_v0 }
 0x811   :  { %v10792_v4 = vadd.f32 %v10791_v46, %v10759_v20 }
 0x812   :  { %12565 = vmatpush.msrb.mxu2 %v20701_v22 }
 0x813   :  { %v10817_v36 = vadd.f32 %v10816_v53, %v10792_v4 }
 0x815   :  { %v10920_v8 = vpop.f32.mrf.mxu0 }
 0x817   :  { %v10947_v21 = vpop.f32.mrf.mxu1 }
 0x819   :  { %v10890_v27 = vpop.f32.mrf.mxu3 }
 0x81d   :  { %v11054_v0 = vpop.f32.mrf.mxu0 }
 0x81f   :  { %v11095_v2 = vpop.f32.mrf.mxu1 }
 0x820   :  { %v11096_v62 = vadd.f32 %v11095_v2, %v11054_v0 }
 0x821   :  { %v10849_v14 = vpop.f32.mrf.mxu2  ;;  %v11005_v31 = vpop.f32.mrf.mxu3 }
 0x822   :  { %v10850_v60 = vadd.f32 %v10849_v14, %v10817_v36 }
 0x824   :  { %v10891_v17 = vadd.f32 %v10890_v27, %v10850_v60 }
 0x825   :  { %v11185_v1 = vpop.f32.mrf.mxu0 }
 0x826   :  { %v10921_v52 = vadd.f32 %v10920_v8, %v10891_v17 }
 0x827   :  { %v11210_v58 = vpop.f32.mrf.mxu1 }
 0x828   :  { %v10948_v23 = vadd.f32 %v10947_v21, %v10921_v52 }
 0x829   :  { %v10980_v7 = vpop.f32.mrf.mxu2  ;;  %v11152_v13 = vpop.f32.mrf.mxu3 }
 0x82a   :  { %v10981_v22 = vadd.f32 %v10980_v7, %v10948_v23 }
 0x82c   :  { %v11006_v42 = vadd.f32 %v11005_v31, %v10981_v22 }
 0x82d   :  { %v11310_v54 = vpop.f32.mrf.mxu0 }
 0x82e   :  { %v11008_v20 = vadd.f32 %v20702_v41, %v11006_v42 }
 0x82f   :  { %v11337_v8 = vpop.f32.mrf.mxu1 }
 0x830   :  { %v15439_v53 = vmul.f32 -1.442695, %v11008_v20 }
 0x831   :  { %v11125_v15 = vpop.f32.mrf.mxu2  ;;  %v11280_v14 = vpop.f32.mrf.mxu3 }
 0x832   :  { %v11126_v46 = vadd.f32 %v11125_v15, %v11096_v62  ;;  %15573 = vpow2.f32 %v15439_v53  ;;  %v20703_v62 = vld [vmem:[#allocation121_spill] sm:$0xff] }
 0x834   :  { %v11153_v4 = vadd.f32 %v11152_v13, %v11126_v46 }
 0x835   :  { %v11444_v31 = vpop.f32.mrf.mxu0 }
 0x836   :  { %v11186_v36 = vadd.f32 %v11185_v1, %v11153_v4 }
 0x837   :  { %v11485_v13 = vpop.f32.mrf.mxu1 }
 0x838   :  { %v11211_v60 = vadd.f32 %v11210_v58, %v11186_v36  ;;  %v15574_v21 = vpop.eup %15573 }
 0x839   :  { %v11239_v17 = vpop.f32.mrf.mxu2  ;;  %v11395_v0 = vpop.f32.mrf.mxu3  ;;  %v11012_v42 = vadd.f32 1.0, %v15574_v21 }
 0x83a   :  { %v11240_v52 = vadd.f32 %v11239_v17, %v11211_v60  ;;  %v20704_v60 = vld [vmem:[#allocation125_spill] sm:$0xff] }
 0x83b   :  { %15575 = vrcp.f32 %v11012_v42  ;;  %v11445_v17 = vadd.f32 %v20704_v60, %v11444_v31  ;;  %v11024_v60 = vand.u32 2147483648, %v11012_v42  ;;  %vm11018_vm3 = vweird.f32 %v11012_v42 }
 0x83c   :  { %v11281_v7 = vadd.f32 %v11280_v14, %v11240_v52 }
 0x83d   :  { %v11486_v21 = vadd.f32 %v11485_v13, %v11445_v17 }
 0x83e   :  { %v11311_v23 = vadd.f32 %v11310_v54, %v11281_v7 }
 0x83f   :  { %v11575_v58 = vpop.f32.mrf.mxu0 }
 0x840   :  { %v11338_v2 = vadd.f32 %v11337_v8, %v11311_v23 }
 0x841   :  { %v11370_v22 = vpop.f32.mrf.mxu2  ;;  %v15576_v4 = vpop.eup %15575 }
 0x842   :  { %v11371_v27 = vadd.f32 %v11370_v22, %v11338_v2  ;;  %v11542_v20 = vpop.f32.mrf.mxu3  ;;  %v11600_v53 = vpop.f32.mrf.mxu1  ;;  %v11014_v36 = vmul.f32 %v15576_v4, %v11012_v42  ;;  %vm11019_vm2 = vweird.f32 %v15576_v4 }
 0x843   :  { %vm11020_vm5 = vmor %vm11018_vm3, %vm11019_vm2 }
 0x844   :  { %v11396_v15 = vadd.f32 %v11395_v0, %v11371_v27  ;;  %v11015_v8 = vsub.f32 1.0, %v11014_v36  ;;  %v11022_v36 = vand.u32 2147483647, %v11012_v42 }
 0x846   :  { %v11398_v41 = vadd.f32 %v20703_v62, %v11396_v15  ;;  %v11016_v27 = vmul.f32 %v15576_v4, %v11015_v8  ;;  %vm11023_vm6 = vcmp.eq.f32.partialorder %v11022_v36, 8.507059e+37 }
 0x848   :  { %v15440_v1 = vmul.f32 -1.442695, %v11398_v41  ;;  %v11017_v44 = vadd.f32 %v15576_v4, %v11016_v27 }
 0x849   :  { %v11700_v52 = vpop.f32.mrf.mxu0 }
 0x84a   :  { %15577 = vpow2.f32 %v15440_v1  ;;  %v11021_v17 = vsel %vm11020_vm5, %v15576_v4, %v11017_v44 }
 0x84b   :  { %v11515_v46 = vpop.f32.mrf.mxu2  ;;  %v11727_v62 = vpop.f32.mrf.mxu1 }
 0x84c   :  { %v11670_v7 = vpop.f32.mrf.mxu3  ;;  %v11516_v0 = vadd.f32 %v11515_v46, %v11486_v21 }
 0x850   :  { %v15578_v54 = vpop.eup %15577 }
 0x851   :  { %v11402_v14 = vadd.f32 1.0, %v15578_v54  ;;  %v11543_v54 = vadd.f32 %v11542_v20, %v11516_v0 }
 0x853   :  { %15579 = vrcp.f32 %v11402_v14  ;;  %v11821_v29 = vpop.f32.mrf.mxu0  ;;  %v11576_v46 = vadd.f32 %v11575_v58, %v11543_v54  ;;  %vm11408_vm8 = vweird.f32 %v11402_v14  ;;  %v11412_v27 = vand.u32 2147483647, %v11402_v14 }
 0x855   :  { %v11629_v23 = vpop.f32.mrf.mxu2  ;;  %v11601_v0 = vadd.f32 %v11600_v53, %v11576_v46  ;;  %vm11413_vm10 = vcmp.eq.f32.partialorder %v11412_v27, 8.507059e+37 }
 0x856   :  { %v11630_v2 = vadd.f32 %v18561_v51, %v11629_v23  ;;  %v11785_v13 = vpop.f32.mrf.mxu3 }
 0x858   :  { %v11671_v22 = vadd.f32 %v11670_v7, %v11630_v2  ;;  %v11025_v7 = vor.u32 1.1754944e-38, %v11024_v60  ;;  %v11414_v2 = vand.u32 2147483648, %v11402_v14 }
 0x859   :  { %v15580_v15 = vpop.eup %15579 }
 0x85a   :  { %v11404_v41 = vmul.f32 %v15580_v15, %v11402_v14  ;;  %v11701_v1 = vadd.f32 %v11700_v52, %v11671_v22  ;;  %vm11409_vm7 = vweird.f32 %v15580_v15  ;;  %v11862_v52 = vpop.f32.mrf.mxu1  ;;  %v11026_v21 = vsel %vm11023_vm6, %v11025_v7, %v11021_v17 }
 0x85b   :  { %vm11410_vm9 = vmor %vm11408_vm8, %vm11409_vm7 }
 0x85c   :  { %v11405_v37 = vsub.f32 1.0, %v11404_v41  ;;  %v11728_v31 = vadd.f32 %v11727_v62, %v11701_v1  ;;  %v11415_v62 = vor.u32 1.1754944e-38, %v11414_v2  ;;  %v11863_v41 = vadd.f32 %v11862_v52, %v11821_v29 }
 0x85d   :  { %v11952_v58 = vpop.f32.mrf.mxu0 }
 0x85e   :  { %v11406_v6 = vmul.f32 %v15580_v15, %v11405_v37 }
 0x85f   :  { %v11760_v51 = vpop.f32.mrf.mxu2 }
 0x860   :  { %v11761_v8 = vadd.f32 %v11760_v51, %v11728_v31  ;;  %v11407_v20 = vadd.f32 %v15580_v15, %v11406_v6  ;;  %v11919_v44 = vpop.f32.mrf.mxu3 }
 0x862   :  { %v11786_v23 = vadd.f32 %v11785_v13, %v11761_v8  ;;  %v11411_v42 = vsel %vm11410_vm9, %v15580_v15, %v11407_v20  ;;  %v11977_v60 = vpop.f32.mrf.mxu1 }
 0x863   :  { %v11416_v1 = vsel %vm11413_vm10, %v11415_v62, %v11411_v42 }
 0x864   :  { %v11788_v22 = vmul.f32 %v11786_v23, %v11026_v21  ;;  %v11791_v6 = vsub.f32 1.0, %v11416_v1  ;;  %v11793_v14 = vmul.f32 %v11416_v1, %v18565_v45 }
 0x866   :  { %v11789_v37 = vadd.f32 %v11788_v22, %v11601_v0 }
 0x867   :  { %v12077_v15 = vpop.f32.mrf.mxu0 }
 0x868   :  { %15581 = vtanh.f32 %v11789_v37 }
 0x869   :  { %v11892_v4 = vpop.f32.mrf.mxu2 }
 0x86a   :  { %v11893_v54 = vadd.f32 %v11892_v4, %v11863_v41  ;;  %v12047_v8 = vpop.f32.mrf.mxu3  ;;  %v12104_v2 = vpop.f32.mrf.mxu1 }
 0x86c   :  { %v11920_v31 = vadd.f32 %v11919_v44, %v11893_v54 }
 0x86e   :  { %v15582_v36 = vpop.eup %15581  ;;  %v11953_v53 = vadd.f32 %v11952_v58, %v11920_v31 }
 0x86f   :  { %v11792_v13 = vmul.f32 %v15582_v36, %v11791_v6 }
 0x870   :  { %v11978_v51 = vadd.f32 %v11977_v60, %v11953_v53 }
 0x871   :  { %v18882_v46 = vadd.f32 %v11793_v14, %v11792_v13  ;;  %v12237_v37 = vpop.f32.mrf.mxu0 }
 0x872   :  { %v12166_v29 = vrot.slane %v11978_v51, 4  ;;  %v12238_v54 = vadd.f32 %v18600_v10, %v12237_v37  ;;  %v20705_v51 = vld [vmem:[#allocation120_spill] sm:$0xff] }
 0x873   :  { %v12409_v17 = vsel %vm417_vm4, %v18882_v46, 0  ;;  %v12006_v7 = vpop.f32.mrf.mxu2  ;;  %v12278_v60 = vpop.f32.mrf.mxu1 }
 0x874   :  { %v18886_v23 = vand.u32 4294901760, %v12409_v17  ;;  %v12168_v52 = vadd.f32 %v12166_v29, %v18212_v28  ;;  %v12048_v21 = vadd.f32 %v12047_v8, %v12006_v7  ;;  %v12162_v41 = vpop.f32.mrf.mxu3  ;;  %v12279_v36 = vadd.f32 %v12278_v60, %v12238_v54 }
 0x876   :  { %v15441_v20 = vmul.f32 -1.442695, %v12168_v52  ;;  %12477 = vmatmul.f32.vlgmr.msra.gmra.mxu3 %v18886_v23  ;;  %v18891_v45 = vsub.f32 %v12409_v17, %v18886_v23  ;;  %v12078_v0 = vadd.f32 %v12077_v15, %v12048_v21 }
 0x877   :  { %12713 = vmatpush.msra.mxu3 %v20077_v11 }
 0x878   :  { %15583 = vpow2.f32 %v15441_v20  ;;  %12507 = vmatmul.f32.vlgmr.msrb.gmra.mxu0 %v18891_v45  ;;  %v18896_v22 = vand.u32 4294901760, %v18891_v45  ;;  %v12105_v42 = vadd.f32 %v12104_v2, %v12078_v0 }
 0x879   :  { %12715 = vmatpush.msra.mxu3 %v20080_v32  ;;  %12742 = vmatpush.msrb.mxu0 %v20215_v61 }
 0x87a   :  { %12534 = vmatmul.f32.vlgmr.msrb.gmra.mxu1 %v18896_v22  ;;  %v12434_v27 = vsub.f32 %v18891_v45, %v18896_v22  ;;  %v12368_v7 = vpop.f32.mrf.mxu0 }
 0x87b   :  { %12717 = vmatpush.msra.mxu3 %v20083_v40  ;;  %12773 = vmatpush.msrb.mxu1 %v20077_v11 }
 0x87c   :  { %v18905_v62 = vand.u32 4294901760, %v12434_v27  ;;  %12746 = vmatpush.msrb.mxu0 %v20216_v25  ;;  %v12393_v37 = vpop.f32.mrf.mxu1 }
 0x87d   :  { %v12137_v58 = vpop.f32.mrf.mxu2  ;;  %12719 = vmatpush.msra.mxu3 %v20086_v48  ;;  %12775 = vmatpush.msrb.mxu1 %v20080_v32 }
 0x87e   :  { %v15584_v44 = vpop.eup %15583  ;;  %v12138_v4 = vadd.f32 %v12137_v58, %v12105_v42  ;;  %12436 = vmatmul.f32.vlgmr.msra.gmra.mxu2 %v18905_v62  ;;  %12592 = vmatmul.f32.vlgmr.msrb.gmra.mxu3 %v18886_v23  ;;  %v12335_v29 = vpop.f32.mrf.mxu3 }
 0x87f   :  { %v12172_v1 = vadd.f32 1.0, %v15584_v44  ;;  %12684 = vmatpush.msra.mxu2 %v20217_v9  ;;  %12777 = vmatpush.msrb.mxu1 %v20083_v40 }
 0x880   :  { %v12163_v31 = vadd.f32 %v12162_v41, %v12138_v4  ;;  %12851 = vmatpush.msrb.mxu3 %v20333_v63  ;;  %12750 = vmatpush.msrb.mxu0 %v20334_v34 }
 0x881   :  { %15585 = vrcp.f32 %v12172_v1  ;;  %12687 = vmatpush.msra.mxu2 %v20335_v24  ;;  %12779 = vmatpush.msrb.mxu1 %v20086_v48  ;;  %v12184_v2 = vand.u32 2147483648, %v12172_v1  ;;  %v12182_v0 = vand.u32 2147483647, %v12172_v1  ;;  %vm12178_vm12 = vweird.f32 %v12172_v1 }
 0x882   :  { %v12189_v6 = vrot.slane %v12163_v31, 4  ;;  %12857 = vmatpush.msrb.mxu3 %v20463_v47  ;;  %12754 = vmatpush.msrb.mxu0 %v20464_v39 }
 0x883   :  { %12690 = vmatpush.msra.mxu2 %v20466_v5  ;;  %v12185_v4 = vor.u32 1.1754944e-38, %v12184_v2  ;;  %vm12183_vm14 = vcmp.eq.f32.partialorder %v12182_v0, 8.507059e+37 }
 0x884   :  { %v12191_v10 = vadd.f32 %v12189_v6, %v18251_v56  ;;  %12863 = vmatpush.msrb.mxu3 %v20587_v3 }
 0x885   :  { %v12308_v53 = vpop.f32.mrf.mxu2  ;;  %12693 = vmatpush.msra.mxu2 %v20588_v19 }
 0x886   :  { %v15442_v13 = vmul.f32 -1.442695, %v12191_v10  ;;  %v12309_v14 = vadd.f32 %v12308_v53, %v12279_v36  ;;  %12567 = vmatmul.f32.vlgmr.msrb.gmra.mxu2 %v18886_v23  ;;  %12869 = vmatpush.msrb.mxu3 %v20705_v51 }
 0x887   :  { %v15586_v15 = vpop.eup %15585  ;;  %12818 = vmatpush.msrb.mxu2 %v20108_v26 }
 0x888   :  { %15587 = vpow2.f32 %v15442_v13  ;;  %v12174_v17 = vmul.f32 %v15586_v15, %v12172_v1  ;;  %v12336_v8 = vadd.f32 %v12335_v29, %v12309_v14  ;;  %vm12179_vm11 = vweird.f32 %v15586_v15 }
 0x889   :  { %12820 = vmatpush.msrb.mxu2 %v20109_v43  ;;  %vm12180_vm13 = vmor %vm12178_vm12, %vm12179_vm11 }
 0x88a   :  { %v12175_v52 = vsub.f32 1.0, %v12174_v17  ;;  %v12369_v21 = vadd.f32 %v12368_v7, %v12336_v8  ;;  %v12404_v7 = vrot.slane %v18621_v18, 6 }
 0x88b   :  { %12822 = vmatpush.msrb.mxu2 %v20110_v38 }
 0x88c   :  { %v12176_v20 = vmul.f32 %v15586_v15, %v12175_v52  ;;  %v12394_v58 = vadd.f32 %v12393_v37, %v12369_v21 }
 0x88d   :  { %12824 = vmatpush.msrb.mxu2 %v20111_v57 }
 0x88e   :  { %v15588_v27 = vpop.eup %15587  ;;  %v12177_v42 = vadd.f32 %v15586_v15, %v12176_v20  ;;  %v12397_v31 = vrot.slane %v12394_v58, 4 }
 0x88f   :  { %v12195_v41 = vadd.f32 1.0, %v15588_v27 }
 0x890   :  { %v12181_v44 = vsel %vm12180_vm13, %v15586_v15, %v12177_v42 }
 0x891   :  { %15589 = vrcp.f32 %v12195_v41  ;;  %v12186_v54 = vsel %vm12183_vm14, %v12185_v4, %v12181_v44  ;;  %v12207_v13 = vand.u32 2147483648, %v12195_v41  ;;  %v12205_v29 = vand.u32 2147483647, %v12195_v41  ;;  %v20706_v4 = vld [vmem:[#allocation124_spill] sm:$0xff] }
 0x892   :  { %v12399_v60 = vmul.f32 %v12397_v31, %v12186_v54  ;;  %vm12201_vm0 = vweird.f32 %v12195_v41  ;;  %v20707_v54 = vld [vmem:[#allocation113_spill] sm:$0xff]  ;;  %v20708_v31 = vld [vmem:[#allocation140_spill] sm:$0xff] }
 0x893   :  { %v12208_v15 = vor.u32 1.1754944e-38, %v12207_v13  ;;  %vm12206_vm2 = vcmp.eq.f32.partialorder %v12205_v29, 8.507059e+37  ;;  %v20714_v13 = vld [vmem:[#allocation123_spill] sm:$0xff]  ;;  %v20716_v29 = vld [vmem:[#allocation126_spill] sm:$0xff] }
 0x894   :  { %v12400_v10 = vadd.f32 %v12399_v60, %v18279_v35  ;;  %v20709_v60 = vld [vmem:[#allocation122_spill] sm:$0xff] }
 0x896   :  { %15591 = vtanh.f32 %v12400_v10  ;;  %v20712_v10 = vld [vmem:[#allocation142_spill] sm:$0xff] }
 0x897   :  { %v15590_v6 = vpop.eup %15589 }
 0x898   :  { %v12197_v36 = vmul.f32 %v15590_v6, %v12195_v41  ;;  %vm12202_vm15 = vweird.f32 %v15590_v6 }
 0x899   :  { %vm12203_vm1 = vmor %vm12201_vm0, %vm12202_vm15 }
 0x89a   :  { %v12198_v53 = vsub.f32 1.0, %v12197_v36  ;;  %v20711_v36 = vld [vmem:[#allocation116_spill] sm:$0xff] }
 0x89c   :  { %v12199_v14 = vmul.f32 %v15590_v6, %v12198_v53  ;;  %v15592_v21 = vpop.eup %15591  ;;  %v20713_v53 = vld [vmem:[#allocation130_spill] sm:$0xff] }
 0x89e   :  { %v12200_v1 = vadd.f32 %v15590_v6, %v12199_v14  ;;  %v20715_v14 = vld [vmem:[#allocation132_spill] sm:$0xff] }
 0x8a0   :  { %v12204_v17 = vsel %vm12203_vm1, %v15590_v6, %v12200_v1  ;;  %v20710_v6 = vld [vmem:[#allocation127_spill] sm:$0xff]  ;;  %v20717_v1 = vld [vmem:[#allocation129_spill] sm:$0xff] }
 0x8a1   :  { %v12209_v8 = vsel %vm12206_vm2, %v12208_v15, %v12204_v17  ;;  %v20718_v15 = vld [vmem:[#allocation136_spill] sm:$0xff]  ;;  %v20719_v17 = vld [vmem:[#allocation150_spill] sm:$0xff] }
 0x8a2   :  { %v12402_v52 = vsub.f32 1.0, %v12209_v8  ;;  %v12406_v2 = vmul.f32 %v12404_v7, %v12209_v8  ;;  %v20720_v8 = vld [vmem:[#allocation138_spill] sm:$0xff]  ;;  %v20721_v7 = vld [vmem:[#allocation141_spill] sm:$0xff] }
 0x8a4   :  { %v12403_v20 = vmul.f32 %v15592_v21, %v12402_v52  ;;  %v20722_v52 = vld [vmem:[#allocation154_spill] sm:$0xff]  ;;  %v20723_v21 = vld [vmem:[#allocation128_spill] sm:$0xff] }
 0x8a6   :  { %v18933_v0 = vadd.f32 %v12406_v2, %v12403_v20  ;;  %v20724_v20 = vld [vmem:[#allocation145_spill] sm:$0xff] }
 0x8a7   :  { %v20725_v2 = vld [vmem:[#allocation157_spill] sm:$0xff] }
 0x8a8   :  { %v12597_v27 = vrot.slane %v18933_v0, 4 }
 0x8aa   :  { %v12598_v37 = vsel %vm417_vm4, %v12597_v27, 0  ;;  %v20726_v27 = vld [vmem:[#allocation131_spill] sm:$0xff] }
 0x8ab   :  { %v18937_v42 = vand.u32 4294901760, %v12598_v37 }
 0x8ad   :  { %v18940_v41 = vsub.f32 %v12598_v37, %v18937_v42  ;;  %12666 = vmatmul.f32.vlgmr.msra.gmra.mxu1 %v18937_v42  ;;  %v20727_v37 = vld [vmem:[#allocation160_spill] sm:$0xff] }
 0x8ae   :  { %12918 = vmatpush.msra.mxu1 %v20108_v26 }
 0x8af   :  { %12696 = vmatmul.f32.vlgmr.msra.gmra.mxu2 %v18940_v41  ;;  %v18946_v18 = vand.u32 4294901760, %v18940_v41 }
 0x8b0   :  { %12920 = vmatpush.msra.mxu1 %v20109_v43  ;;  %12947 = vmatpush.msra.mxu2 %v20114_v59 }
 0x8b1   :  { %12723 = vmatmul.f32.vlgmr.msra.gmra.mxu3 %v18946_v18  ;;  %v12623_v58 = vsub.f32 %v18940_v41, %v18946_v18 }
 0x8b2   :  { %12922 = vmatpush.msra.mxu1 %v20110_v38  ;;  %12951 = vmatpush.msra.mxu2 %v20115_v50 }
 0x8b3   :  { %v18955_v44 = vand.u32 4294901760, %v12623_v58  ;;  %12978 = vmatpush.msra.mxu3 %v20108_v26  ;;  %v20728_v58 = vld [vmem:[#allocation143_spill] sm:$0xff] }
 0x8b4   :  { %12924 = vmatpush.msra.mxu1 %v20111_v57  ;;  %12955 = vmatpush.msra.mxu2 %v20116_v55 }
 0x8b5   :  { %12625 = vmatmul.f32.vlgmr.msra.gmra.mxu0 %v18955_v44  ;;  %12781 = vmatmul.f32.vlgmr.msrb.gmra.mxu1 %v18937_v42 }
 0x8b6   :  { %12980 = vmatpush.msra.mxu3 %v20109_v43  ;;  %12889 = vmatpush.msra.mxu0 %v20117_v33 }
 0x8b7   :  { %12830 = vmatmul.f32.vlgmr.msrb.gmra.mxu2 %v18905_v62  ;;  %13036 = vmatpush.msrb.mxu1 %v20118_v12 }
 0x8b8   :  { %12959 = vmatpush.msra.mxu2 %v20119_v16  ;;  %12982 = vmatpush.msra.mxu3 %v20110_v38 }
 0x8b9   :  { %12871 = vmatmul.f32.vlgmr.msrb.gmra.mxu3 %v18886_v23  ;;  %12892 = vmatpush.msra.mxu0 %v20120_v49 }
 0x8ba   :  { %12984 = vmatpush.msra.mxu3 %v20111_v57  ;;  %13042 = vmatpush.msrb.mxu1 %v20121_v30 }
 0x8bb   :  { %13074 = vmatpush.msrb.mxu2 %v20706_v4  ;;  %12895 = vmatpush.msra.mxu0 %v20707_v54 }
 0x8bc   :  { %13048 = vmatpush.msrb.mxu1 %v20708_v31  ;;  %13103 = vmatpush.msrb.mxu3 %v20709_v60 }
 0x8bd   :  { %12756 = vmatmul.f32.vlgmr.msrb.gmra.mxu0 %v18937_v42  ;;  %12928 = vmatmul.f32.vlgmr.msra.gmra.mxu1 %v18896_v22 }
 0x8be   :  { %13077 = vmatpush.msrb.mxu2 %v20710_v6  ;;  %12898 = vmatpush.msra.mxu0 %v20711_v36 }
 0x8bf   :  { %12961 = vmatmul.f32.vlgmr.msra.gmra.mxu2 %v18886_v23  ;;  %13054 = vmatpush.msrb.mxu1 %v20712_v10 }
 0x8c0   :  { %13080 = vmatpush.msrb.mxu2 %v20713_v53  ;;  %13105 = vmatpush.msrb.mxu3 %v20714_v13 }
 0x8c1   :  { %12986 = vmatmul.f32.vlgmr.msra.gmra.mxu3 %v18886_v23  ;;  %13003 = vmatpush.msrb.mxu0 %v20709_v60 }
 0x8c2   :  { %13083 = vmatpush.msrb.mxu2 %v20715_v14  ;;  %13107 = vmatpush.msrb.mxu3 %v20716_v29 }
 0x8c3   :  { %13163 = vmatpush.msra.mxu1 %v20709_v60  ;;  %13005 = vmatpush.msrb.mxu0 %v20714_v13 }
 0x8c4   :  { %13109 = vmatpush.msrb.mxu3 %v20717_v1  ;;  %13208 = vmatpush.msra.mxu2 %v20718_v15 }
 0x8c5   :  { %12901 = vmatmul.f32.vlgmr.msra.gmra.mxu0 %v18891_v45  ;;  %13056 = vmatmul.f32.vlgmr.msrb.gmra.mxu1 %v18937_v42 }
 0x8c6   :  { %13165 = vmatpush.msra.mxu1 %v20714_v13  ;;  %13007 = vmatpush.msrb.mxu0 %v20716_v29 }
 0x8c7   :  { %13086 = vmatmul.f32.vlgmr.msrb.gmra.mxu2 %v18940_v41  ;;  %13241 = vmatpush.msra.mxu3 %v20719_v17  ;;  %v20745_v17 = vld [vmem:[#allocation162_spill] sm:$0xff] }
 0x8c8   :  { %13167 = vmatpush.msra.mxu1 %v20716_v29  ;;  %13210 = vmatpush.msra.mxu2 %v20720_v8 }
 0x8c9   :  { %13113 = vmatmul.f32.vlgmr.msrb.gmra.mxu3 %v18946_v18  ;;  %13009 = vmatpush.msrb.mxu0 %v20717_v1 }
 0x8ca   :  { %13169 = vmatpush.msra.mxu1 %v20717_v1  ;;  %13212 = vmatpush.msra.mxu2 %v20721_v7 }
 0x8cb   :  { %13247 = vmatpush.msra.mxu3 %v20722_v52  ;;  %13132 = vmatpush.msra.mxu0 %v20723_v21  ;;  %v20729_v21 = vld [vmem:[#allocation133_spill] sm:$0xff]  ;;  %v20730_v52 = vld [vmem:[#allocation147_spill] sm:$0xff] }
 0x8cc   :  { %13214 = vmatpush.msra.mxu2 %v20724_v20  ;;  %13308 = vmatpush.msrb.mxu1 %v20718_v15 }
 0x8cd   :  { %13015 = vmatmul.f32.vlgmr.msrb.gmra.mxu0 %v18955_v44  ;;  %13171 = vmatmul.f32.vlgmr.msra.gmra.mxu1 %v18937_v42 }
 0x8ce   :  { %13253 = vmatpush.msra.mxu3 %v20725_v2  ;;  %13136 = vmatpush.msra.mxu0 %v20726_v27  ;;  %v20731_v2 = vld [vmem:[#allocation135_spill] sm:$0xff]  ;;  %v20732_v27 = vld [vmem:[#allocation149_spill] sm:$0xff] }
 0x8cf   :  { %13220 = vmatmul.f32.vlgmr.msra.gmra.mxu2 %v18955_v44  ;;  %13310 = vmatpush.msrb.mxu1 %v20720_v8 }
 0x8d0   :  { %13259 = vmatpush.msra.mxu3 %v20727_v37  ;;  %13337 = vmatpush.msrb.mxu2 %v20728_v58  ;;  %v20733_v58 = vld [vmem:[#allocation139_spill] sm:$0xff]  ;;  %v20736_v37 = vld [vmem:[#allocation144_spill] sm:$0xff] }
 0x8d1   :  { %13140 = vmatpush.msra.mxu0 %v20729_v21  ;;  %13261 = vmatmul.f32.vlgmr.msra.gmra.mxu3 %v18937_v42  ;;  %v20734_v21 = vld [vmem:[#allocation151_spill] sm:$0xff] }
 0x8d2   :  { %13312 = vmatpush.msrb.mxu1 %v20721_v7  ;;  %13341 = vmatpush.msrb.mxu2 %v20730_v52  ;;  %v20735_v52 = vld [vmem:[#allocation167_spill] sm:$0xff] }
 0x8d3   :  { %13368 = vmatpush.msrb.mxu3 %v20718_v15  ;;  %13144 = vmatpush.msra.mxu0 %v20731_v2  ;;  %v20738_v2 = vld [vmem:[#allocation155_spill] sm:$0xff] }
 0x8d4   :  { %13314 = vmatpush.msrb.mxu1 %v20724_v20  ;;  %13345 = vmatpush.msrb.mxu2 %v20732_v27  ;;  %v20737_v27 = vld [vmem:[#allocation168_spill] sm:$0xff] }
 0x8d5   :  { %13370 = vmatpush.msrb.mxu3 %v20720_v8  ;;  %13146 = vmatmul.f32.vlgmr.msra.gmra.mxu0 %v18937_v42  ;;  %v20739_v8 = vld [vmem:[#allocation146_spill] sm:$0xff] }
 0x8d6   :  { %13279 = vmatpush.msrb.mxu0 %v20733_v58  ;;  %13318 = vmatmul.f32.vlgmr.msrb.gmra.mxu1 %v18946_v18  ;;  %v20740_v58 = vld [vmem:[#allocation169_spill] sm:$0xff] }
 0x8d7   :  { %13349 = vmatpush.msrb.mxu2 %v20734_v21  ;;  %13372 = vmatpush.msrb.mxu3 %v20721_v7  ;;  %v20741_v21 = vld [vmem:[#allocation158_spill] sm:$0xff]  ;;  %v20742_v7 = vld [vmem:[#allocation152_spill] sm:$0xff] }
 0x8d8   :  { %13426 = vmatpush.msra.mxu1 %v20735_v52  ;;  %13282 = vmatpush.msrb.mxu0 %v20736_v37  ;;  %v20743_v52 = vld [vmem:[#allocation148_spill] sm:$0xff]  ;;  %v20744_v37 = vld [vmem:[#allocation170_spill] sm:$0xff] }
 0x8d9   :  { %13351 = vmatmul.f32.vlgmr.msrb.gmra.mxu2 %v18937_v42  ;;  %13374 = vmatpush.msrb.mxu3 %v20724_v20  ;;  %v20746_v20 = vld [vmem:[#allocation153_spill] sm:$0xff] }
 0x8da   :  { %13432 = vmatpush.msra.mxu1 %v20737_v27  ;;  %13464 = vmatpush.msra.mxu2 %v20738_v2 }
 0x8db   :  { %13285 = vmatpush.msrb.mxu0 %v20739_v8  ;;  %13376 = vmatmul.f32.vlgmr.msrb.gmra.mxu3 %v18937_v42  ;;  %v20747_v8 = vld [vmem:[#allocation164_spill] sm:$0xff] }
 0x8dc   :  { %13438 = vmatpush.msra.mxu1 %v20740_v58  ;;  %13467 = vmatpush.msra.mxu2 %v20741_v21  ;;  %v20748_v58 = vld [vmem:[#allocation156_spill] sm:$0xff] }
 0x8dd   :  { %13493 = vmatpush.msra.mxu3 %v20742_v7  ;;  %13288 = vmatpush.msrb.mxu0 %v20743_v52  ;;  %v20752_v52 = vld [vmem:[#allocation14_spill] sm:$0xff] }
 0x8de   :  { %13444 = vmatpush.msra.mxu1 %v20744_v37  ;;  %13470 = vmatpush.msra.mxu2 %v20745_v17  ;;  %v20749_v37 = vld [vmem:[#allocation159_spill] sm:$0xff]  ;;  %v20750_v17 = vld [vmem:[#allocation5_spill] sm:$0xff] }
 0x8df   :  { %13495 = vmatpush.msra.mxu3 %v20746_v20  ;;  %13291 = vmatmul.f32.vlgmr.msrb.gmra.mxu0 %v18940_v41 }
 0x8e0   :  { %13393 = vmatpush.msra.mxu0 %v20742_v7  ;;  %13446 = vmatmul.f32.vlgmr.msra.gmra.mxu1 %v18886_v23 }
 0x8e1   :  { %13473 = vmatpush.msra.mxu2 %v20747_v8  ;;  %13497 = vmatpush.msra.mxu3 %v20748_v58  ;;  %v20751_v8 = vld [vmem:[#allocation6_spill] sm:$0xff] }
 0x8e2   :  { %13553 = vmatpush.msrb.mxu1 %v20742_v7  ;;  %13395 = vmatpush.msra.mxu0 %v20746_v20  ;;  %v20754_v7 = vld [vmem:[#allocation17_spill] sm:$0xff] }
 0x8e3   :  { %13476 = vmatmul.f32.vlgmr.msra.gmra.mxu2 %v18891_v45  ;;  %13499 = vmatpush.msra.mxu3 %v20749_v37  ;;  %v20753_v45 = vld [vmem:[#allocation10_spill] sm:$0xff] }
 0x8e4   :  { %13555 = vmatpush.msrb.mxu1 %v20746_v20  ;;  %13585 = vmatpush.msrb.mxu2 %v20750_v17  ;;  %v20755_v20 = vld [vmem:[#allocation161_spill] sm:$0xff] }
 0x8e5   :  { %13397 = vmatpush.msra.mxu0 %v20748_v58  ;;  %13503 = vmatmul.f32.vlgmr.msra.gmra.mxu3 %v18896_v22  ;;  %v20756_v22 = vld [vmem:[#allocation13_spill] sm:$0xff] }
 0x8e6   :  { %13557 = vmatpush.msrb.mxu1 %v20748_v58  ;;  %13587 = vmatpush.msrb.mxu2 %v20751_v8  ;;  %v20757_v58 = vld [vmem:[#allocation19_spill] sm:$0xff] }
 0x8e7   :  { %13618 = vmatpush.msrb.mxu3 %v20752_v52  ;;  %13399 = vmatpush.msra.mxu0 %v20749_v37  ;;  %v20758_v52 = vld [vmem:[#allocation163_spill] sm:$0xff] }
 0x8e8   :  { %13559 = vmatpush.msrb.mxu1 %v20749_v37  ;;  %13589 = vmatpush.msrb.mxu2 %v20753_v45  ;;  %v20759_v37 = vld [vmem:[#allocation20_spill] sm:$0xff] }
 0x8e9   :  { %13624 = vmatpush.msrb.mxu3 %v20754_v7  ;;  %13405 = vmatmul.f32.vlgmr.msra.gmra.mxu0 %v18905_v62  ;;  %v20760_v7 = vld [vmem:[#allocation9_spill] sm:$0xff] }
 0x8ea   :  { %13522 = vmatpush.msrb.mxu0 %v20755_v20  ;;  %13561 = vmatmul.f32.vlgmr.msrb.gmra.mxu1 %v18886_v23  ;;  %v20761_v62 = vld [vmem:[#allocation165_spill] sm:$0xff]  ;;  %v20762_v20 = vld [vmem:[#allocation11_spill] sm:$0xff] }
 0x8eb   :  { %13591 = vmatpush.msrb.mxu2 %v20756_v22  ;;  %13630 = vmatpush.msrb.mxu3 %v20757_v58  ;;  %v20763_v58 = vld [vmem:[#allocation166_spill] sm:$0xff] }
 0x8ec   :  { %13685 = vmatpush.msra.mxu1 %v20750_v17  ;;  %13526 = vmatpush.msrb.mxu0 %v20758_v52  ;;  %v20764_v52 = vld [vmem:[#allocation15_spill] sm:$0xff] }
 0x8ed   :  { %13597 = vmatmul.f32.vlgmr.msrb.gmra.mxu2 %v18955_v44  ;;  %13636 = vmatpush.msrb.mxu3 %v20759_v37  ;;  %v20765_v37 = vld [vmem:[#allocation7_spill] sm:$0xff] }
 0x8ee   :  { %13687 = vmatpush.msra.mxu1 %v20751_v8  ;;  %13714 = vmatpush.msra.mxu2 %v20760_v7  ;;  %v20766_v7 = vld [vmem:[#allocation18_spill] sm:$0xff] }
 0x8ef   :  { %13530 = vmatpush.msrb.mxu0 %v20761_v62  ;;  %13638 = vmatmul.f32.vlgmr.msrb.gmra.mxu3 %v18937_v42 }
 0x8f0   :  { %13689 = vmatpush.msra.mxu1 %v20753_v45  ;;  %13718 = vmatpush.msra.mxu2 %v20762_v20  ;;  %v20767_v20 = vld [vmem:[#allocation33_spill] sm:$0xff] }
 0x8f1   :  { %13745 = vmatpush.msra.mxu3 %v20750_v17  ;;  %13534 = vmatpush.msrb.mxu0 %v20763_v58  ;;  %v20768_v17 = vld [vmem:[#allocation8_spill] sm:$0xff]  ;;  %v20777_v58 = vld [vmem:[#allocation27_spill] sm:$0xff] }
 0x8f2   :  { %13691 = vmatpush.msra.mxu1 %v20756_v22  ;;  %13722 = vmatpush.msra.mxu2 %v20764_v52  ;;  %v20769_v52 = vld [vmem:[#allocation34_spill] sm:$0xff] }
 0x8f3   :  { %13747 = vmatpush.msra.mxu3 %v20751_v8  ;;  %13536 = vmatmul.f32.vlgmr.msrb.gmra.mxu0 %v18886_v23  ;;  %v20770_v8 = vld [vmem:[#allocation22_spill] sm:$0xff]  ;;  %v20771_v23 = vld [vmem:[#allocation12_spill] sm:$0xff] }
 0x8f4   :  { %13656 = vmatpush.msra.mxu0 %v20765_v37  ;;  %13695 = vmatmul.f32.vlgmr.msra.gmra.mxu1 %v18946_v18  ;;  %v20772_v37 = vld [vmem:[#allocation35_spill] sm:$0xff] }
 0x8f5   :  { %13726 = vmatpush.msra.mxu2 %v20766_v7  ;;  %13749 = vmatpush.msra.mxu3 %v20753_v45  ;;  %v20773_v7 = vld [vmem:[#allocation24_spill] sm:$0xff]  ;;  %v20774_v45 = vld [vmem:[#allocation21_spill] sm:$0xff] }
 0x8f6   :  { %13803 = vmatpush.msrb.mxu1 %v20767_v20  ;;  %13659 = vmatpush.msra.mxu0 %v20768_v17  ;;  %v20775_v20 = vld [vmem:[#allocation16_spill] sm:$0xff]  ;;  %v20776_v17 = vld [vmem:[#allocation39_spill] sm:$0xff] }
 0x8f7   :  { %13728 = vmatmul.f32.vlgmr.msra.gmra.mxu2 %v18937_v42  ;;  %13751 = vmatpush.msra.mxu3 %v20756_v22  ;;  %v20778_v22 = vld [vmem:[#allocation23_spill] sm:$0xff] }
 0x8f8   :  { %13809 = vmatpush.msrb.mxu1 %v20769_v52  ;;  %13841 = vmatpush.msrb.mxu2 %v20770_v8  ;;  %v20779_v52 = vld [vmem:[#allocation28_spill] sm:$0xff]  ;;  %v20780_v8 = vld [vmem:[#allocation25_spill] sm:$0xff] }
 0x8f9   :  { %13662 = vmatpush.msra.mxu0 %v20771_v23  ;;  %13753 = vmatmul.f32.vlgmr.msra.gmra.mxu3 %v18937_v42  ;;  %v20781_v23 = vld [vmem:[#allocation26_spill] sm:$0xff] }
 0x8fa   :  { %13815 = vmatpush.msrb.mxu1 %v20772_v37  ;;  %13844 = vmatpush.msrb.mxu2 %v20773_v7  ;;  %v20783_v37 = vld [vmem:[#allocation37_spill] sm:$0xff]  ;;  %v20784_v7 = vld [vmem:[#allocation46_spill] sm:$0xff] }
 0x8fb   :  { %13870 = vmatpush.msrb.mxu3 %v20774_v45  ;;  %13665 = vmatpush.msra.mxu0 %v20775_v20  ;;  %v20786_v20 = vld [vmem:[#allocation49_spill] sm:$0xff] }
 0x8fc   :  { %13821 = vmatpush.msrb.mxu1 %v20776_v17  ;;  %13847 = vmatpush.msrb.mxu2 %v20777_v58  ;;  %v20782_v58 = vld [vmem:[#allocation36_spill] sm:$0xff]  ;;  %v20787_v17 = vld [vmem:[#allocation29_spill] sm:$0xff] }
 0x8fd   :  { %13872 = vmatpush.msrb.mxu3 %v20778_v22  ;;  %13668 = vmatmul.f32.vlgmr.msra.gmra.mxu0 %v18940_v41 }
 0x8fe   :  { %13770 = vmatpush.msrb.mxu0 %v20774_v45  ;;  %13823 = vmatmul.f32.vlgmr.msrb.gmra.mxu1 %v18937_v42 }
 0x8ff   :  { %13850 = vmatpush.msrb.mxu2 %v20779_v52  ;;  %13874 = vmatpush.msrb.mxu3 %v20780_v8  ;;  %v20789_v52 = vld [vmem:[#allocation51_spill] sm:$0xff] }
 0x900   :  { %13930 = vmatpush.msra.mxu1 %v20774_v45  ;;  %13772 = vmatpush.msrb.mxu0 %v20778_v22  ;;  %v20785_v45 = vld [vmem:[#allocation38_spill] sm:$0xff] }
 0x901   :  { %13853 = vmatmul.f32.vlgmr.msrb.gmra.mxu2 %v18940_v41  ;;  %13876 = vmatpush.msrb.mxu3 %v20781_v23 }
 0x902   :  { %13932 = vmatpush.msra.mxu1 %v20778_v22  ;;  %14001 = vmatpush.msra.mxu2 %v20782_v58  ;;  %v20788_v22 = vld [vmem:[#allocation45_spill] sm:$0xff] }
 0x903   :  { %13774 = vmatpush.msrb.mxu0 %v20780_v8  ;;  %13880 = vmatmul.f32.vlgmr.msrb.gmra.mxu3 %v18946_v18 }
 0x904   :  { %13934 = vmatpush.msra.mxu1 %v20780_v8  ;;  %14003 = vmatpush.msra.mxu2 %v20783_v37  ;;  %v20790_v8 = vld [vmem:[#allocation30_spill] sm:$0xff] }
 0x905   :  { %14034 = vmatpush.msra.mxu3 %v20784_v7  ;;  %13776 = vmatpush.msrb.mxu0 %v20781_v23  ;;  %v20792_v7 = vld [vmem:[#allocation42_spill] sm:$0xff] }
 0x906   :  { %13936 = vmatpush.msra.mxu1 %v20781_v23  ;;  %14005 = vmatpush.msra.mxu2 %v20785_v45  ;;  %v20791_v23 = vld [vmem:[#allocation52_spill] sm:$0xff] }
 0x907   :  { %14040 = vmatpush.msra.mxu3 %v20786_v20  ;;  %13782 = vmatmul.f32.vlgmr.msrb.gmra.mxu0 %v18955_v44  ;;  %v20793_v20 = vld [vmem:[#allocation31_spill] sm:$0xff] }
 0x908   :  { %13899 = vmatpush.msra.mxu0 %v20787_v17  ;;  %13938 = vmatmul.f32.vlgmr.msra.gmra.mxu1 %v18937_v42  ;;  %v20794_v17 = vld [vmem:[#allocation44_spill] sm:$0xff] }
 0x909   :  { %14007 = vmatpush.msra.mxu2 %v20788_v22  ;;  %14046 = vmatpush.msra.mxu3 %v20789_v52  ;;  %v20795_v52 = vld [vmem:[#allocation32_spill] sm:$0xff] }
 0x90a   :  { %14101 = vmatpush.msrb.mxu1 %v20782_v58  ;;  %13903 = vmatpush.msra.mxu0 %v20790_v8  ;;  %v20797_v8 = vld [vmem:[#allocation40_spill] sm:$0xff] }
 0x90b   :  { %14013 = vmatmul.f32.vlgmr.msra.gmra.mxu2 %v18955_v44  ;;  %14052 = vmatpush.msra.mxu3 %v20791_v23  ;;  %v20796_v44 = vld [vmem:[#allocation48_spill] sm:$0xff]  ;;  %v20798_v23 = vld [vmem:[#allocation50_spill] sm:$0xff] }
 0x90c   :  { %14103 = vmatpush.msrb.mxu1 %v20783_v37  ;;  %14130 = vmatpush.msrb.mxu2 %v20792_v7  ;;  %v20800_v7 = vld [vmem:[#allocation81_spill] sm:$0xff] }
 0x90d   :  { %13907 = vmatpush.msra.mxu0 %v20793_v20  ;;  %14054 = vmatmul.f32.vlgmr.msra.gmra.mxu3 %v18937_v42  ;;  %v20802_v20 = vld [vmem:[#allocation84_spill] sm:$0xff] }
 0x90e   :  { %14105 = vmatpush.msrb.mxu1 %v20785_v45  ;;  %14134 = vmatpush.msrb.mxu2 %v20794_v17  ;;  %v20804_v17 = vld [vmem:[#allocation47_spill] sm:$0xff] }
 0x90f   :  { %14161 = vmatpush.msrb.mxu3 %v20782_v58  ;;  %13911 = vmatpush.msra.mxu0 %v20795_v52  ;;  %v20799_v58 = vld [vmem:[#allocation41_spill] sm:$0xff]  ;;  %v20805_v52 = vld [vmem:[#allocation71_spill] sm:$0xff] }
 0x910   :  { %14107 = vmatpush.msrb.mxu1 %v20788_v22  ;;  %14138 = vmatpush.msrb.mxu2 %v20796_v44  ;;  %v20807_v44 = vld [vmem:[#allocation76_spill] sm:$0xff] }
 0x911   :  { %14163 = vmatpush.msrb.mxu3 %v20783_v37  ;;  %13913 = vmatmul.f32.vlgmr.msra.gmra.mxu0 %v18937_v42  ;;  %v20801_v37 = vld [vmem:[#allocation43_spill] sm:$0xff] }
 0x912   :  { %14111 = vmatmul.f32.vlgmr.msrb.gmra.mxu1 %v18946_v18  ;;  %14072 = vmatpush.msrb.mxu0 %v20797_v8  ;;  %v20803_v18 = vld [vmem:[#allocation73_spill] sm:$0xff]  ;;  %v20809_v8 = vld [vmem:[#allocation88_spill] sm:$0xff] }
 0x913   :  { %14142 = vmatpush.msrb.mxu2 %v20798_v23  ;;  %14165 = vmatpush.msrb.mxu3 %v20785_v45  ;;  %v20806_v45 = vld [vmem:[#allocation86_spill] sm:$0xff]  ;;  %v20811_v23 = vld [vmem:[#allocation75_spill] sm:$0xff] }
 0x914   :  { %14144 = vmatmul.f32.vlgmr.msrb.gmra.mxu2 %v18937_v42  ;;  %14075 = vmatpush.msrb.mxu0 %v20799_v58  ;;  %v20812_v58 = vld [vmem:[#allocation83_spill] sm:$0xff] }
 0x915   :  { %14167 = vmatpush.msrb.mxu3 %v20788_v22  ;;  %14234 = vmatpush.msra.mxu1 %v20800_v7  ;;  %v20808_v22 = vld [vmem:[#allocation72_spill] sm:$0xff]  ;;  %v12437_v7 = vpop.f32.mrf.mxu2 }
 0x916   :  { %14169 = vmatmul.f32.vlgmr.msrb.gmra.mxu3 %v18937_v42  ;;  %14078 = vmatpush.msrb.mxu0 %v20801_v37  ;;  %v20810_v42 = vld [vmem:[#allocation79_spill] sm:$0xff]  ;;  %v20814_v37 = vld [vmem:[#allocation98_spill] sm:$0xff] }
 0x917   :  { %14240 = vmatpush.msra.mxu1 %v20802_v20  ;;  %14272 = vmatpush.msra.mxu2 %v20803_v18  ;;  %v12535_v20 = vpop.f32.mrf.mxu1  ;;  %v12478_v18 = vpop.f32.mrf.mxu3 }
 0x918   :  { %14081 = vmatpush.msrb.mxu0 %v20804_v17  ;;  %14301 = vmatpush.msra.mxu3 %v20805_v52  ;;  %v20815_v17 = vld [vmem:[#allocation74_spill] sm:$0xff] }
 0x919   :  { %14084 = vmatmul.f32.vlgmr.msrb.gmra.mxu0 %v18940_v41  ;;  %14246 = vmatpush.msra.mxu1 %v20806_v45  ;;  %v20813_v41 = vld [vmem:[#allocation78_spill] sm:$0xff]  ;;  %v12479_v45 = vadd.f32 %v12478_v18, %v12437_v7 }
 0x91a   :  { %14275 = vmatpush.msra.mxu2 %v20807_v44  ;;  %14303 = vmatpush.msra.mxu3 %v20808_v22  ;;  %v20817_v44 = vld [vmem:[#allocation77_spill] sm:$0xff] }
 0x91b   :  { %14252 = vmatpush.msra.mxu1 %v20809_v8  ;;  %14201 = vmatpush.msra.mxu0 %v20805_v52  ;;  %v12508_v8 = vpop.f32.mrf.mxu0 }
 0x91c   :  { %14278 = vmatpush.msra.mxu2 %v20810_v42  ;;  %14305 = vmatpush.msra.mxu3 %v20811_v23  ;;  %v20819_v42 = vld [vmem:[#allocation82_spill] sm:$0xff] }
 0x91d   :  { %14361 = vmatpush.msrb.mxu1 %v20805_v52  ;;  %14203 = vmatpush.msra.mxu0 %v20808_v22  ;;  %v20816_v52 = vld [vmem:[#allocation101_spill] sm:$0xff]  ;;  %v12568_v7 = vpop.f32.mrf.mxu2 }
 0x91e   :  { %14281 = vmatpush.msra.mxu2 %v20812_v58  ;;  %14307 = vmatpush.msra.mxu3 %v20813_v41  ;;  %v12509_v58 = vadd.f32 %v12508_v8, %v12479_v45 }
 0x91f   :  { %14363 = vmatpush.msrb.mxu1 %v20808_v22  ;;  %14205 = vmatpush.msra.mxu0 %v20811_v23  ;;  %v20818_v22 = vld [vmem:[#allocation104_spill] sm:$0xff] }
 0x920   :  { %14423 = vmatpush.msrb.mxu3 %v20814_v37  ;;  %14390 = vmatpush.msrb.mxu2 %v20077_v11  ;;  %v20821_v37 = vld [vmem:[#allocation85_spill] sm:$0xff]  ;;  %v12536_v18 = vadd.f32 %v12535_v20, %v12509_v58  ;;  %v19192_v58 = vld [vmem:[%s19411_s8] ss:$0 sm:$0xff] }
 0x921   :  { %14365 = vmatpush.msrb.mxu1 %v20811_v23  ;;  %14207 = vmatpush.msra.mxu0 %v20813_v41  ;;  %v20820_v23 = vld [vmem:[#allocation107_spill] sm:$0xff]  ;;  %20822 = vst [vmem:[#allocation108_spill] sm:$0xff] %v19192_v58 }
 0x922   :  { %14429 = vmatpush.msrb.mxu3 %v20816_v52  ;;  %14392 = vmatpush.msrb.mxu2 %v20080_v32  ;;  %v12569_v52 = vadd.f32 %v12568_v7, %v12536_v18 }
 0x923   :  { %14330 = vmatpush.msrb.mxu0 %v20815_v17  ;;  %14367 = vmatpush.msrb.mxu1 %v20813_v41  ;;  %v12593_v17 = vpop.f32.mrf.mxu3 }
 0x924   :  { %14435 = vmatpush.msrb.mxu3 %v20818_v22  ;;  %14394 = vmatpush.msrb.mxu2 %v20083_v40 }
 0x925   :  { %14334 = vmatpush.msrb.mxu0 %v20817_v44  ;;  %v12594_v44 = vadd.f32 %v12593_v17, %v12569_v52 }
 0x926   :  { %14441 = vmatpush.msrb.mxu3 %v20820_v23  ;;  %14396 = vmatpush.msrb.mxu2 %v20086_v48 }
 0x927   :  { %14338 = vmatpush.msrb.mxu0 %v20819_v42 }
 0x929   :  { %14342 = vmatpush.msrb.mxu0 %v20821_v37 }
 0x92a   :  { %v12667_v41 = vpop.f32.mrf.mxu1 }
 0x932   :  { %v12626_v62 = vpop.f32.mrf.mxu0  ;;  %v12697_v22 = vpop.f32.mrf.mxu2 }
 0x933   :  { %v12627_v21 = vadd.f32 %v12626_v62, %v12594_v44  ;;  %v12782_v2 = vpop.f32.mrf.mxu1 }
 0x934   :  { %v12724_v27 = vpop.f32.mrf.mxu3 }
 0x935   :  { %v12668_v15 = vadd.f32 %v12667_v41, %v12627_v21 }
 0x937   :  { %v12698_v42 = vadd.f32 %v12697_v22, %v12668_v15 }
 0x939   :  { %v12725_v1 = vadd.f32 %v12724_v27, %v12698_v42 }
 0x93a   :  { %v12757_v23 = vpop.f32.mrf.mxu0  ;;  %v12831_v45 = vpop.f32.mrf.mxu2 }
 0x93b   :  { %v12758_v8 = vadd.f32 %v12757_v23, %v12725_v1  ;;  %v12929_v14 = vpop.f32.mrf.mxu1 }
 0x93c   :  { %v12872_v29 = vpop.f32.mrf.mxu3 }
 0x93d   :  { %v12783_v37 = vadd.f32 %v12782_v2, %v12758_v8  ;;  %v12873_v13 = vadd.f32 %v12872_v29, %v12831_v45 }
 0x93f   :  { %v12785_v62 = vadd.f32 %v19192_v58, %v12783_v37 }
 0x941   :  { %v15443_v27 = vmul.f32 -1.442695, %v12785_v62 }
 0x942   :  { %v12902_v53 = vpop.f32.mrf.mxu0  ;;  %v12962_v20 = vpop.f32.mrf.mxu2 }
 0x943   :  { %v12903_v7 = vadd.f32 %v12902_v53, %v12873_v13  ;;  %v13057_v18 = vpop.f32.mrf.mxu1  ;;  %15593 = vpow2.f32 %v15443_v27 }
 0x944   :  { %v12987_v21 = vpop.f32.mrf.mxu3 }
 0x945   :  { %v12930_v15 = vadd.f32 %v12929_v14, %v12903_v7 }
 0x947   :  { %v12963_v41 = vadd.f32 %v12962_v20, %v12930_v15  ;;  %v19198_v20 = vld [vmem:[%s19411_s8 + $0x1] ss:$0 sm:$0xff] }
 0x948   :  { %20823 = vst [vmem:[#allocation111_spill] sm:$0xff] %v19198_v20 }
 0x949   :  { %v12988_v1 = vadd.f32 %v12987_v21, %v12963_v41  ;;  %v15594_v42 = vpop.eup %15593 }
 0x94a   :  { %v13016_v17 = vpop.f32.mrf.mxu0  ;;  %v13087_v52 = vpop.f32.mrf.mxu2  ;;  %v12789_v53 = vadd.f32 1.0, %v15594_v42 }
 0x94b   :  { %v13017_v29 = vadd.f32 %v13016_v17, %v12988_v1  ;;  %v13172_v23 = vpop.f32.mrf.mxu1 }
 0x94c   :  { %v13114_v2 = vpop.f32.mrf.mxu3  ;;  %15595 = vrcp.f32 %v12789_v53  ;;  %vm12795_vm5 = vweird.f32 %v12789_v53  ;;  %v12799_v60 = vand.u32 2147483647, %v12789_v53 }
 0x94d   :  { %v13058_v44 = vadd.f32 %v13057_v18, %v13017_v29  ;;  %v19204_v29 = vld [vmem:[%s19411_s8 + $0x2] ss:$0 sm:$0xff] }
 0x94e   :  { %20824 = vst [vmem:[#allocation115_spill] sm:$0xff] %v19204_v29  ;;  %vm12800_vm7 = vcmp.eq.f32.partialorder %v12799_v60, 8.507059e+37 }
 0x94f   :  { %v13088_v22 = vadd.f32 %v13087_v52, %v13058_v44 }
 0x951   :  { %v13115_v45 = vadd.f32 %v13114_v2, %v13088_v22 }
 0x952   :  { %v13147_v8 = vpop.f32.mrf.mxu0  ;;  %v13221_v10 = vpop.f32.mrf.mxu2 }
 0x953   :  { %v13148_v37 = vadd.f32 %v13147_v8, %v13115_v45  ;;  %v13319_v21 = vpop.f32.mrf.mxu1  ;;  %v15596_v41 = vpop.eup %15595  ;;  %v13222_v2 = vadd.f32 %v19204_v29, %v13221_v10  ;;  %v19210_v8 = vld [vmem:[%s19412_s9] ss:$0 sm:$0xff] }
 0x954   :  { %v13262_v14 = vpop.f32.mrf.mxu3  ;;  %v12791_v17 = vmul.f32 %v15596_v41, %v12789_v53  ;;  %vm12796_vm3 = vweird.f32 %v15596_v41 }
 0x955   :  { %v13173_v13 = vadd.f32 %v13172_v23, %v13148_v37  ;;  %v13263_v45 = vadd.f32 %v13262_v14, %v13222_v2  ;;  %v12801_v14 = vand.u32 2147483648, %v12789_v53  ;;  %vm12797_vm6 = vmor %vm12795_vm5, %vm12796_vm3  ;;  %vm15352_vm5 = vcmask 261126  }
 0x956   :  { %v12792_v22 = vsub.f32 1.0, %v12791_v17 }
 0x957   :  { %v13175_v62 = vadd.f32 %v19198_v20, %v13173_v13 }
 0x959   :  { %v15444_v7 = vmul.f32 -1.442695, %v13175_v62 }
 0x95b   :  { %15597 = vpow2.f32 %v15444_v7  ;;  %v12793_v7 = vmul.f32 %v15596_v41, %v12792_v22 }
 0x95c   :  { %v13292_v15 = vpop.f32.mrf.mxu0  ;;  %v13352_v27 = vpop.f32.mrf.mxu2 }
 0x95d   :  { %v13447_v44 = vpop.f32.mrf.mxu1  ;;  %v13293_v13 = vadd.f32 %v13292_v15, %v13263_v45  ;;  %v12794_v6 = vadd.f32 %v15596_v41, %v12793_v7  ;;  %v12802_v45 = vor.u32 1.1754944e-38, %v12801_v14 }
 0x95e   :  { %v13377_v18 = vpop.f32.mrf.mxu3 }
 0x95f   :  { %v13320_v17 = vadd.f32 %v13319_v21, %v13293_v13 }
 0x961   :  { %v15598_v1 = vpop.eup %15597  ;;  %v13353_v15 = vadd.f32 %v13352_v27, %v13320_v17 }
 0x962   :  { %v13179_v52 = vadd.f32 1.0, %v15598_v1 }
 0x963   :  { %v13378_v13 = vadd.f32 %v13377_v18, %v13353_v15 }
 0x964   :  { %15599 = vrcp.f32 %v13179_v52  ;;  %vm13185_vm9 = vweird.f32 %v13179_v52  ;;  %v13189_v7 = vand.u32 2147483647, %v13179_v52 }
 0x966   :  { %v13406_v42 = vpop.f32.mrf.mxu0  ;;  %v13477_v23 = vpop.f32.mrf.mxu2  ;;  %vm13190_vm11 = vcmp.eq.f32.partialorder %v13189_v7, 8.507059e+37 }
 0x967   :  { %v13407_v37 = vadd.f32 %v19210_v8, %v13406_v42  ;;  %v13562_v2 = vpop.f32.mrf.mxu1 }
 0x968   :  { %v13504_v20 = vpop.f32.mrf.mxu3 }
 0x969   :  { %v13448_v62 = vadd.f32 %v13447_v44, %v13407_v37  ;;  %v12798_v44 = vsel %vm12797_vm6, %v15596_v41, %v12794_v6 }
 0x96a   :  { %v15600_v1 = vpop.eup %15599 }
 0x96b   :  { %v13181_v58 = vmul.f32 %v15600_v1, %v13179_v52  ;;  %v13478_v10 = vadd.f32 %v13477_v23, %v13448_v62  ;;  %vm13186_vm8 = vweird.f32 %v15600_v1  ;;  %v12803_v23 = vsel %vm12800_vm7, %v12802_v45, %v12798_v44 }
 0x96c   :  { %vm13187_vm10 = vmor %vm13185_vm9, %vm13186_vm8 }
 0x96d   :  { %v13182_v29 = vsub.f32 1.0, %v13181_v58  ;;  %v13505_v36 = vadd.f32 %v13504_v20, %v13478_v10  ;;  %v13191_v20 = vand.u32 2147483648, %v13179_v52 }
 0x96f   :  { %v13183_v31 = vmul.f32 %v15600_v1, %v13182_v29  ;;  %v13192_v10 = vor.u32 1.1754944e-38, %v13191_v20 }
 0x970   :  { %v13537_v54 = vpop.f32.mrf.mxu0  ;;  %v13598_v42 = vpop.f32.mrf.mxu2 }
 0x971   :  { %v13538_v22 = vadd.f32 %v13537_v54, %v13505_v36  ;;  %v13184_v58 = vadd.f32 %v15600_v1, %v13183_v31  ;;  %v13696_v27 = vpop.f32.mrf.mxu1 }
 0x972   :  { %v13639_v21 = vpop.f32.mrf.mxu3 }
 0x973   :  { %v13563_v37 = vadd.f32 %v13562_v2, %v13538_v22  ;;  %v13188_v29 = vsel %vm13187_vm10, %v15600_v1, %v13184_v58  ;;  %v13640_v6 = vadd.f32 %v13639_v21, %v13598_v42 }
 0x974   :  { %v13193_v36 = vsel %vm13190_vm11, %v13192_v10, %v13188_v29 }
 0x975   :  { %v13565_v62 = vmul.f32 %v13563_v37, %v12803_v23  ;;  %v13568_v31 = vsub.f32 1.0, %v13193_v36  ;;  %v13570_v52 = vmul.f32 %v13193_v36, %v18882_v46 }
 0x977   :  { %v13566_v53 = vadd.f32 %v13565_v62, %v13378_v13 }
 0x979   :  { %15601 = vtanh.f32 %v13566_v53 }
 0x97a   :  { %v13669_v54 = vpop.f32.mrf.mxu0  ;;  %v13729_v60 = vpop.f32.mrf.mxu2 }
 0x97b   :  { %v13670_v41 = vadd.f32 %v13669_v54, %v13640_v6  ;;  %v13824_v1 = vpop.f32.mrf.mxu1 }
 0x97c   :  { %v13754_v14 = vpop.f32.mrf.mxu3 }
 0x97d   :  { %v13697_v17 = vadd.f32 %v13696_v27, %v13670_v41 }
 0x97f   :  { %v15602_v2 = vpop.eup %15601  ;;  %v13730_v18 = vadd.f32 %v13729_v60, %v13697_v17 }
 0x980   :  { %v13569_v15 = vmul.f32 %v15602_v2, %v13568_v31 }
 0x981   :  { %v13755_v44 = vadd.f32 %v13754_v14, %v13730_v18 }
 0x982   :  { %v19214_v22 = vadd.f32 %v13570_v52, %v13569_v15 }
 0x983   :  { %v13943_v45 = vrot.slane %v13755_v44, 2 }
 0x984   :  { %v14186_v42 = vsel %vm417_vm4, %v19214_v22, 0  ;;  %v13783_v37 = vpop.f32.mrf.mxu0  ;;  %v13854_v23 = vpop.f32.mrf.mxu2 }
 0x985   :  { %v19218_v58 = vand.u32 4294901760, %v14186_v42  ;;  %v13945_v21 = vadd.f32 %v13943_v45, %v18212_v28  ;;  %v13825_v20 = vadd.f32 %v13824_v1, %v13783_v37  ;;  %v13939_v29 = vpop.f32.mrf.mxu1 }
 0x986   :  { %v13881_v62 = vpop.f32.mrf.mxu3 }
 0x987   :  { %v15445_v13 = vmul.f32 -1.442695, %v13945_v21  ;;  %14254 = vmatmul.f32.vlgmr.msra.gmra.mxu1 %v19218_v58  ;;  %v19223_v46 = vsub.f32 %v14186_v42, %v19218_v58  ;;  %v13855_v7 = vadd.f32 %v13854_v23, %v13825_v20 }
 0x988   :  { %14490 = vmatpush.msra.mxu1 %v20077_v11 }
 0x989   :  { %15603 = vpow2.f32 %v15445_v13  ;;  %14284 = vmatmul.f32.vlgmr.msra.gmra.mxu2 %v19223_v46  ;;  %v19228_v53 = vand.u32 4294901760, %v19223_v46  ;;  %v13882_v10 = vadd.f32 %v13881_v62, %v13855_v7 }
 0x98a   :  { %14492 = vmatpush.msra.mxu1 %v20080_v32  ;;  %14519 = vmatpush.msra.mxu2 %v20215_v61 }
 0x98b   :  { %14311 = vmatmul.f32.vlgmr.msra.gmra.mxu3 %v19228_v53  ;;  %v14211_v28 = vsub.f32 %v19223_v46, %v19228_v53 }
 0x98c   :  { %14494 = vmatpush.msra.mxu1 %v20083_v40  ;;  %14550 = vmatpush.msra.mxu3 %v20077_v11 }
 0x98d   :  { %v19237_v27 = vand.u32 4294901760, %v14211_v28  ;;  %14523 = vmatpush.msra.mxu2 %v20216_v25  ;;  %v15641_v25 = vld [vmem:[%s19408_s5] ss:$0 sm:$0xff]  ;;  %s15670_s5 = smov [#allocation2]  }
 0x98e   :  { %v13914_v6 = vpop.f32.mrf.mxu0  ;;  %v14014_v54 = vpop.f32.mrf.mxu2  ;;  %14496 = vmatpush.msra.mxu1 %v20086_v48  ;;  %14552 = vmatpush.msra.mxu3 %v20080_v32  ;;  %s15359_s2 = sshll.u32 %s15670_s5, 4  ;;  %s15360_s2 = int_to_ptr.vmem [resolvable:$true] %s15359_s2 }
 0x98f   :  { %v15604_v61 = vpop.eup %15603  ;;  %v13915_v60 = vadd.f32 %v13914_v6, %v13882_v10  ;;  %14213 = vmatmul.f32.vlgmr.msra.gmra.mxu0 %v19237_v27  ;;  %14369 = vmatmul.f32.vlgmr.msrb.gmra.mxu1 %v19218_v58  ;;  %v14015_v41 = vadd.f32 %v15641_v25, %v14014_v54 }
 0x990   :  { %v13949_v36 = vadd.f32 1.0, %v15604_v61  ;;  %14461 = vmatpush.msra.mxu0 %v20217_v9  ;;  %14554 = vmatpush.msra.mxu3 %v20083_v40  ;;  %v14055_v32 = vpop.f32.mrf.mxu3 }
 0x991   :  { %v13940_v11 = vadd.f32 %v13939_v29, %v13915_v60  ;;  %14628 = vmatpush.msrb.mxu1 %v20333_v63  ;;  %14527 = vmatpush.msra.mxu2 %v20334_v34  ;;  %v14056_v9 = vadd.f32 %v14055_v32, %v14015_v41 }
 0x992   :  { %15605 = vrcp.f32 %v13949_v36  ;;  %14464 = vmatpush.msra.mxu0 %v20335_v24  ;;  %14556 = vmatpush.msra.mxu3 %v20086_v48  ;;  %v14112_v24 = vpop.f32.mrf.mxu1  ;;  %v13961_v14 = vand.u32 2147483648, %v13949_v36  ;;  %v13959_v2 = vand.u32 2147483647, %v13949_v36  ;;  %vm13955_vm13 = vweird.f32 %v13949_v36 }
 0x993   :  { %v13966_v17 = vrot.slane %v13940_v11, 2  ;;  %14634 = vmatpush.msrb.mxu1 %v20463_v47  ;;  %14531 = vmatpush.msra.mxu2 %v20464_v39 }
 0x994   :  { %14467 = vmatpush.msra.mxu0 %v20466_v5  ;;  %v13962_v45 = vor.u32 1.1754944e-38, %v13961_v14  ;;  %vm13960_vm15 = vcmp.eq.f32.partialorder %v13959_v2, 8.507059e+37  ;;  %v20847_v14 = vld [vmem:[#allocation133_spill] sm:$0xff]  ;;  %v20848_v2 = vld [vmem:[#allocation147_spill] sm:$0xff] }
 0x995   :  { %v13968_v40 = vadd.f32 %v13966_v17, %v18251_v56  ;;  %14640 = vmatpush.msrb.mxu1 %v20587_v3 }
 0x996   :  { %v14085_v63 = vpop.f32.mrf.mxu0  ;;  %14470 = vmatpush.msra.mxu0 %v20588_v19 }
 0x997   :  { %v15446_v34 = vmul.f32 -1.442695, %v13968_v40  ;;  %v14086_v31 = vadd.f32 %v14085_v63, %v14056_v9  ;;  %14344 = vmatmul.f32.vlgmr.msrb.gmra.mxu0 %v19218_v58  ;;  %14646 = vmatpush.msrb.mxu1 %v20705_v51  ;;  %v14145_v56 = vpop.f32.mrf.mxu2 }
 0x998   :  { %v15606_v48 = vpop.eup %15605  ;;  %14595 = vmatpush.msrb.mxu0 %v20108_v26 }
 0x999   :  { %15607 = vpow2.f32 %v15446_v34  ;;  %v14113_v47 = vadd.f32 %v14112_v24, %v14086_v31  ;;  %v13951_v39 = vmul.f32 %v15606_v48, %v13949_v36  ;;  %vm13956_vm12 = vweird.f32 %v15606_v48  ;;  %v14170_v15 = vpop.f32.mrf.mxu3  ;;  %v20838_v31 = vld [vmem:[#allocation138_spill] sm:$0xff] }
 0x99a   :  { %14597 = vmatpush.msrb.mxu0 %v20109_v43  ;;  %vm13957_vm14 = vmor %vm13955_vm13, %vm13956_vm12  ;;  %v14181_v36 = vrot.slane %v18933_v0, 6  ;;  %v20840_v24 = vld [vmem:[#allocation154_spill] sm:$0xff] }
 0x99b   :  { %v13952_v5 = vsub.f32 1.0, %v13951_v39  ;;  %v14146_v3 = vadd.f32 %v14145_v56, %v14113_v47  ;;  %v20841_v47 = vld [vmem:[#allocation128_spill] sm:$0xff]  ;;  %v20842_v39 = vld [vmem:[#allocation145_spill] sm:$0xff] }
 0x99c   :  { %14599 = vmatpush.msrb.mxu0 %v20110_v38  ;;  %v20843_v56 = vld [vmem:[#allocation157_spill] sm:$0xff] }
 0x99d   :  { %v13953_v19 = vmul.f32 %v15606_v48, %v13952_v5  ;;  %v14171_v44 = vadd.f32 %v14170_v15, %v14146_v3  ;;  %v20844_v5 = vld [vmem:[#allocation131_spill] sm:$0xff]  ;;  %v20845_v3 = vld [vmem:[#allocation160_spill] sm:$0xff] }
 0x99e   :  { %14601 = vmatpush.msrb.mxu0 %v20111_v57  ;;  %v20851_v15 = vld [vmem:[#allocation139_spill] sm:$0xff] }
 0x99f   :  { %v15608_v51 = vpop.eup %15607  ;;  %v13954_v18 = vadd.f32 %v15606_v48, %v13953_v19  ;;  %v14174_v37 = vrot.slane %v14171_v44, 2  ;;  %v20846_v19 = vld [vmem:[#allocation143_spill] sm:$0xff] }
 0x9a0   :  { %v13972_v52 = vadd.f32 1.0, %v15608_v51  ;;  %v20849_v51 = vld [vmem:[#allocation135_spill] sm:$0xff] }
 0x9a1   :  { %v13958_v1 = vsel %vm13957_vm14, %v15606_v48, %v13954_v18  ;;  %v20839_v48 = vld [vmem:[#allocation141_spill] sm:$0xff]  ;;  %v20853_v44 = vld [vmem:[#allocation167_spill] sm:$0xff] }
 0x9a2   :  { %15609 = vrcp.f32 %v13972_v52  ;;  %v13963_v42 = vsel %vm13960_vm15, %v13962_v45, %v13958_v1  ;;  %v13984_v7 = vand.u32 2147483648, %v13972_v52  ;;  %v13982_v29 = vand.u32 2147483647, %v13972_v52  ;;  %v20850_v18 = vld [vmem:[#allocation149_spill] sm:$0xff]  ;;  %v20854_v1 = vld [vmem:[#allocation144_spill] sm:$0xff] }
 0x9a3   :  { %v14176_v23 = vmul.f32 %v14174_v37, %v13963_v42  ;;  %vm13978_vm1 = vweird.f32 %v13972_v52  ;;  %v20855_v45 = vld [vmem:[#allocation168_spill] sm:$0xff]  ;;  %v20856_v42 = vld [vmem:[#allocation155_spill] sm:$0xff]  ;;  %v20857_v37 = vld [vmem:[#allocation146_spill] sm:$0xff] }
 0x9a4   :  { %v13985_v6 = vor.u32 1.1754944e-38, %v13984_v7  ;;  %vm13983_vm3 = vcmp.eq.f32.partialorder %v13982_v29, 8.507059e+37  ;;  %v20863_v7 = vld [vmem:[#allocation162_spill] sm:$0xff]  ;;  %v20865_v29 = vld [vmem:[#allocation164_spill] sm:$0xff] }
 0x9a5   :  { %v14177_v13 = vadd.f32 %v14176_v23, %v18279_v35  ;;  %v20858_v23 = vld [vmem:[#allocation169_spill] sm:$0xff] }
 0x9a7   :  { %15611 = vtanh.f32 %v14177_v13  ;;  %v20861_v13 = vld [vmem:[#allocation148_spill] sm:$0xff] }
 0x9a8   :  { %v15610_v21 = vpop.eup %15609 }
 0x9a9   :  { %v13974_v20 = vmul.f32 %v15610_v21, %v13972_v52  ;;  %vm13979_vm0 = vweird.f32 %v15610_v21  ;;  %v20852_v52 = vld [vmem:[#allocation151_spill] sm:$0xff] }
 0x9aa   :  { %vm13980_vm2 = vmor %vm13978_vm1, %vm13979_vm0 }
 0x9ab   :  { %v13975_v62 = vsub.f32 1.0, %v13974_v20  ;;  %v20860_v20 = vld [vmem:[#allocation152_spill] sm:$0xff] }
 0x9ad   :  { %v13976_v28 = vmul.f32 %v15610_v21, %v13975_v62  ;;  %v15612_v11 = vpop.eup %15611  ;;  %v20862_v62 = vld [vmem:[#allocation170_spill] sm:$0xff] }
 0x9af   :  { %v13977_v10 = vadd.f32 %v15610_v21, %v13976_v28  ;;  %v20864_v28 = vld [vmem:[#allocation153_spill] sm:$0xff] }
 0x9b1   :  { %v13981_v54 = vsel %vm13980_vm2, %v15610_v21, %v13977_v10  ;;  %v20859_v21 = vld [vmem:[#allocation158_spill] sm:$0xff]  ;;  %v20866_v10 = vld [vmem:[#allocation156_spill] sm:$0xff] }
 0x9b2   :  { %v13986_v61 = vsel %vm13983_vm3, %v13985_v6, %v13981_v54  ;;  %v20867_v6 = vld [vmem:[#allocation159_spill] sm:$0xff]  ;;  %v20868_v54 = vld [vmem:[#allocation161_spill] sm:$0xff] }
 0x9b3   :  { %v14179_v60 = vsub.f32 1.0, %v13986_v61  ;;  %v14183_v41 = vmul.f32 %v14181_v36, %v13986_v61  ;;  %v20870_v61 = vld [vmem:[#allocation165_spill] sm:$0xff] }
 0x9b5   :  { %v14180_v25 = vmul.f32 %v15612_v11, %v14179_v60  ;;  %v20871_v60 = vld [vmem:[#allocation166_spill] sm:$0xff] }
 0x9b7   :  { %v14184_v35 = vadd.f32 %v14183_v41, %v14180_v25 }
 0x9b9   :  { %v14374_v32 = vrot.slane %v14184_v35, 6  ;;  %15353 = vst.msk [vmem:[#allocation2 - $0x6] sm:$0xc0] %vm15352_vm5, %v14184_v35 }
 0x9bb   :  { %v14375_v17 = vsel %vm417_vm4, %v14374_v32, 0 }
 0x9bc   :  { %v19269_v40 = vand.u32 4294901760, %v14375_v17 }
 0x9be   :  { %14443 = vmatmul.f32.vlgmr.msrb.gmra.mxu3 %v19269_v40  ;;  %v19273_v9 = vsub.f32 %v14375_v17, %v19269_v40 }
 0x9bf   :  { %14695 = vmatpush.msrb.mxu3 %v20108_v26 }
 0x9c0   :  { %14473 = vmatmul.f32.vlgmr.msra.gmra.mxu0 %v19273_v9  ;;  %v19278_v0 = vand.u32 4294901760, %v19273_v9 }
 0x9c1   :  { %14697 = vmatpush.msrb.mxu3 %v20109_v43  ;;  %14724 = vmatpush.msra.mxu0 %v20114_v59  ;;  %v20827_v59 = vld [vmem:[#allocation122_spill] sm:$0xff] }
 0x9c2   :  { %14500 = vmatmul.f32.vlgmr.msra.gmra.mxu1 %v19278_v0  ;;  %v14400_v63 = vsub.f32 %v19273_v9, %v19278_v0 }
 0x9c3   :  { %14699 = vmatpush.msrb.mxu3 %v20110_v38  ;;  %14728 = vmatpush.msra.mxu0 %v20115_v50  ;;  %v20829_v50 = vld [vmem:[#allocation116_spill] sm:$0xff] }
 0x9c4   :  { %v14401_v34 = vand.u32 4294901760, %v14400_v63  ;;  %14755 = vmatpush.msra.mxu1 %v20108_v26  ;;  %v20825_v26 = vld [vmem:[#allocation113_spill] sm:$0xff] }
 0x9c5   :  { %14701 = vmatpush.msrb.mxu3 %v20111_v57  ;;  %14732 = vmatpush.msra.mxu0 %v20116_v55  ;;  %v20831_v55 = vld [vmem:[#allocation130_spill] sm:$0xff] }
 0x9c6   :  { %14402 = vmatmul.f32.vlgmr.msrb.gmra.mxu2 %v14401_v34  ;;  %14558 = vmatmul.f32.vlgmr.msra.gmra.mxu3 %v19269_v40 }
 0x9c7   :  { %14757 = vmatpush.msra.mxu1 %v20109_v43  ;;  %14666 = vmatpush.msrb.mxu2 %v20117_v33  ;;  %v20826_v43 = vld [vmem:[#allocation140_spill] sm:$0xff]  ;;  %v20832_v33 = vld [vmem:[#allocation123_spill] sm:$0xff] }
 0x9c8   :  { %14607 = vmatmul.f32.vlgmr.msrb.gmra.mxu0 %v19237_v27  ;;  %14813 = vmatpush.msra.mxu3 %v20118_v12  ;;  %v20833_v12 = vld [vmem:[#allocation132_spill] sm:$0xff] }
 0x9c9   :  { %14736 = vmatpush.msra.mxu0 %v20119_v16  ;;  %14759 = vmatpush.msra.mxu1 %v20110_v38  ;;  %v20828_v38 = vld [vmem:[#allocation127_spill] sm:$0xff]  ;;  %v20834_v16 = vld [vmem:[#allocation126_spill] sm:$0xff] }
 0x9ca   :  { %14648 = vmatmul.f32.vlgmr.msrb.gmra.mxu1 %v19218_v58  ;;  %14669 = vmatpush.msrb.mxu2 %v20120_v49  ;;  %v20835_v49 = vld [vmem:[#allocation129_spill] sm:$0xff] }
 0x9cb   :  { %14761 = vmatpush.msra.mxu1 %v20111_v57  ;;  %14819 = vmatpush.msra.mxu3 %v20121_v30  ;;  %v20830_v57 = vld [vmem:[#allocation142_spill] sm:$0xff]  ;;  %v20836_v30 = vld [vmem:[#allocation136_spill] sm:$0xff] }
 0x9cc   :  { %14851 = vmatpush.msrb.mxu0 %v20706_v4  ;;  %14672 = vmatpush.msrb.mxu2 %v20825_v26  ;;  %v20837_v4 = vld [vmem:[#allocation150_spill] sm:$0xff] }
 0x9cd   :  { %14825 = vmatpush.msra.mxu3 %v20826_v43  ;;  %14880 = vmatpush.msrb.mxu1 %v20827_v59 }
 0x9ce   :  { %14533 = vmatmul.f32.vlgmr.msra.gmra.mxu2 %v19269_v40  ;;  %14705 = vmatmul.f32.vlgmr.msrb.gmra.mxu3 %v19228_v53 }
 0x9cf   :  { %14854 = vmatpush.msrb.mxu0 %v20828_v38  ;;  %14675 = vmatpush.msrb.mxu2 %v20829_v50 }
 0x9d0   :  { %14738 = vmatmul.f32.vlgmr.msra.gmra.mxu0 %v19218_v58  ;;  %14831 = vmatpush.msra.mxu3 %v20830_v57 }
 0x9d1   :  { %14857 = vmatpush.msrb.mxu0 %v20831_v55  ;;  %14882 = vmatpush.msrb.mxu1 %v20832_v33 }
 0x9d2   :  { %14763 = vmatmul.f32.vlgmr.msra.gmra.mxu1 %v19218_v58  ;;  %14780 = vmatpush.msra.mxu2 %v20827_v59 }
 0x9d3   :  { %14860 = vmatpush.msrb.mxu0 %v20833_v12  ;;  %14884 = vmatpush.msrb.mxu1 %v20834_v16 }
 0x9d4   :  { %14940 = vmatpush.msrb.mxu3 %v20827_v59  ;;  %14782 = vmatpush.msra.mxu2 %v20832_v33 }
 0x9d5   :  { %14886 = vmatpush.msrb.mxu1 %v20835_v49  ;;  %14985 = vmatpush.msra.mxu0 %v20836_v30 }
 0x9d6   :  { %14678 = vmatmul.f32.vlgmr.msrb.gmra.mxu2 %v19223_v46  ;;  %14833 = vmatmul.f32.vlgmr.msra.gmra.mxu3 %v19269_v40 }
 0x9d7   :  { %14942 = vmatpush.msrb.mxu3 %v20832_v33  ;;  %14784 = vmatpush.msra.mxu2 %v20834_v16 }
 0x9d8   :  { %14863 = vmatmul.f32.vlgmr.msrb.gmra.mxu0 %v19273_v9  ;;  %15018 = vmatpush.msra.mxu1 %v20837_v4 }
 0x9d9   :  { %14944 = vmatpush.msrb.mxu3 %v20834_v16  ;;  %14987 = vmatpush.msra.mxu0 %v20838_v31 }
 0x9da   :  { %14890 = vmatmul.f32.vlgmr.msrb.gmra.mxu1 %v19278_v0  ;;  %14786 = vmatpush.msra.mxu2 %v20835_v49 }
 0x9db   :  { %14946 = vmatpush.msrb.mxu3 %v20835_v49  ;;  %14989 = vmatpush.msra.mxu0 %v20839_v48 }
 0x9dc   :  { %15024 = vmatpush.msra.mxu1 %v20840_v24  ;;  %14909 = vmatpush.msrb.mxu2 %v20841_v47 }
 0x9dd   :  { %14991 = vmatpush.msra.mxu0 %v20842_v39  ;;  %15085 = vmatpush.msra.mxu3 %v20836_v30 }
 0x9de   :  { %14792 = vmatmul.f32.vlgmr.msra.gmra.mxu2 %v14401_v34  ;;  %14948 = vmatmul.f32.vlgmr.msrb.gmra.mxu3 %v19269_v40 }
 0x9df   :  { %15030 = vmatpush.msra.mxu1 %v20843_v56  ;;  %14913 = vmatpush.msrb.mxu2 %v20844_v5 }
 0x9e0   :  { %14997 = vmatmul.f32.vlgmr.msra.gmra.mxu0 %v14401_v34  ;;  %15087 = vmatpush.msra.mxu3 %v20838_v31 }
 0x9e1   :  { %15036 = vmatpush.msra.mxu1 %v20845_v3  ;;  %15114 = vmatpush.msrb.mxu0 %v20846_v19 }
 0x9e2   :  { %14917 = vmatpush.msrb.mxu2 %v20847_v14  ;;  %15038 = vmatmul.f32.vlgmr.msra.gmra.mxu1 %v19269_v40 }
 0x9e3   :  { %15089 = vmatpush.msra.mxu3 %v20839_v48  ;;  %15118 = vmatpush.msrb.mxu0 %v20848_v2 }
 0x9e4   :  { %15145 = vmatpush.msrb.mxu1 %v20836_v30  ;;  %14921 = vmatpush.msrb.mxu2 %v20849_v51  ;;  %v20872_v30 = vld [vmem:[#allocation108_spill] sm:$0xff] }
 0x9e5   :  { %15091 = vmatpush.msra.mxu3 %v20842_v39  ;;  %15122 = vmatpush.msrb.mxu0 %v20850_v18 }
 0x9e6   :  { %15147 = vmatpush.msrb.mxu1 %v20838_v31  ;;  %14923 = vmatmul.f32.vlgmr.msrb.gmra.mxu2 %v19269_v40 }
 0x9e7   :  { %15056 = vmatpush.msra.mxu2 %v20851_v15  ;;  %15095 = vmatmul.f32.vlgmr.msra.gmra.mxu3 %v19278_v0 }
 0x9e8   :  { %15126 = vmatpush.msrb.mxu0 %v20852_v52  ;;  %15149 = vmatpush.msrb.mxu1 %v20839_v48 }
 0x9e9   :  { %15203 = vmatpush.msrb.mxu3 %v20853_v44  ;;  %15059 = vmatpush.msra.mxu2 %v20854_v1 }
 0x9ea   :  { %15128 = vmatmul.f32.vlgmr.msrb.gmra.mxu0 %v19269_v40  ;;  %15151 = vmatpush.msrb.mxu1 %v20842_v39 }
 0x9eb   :  { %15209 = vmatpush.msrb.mxu3 %v20855_v45  ;;  %15241 = vmatpush.msra.mxu0 %v20856_v42 }
 0x9ec   :  { %15062 = vmatpush.msra.mxu2 %v20857_v37  ;;  %15153 = vmatmul.f32.vlgmr.msrb.gmra.mxu1 %v19269_v40 }
 0x9ed   :  { %15215 = vmatpush.msrb.mxu3 %v20858_v23  ;;  %15244 = vmatpush.msra.mxu0 %v20859_v21 }
 0x9ee   :  { %15270 = vmatpush.msra.mxu1 %v20860_v20  ;;  %15065 = vmatpush.msra.mxu2 %v20861_v13 }
 0x9ef   :  { %15221 = vmatpush.msrb.mxu3 %v20862_v62  ;;  %15247 = vmatpush.msra.mxu0 %v20863_v7  ;;  %v20873_v7 = vld [vmem:[#allocation111_spill] sm:$0xff] }
 0x9f0   :  { %15272 = vmatpush.msra.mxu1 %v20864_v28  ;;  %15068 = vmatmul.f32.vlgmr.msra.gmra.mxu2 %v19273_v9 }
 0x9f1   :  { %15170 = vmatpush.msrb.mxu2 %v20860_v20  ;;  %15223 = vmatmul.f32.vlgmr.msrb.gmra.mxu3 %v19218_v58 }
 0x9f2   :  { %15250 = vmatpush.msra.mxu0 %v20865_v29  ;;  %15274 = vmatpush.msra.mxu1 %v20866_v10 }
 0x9f3   :  { %15330 = vmatpush.msra.mxu3 %v20860_v20  ;;  %15172 = vmatpush.msrb.mxu2 %v20864_v28 }
 0x9f4   :  { %15253 = vmatmul.f32.vlgmr.msra.gmra.mxu0 %v19223_v46  ;;  %15276 = vmatpush.msra.mxu1 %v20867_v6  ;;  %v20869_v46 = vld [vmem:[#allocation163_spill] sm:$0xff] }
 0x9f5   :  { %15332 = vmatpush.msra.mxu3 %v20864_v28  ;;  %15174 = vmatpush.msrb.mxu2 %v20866_v10 }
 0x9f6   :  { %15280 = vmatmul.f32.vlgmr.msra.gmra.mxu1 %v19228_v53 }
 0x9f7   :  { %15334 = vmatpush.msra.mxu3 %v20866_v10  ;;  %15176 = vmatpush.msrb.mxu2 %v20867_v6 }
 0x9f8   :  { %15182 = vmatmul.f32.vlgmr.msrb.gmra.mxu2 %v19237_v27 }
 0x9f9   :  { %15336 = vmatpush.msra.mxu3 %v20867_v6  ;;  %15299 = vmatpush.msra.mxu2 %v20868_v54 }
 0x9fa   :  { %15338 = vmatmul.f32.vlgmr.msra.gmra.mxu3 %v19218_v58 }
 0x9fb   :  { %15303 = vmatpush.msra.mxu2 %v20869_v46 }
 0x9fd   :  { %15307 = vmatpush.msra.mxu2 %v20870_v61 }
 0x9ff   :  { %15311 = vmatpush.msra.mxu2 %v20871_v60  ;;  %v20874_v60 = vld [vmem:[#allocation115_spill] sm:$0xff] }
 0xa00   :  { %15313 = vmatmul.f32.vlgmr.msra.gmra.mxu2 %v19218_v58 }
 0xa04   :  { %v14255_v36 = vpop.f32.mrf.mxu1 }
 0xa0c   :  { %v14214_v53 = vpop.f32.mrf.mxu0  ;;  %v14285_v27 = vpop.f32.mrf.mxu2 }
 0xa0d   :  { %v14256_v25 = vadd.f32 %v14255_v36, %v14214_v53  ;;  %v14370_v35 = vpop.f32.mrf.mxu1 }
 0xa0e   :  { %v14312_v11 = vpop.f32.mrf.mxu3 }
 0xa0f   :  { %v14286_v32 = vadd.f32 %v14285_v27, %v14256_v25 }
 0xa11   :  { %v14313_v40 = vadd.f32 %v14312_v11, %v14286_v32 }
 0xa14   :  { %v14345_v41 = vpop.f32.mrf.mxu0 }
 0xa15   :  { %v14346_v0 = vadd.f32 %v14345_v41, %v14313_v40 }
 0xa17   :  { %v14371_v34 = vadd.f32 %v14370_v35, %v14346_v0 }
 0xa3d   :  { %v14474_v9 = vpop.f32.mrf.mxu0 }
 0xa3f   :  { %v14501_v63 = vpop.f32.mrf.mxu1 }
 0xa41   :  { %v14444_v17 = vpop.f32.mrf.mxu3 }
 0xa45   :  { %v14608_v50 = vpop.f32.mrf.mxu0 }
 0xa47   :  { %v14649_v57 = vpop.f32.mrf.mxu1 }
 0xa48   :  { %v14650_v48 = vadd.f32 %v14649_v57, %v14608_v50 }
 0xa49   :  { %v14403_v26 = vpop.f32.mrf.mxu2  ;;  %v14559_v43 = vpop.f32.mrf.mxu3 }
 0xa4a   :  { %v14404_v59 = vadd.f32 %v14403_v26, %v14371_v34 }
 0xa4c   :  { %v14445_v38 = vadd.f32 %v14444_v17, %v14404_v59 }
 0xa4d   :  { %v14739_v31 = vpop.f32.mrf.mxu0 }
 0xa4e   :  { %v14475_v58 = vadd.f32 %v14474_v9, %v14445_v38 }
 0xa4f   :  { %v14764_v24 = vpop.f32.mrf.mxu1 }
 0xa50   :  { %v14502_v55 = vadd.f32 %v14501_v63, %v14475_v58 }
 0xa51   :  { %v14534_v33 = vpop.f32.mrf.mxu2  ;;  %v14706_v16 = vpop.f32.mrf.mxu3 }
 0xa52   :  { %v14535_v12 = vadd.f32 %v14534_v33, %v14502_v55 }
 0xa54   :  { %v14560_v49 = vadd.f32 %v14559_v43, %v14535_v12 }
 0xa55   :  { %v14864_v2 = vpop.f32.mrf.mxu0 }
 0xa56   :  { %v14562_v4 = vadd.f32 %v20872_v30, %v14560_v49 }
 0xa57   :  { %v14891_v15 = vpop.f32.mrf.mxu1 }
 0xa58   :  { %v15447_v39 = vmul.f32 -1.442695, %v14562_v4 }
 0xa59   :  { %v14679_v47 = vpop.f32.mrf.mxu2  ;;  %v14834_v3 = vpop.f32.mrf.mxu3 }
 0xa5a   :  { %v14680_v56 = vadd.f32 %v14679_v47, %v14650_v48  ;;  %15613 = vpow2.f32 %v15447_v39 }
 0xa5c   :  { %v14707_v5 = vadd.f32 %v14706_v16, %v14680_v56 }
 0xa5d   :  { %v14998_v20 = vpop.f32.mrf.mxu0 }
 0xa5e   :  { %v14740_v19 = vadd.f32 %v14739_v31, %v14707_v5  ;;  %v14999_v53 = vadd.f32 %v20874_v60, %v14998_v20 }
 0xa5f   :  { %v15039_v62 = vpop.f32.mrf.mxu1 }
 0xa60   :  { %v14765_v14 = vadd.f32 %v14764_v24, %v14740_v19  ;;  %v15614_v52 = vpop.eup %15613  ;;  %v15040_v27 = vadd.f32 %v15039_v62, %v14999_v53 }
 0xa61   :  { %v14793_v51 = vpop.f32.mrf.mxu2  ;;  %v14566_v45 = vadd.f32 1.0, %v15614_v52  ;;  %v14949_v42 = vpop.f32.mrf.mxu3 }
 0xa62   :  { %v14794_v18 = vadd.f32 %v14793_v51, %v14765_v14 }
 0xa63   :  { %15615 = vrcp.f32 %v14566_v45  ;;  %v14578_v50 = vand.u32 2147483648, %v14566_v45  ;;  %vm14572_vm6 = vweird.f32 %v14566_v45  ;;  %v14576_v57 = vand.u32 2147483647, %v14566_v45 }
 0xa64   :  { %v14835_v44 = vadd.f32 %v14834_v3, %v14794_v18 }
 0xa65   :  { %v14579_v4 = vor.u32 1.1754944e-38, %v14578_v50  ;;  %vm14577_vm8 = vcmp.eq.f32.partialorder %v14576_v57, 8.507059e+37 }
 0xa66   :  { %v14865_v1 = vadd.f32 %v14864_v2, %v14835_v44 }
 0xa67   :  { %v15129_v61 = vpop.f32.mrf.mxu0 }
 0xa68   :  { %v14892_v37 = vadd.f32 %v14891_v15, %v14865_v1 }
 0xa69   :  { %v14924_v23 = vpop.f32.mrf.mxu2  ;;  %v15616_v10 = vpop.eup %15615 }
 0xa6a   :  { %v14925_v21 = vadd.f32 %v14924_v23, %v14892_v37  ;;  %v15096_v6 = vpop.f32.mrf.mxu3  ;;  %v14568_v46 = vmul.f32 %v15616_v10, %v14566_v45  ;;  %v15154_v36 = vpop.f32.mrf.mxu1  ;;  %vm14573_vm4 = vweird.f32 %v15616_v10 }
 0xa6b   :  { %vm14574_vm7 = vmor %vm14572_vm6, %vm14573_vm4 }
 0xa6c   :  { %v14950_v13 = vadd.f32 %v14949_v42, %v14925_v21  ;;  %v14569_v25 = vsub.f32 1.0, %v14568_v46 }
 0xa6e   :  { %v14952_v28 = vadd.f32 %v20873_v7, %v14950_v13  ;;  %v14570_v9 = vmul.f32 %v15616_v10, %v14569_v25 }
 0xa70   :  { %v15448_v29 = vmul.f32 -1.442695, %v14952_v28  ;;  %v14571_v26 = vadd.f32 %v15616_v10, %v14570_v9 }
 0xa71   :  { %v15254_v63 = vpop.f32.mrf.mxu0 }
 0xa72   :  { %15617 = vpow2.f32 %v15448_v29  ;;  %v14575_v49 = vsel %vm14574_vm7, %v15616_v10, %v14571_v26 }
 0xa73   :  { %v15069_v54 = vpop.f32.mrf.mxu2  ;;  %v15281_v38 = vpop.f32.mrf.mxu1  ;;  %v14580_v24 = vsel %vm14577_vm8, %v14579_v4, %v14575_v49 }
 0xa74   :  { %v15224_v35 = vpop.f32.mrf.mxu3  ;;  %v15070_v17 = vadd.f32 %v15069_v54, %v15040_v27 }
 0xa76   :  { %v15097_v34 = vadd.f32 %v15096_v6, %v15070_v17 }
 0xa78   :  { %v15618_v11 = vpop.eup %15617  ;;  %v15130_v16 = vadd.f32 %v15129_v61, %v15097_v34 }
 0xa79   :  { %v14956_v41 = vadd.f32 1.0, %v15618_v11 }
 0xa7a   :  { %v15155_v39 = vadd.f32 %v15154_v36, %v15130_v16 }
 0xa7b   :  { %15619 = vrcp.f32 %v14956_v41  ;;  %v15183_v32 = vpop.f32.mrf.mxu2  ;;  %v14968_v47 = vand.u32 2147483648, %v14956_v41  ;;  %vm14962_vm10 = vweird.f32 %v14956_v41  ;;  %v14966_v3 = vand.u32 2147483647, %v14956_v41 }
 0xa7c   :  { %v15184_v40 = vadd.f32 %v19210_v8, %v15183_v32 }
 0xa7d   :  { %v15339_v30 = vpop.f32.mrf.mxu3  ;;  %v14969_v2 = vor.u32 1.1754944e-38, %v14968_v47  ;;  %vm14967_vm12 = vcmp.eq.f32.partialorder %v14966_v3, 8.507059e+37 }
 0xa7e   :  { %v15225_v0 = vadd.f32 %v15224_v35, %v15184_v40 }
 0xa80   :  { %v15255_v43 = vadd.f32 %v15254_v63, %v15225_v0 }
 0xa81   :  { %v15620_v59 = vpop.eup %15619 }
 0xa82   :  { %v14958_v58 = vmul.f32 %v15620_v59, %v14956_v41  ;;  %v15282_v55 = vadd.f32 %v15281_v38, %v15255_v43  ;;  %vm14963_vm9 = vweird.f32 %v15620_v59 }
 0xa83   :  { %v15314_v33 = vpop.f32.mrf.mxu2  ;;  %vm14964_vm11 = vmor %vm14962_vm10, %vm14963_vm9 }
 0xa84   :  { %v14959_v12 = vsub.f32 1.0, %v14958_v58  ;;  %v15315_v8 = vadd.f32 %v15314_v33, %v15282_v55 }
 0xa86   :  { %v14960_v31 = vmul.f32 %v15620_v59, %v14959_v12  ;;  %v15340_v48 = vadd.f32 %v15339_v30, %v15315_v8 }
 0xa88   :  { %v14961_v56 = vadd.f32 %v15620_v59, %v14960_v31  ;;  %v15342_v5 = vmul.f32 %v15340_v48, %v14580_v24 }
 0xa8a   :  { %v15343_v19 = vadd.f32 %v15342_v5, %v15155_v39  ;;  %v14965_v14 = vsel %vm14964_vm11, %v15620_v59, %v14961_v56 }
 0xa8b   :  { %v14970_v51 = vsel %vm14967_vm12, %v14969_v2, %v14965_v14 }
 0xa8c   :  { %15621 = vtanh.f32 %v15343_v19  ;;  %v15345_v18 = vsub.f32 1.0, %v14970_v51  ;;  %v15347_v44 = vmul.f32 %v14970_v51, %v19214_v22 }
 0xa92   :  { %v15622_v15 = vpop.eup %15621 }
 0xa93   :  { %v15346_v52 = vmul.f32 %v15622_v15, %v15345_v18 }
 0xa95   :  { %v15348_v1 = vadd.f32 %v15347_v44, %v15346_v52 }
 0xa97   :  { %v15350_v45 = vrot.slane %v15348_v1, 2 }
 0xa99   :  { %15354 = vst.msk [vmem:[#allocation2 - $0x4] sm:$0xc0] %vm15352_vm5, %v15350_v45 }
 0xa9a   :  { %15367 = dma.vmem_to_hbm [thread:$0]  %s15360_s2, 64, %s15362_s23, [#allocation3], %s15671_s24, %s15671_s24, %s15672_s25  }
 0xa9b   :  { %15666 = dma.done.wait [#allocation3], 64  }
 0xa9c   :  { %15667 = vsyncadd [#allocation3], 4294967232 }
 0xa9d   :  { %15372 = vsyncpa [#allocation3], 1 }

</bundles_post_ra>
